<compile_context>
chip_gen: v6e
topology: v6e:2x2x1
jax: 0.10.0
libtpu: 0.0.40
codegen_flags: <defaults>
</compile_context>

<pallas_src>
import numpy as np
import jax
import jax.numpy as jnp
from jax.experimental import pallas as pl
from jax.experimental.pallas import tpu as pltpu

EPS = 1e-5
K = 3                                    # 3x3 kernels everywhere
LANE = 128
FEATURES = (4, 8, 16)
LAYERS = ("d0", "d1", "bt", "u1", "u0", "fn")
PNAME = dict(d0="down0", d1="down1", bt="bottom", u1="up1", u0="up0", fn="final")


def _align(n, m=LANE):
    return -(-n // m) * m


# --------------------- dense 0/1 spatial operators (numpy) --------------------- #
# NOTE: these grow as ~9*(H*W)^2 per layer (total ~5 MiB bf16 at 16x16); this
# formulation must switch to tiled operators / direct conv at larger resolutions.

def _conv_gather(h, w, stride):
    """S[hi*w+wi, t*Mout+m]=1 iff input (hi,wi) is tap t=(kh*3+kw) of output pixel m
    for Conv2d(k=3, pad=1, stride)."""
    ho = (h + 2 - K) // stride + 1
    wo = (w + 2 - K) // stride + 1
    m_out = ho * wo
    s = np.zeros((h * w, 9 * m_out), np.float32)
    for kh in range(K):
        for kw in range(K):
            t = kh * K + kw
            for oh in range(ho):
                for ow in range(wo):
                    ih, iw = stride * oh + kh - 1, stride * ow + kw - 1
                    if 0 <= ih < h and 0 <= iw < w:
                        s[ih * w + iw, t * m_out + oh * wo + ow] = 1.0
    return s


def _convt_scatter(h, w):
    """S[hi*w+wi, t*Mout+m]=1 iff ConvTranspose2d(k=3, s=2, p=1, op=1) routes input
    (hi,wi) through tap t to output pixel (2hi+kh-1, 2wi+kw-1)."""
    ho, wo = 2 * h, 2 * w
    m_out = ho * wo
    s = np.zeros((h * w, 9 * m_out), np.float32)
    for kh in range(K):
        for kw in range(K):
            t = kh * K + kw
            for ih in range(h):
                for iw in range(w):
                    oh, ow = 2 * ih + kh - 1, 2 * iw + kw - 1
                    if 0 <= oh < ho and 0 <= ow < wo:
                        s[ih * w + iw, t * m_out + oh * wo + ow] = 1.0
    return s


# ------------------------- host-side parameter packing ------------------------- #

def _rows_cm(b, c, c_off=0):
    """Channel-major / sample-minor row order (row = c*B + b): sublane concat of two
    branches in this order == torch.cat(dim=1)."""
    return [(bb, c_off + cc) for cc in range(c) for bb in range(b)]


def _rows_sm(b, c):
    """Sample-major row order (row = b*C + c): matches a contiguous NCHW reshape."""
    return [(bb, cc) for bb in range(b) for cc in range(c)]


def _mix_weight(w9, in_rows, out_rows, bias=None):
    """Fused, batch-block-diagonal channel-mix matrix (n_out, 9*len(in_rows)[+1]).
    Column t*R + r mixes tap t of input row r; the optional last column carries the
    final conv_only bias (multiplied by an in-kernel ones-row)."""
    r = len(in_rows)
    wm = np.zeros((len(out_rows), 9 * r + (1 if bias is not None else 0)), np.float32)
    for o, (bo, co) in enumerate(out_rows):
        for t in range(9):
            for i, (bi, ci) in enumerate(in_rows):
                if bi == bo:
                    wm[o, t * r + i] = w9[t, co, ci]
        if bias is not None:
            wm[o, 9 * r] = bias[co]
    return wm


def init_params(key, c_in, c_out, features):
    """Synthetic weights in per-tap layout (9, Cout, Cin), t = kh*3+kw:
       forward conv   : W[t, co, ci] == torch Conv2d.weight[co, ci, kh, kw]
       transposed conv: W[t, co, ci] == torch ConvTranspose2d.weight[ci, co, kh, kw]
    (A real checkpoint needs exactly that re-layout before pack_operands.)"""
    f0, f1, f2 = features
    chans = dict(down0=(f0, c_in), down1=(f1, f0), bottom=(f2, f1),
                 up1=(f0, f1 + f2), up0=(f0, 2 * f0), final=(c_out, f0))
    params = {}
    keys = jax.random.split(key, 2 * len(chans))
    for i, name in enumerate(sorted(chans)):
        co, ci = chans[name]
        params[name + "_w"] = 0.1 * jax.random.normal(keys[2 * i], (9, co, ci), jnp.float32)
        # Biases of the 5 Conv+IN+ReLU layers cancel under InstanceNorm (kept only
        # for checkpoint-shape parity); only final_b affects the output.
        params[name + "_b"] = 0.01 * jax.random.normal(keys[2 * i + 1], (co,), jnp.float32)
    return params


def pack_operands(params, b, c_in, c_out, h, w):
    """Build the packed bf16 operand slabs (128-lane-aligned segments) and the
    static slicing layout used by the kernel."""
    f0, f1, f2 = FEATURES
    h0, w0, h1, w1 = h // 2, w // 2, h // 4, w // 4

    plan = {                       # layer -> (in_rows, out_rows, Mout)
        "d0": (_rows_sm(b, c_in), _rows_cm(b, f0), h0 * w0),
        "d1": (_rows_cm(b, f0), _rows_cm(b, f1), h1 * w1),
        "bt": (_rows_cm(b, f1), _rows_cm(b, f2), h1 * w1),
        "u1": (_rows_cm(b, f1) + _rows_cm(b, f2, f1), _rows_cm(b, f0), h0 * w0),
        "u0": (_rows_cm(b, f0) + _rows_cm(b, f0, f0), _rows_cm(b, f0), h * w),
        "fn": (_rows_cm(b, f0), _rows_sm(b, c_out), 4 * h * w),
    }
    s_ops = {
        "d0": _conv_gather(h, w, 2), "d1": _conv_gather(h0, w0, 2),
        "bt": _conv_gather(h1, w1, 1), "u1": _convt_scatter(h1, w1),
        "u0": _convt_scatter(h0, w0), "fn": _convt_scatter(h, w),
    }

    def pack_cols(mats):
        rows = max(m.shape[0] for m in mats)
        offs, cols = [], 0
        for m in mats:
            offs.append(cols)
            cols += _align(m.shape[1])
        slab = np.zeros((rows, cols), np.float32)
        for m, o in zip(mats, offs):
            slab[:m.shape[0], o:o + m.shape[1]] = m
        return slab, offs

    # S operators grouped by row count (no wasted row padding); big final scatter
    # and down0 operator stay whole-ref so their matmul operand is a full load.
    s64_slab, (off_d1, off_u0) = pack_cols([s_ops["d1"], s_ops["u0"]])
    s16_slab, (off_bt, off_u1) = pack_cols([s_ops["bt"], s_ops["u1"]])
    s_off = dict(d0=0, d1=off_d1, bt=off_bt, u1=off_u1, u0=off_u0, fn=0)

    mixes = {}
    for lk in LAYERS:
        in_rows, out_rows, _ = plan[lk]
        bias = np.asarray(params["final_b"]) if lk == "fn" else None
        mixes[lk] = _mix_weight(np.asarray(params[PNAME[lk] + "_w"]), in_rows, out_rows, bias)
    w_slab, w_off_list = pack_cols([mixes[lk] for lk in LAYERS])
    w_off = dict(zip(LAYERS, w_off_list))

    operands = dict(
        s_d0=jnp.asarray(s_ops["d0"], jnp.bfloat16),
        s_64=jnp.asarray(s64_slab, jnp.bfloat16),
        s_16=jnp.asarray(s16_slab, jnp.bfloat16),
        s_fn=jnp.asarray(s_ops["fn"], jnp.bfloat16),
        w_slab=jnp.asarray(w_slab, jnp.bfloat16),
    )
    meta = {lk: dict(r=len(plan[lk][0]), n_out=len(plan[lk][1]), mout=plan[lk][2],
                     hw_in=s_ops[lk].shape[0], s_off=s_off[lk], w_off=w_off[lk],
                     w_cols=mixes[lk].shape[1])
            for lk in LAYERS}
    return operands, meta


# ----------------------------- fused Pallas kernel ----------------------------- #

def build_upsample_unet(key, c_in, c_out, h, w, batch):
    """Returns (jitted forward(x, operands) -> (B, c_out, 2h, 2w) f32, operands)."""
    params = init_params(key, c_in, c_out, FEATURES)
    operands, meta = pack_operands(params, batch, c_in, c_out, h, w)

    col_rows = max(9 * meta[lk]["r"] + (1 if lk == "fn" else 0) for lk in LAYERS)
    col_cols = max(meta[lk]["mout"] for lk in LAYERS)
    cat_rows = batch * (FEATURES[1] + FEATURES[2])
    cat_cols = (h // 2) * (w // 2)
    out_rows, out_m = batch * c_out, 4 * h * w

    # TODO(synk): dropout(p=0.0) is an identity in forward; intentionally omitted.

    def kernel(x_ref, sd0_ref, s64_ref, s16_ref, sfn_ref, w_ref, o_ref,
               col_ref, cat_ref):

        def layer(x_bf, s_blk, lk, norm_act=True, bias_row=False):
            m = meta[lk]
            r, mout = m["r"], m["mout"]
            # One spatial gather matmul (exact: S is 0/1 with <=1 nonzero/column).
            p = jnp.dot(x_bf, s_blk,
                        preferred_element_type=jnp.float32).astype(jnp.bfloat16)
            # Tap-stack the products along sublanes (9 cheap VMEM stores) so the
            # whole channel mix is ONE matmul with K = 9*sum(Cin) (+1 bias col).
            for t in range(9):
                col_ref[t * r:(t + 1) * r, :mout] = p[:, t * mout:(t + 1) * mout]
            rows = 9 * r
            if bias_row:                         # ones-row -> bias column of w_blk
                col_ref[rows:rows + 1, :mout] = jnp.ones((1, mout), jnp.bfloat16)
                rows += 1
            w_blk = w_ref[:m["n_out"], m["w_off"]:m["w_off"] + m["w_cols"]]
            y = jnp.dot(w_blk, col_ref[:rows, :mout],
                        preferred_element_type=jnp.float32)
            if not norm_act:
                return y
            # InstanceNorm (affine=False, biased var) + ReLU per (sample, channel)
            # row over the spatial lane axis.  Conv bias is dropped: a per-channel
            # constant cancels exactly against the per-channel mean.
            mean = jnp.mean(y, axis=1, keepdims=True)
            var = jnp.mean((y - mean) ** 2, axis=1, keepdims=True)
            y = jnp.maximum((y - mean) * jax.lax.rsqrt(var + EPS), 0.0)
            return y.astype(jnp.bfloat16)

        def s_slice(ref, lk):
            m = meta[lk]
            return ref[:, m["s_off"]:m["s_off"] + 9 * m["mout"]]

        def cat_rows2(top, bot, mout):           # sublane concat == torch.cat(dim=1)
            rt, rb = top.shape[0], bot.shape[0]
            cat_ref[:rt, :mout] = top
            cat_ref[rt:rt + rb, :mout] = bot
            return cat_ref[:rt + rb, :mout]

        x = x_ref[...]                                           # (B*Cin, H*W) bf16
        d0 = layer(x, sd0_ref[...], "d0")                        # (B*4, 64)
        d1 = layer(d0, s_slice(s64_ref, "d1"), "d1")             # (B*8, 16)
        bt = layer(d1, s_slice(s16_ref, "bt"), "bt")             # (B*16, 16)
        u1 = layer(cat_rows2(d1, bt, meta["bt"]["mout"]),
                   s_slice(s16_ref, "u1"), "u1")                 # (B*4, 64)
        u0 = layer(cat_rows2(d0, u1, meta["u1"]["mout"]),
                   s_slice(s64_ref, "u0"), "u0")                 # (B*4, 256)
        # Final ConvT (conv_only + bias): full scatter operator -> single dense store.
        o_ref[...] = layer(u0, sfn_ref[...], "fn", norm_act=False, bias_row=True)

    # Advisory cost hint for XLA scheduling around the custom call.
    flops = sum(2 * meta[lk]["r"] * meta[lk]["hw_in"] * 9 * meta[lk]["mout"]
                + 2 * meta[lk]["n_out"] * meta[lk]["w_cols"] * meta[lk]["mout"]
                for lk in LAYERS)
    bytes_accessed = (sum(int(np.prod(v.shape)) * 2 for v in operands.values())
                      + batch * c_in * h * w * 2 + out_rows * out_m * 4)
    transcendentals = sum(meta[lk]["n_out"] for lk in LAYERS if lk != "fn")

    @jax.jit
    def forward(x, ops):
        # NCHW -> (B*Cin, H*W) is a contiguous (free) reshape; MXU operands in bf16.
        xb = x.reshape(batch * c_in, h * w).astype(jnp.bfloat16)
        args = (xb, ops["s_d0"], ops["s_64"], ops["s_16"], ops["s_fn"], ops["w_slab"])
        y = pl.pallas_call(
            kernel,
            out_shape=jax.ShapeDtypeStruct((out_rows, out_m), jnp.float32),
            grid=(1,),
            in_specs=[pl.BlockSpec(a.shape, lambda i: (0, 0)) for a in args],
            out_specs=pl.BlockSpec((out_rows, out_m), lambda i: (0, 0)),
            scratch_shapes=[pltpu.VMEM((col_rows, col_cols), jnp.bfloat16),
                            pltpu.VMEM((cat_rows, cat_cols), jnp.bfloat16)],
            compiler_params=pltpu.CompilerParams(
                dimension_semantics=("arbitrary",),
                vmem_limit_bytes=32 * 1024 * 1024),
            cost_estimate=pl.CostEstimate(flops=int(flops),
                                          transcendentals=int(transcendentals),
                                          bytes_accessed=int(bytes_accessed)),
        )(*args)
        # Output rows are sample-major (b*Cout + c): contiguous reshape back to NCHW.
        return y.reshape(batch, c_out, 2 * h, 2 * w)

    return forward, operands


if __name__ == "__main__":
    B, C_IN, C_OUT, H, W = 2, 3, 2, 16, 16
    key = jax.random.PRNGKey(0)
    kx, kp = jax.random.split(key)
    x = jax.random.normal(kx, (B, C_IN, H, W), jnp.float32)

    forward, operands = build_upsample_unet(kp, C_IN, C_OUT, H, W, B)
    y = jax.block_until_ready(forward(x, operands))

    assert y.shape == (B, C_OUT, 2 * H, 2 * W), y.shape
    assert bool(jnp.all(jnp.isfinite(y)))
    print("KERNEL_OK")
</pallas_src>

<mosaic_0001>
module attributes {stable_mosaic.version = 11 : i64} {
  func.func @kernel(%arg0: i32, %arg1: memref<6x256xbf16, #tpu.memory_space<vmem>>, %arg2: memref<256x576xbf16, #tpu.memory_space<vmem>>, %arg3: memref<64x2560xbf16, #tpu.memory_space<vmem>>, %arg4: memref<16x896xbf16, #tpu.memory_space<vmem>>, %arg5: memref<256x9216xbf16, #tpu.memory_space<vmem>>, %arg6: memref<32x1408xbf16, #tpu.memory_space<vmem>>, %arg7: memref<4x1024xf32, #tpu.memory_space<vmem>>, %arg8: memref<432x1024xbf16, #tpu.memory_space<vmem>>, %arg9: memref<48x64xbf16, #tpu.memory_space<vmem>>) attributes {dimension_semantics = [#tpu.dimension_semantics<arbitrary>], iteration_bounds = array<i64: 1>, scalar_prefetch = 0 : i64, scratch_operands = 2 : i64, tpu.core_type = #tpu.core_type<tc>, window_params = [{pipeline_mode = #tpu.pipeline_mode<synchronous>, transform_indices = @transform_0, window_bounds = array<i64: 6, 256>}, {pipeline_mode = #tpu.pipeline_mode<synchronous>, transform_indices = @transform_1, window_bounds = array<i64: 256, 576>}, {pipeline_mode = #tpu.pipeline_mode<synchronous>, transform_indices = @transform_2, window_bounds = array<i64: 64, 2560>}, {pipeline_mode = #tpu.pipeline_mode<synchronous>, transform_indices = @transform_3, window_bounds = array<i64: 16, 896>}, {pipeline_mode = #tpu.pipeline_mode<synchronous>, transform_indices = @transform_4, window_bounds = array<i64: 256, 9216>}, {pipeline_mode = #tpu.pipeline_mode<synchronous>, transform_indices = @transform_5, window_bounds = array<i64: 32, 1408>}, {pipeline_mode = #tpu.pipeline_mode<synchronous>, transform_indices = @transform_6, window_bounds = array<i64: 4, 1024>}]} {
    %c0 = arith.constant 0 : index
    %c0_0 = arith.constant 0 : index
    %0 = vector.load %arg1[%c0, %c0_0] : memref<6x256xbf16, #tpu.memory_space<vmem>>, vector<6x256xbf16>
    %c0_1 = arith.constant 0 : index
    %c0_2 = arith.constant 0 : index
    %1 = vector.load %arg2[%c0_1, %c0_2] : memref<256x576xbf16, #tpu.memory_space<vmem>>, vector<256x576xbf16>
    %cst = arith.constant dense<0.000000e+00> : vector<6x576xf32>
    %2 = tpu.matmul %0, %1, %cst {dimension_numbers = #tpu.dot_dimension_numbers<[1], [0], [0], [1], [0, 0, 1, 1], [], []>} : vector<6x256xbf16>, vector<256x576xbf16>, vector<6x576xf32> -> vector<6x576xf32>
    %3 = arith.truncf %2 : vector<6x576xf32> to vector<6x576xbf16>
    %4 = vector.extract_strided_slice %3 {offsets = [0, 0], sizes = [6, 64], strides = [1, 1]} : vector<6x576xbf16> to vector<6x64xbf16>
    %c0_3 = arith.constant 0 : index
    %c0_4 = arith.constant 0 : index
    %5 = vector.load %arg8[%c0_3, %c0_4] : memref<432x1024xbf16, #tpu.memory_space<vmem>>, vector<6x64xbf16>
    tpu.vector_store %arg8[%c0_3, %c0_4], %4 {strides = array<i32>} : memref<432x1024xbf16, #tpu.memory_space<vmem>>, vector<6x64xbf16>,
    %6 = vector.extract_strided_slice %3 {offsets = [0, 64], sizes = [6, 64], strides = [1, 1]} : vector<6x576xbf16> to vector<6x64xbf16>
    %c6 = arith.constant 6 : index
    %c0_5 = arith.constant 0 : index
    %7 = vector.load %arg8[%c6, %c0_5] : memref<432x1024xbf16, #tpu.memory_space<vmem>>, vector<6x64xbf16>
    tpu.vector_store %arg8[%c6, %c0_5], %6 {strides = array<i32>} : memref<432x1024xbf16, #tpu.memory_space<vmem>>, vector<6x64xbf16>,
    %8 = vector.extract_strided_slice %3 {offsets = [0, 128], sizes = [6, 64], strides = [1, 1]} : vector<6x576xbf16> to vector<6x64xbf16>
    %c12 = arith.constant 12 : index
    %c0_6 = arith.constant 0 : index
    %9 = vector.load %arg8[%c12, %c0_6] : memref<432x1024xbf16, #tpu.memory_space<vmem>>, vector<6x64xbf16>
    tpu.vector_store %arg8[%c12, %c0_6], %8 {strides = array<i32>} : memref<432x1024xbf16, #tpu.memory_space<vmem>>, vector<6x64xbf16>,
    %10 = vector.extract_strided_slice %3 {offsets = [0, 192], sizes = [6, 64], strides = [1, 1]} : vector<6x576xbf16> to vector<6x64xbf16>
    %c18 = arith.constant 18 : index
    %c0_7 = arith.constant 0 : index
    %11 = vector.load %arg8[%c18, %c0_7] : memref<432x1024xbf16, #tpu.memory_space<vmem>>, vector<6x64xbf16>
    tpu.vector_store %arg8[%c18, %c0_7], %10 {strides = array<i32>} : memref<432x1024xbf16, #tpu.memory_space<vmem>>, vector<6x64xbf16>,
    %12 = vector.extract_strided_slice %3 {offsets = [0, 256], sizes = [6, 64], strides = [1, 1]} : vector<6x576xbf16> to vector<6x64xbf16>
    %c24 = arith.constant 24 : index
    %c0_8 = arith.constant 0 : index
    %13 = vector.load %arg8[%c24, %c0_8] : memref<432x1024xbf16, #tpu.memory_space<vmem>>, vector<6x64xbf16>
    tpu.vector_store %arg8[%c24, %c0_8], %12 {strides = array<i32>} : memref<432x1024xbf16, #tpu.memory_space<vmem>>, vector<6x64xbf16>,
    %14 = vector.extract_strided_slice %3 {offsets = [0, 320], sizes = [6, 64], strides = [1, 1]} : vector<6x576xbf16> to vector<6x64xbf16>
    %c30 = arith.constant 30 : index
    %c0_9 = arith.constant 0 : index
    %15 = vector.load %arg8[%c30, %c0_9] : memref<432x1024xbf16, #tpu.memory_space<vmem>>, vector<6x64xbf16>
    tpu.vector_store %arg8[%c30, %c0_9], %14 {strides = array<i32>} : memref<432x1024xbf16, #tpu.memory_space<vmem>>, vector<6x64xbf16>,
    %16 = vector.extract_strided_slice %3 {offsets = [0, 384], sizes = [6, 64], strides = [1, 1]} : vector<6x576xbf16> to vector<6x64xbf16>
    %c36 = arith.constant 36 : index
    %c0_10 = arith.constant 0 : index
    %17 = vector.load %arg8[%c36, %c0_10] : memref<432x1024xbf16, #tpu.memory_space<vmem>>, vector<6x64xbf16>
    tpu.vector_store %arg8[%c36, %c0_10], %16 {strides = array<i32>} : memref<432x1024xbf16, #tpu.memory_space<vmem>>, vector<6x64xbf16>,
    %18 = vector.extract_strided_slice %3 {offsets = [0, 448], sizes = [6, 64], strides = [1, 1]} : vector<6x576xbf16> to vector<6x64xbf16>
    %c42 = arith.constant 42 : index
    %c0_11 = arith.constant 0 : index
    %19 = vector.load %arg8[%c42, %c0_11] : memref<432x1024xbf16, #tpu.memory_space<vmem>>, vector<6x64xbf16>
    tpu.vector_store %arg8[%c42, %c0_11], %18 {strides = array<i32>} : memref<432x1024xbf16, #tpu.memory_space<vmem>>, vector<6x64xbf16>,
    %20 = vector.extract_strided_slice %3 {offsets = [0, 512], sizes = [6, 64], strides = [1, 1]} : vector<6x576xbf16> to vector<6x64xbf16>
    %c48 = arith.constant 48 : index
    %c0_12 = arith.constant 0 : index
    %21 = vector.load %arg8[%c48, %c0_12] : memref<432x1024xbf16, #tpu.memory_space<vmem>>, vector<6x64xbf16>
    tpu.vector_store %arg8[%c48, %c0_12], %20 {strides = array<i32>} : memref<432x1024xbf16, #tpu.memory_space<vmem>>, vector<6x64xbf16>,
    %c0_13 = arith.constant 0 : index
    %c0_14 = arith.constant 0 : index
    %22 = vector.load %arg6[%c0_13, %c0_14] : memref<32x1408xbf16, #tpu.memory_space<vmem>>, vector<8x54xbf16>
    %c0_15 = arith.constant 0 : index
    %c0_16 = arith.constant 0 : index
    %23 = vector.load %arg8[%c0_15, %c0_16] : memref<432x1024xbf16, #tpu.memory_space<vmem>>, vector<54x64xbf16>
    %cst_17 = arith.constant dense<0.000000e+00> : vector<8x64xf32>
    %24 = tpu.matmul %22, %23, %cst_17 {dimension_numbers = #tpu.dot_dimension_numbers<[1], [0], [0], [1], [0, 0, 1, 1], [], []>} : vector<8x54xbf16>, vector<54x64xbf16>, vector<8x64xf32> -> vector<8x64xf32>
    %cst_18 = arith.constant dense<0.000000e+00> : vector<8xf32>
    %25 = vector.multi_reduction <add>, %24, %cst_18 [1] : vector<8x64xf32> to vector<8xf32>
    %26 = vector.shape_cast %25 : vector<8xf32> to vector<8x1xf32>
    %cst_19 = arith.constant 6.400000e+01 : f32
    %27 = vector.broadcast %cst_19 : f32 to vector<8x1xf32>
    %28 = arith.divf %26, %27 : vector<8x1xf32>
    %29 = vector.broadcast %28 : vector<8x1xf32> to vector<8x64xf32>
    %30 = arith.subf %24, %29 : vector<8x64xf32>
    %31 = arith.mulf %30, %30 : vector<8x64xf32>
    %cst_20 = arith.constant dense<0.000000e+00> : vector<8xf32>
    %32 = vector.multi_reduction <add>, %31, %cst_20 [1] : vector<8x64xf32> to vector<8xf32>
    %33 = vector.shape_cast %32 : vector<8xf32> to vector<8x1xf32>
    %cst_21 = arith.constant 6.400000e+01 : f32
    %34 = vector.broadcast %cst_21 : f32 to vector<8x1xf32>
    %35 = arith.divf %33, %34 : vector<8x1xf32>
    %36 = vector.broadcast %28 : vector<8x1xf32> to vector<8x64xf32>
    %37 = arith.subf %24, %36 : vector<8x64xf32>
    %cst_22 = arith.constant 9.99999974E-6 : f32
    %38 = vector.broadcast %cst_22 : f32 to vector<8x1xf32>
    %39 = arith.addf %35, %38 : vector<8x1xf32>
    %40 = math.rsqrt %39 : vector<8x1xf32>
    %41 = vector.broadcast %40 : vector<8x1xf32> to vector<8x64xf32>
    %42 = arith.mulf %37, %41 : vector<8x64xf32>
    %cst_23 = arith.constant 0.000000e+00 : f32
    %43 = vector.broadcast %cst_23 : f32 to vector<8x64xf32>
    %44 = arith.maximumf %42, %43 : vector<8x64xf32>
    %45 = arith.truncf %44 : vector<8x64xf32> to vector<8x64xbf16>
    %c0_24 = arith.constant 0 : index
    %c0_25 = arith.constant 0 : index
    %46 = vector.load %arg3[%c0_24, %c0_25] : memref<64x2560xbf16, #tpu.memory_space<vmem>>, vector<64x144xbf16>
    %cst_26 = arith.constant dense<0.000000e+00> : vector<8x144xf32>
    %47 = tpu.matmul %45, %46, %cst_26 {dimension_numbers = #tpu.dot_dimension_numbers<[1], [0], [0], [1], [0, 0, 1, 1], [], []>} : vector<8x64xbf16>, vector<64x144xbf16>, vector<8x144xf32> -> vector<8x144xf32>
    %48 = arith.truncf %47 : vector<8x144xf32> to vector<8x144xbf16>
    %49 = vector.extract_strided_slice %48 {offsets = [0, 0], sizes = [8, 16], strides = [1, 1]} : vector<8x144xbf16> to vector<8x16xbf16>
    %c0_27 = arith.constant 0 : index
    %c0_28 = arith.constant 0 : index
    %50 = vector.load %arg8[%c0_27, %c0_28] : memref<432x1024xbf16, #tpu.memory_space<vmem>>, vector<8x16xbf16>
    tpu.vector_store %arg8[%c0_27, %c0_28], %49 {strides = array<i32>} : memref<432x1024xbf16, #tpu.memory_space<vmem>>, vector<8x16xbf16>,
    %51 = vector.extract_strided_slice %48 {offsets = [0, 16], sizes = [8, 16], strides = [1, 1]} : vector<8x144xbf16> to vector<8x16xbf16>
    %c8 = arith.constant 8 : index
    %c0_29 = arith.constant 0 : index
    %52 = vector.load %arg8[%c8, %c0_29] : memref<432x1024xbf16, #tpu.memory_space<vmem>>, vector<8x16xbf16>
    tpu.vector_store %arg8[%c8, %c0_29], %51 {strides = array<i32>} : memref<432x1024xbf16, #tpu.memory_space<vmem>>, vector<8x16xbf16>,
    %53 = vector.extract_strided_slice %48 {offsets = [0, 32], sizes = [8, 16], strides = [1, 1]} : vector<8x144xbf16> to vector<8x16xbf16>
    %c16 = arith.constant 16 : index
    %c0_30 = arith.constant 0 : index
    %54 = vector.load %arg8[%c16, %c0_30] : memref<432x1024xbf16, #tpu.memory_space<vmem>>, vector<8x16xbf16>
    tpu.vector_store %arg8[%c16, %c0_30], %53 {strides = array<i32>} : memref<432x1024xbf16, #tpu.memory_space<vmem>>, vector<8x16xbf16>,
    %55 = vector.extract_strided_slice %48 {offsets = [0, 48], sizes = [8, 16], strides = [1, 1]} : vector<8x144xbf16> to vector<8x16xbf16>
    %c24_31 = arith.constant 24 : index
    %c0_32 = arith.constant 0 : index
    %56 = vector.load %arg8[%c24_31, %c0_32] : memref<432x1024xbf16, #tpu.memory_space<vmem>>, vector<8x16xbf16>
    tpu.vector_store %arg8[%c24_31, %c0_32], %55 {strides = array<i32>} : memref<432x1024xbf16, #tpu.memory_space<vmem>>, vector<8x16xbf16>,
    %57 = vector.extract_strided_slice %48 {offsets = [0, 64], sizes = [8, 16], strides = [1, 1]} : vector<8x144xbf16> to vector<8x16xbf16>
    %c32 = arith.constant 32 : index
    %c0_33 = arith.constant 0 : index
    %58 = vector.load %arg8[%c32, %c0_33] : memref<432x1024xbf16, #tpu.memory_space<vmem>>, vector<8x16xbf16>
    tpu.vector_store %arg8[%c32, %c0_33], %57 {strides = array<i32>} : memref<432x1024xbf16, #tpu.memory_space<vmem>>, vector<8x16xbf16>,
    %59 = vector.extract_strided_slice %48 {offsets = [0, 80], sizes = [8, 16], strides = [1, 1]} : vector<8x144xbf16> to vector<8x16xbf16>
    %c40 = arith.constant 40 : index
    %c0_34 = arith.constant 0 : index
    %60 = vector.load %arg8[%c40, %c0_34] : memref<432x1024xbf16, #tpu.memory_space<vmem>>, vector<8x16xbf16>
    tpu.vector_store %arg8[%c40, %c0_34], %59 {strides = array<i32>} : memref<432x1024xbf16, #tpu.memory_space<vmem>>, vector<8x16xbf16>,
    %61 = vector.extract_strided_slice %48 {offsets = [0, 96], sizes = [8, 16], strides = [1, 1]} : vector<8x144xbf16> to vector<8x16xbf16>
    %c48_35 = arith.constant 48 : index
    %c0_36 = arith.constant 0 : index
    %62 = vector.load %arg8[%c48_35, %c0_36] : memref<432x1024xbf16, #tpu.memory_space<vmem>>, vector<8x16xbf16>
    tpu.vector_store %arg8[%c48_35, %c0_36], %61 {strides = array<i32>} : memref<432x1024xbf16, #tpu.memory_space<vmem>>, vector<8x16xbf16>,
    %63 = vector.extract_strided_slice %48 {offsets = [0, 112], sizes = [8, 16], strides = [1, 1]} : vector<8x144xbf16> to vector<8x16xbf16>
    %c56 = arith.constant 56 : index
    %c0_37 = arith.constant 0 : index
    %64 = vector.load %arg8[%c56, %c0_37] : memref<432x1024xbf16, #tpu.memory_space<vmem>>, vector<8x16xbf16>
    tpu.vector_store %arg8[%c56, %c0_37], %63 {strides = array<i32>} : memref<432x1024xbf16, #tpu.memory_space<vmem>>, vector<8x16xbf16>,
    %65 = vector.extract_strided_slice %48 {offsets = [0, 128], sizes = [8, 16], strides = [1, 1]} : vector<8x144xbf16> to vector<8x16xbf16>
    %c64 = arith.constant 64 : index
    %c0_38 = arith.constant 0 : index
    %66 = vector.load %arg8[%c64, %c0_38] : memref<432x1024xbf16, #tpu.memory_space<vmem>>, vector<8x16xbf16>
    tpu.vector_store %arg8[%c64, %c0_38], %65 {strides = array<i32>} : memref<432x1024xbf16, #tpu.memory_space<vmem>>, vector<8x16xbf16>,
    %c0_39 = arith.constant 0 : index
    %c128 = arith.constant 128 : index
    %67 = vector.load %arg6[%c0_39, %c128] : memref<32x1408xbf16, #tpu.memory_space<vmem>>, vector<16x72xbf16>
    %c0_40 = arith.constant 0 : index
    %c0_41 = arith.constant 0 : index
    %68 = vector.load %arg8[%c0_40, %c0_41] : memref<432x1024xbf16, #tpu.memory_space<vmem>>, vector<72x16xbf16>
    %cst_42 = arith.constant dense<0.000000e+00> : vector<16x16xf32>
    %69 = tpu.matmul %67, %68, %cst_42 {dimension_numbers = #tpu.dot_dimension_numbers<[1], [0], [0], [1], [0, 0, 1, 1], [], []>} : vector<16x72xbf16>, vector<72x16xbf16>, vector<16x16xf32> -> vector<16x16xf32>
    %cst_43 = arith.constant dense<0.000000e+00> : vector<16xf32>
    %70 = vector.multi_reduction <add>, %69, %cst_43 [1] : vector<16x16xf32> to vector<16xf32>
    %71 = vector.shape_cast %70 : vector<16xf32> to vector<16x1xf32>
    %cst_44 = arith.constant 1.600000e+01 : f32
    %72 = vector.broadcast %cst_44 : f32 to vector<16x1xf32>
    %73 = arith.divf %71, %72 : vector<16x1xf32>
    %74 = vector.broadcast %73 : vector<16x1xf32> to vector<16x16xf32>
    %75 = arith.subf %69, %74 : vector<16x16xf32>
    %76 = arith.mulf %75, %75 : vector<16x16xf32>
    %cst_45 = arith.constant dense<0.000000e+00> : vector<16xf32>
    %77 = vector.multi_reduction <add>, %76, %cst_45 [1] : vector<16x16xf32> to vector<16xf32>
    %78 = vector.shape_cast %77 : vector<16xf32> to vector<16x1xf32>
    %cst_46 = arith.constant 1.600000e+01 : f32
    %79 = vector.broadcast %cst_46 : f32 to vector<16x1xf32>
    %80 = arith.divf %78, %79 : vector<16x1xf32>
    %81 = vector.broadcast %73 : vector<16x1xf32> to vector<16x16xf32>
    %82 = arith.subf %69, %81 : vector<16x16xf32>
    %cst_47 = arith.constant 9.99999974E-6 : f32
    %83 = vector.broadcast %cst_47 : f32 to vector<16x1xf32>
    %84 = arith.addf %80, %83 : vector<16x1xf32>
    %85 = math.rsqrt %84 : vector<16x1xf32>
    %86 = vector.broadcast %85 : vector<16x1xf32> to vector<16x16xf32>
    %87 = arith.mulf %82, %86 : vector<16x16xf32>
    %cst_48 = arith.constant 0.000000e+00 : f32
    %88 = vector.broadcast %cst_48 : f32 to vector<16x16xf32>
    %89 = arith.maximumf %87, %88 : vector<16x16xf32>
    %90 = arith.truncf %89 : vector<16x16xf32> to vector<16x16xbf16>
    %c0_49 = arith.constant 0 : index
    %c0_50 = arith.constant 0 : index
    %91 = vector.load %arg4[%c0_49, %c0_50] : memref<16x896xbf16, #tpu.memory_space<vmem>>, vector<16x144xbf16>
    %cst_51 = arith.constant dense<0.000000e+00> : vector<16x144xf32>
    %92 = tpu.matmul %90, %91, %cst_51 {dimension_numbers = #tpu.dot_dimension_numbers<[1], [0], [0], [1], [0, 0, 1, 1], [], []>} : vector<16x16xbf16>, vector<16x144xbf16>, vector<16x144xf32> -> vector<16x144xf32>
    %93 = arith.truncf %92 : vector<16x144xf32> to vector<16x144xbf16>
    %94 = vector.extract_strided_slice %93 {offsets = [0, 0], sizes = [16, 16], strides = [1, 1]} : vector<16x144xbf16> to vector<16x16xbf16>
    %c0_52 = arith.constant 0 : index
    %c0_53 = arith.constant 0 : index
    %95 = vector.load %arg8[%c0_52, %c0_53] : memref<432x1024xbf16, #tpu.memory_space<vmem>>, vector<16x16xbf16>
    tpu.vector_store %arg8[%c0_52, %c0_53], %94 {strides = array<i32>} : memref<432x1024xbf16, #tpu.memory_space<vmem>>, vector<16x16xbf16>,
    %96 = vector.extract_strided_slice %93 {offsets = [0, 16], sizes = [16, 16], strides = [1, 1]} : vector<16x144xbf16> to vector<16x16xbf16>
    %c16_54 = arith.constant 16 : index
    %c0_55 = arith.constant 0 : index
    %97 = vector.load %arg8[%c16_54, %c0_55] : memref<432x1024xbf16, #tpu.memory_space<vmem>>, vector<16x16xbf16>
    tpu.vector_store %arg8[%c16_54, %c0_55], %96 {strides = array<i32>} : memref<432x1024xbf16, #tpu.memory_space<vmem>>, vector<16x16xbf16>,
    %98 = vector.extract_strided_slice %93 {offsets = [0, 32], sizes = [16, 16], strides = [1, 1]} : vector<16x144xbf16> to vector<16x16xbf16>
    %c32_56 = arith.constant 32 : index
    %c0_57 = arith.constant 0 : index
    %99 = vector.load %arg8[%c32_56, %c0_57] : memref<432x1024xbf16, #tpu.memory_space<vmem>>, vector<16x16xbf16>
    tpu.vector_store %arg8[%c32_56, %c0_57], %98 {strides = array<i32>} : memref<432x1024xbf16, #tpu.memory_space<vmem>>, vector<16x16xbf16>,
    %100 = vector.extract_strided_slice %93 {offsets = [0, 48], sizes = [16, 16], strides = [1, 1]} : vector<16x144xbf16> to vector<16x16xbf16>
    %c48_58 = arith.constant 48 : index
    %c0_59 = arith.constant 0 : index
    %101 = vector.load %arg8[%c48_58, %c0_59] : memref<432x1024xbf16, #tpu.memory_space<vmem>>, vector<16x16xbf16>
    tpu.vector_store %arg8[%c48_58, %c0_59], %100 {strides = array<i32>} : memref<432x1024xbf16, #tpu.memory_space<vmem>>, vector<16x16xbf16>,
    %102 = vector.extract_strided_slice %93 {offsets = [0, 64], sizes = [16, 16], strides = [1, 1]} : vector<16x144xbf16> to vector<16x16xbf16>
    %c64_60 = arith.constant 64 : index
    %c0_61 = arith.constant 0 : index
    %103 = vector.load %arg8[%c64_60, %c0_61] : memref<432x1024xbf16, #tpu.memory_space<vmem>>, vector<16x16xbf16>
    tpu.vector_store %arg8[%c64_60, %c0_61], %102 {strides = array<i32>} : memref<432x1024xbf16, #tpu.memory_space<vmem>>, vector<16x16xbf16>,
    %104 = vector.extract_strided_slice %93 {offsets = [0, 80], sizes = [16, 16], strides = [1, 1]} : vector<16x144xbf16> to vector<16x16xbf16>
    %c80 = arith.constant 80 : index
    %c0_62 = arith.constant 0 : index
    %105 = vector.load %arg8[%c80, %c0_62] : memref<432x1024xbf16, #tpu.memory_space<vmem>>, vector<16x16xbf16>
    tpu.vector_store %arg8[%c80, %c0_62], %104 {strides = array<i32>} : memref<432x1024xbf16, #tpu.memory_space<vmem>>, vector<16x16xbf16>,
    %106 = vector.extract_strided_slice %93 {offsets = [0, 96], sizes = [16, 16], strides = [1, 1]} : vector<16x144xbf16> to vector<16x16xbf16>
    %c96 = arith.constant 96 : index
    %c0_63 = arith.constant 0 : index
    %107 = vector.load %arg8[%c96, %c0_63] : memref<432x1024xbf16, #tpu.memory_space<vmem>>, vector<16x16xbf16>
    tpu.vector_store %arg8[%c96, %c0_63], %106 {strides = array<i32>} : memref<432x1024xbf16, #tpu.memory_space<vmem>>, vector<16x16xbf16>,
    %108 = vector.extract_strided_slice %93 {offsets = [0, 112], sizes = [16, 16], strides = [1, 1]} : vector<16x144xbf16> to vector<16x16xbf16>
    %c112 = arith.constant 112 : index
    %c0_64 = arith.constant 0 : index
    %109 = vector.load %arg8[%c112, %c0_64] : memref<432x1024xbf16, #tpu.memory_space<vmem>>, vector<16x16xbf16>
    tpu.vector_store %arg8[%c112, %c0_64], %108 {strides = array<i32>} : memref<432x1024xbf16, #tpu.memory_space<vmem>>, vector<16x16xbf16>,
    %110 = vector.extract_strided_slice %93 {offsets = [0, 128], sizes = [16, 16], strides = [1, 1]} : vector<16x144xbf16> to vector<16x16xbf16>
    %c128_65 = arith.constant 128 : index
    %c0_66 = arith.constant 0 : index
    %111 = vector.load %arg8[%c128_65, %c0_66] : memref<432x1024xbf16, #tpu.memory_space<vmem>>, vector<16x16xbf16>
    tpu.vector_store %arg8[%c128_65, %c0_66], %110 {strides = array<i32>} : memref<432x1024xbf16, #tpu.memory_space<vmem>>, vector<16x16xbf16>,
    %c0_67 = arith.constant 0 : index
    %c256 = arith.constant 256 : index
    %112 = vector.load %arg6[%c0_67, %c256] : memref<32x1408xbf16, #tpu.memory_space<vmem>>, vector<32x144xbf16>
    %c0_68 = arith.constant 0 : index
    %c0_69 = arith.constant 0 : index
    %113 = vector.load %arg8[%c0_68, %c0_69] : memref<432x1024xbf16, #tpu.memory_space<vmem>>, vector<144x16xbf16>
    %cst_70 = arith.constant dense<0.000000e+00> : vector<32x16xf32>
    %114 = tpu.matmul %112, %113, %cst_70 {dimension_numbers = #tpu.dot_dimension_numbers<[1], [0], [0], [1], [0, 0, 1, 1], [], []>} : vector<32x144xbf16>, vector<144x16xbf16>, vector<32x16xf32> -> vector<32x16xf32>
    %cst_71 = arith.constant dense<0.000000e+00> : vector<32xf32>
    %115 = vector.multi_reduction <add>, %114, %cst_71 [1] : vector<32x16xf32> to vector<32xf32>
    %116 = vector.shape_cast %115 : vector<32xf32> to vector<32x1xf32>
    %cst_72 = arith.constant 1.600000e+01 : f32
    %117 = vector.broadcast %cst_72 : f32 to vector<32x1xf32>
    %118 = arith.divf %116, %117 : vector<32x1xf32>
    %119 = vector.broadcast %118 : vector<32x1xf32> to vector<32x16xf32>
    %120 = arith.subf %114, %119 : vector<32x16xf32>
    %121 = arith.mulf %120, %120 : vector<32x16xf32>
    %cst_73 = arith.constant dense<0.000000e+00> : vector<32xf32>
    %122 = vector.multi_reduction <add>, %121, %cst_73 [1] : vector<32x16xf32> to vector<32xf32>
    %123 = vector.shape_cast %122 : vector<32xf32> to vector<32x1xf32>
    %cst_74 = arith.constant 1.600000e+01 : f32
    %124 = vector.broadcast %cst_74 : f32 to vector<32x1xf32>
    %125 = arith.divf %123, %124 : vector<32x1xf32>
    %126 = vector.broadcast %118 : vector<32x1xf32> to vector<32x16xf32>
    %127 = arith.subf %114, %126 : vector<32x16xf32>
    %cst_75 = arith.constant 9.99999974E-6 : f32
    %128 = vector.broadcast %cst_75 : f32 to vector<32x1xf32>
    %129 = arith.addf %125, %128 : vector<32x1xf32>
    %130 = math.rsqrt %129 : vector<32x1xf32>
    %131 = vector.broadcast %130 : vector<32x1xf32> to vector<32x16xf32>
    %132 = arith.mulf %127, %131 : vector<32x16xf32>
    %cst_76 = arith.constant 0.000000e+00 : f32
    %133 = vector.broadcast %cst_76 : f32 to vector<32x16xf32>
    %134 = arith.maximumf %132, %133 : vector<32x16xf32>
    %135 = arith.truncf %134 : vector<32x16xf32> to vector<32x16xbf16>
    %c0_77 = arith.constant 0 : index
    %c0_78 = arith.constant 0 : index
    %136 = vector.load %arg9[%c0_77, %c0_78] : memref<48x64xbf16, #tpu.memory_space<vmem>>, vector<16x16xbf16>
    tpu.vector_store %arg9[%c0_77, %c0_78], %90 {strides = array<i32>} : memref<48x64xbf16, #tpu.memory_space<vmem>>, vector<16x16xbf16>,
    %c16_79 = arith.constant 16 : index
    %c0_80 = arith.constant 0 : index
    %137 = vector.load %arg9[%c16_79, %c0_80] : memref<48x64xbf16, #tpu.memory_space<vmem>>, vector<32x16xbf16>
    tpu.vector_store %arg9[%c16_79, %c0_80], %135 {strides = array<i32>} : memref<48x64xbf16, #tpu.memory_space<vmem>>, vector<32x16xbf16>,
    %c0_81 = arith.constant 0 : index
    %c0_82 = arith.constant 0 : index
    %138 = vector.load %arg9[%c0_81, %c0_82] : memref<48x64xbf16, #tpu.memory_space<vmem>>, vector<48x16xbf16>
    %c0_83 = arith.constant 0 : index
    %c256_84 = arith.constant 256 : index
    %139 = vector.load %arg4[%c0_83, %c256_84] : memref<16x896xbf16, #tpu.memory_space<vmem>>, vector<16x576xbf16>
    %cst_85 = arith.constant dense<0.000000e+00> : vector<48x576xf32>
    %140 = tpu.matmul %138, %139, %cst_85 {dimension_numbers = #tpu.dot_dimension_numbers<[1], [0], [0], [1], [0, 0, 1, 1], [], []>} : vector<48x16xbf16>, vector<16x576xbf16>, vector<48x576xf32> -> vector<48x576xf32>
    %141 = arith.truncf %140 : vector<48x576xf32> to vector<48x576xbf16>
    %142 = vector.extract_strided_slice %141 {offsets = [0, 0], sizes = [48, 64], strides = [1, 1]} : vector<48x576xbf16> to vector<48x64xbf16>
    %c0_86 = arith.constant 0 : index
    %c0_87 = arith.constant 0 : index
    %143 = vector.load %arg8[%c0_86, %c0_87] : memref<432x1024xbf16, #tpu.memory_space<vmem>>, vector<48x64xbf16>
    tpu.vector_store %arg8[%c0_86, %c0_87], %142 {strides = array<i32>} : memref<432x1024xbf16, #tpu.memory_space<vmem>>, vector<48x64xbf16>,
    %144 = vector.extract_strided_slice %141 {offsets = [0, 64], sizes = [48, 64], strides = [1, 1]} : vector<48x576xbf16> to vector<48x64xbf16>
    %c48_88 = arith.constant 48 : index
    %c0_89 = arith.constant 0 : index
    %145 = vector.load %arg8[%c48_88, %c0_89] : memref<432x1024xbf16, #tpu.memory_space<vmem>>, vector<48x64xbf16>
    tpu.vector_store %arg8[%c48_88, %c0_89], %144 {strides = array<i32>} : memref<432x1024xbf16, #tpu.memory_space<vmem>>, vector<48x64xbf16>,
    %146 = vector.extract_strided_slice %141 {offsets = [0, 128], sizes = [48, 64], strides = [1, 1]} : vector<48x576xbf16> to vector<48x64xbf16>
    %c96_90 = arith.constant 96 : index
    %c0_91 = arith.constant 0 : index
    %147 = vector.load %arg8[%c96_90, %c0_91] : memref<432x1024xbf16, #tpu.memory_space<vmem>>, vector<48x64xbf16>
    tpu.vector_store %arg8[%c96_90, %c0_91], %146 {strides = array<i32>} : memref<432x1024xbf16, #tpu.memory_space<vmem>>, vector<48x64xbf16>,
    %148 = vector.extract_strided_slice %141 {offsets = [0, 192], sizes = [48, 64], strides = [1, 1]} : vector<48x576xbf16> to vector<48x64xbf16>
    %c144 = arith.constant 144 : index
    %c0_92 = arith.constant 0 : index
    %149 = vector.load %arg8[%c144, %c0_92] : memref<432x1024xbf16, #tpu.memory_space<vmem>>, vector<48x64xbf16>
    tpu.vector_store %arg8[%c144, %c0_92], %148 {strides = array<i32>} : memref<432x1024xbf16, #tpu.memory_space<vmem>>, vector<48x64xbf16>,
    %150 = vector.extract_strided_slice %141 {offsets = [0, 256], sizes = [48, 64], strides = [1, 1]} : vector<48x576xbf16> to vector<48x64xbf16>
    %c192 = arith.constant 192 : index
    %c0_93 = arith.constant 0 : index
    %151 = vector.load %arg8[%c192, %c0_93] : memref<432x1024xbf16, #tpu.memory_space<vmem>>, vector<48x64xbf16>
    tpu.vector_store %arg8[%c192, %c0_93], %150 {strides = array<i32>} : memref<432x1024xbf16, #tpu.memory_space<vmem>>, vector<48x64xbf16>,
    %152 = vector.extract_strided_slice %141 {offsets = [0, 320], sizes = [48, 64], strides = [1, 1]} : vector<48x576xbf16> to vector<48x64xbf16>
    %c240 = arith.constant 240 : index
    %c0_94 = arith.constant 0 : index
    %153 = vector.load %arg8[%c240, %c0_94] : memref<432x1024xbf16, #tpu.memory_space<vmem>>, vector<48x64xbf16>
    tpu.vector_store %arg8[%c240, %c0_94], %152 {strides = array<i32>} : memref<432x1024xbf16, #tpu.memory_space<vmem>>, vector<48x64xbf16>,
    %154 = vector.extract_strided_slice %141 {offsets = [0, 384], sizes = [48, 64], strides = [1, 1]} : vector<48x576xbf16> to vector<48x64xbf16>
    %c288 = arith.constant 288 : index
    %c0_95 = arith.constant 0 : index
    %155 = vector.load %arg8[%c288, %c0_95] : memref<432x1024xbf16, #tpu.memory_space<vmem>>, vector<48x64xbf16>
    tpu.vector_store %arg8[%c288, %c0_95], %154 {strides = array<i32>} : memref<432x1024xbf16, #tpu.memory_space<vmem>>, vector<48x64xbf16>,
    %156 = vector.extract_strided_slice %141 {offsets = [0, 448], sizes = [48, 64], strides = [1, 1]} : vector<48x576xbf16> to vector<48x64xbf16>
    %c336 = arith.constant 336 : index
    %c0_96 = arith.constant 0 : index
    %157 = vector.load %arg8[%c336, %c0_96] : memref<432x1024xbf16, #tpu.memory_space<vmem>>, vector<48x64xbf16>
    tpu.vector_store %arg8[%c336, %c0_96], %156 {strides = array<i32>} : memref<432x1024xbf16, #tpu.memory_space<vmem>>, vector<48x64xbf16>,
    %158 = vector.extract_strided_slice %141 {offsets = [0, 512], sizes = [48, 64], strides = [1, 1]} : vector<48x576xbf16> to vector<48x64xbf16>
    %c384 = arith.constant 384 : index
    %c0_97 = arith.constant 0 : index
    %159 = vector.load %arg8[%c384, %c0_97] : memref<432x1024xbf16, #tpu.memory_space<vmem>>, vector<48x64xbf16>
    tpu.vector_store %arg8[%c384, %c0_97], %158 {strides = array<i32>} : memref<432x1024xbf16, #tpu.memory_space<vmem>>, vector<48x64xbf16>,
    %c0_98 = arith.constant 0 : index
    %c512 = arith.constant 512 : index
    %160 = vector.load %arg6[%c0_98, %c512] : memref<32x1408xbf16, #tpu.memory_space<vmem>>, vector<8x432xbf16>
    %c0_99 = arith.constant 0 : index
    %c0_100 = arith.constant 0 : index
    %161 = vector.load %arg8[%c0_99, %c0_100] : memref<432x1024xbf16, #tpu.memory_space<vmem>>, vector<432x64xbf16>
    %cst_101 = arith.constant dense<0.000000e+00> : vector<8x64xf32>
    %162 = tpu.matmul %160, %161, %cst_101 {dimension_numbers = #tpu.dot_dimension_numbers<[1], [0], [0], [1], [0, 0, 1, 1], [], []>} : vector<8x432xbf16>, vector<432x64xbf16>, vector<8x64xf32> -> vector<8x64xf32>
    %cst_102 = arith.constant dense<0.000000e+00> : vector<8xf32>
    %163 = vector.multi_reduction <add>, %162, %cst_102 [1] : vector<8x64xf32> to vector<8xf32>
    %164 = vector.shape_cast %163 : vector<8xf32> to vector<8x1xf32>
    %cst_103 = arith.constant 6.400000e+01 : f32
    %165 = vector.broadcast %cst_103 : f32 to vector<8x1xf32>
    %166 = arith.divf %164, %165 : vector<8x1xf32>
    %167 = vector.broadcast %166 : vector<8x1xf32> to vector<8x64xf32>
    %168 = arith.subf %162, %167 : vector<8x64xf32>
    %169 = arith.mulf %168, %168 : vector<8x64xf32>
    %cst_104 = arith.constant dense<0.000000e+00> : vector<8xf32>
    %170 = vector.multi_reduction <add>, %169, %cst_104 [1] : vector<8x64xf32> to vector<8xf32>
    %171 = vector.shape_cast %170 : vector<8xf32> to vector<8x1xf32>
    %cst_105 = arith.constant 6.400000e+01 : f32
    %172 = vector.broadcast %cst_105 : f32 to vector<8x1xf32>
    %173 = arith.divf %171, %172 : vector<8x1xf32>
    %174 = vector.broadcast %166 : vector<8x1xf32> to vector<8x64xf32>
    %175 = arith.subf %162, %174 : vector<8x64xf32>
    %cst_106 = arith.constant 9.99999974E-6 : f32
    %176 = vector.broadcast %cst_106 : f32 to vector<8x1xf32>
    %177 = arith.addf %173, %176 : vector<8x1xf32>
    %178 = math.rsqrt %177 : vector<8x1xf32>
    %179 = vector.broadcast %178 : vector<8x1xf32> to vector<8x64xf32>
    %180 = arith.mulf %175, %179 : vector<8x64xf32>
    %cst_107 = arith.constant 0.000000e+00 : f32
    %181 = vector.broadcast %cst_107 : f32 to vector<8x64xf32>
    %182 = arith.maximumf %180, %181 : vector<8x64xf32>
    %183 = arith.truncf %182 : vector<8x64xf32> to vector<8x64xbf16>
    %c0_108 = arith.constant 0 : index
    %c0_109 = arith.constant 0 : index
    %184 = vector.load %arg9[%c0_108, %c0_109] : memref<48x64xbf16, #tpu.memory_space<vmem>>, vector<8x64xbf16>
    tpu.vector_store %arg9[%c0_108, %c0_109], %45 {strides = array<i32>} : memref<48x64xbf16, #tpu.memory_space<vmem>>, vector<8x64xbf16>,
    %c8_110 = arith.constant 8 : index
    %c0_111 = arith.constant 0 : index
    %185 = vector.load %arg9[%c8_110, %c0_111] : memref<48x64xbf16, #tpu.memory_space<vmem>>, vector<8x64xbf16>
    tpu.vector_store %arg9[%c8_110, %c0_111], %183 {strides = array<i32>} : memref<48x64xbf16, #tpu.memory_space<vmem>>, vector<8x64xbf16>,
    %c0_112 = arith.constant 0 : index
    %c0_113 = arith.constant 0 : index
    %186 = vector.load %arg9[%c0_112, %c0_113] : memref<48x64xbf16, #tpu.memory_space<vmem>>, vector<16x64xbf16>
    %c0_114 = arith.constant 0 : index
    %c256_115 = arith.constant 256 : index
    %187 = vector.load %arg3[%c0_114, %c256_115] : memref<64x2560xbf16, #tpu.memory_space<vmem>>, vector<64x2304xbf16>
    %cst_116 = arith.constant dense<0.000000e+00> : vector<16x2304xf32>
    %188 = tpu.matmul %186, %187, %cst_116 {dimension_numbers = #tpu.dot_dimension_numbers<[1], [0], [0], [1], [0, 0, 1, 1], [], []>} : vector<16x64xbf16>, vector<64x2304xbf16>, vector<16x2304xf32> -> vector<16x2304xf32>
    %189 = arith.truncf %188 : vector<16x2304xf32> to vector<16x2304xbf16>
    %190 = vector.extract_strided_slice %189 {offsets = [0, 0], sizes = [16, 256], strides = [1, 1]} : vector<16x2304xbf16> to vector<16x256xbf16>
    %c0_117 = arith.constant 0 : index
    %c0_118 = arith.constant 0 : index
    %191 = vector.load %arg8[%c0_117, %c0_118] : memref<432x1024xbf16, #tpu.memory_space<vmem>>, vector<16x256xbf16>
    tpu.vector_store %arg8[%c0_117, %c0_118], %190 {strides = array<i32>} : memref<432x1024xbf16, #tpu.memory_space<vmem>>, vector<16x256xbf16>,
    %192 = vector.extract_strided_slice %189 {offsets = [0, 256], sizes = [16, 256], strides = [1, 1]} : vector<16x2304xbf16> to vector<16x256xbf16>
    %c16_119 = arith.constant 16 : index
    %c0_120 = arith.constant 0 : index
    %193 = vector.load %arg8[%c16_119, %c0_120] : memref<432x1024xbf16, #tpu.memory_space<vmem>>, vector<16x256xbf16>
    tpu.vector_store %arg8[%c16_119, %c0_120], %192 {strides = array<i32>} : memref<432x1024xbf16, #tpu.memory_space<vmem>>, vector<16x256xbf16>,
    %194 = vector.extract_strided_slice %189 {offsets = [0, 512], sizes = [16, 256], strides = [1, 1]} : vector<16x2304xbf16> to vector<16x256xbf16>
    %c32_121 = arith.constant 32 : index
    %c0_122 = arith.constant 0 : index
    %195 = vector.load %arg8[%c32_121, %c0_122] : memref<432x1024xbf16, #tpu.memory_space<vmem>>, vector<16x256xbf16>
    tpu.vector_store %arg8[%c32_121, %c0_122], %194 {strides = array<i32>} : memref<432x1024xbf16, #tpu.memory_space<vmem>>, vector<16x256xbf16>,
    %196 = vector.extract_strided_slice %189 {offsets = [0, 768], sizes = [16, 256], strides = [1, 1]} : vector<16x2304xbf16> to vector<16x256xbf16>
    %c48_123 = arith.constant 48 : index
    %c0_124 = arith.constant 0 : index
    %197 = vector.load %arg8[%c48_123, %c0_124] : memref<432x1024xbf16, #tpu.memory_space<vmem>>, vector<16x256xbf16>
    tpu.vector_store %arg8[%c48_123, %c0_124], %196 {strides = array<i32>} : memref<432x1024xbf16, #tpu.memory_space<vmem>>, vector<16x256xbf16>,
    %198 = vector.extract_strided_slice %189 {offsets = [0, 1024], sizes = [16, 256], strides = [1, 1]} : vector<16x2304xbf16> to vector<16x256xbf16>
    %c64_125 = arith.constant 64 : index
    %c0_126 = arith.constant 0 : index
    %199 = vector.load %arg8[%c64_125, %c0_126] : memref<432x1024xbf16, #tpu.memory_space<vmem>>, vector<16x256xbf16>
    tpu.vector_store %arg8[%c64_125, %c0_126], %198 {strides = array<i32>} : memref<432x1024xbf16, #tpu.memory_space<vmem>>, vector<16x256xbf16>,
    %200 = vector.extract_strided_slice %189 {offsets = [0, 1280], sizes = [16, 256], strides = [1, 1]} : vector<16x2304xbf16> to vector<16x256xbf16>
    %c80_127 = arith.constant 80 : index
    %c0_128 = arith.constant 0 : index
    %201 = vector.load %arg8[%c80_127, %c0_128] : memref<432x1024xbf16, #tpu.memory_space<vmem>>, vector<16x256xbf16>
    tpu.vector_store %arg8[%c80_127, %c0_128], %200 {strides = array<i32>} : memref<432x1024xbf16, #tpu.memory_space<vmem>>, vector<16x256xbf16>,
    %202 = vector.extract_strided_slice %189 {offsets = [0, 1536], sizes = [16, 256], strides = [1, 1]} : vector<16x2304xbf16> to vector<16x256xbf16>
    %c96_129 = arith.constant 96 : index
    %c0_130 = arith.constant 0 : index
    %203 = vector.load %arg8[%c96_129, %c0_130] : memref<432x1024xbf16, #tpu.memory_space<vmem>>, vector<16x256xbf16>
    tpu.vector_store %arg8[%c96_129, %c0_130], %202 {strides = array<i32>} : memref<432x1024xbf16, #tpu.memory_space<vmem>>, vector<16x256xbf16>,
    %204 = vector.extract_strided_slice %189 {offsets = [0, 1792], sizes = [16, 256], strides = [1, 1]} : vector<16x2304xbf16> to vector<16x256xbf16>
    %c112_131 = arith.constant 112 : index
    %c0_132 = arith.constant 0 : index
    %205 = vector.load %arg8[%c112_131, %c0_132] : memref<432x1024xbf16, #tpu.memory_space<vmem>>, vector<16x256xbf16>
    tpu.vector_store %arg8[%c112_131, %c0_132], %204 {strides = array<i32>} : memref<432x1024xbf16, #tpu.memory_space<vmem>>, vector<16x256xbf16>,
    %206 = vector.extract_strided_slice %189 {offsets = [0, 2048], sizes = [16, 256], strides = [1, 1]} : vector<16x2304xbf16> to vector<16x256xbf16>
    %c128_133 = arith.constant 128 : index
    %c0_134 = arith.constant 0 : index
    %207 = vector.load %arg8[%c128_133, %c0_134] : memref<432x1024xbf16, #tpu.memory_space<vmem>>, vector<16x256xbf16>
    tpu.vector_store %arg8[%c128_133, %c0_134], %206 {strides = array<i32>} : memref<432x1024xbf16, #tpu.memory_space<vmem>>, vector<16x256xbf16>,
    %c0_135 = arith.constant 0 : index
    %c1024 = arith.constant 1024 : index
    %208 = vector.load %arg6[%c0_135, %c1024] : memref<32x1408xbf16, #tpu.memory_space<vmem>>, vector<8x144xbf16>
    %c0_136 = arith.constant 0 : index
    %c0_137 = arith.constant 0 : index
    %209 = vector.load %arg8[%c0_136, %c0_137] : memref<432x1024xbf16, #tpu.memory_space<vmem>>, vector<144x256xbf16>
    %cst_138 = arith.constant dense<0.000000e+00> : vector<8x256xf32>
    %210 = tpu.matmul %208, %209, %cst_138 {dimension_numbers = #tpu.dot_dimension_numbers<[1], [0], [0], [1], [0, 0, 1, 1], [], []>} : vector<8x144xbf16>, vector<144x256xbf16>, vector<8x256xf32> -> vector<8x256xf32>
    %cst_139 = arith.constant dense<0.000000e+00> : vector<8xf32>
    %211 = vector.multi_reduction <add>, %210, %cst_139 [1] : vector<8x256xf32> to vector<8xf32>
    %212 = vector.shape_cast %211 : vector<8xf32> to vector<8x1xf32>
    %cst_140 = arith.constant 2.560000e+02 : f32
    %213 = vector.broadcast %cst_140 : f32 to vector<8x1xf32>
    %214 = arith.divf %212, %213 : vector<8x1xf32>
    %215 = vector.broadcast %214 : vector<8x1xf32> to vector<8x256xf32>
    %216 = arith.subf %210, %215 : vector<8x256xf32>
    %217 = arith.mulf %216, %216 : vector<8x256xf32>
    %cst_141 = arith.constant dense<0.000000e+00> : vector<8xf32>
    %218 = vector.multi_reduction <add>, %217, %cst_141 [1] : vector<8x256xf32> to vector<8xf32>
    %219 = vector.shape_cast %218 : vector<8xf32> to vector<8x1xf32>
    %cst_142 = arith.constant 2.560000e+02 : f32
    %220 = vector.broadcast %cst_142 : f32 to vector<8x1xf32>
    %221 = arith.divf %219, %220 : vector<8x1xf32>
    %222 = vector.broadcast %214 : vector<8x1xf32> to vector<8x256xf32>
    %223 = arith.subf %210, %222 : vector<8x256xf32>
    %cst_143 = arith.constant 9.99999974E-6 : f32
    %224 = vector.broadcast %cst_143 : f32 to vector<8x1xf32>
    %225 = arith.addf %221, %224 : vector<8x1xf32>
    %226 = math.rsqrt %225 : vector<8x1xf32>
    %227 = vector.broadcast %226 : vector<8x1xf32> to vector<8x256xf32>
    %228 = arith.mulf %223, %227 : vector<8x256xf32>
    %cst_144 = arith.constant 0.000000e+00 : f32
    %229 = vector.broadcast %cst_144 : f32 to vector<8x256xf32>
    %230 = arith.maximumf %228, %229 : vector<8x256xf32>
    %231 = arith.truncf %230 : vector<8x256xf32> to vector<8x256xbf16>
    %c0_145 = arith.constant 0 : index
    %c0_146 = arith.constant 0 : index
    %232 = vector.load %arg5[%c0_145, %c0_146] : memref<256x9216xbf16, #tpu.memory_space<vmem>>, vector<256x9216xbf16>
    %cst_147 = arith.constant dense<0.000000e+00> : vector<8x9216xf32>
    %233 = tpu.matmul %231, %232, %cst_147 {dimension_numbers = #tpu.dot_dimension_numbers<[1], [0], [0], [1], [0, 0, 1, 1], [], []>} : vector<8x256xbf16>, vector<256x9216xbf16>, vector<8x9216xf32> -> vector<8x9216xf32>
    %234 = arith.truncf %233 : vector<8x9216xf32> to vector<8x9216xbf16>
    %235 = vector.extract_strided_slice %234 {offsets = [0, 0], sizes = [8, 1024], strides = [1, 1]} : vector<8x9216xbf16> to vector<8x1024xbf16>
    %c0_148 = arith.constant 0 : index
    %c0_149 = arith.constant 0 : index
    %236 = vector.load %arg8[%c0_148, %c0_149] : memref<432x1024xbf16, #tpu.memory_space<vmem>>, vector<8x1024xbf16>
    tpu.vector_store %arg8[%c0_148, %c0_149], %235 {strides = array<i32>} : memref<432x1024xbf16, #tpu.memory_space<vmem>>, vector<8x1024xbf16>,
    %237 = vector.extract_strided_slice %234 {offsets = [0, 1024], sizes = [8, 1024], strides = [1, 1]} : vector<8x9216xbf16> to vector<8x1024xbf16>
    %c8_150 = arith.constant 8 : index
    %c0_151 = arith.constant 0 : index
    %238 = vector.load %arg8[%c8_150, %c0_151] : memref<432x1024xbf16, #tpu.memory_space<vmem>>, vector<8x1024xbf16>
    tpu.vector_store %arg8[%c8_150, %c0_151], %237 {strides = array<i32>} : memref<432x1024xbf16, #tpu.memory_space<vmem>>, vector<8x1024xbf16>,
    %239 = vector.extract_strided_slice %234 {offsets = [0, 2048], sizes = [8, 1024], strides = [1, 1]} : vector<8x9216xbf16> to vector<8x1024xbf16>
    %c16_152 = arith.constant 16 : index
    %c0_153 = arith.constant 0 : index
    %240 = vector.load %arg8[%c16_152, %c0_153] : memref<432x1024xbf16, #tpu.memory_space<vmem>>, vector<8x1024xbf16>
    tpu.vector_store %arg8[%c16_152, %c0_153], %239 {strides = array<i32>} : memref<432x1024xbf16, #tpu.memory_space<vmem>>, vector<8x1024xbf16>,
    %241 = vector.extract_strided_slice %234 {offsets = [0, 3072], sizes = [8, 1024], strides = [1, 1]} : vector<8x9216xbf16> to vector<8x1024xbf16>
    %c24_154 = arith.constant 24 : index
    %c0_155 = arith.constant 0 : index
    %242 = vector.load %arg8[%c24_154, %c0_155] : memref<432x1024xbf16, #tpu.memory_space<vmem>>, vector<8x1024xbf16>
    tpu.vector_store %arg8[%c24_154, %c0_155], %241 {strides = array<i32>} : memref<432x1024xbf16, #tpu.memory_space<vmem>>, vector<8x1024xbf16>,
    %243 = vector.extract_strided_slice %234 {offsets = [0, 4096], sizes = [8, 1024], strides = [1, 1]} : vector<8x9216xbf16> to vector<8x1024xbf16>
    %c32_156 = arith.constant 32 : index
    %c0_157 = arith.constant 0 : index
    %244 = vector.load %arg8[%c32_156, %c0_157] : memref<432x1024xbf16, #tpu.memory_space<vmem>>, vector<8x1024xbf16>
    tpu.vector_store %arg8[%c32_156, %c0_157], %243 {strides = array<i32>} : memref<432x1024xbf16, #tpu.memory_space<vmem>>, vector<8x1024xbf16>,
    %245 = vector.extract_strided_slice %234 {offsets = [0, 5120], sizes = [8, 1024], strides = [1, 1]} : vector<8x9216xbf16> to vector<8x1024xbf16>
    %c40_158 = arith.constant 40 : index
    %c0_159 = arith.constant 0 : index
    %246 = vector.load %arg8[%c40_158, %c0_159] : memref<432x1024xbf16, #tpu.memory_space<vmem>>, vector<8x1024xbf16>
    tpu.vector_store %arg8[%c40_158, %c0_159], %245 {strides = array<i32>} : memref<432x1024xbf16, #tpu.memory_space<vmem>>, vector<8x1024xbf16>,
    %247 = vector.extract_strided_slice %234 {offsets = [0, 6144], sizes = [8, 1024], strides = [1, 1]} : vector<8x9216xbf16> to vector<8x1024xbf16>
    %c48_160 = arith.constant 48 : index
    %c0_161 = arith.constant 0 : index
    %248 = vector.load %arg8[%c48_160, %c0_161] : memref<432x1024xbf16, #tpu.memory_space<vmem>>, vector<8x1024xbf16>
    tpu.vector_store %arg8[%c48_160, %c0_161], %247 {strides = array<i32>} : memref<432x1024xbf16, #tpu.memory_space<vmem>>, vector<8x1024xbf16>,
    %249 = vector.extract_strided_slice %234 {offsets = [0, 7168], sizes = [8, 1024], strides = [1, 1]} : vector<8x9216xbf16> to vector<8x1024xbf16>
    %c56_162 = arith.constant 56 : index
    %c0_163 = arith.constant 0 : index
    %250 = vector.load %arg8[%c56_162, %c0_163] : memref<432x1024xbf16, #tpu.memory_space<vmem>>, vector<8x1024xbf16>
    tpu.vector_store %arg8[%c56_162, %c0_163], %249 {strides = array<i32>} : memref<432x1024xbf16, #tpu.memory_space<vmem>>, vector<8x1024xbf16>,
    %251 = vector.extract_strided_slice %234 {offsets = [0, 8192], sizes = [8, 1024], strides = [1, 1]} : vector<8x9216xbf16> to vector<8x1024xbf16>
    %c64_164 = arith.constant 64 : index
    %c0_165 = arith.constant 0 : index
    %252 = vector.load %arg8[%c64_164, %c0_165] : memref<432x1024xbf16, #tpu.memory_space<vmem>>, vector<8x1024xbf16>
    tpu.vector_store %arg8[%c64_164, %c0_165], %251 {strides = array<i32>} : memref<432x1024xbf16, #tpu.memory_space<vmem>>, vector<8x1024xbf16>,
    %cst_166 = arith.constant 1.000000e+00 : bf16
    %253 = vector.broadcast %cst_166 : bf16 to vector<1x1024xbf16>
    %c72 = arith.constant 72 : index
    %c0_167 = arith.constant 0 : index
    %254 = vector.load %arg8[%c72, %c0_167] : memref<432x1024xbf16, #tpu.memory_space<vmem>>, vector<1x1024xbf16>
    tpu.vector_store %arg8[%c72, %c0_167], %253 {strides = array<i32>} : memref<432x1024xbf16, #tpu.memory_space<vmem>>, vector<1x1024xbf16>,
    %c0_168 = arith.constant 0 : index
    %c1280 = arith.constant 1280 : index
    %255 = vector.load %arg6[%c0_168, %c1280] : memref<32x1408xbf16, #tpu.memory_space<vmem>>, vector<4x73xbf16>
    %c0_169 = arith.constant 0 : index
    %c0_170 = arith.constant 0 : index
    %256 = vector.load %arg8[%c0_169, %c0_170] : memref<432x1024xbf16, #tpu.memory_space<vmem>>, vector<73x1024xbf16>
    %cst_171 = arith.constant dense<0.000000e+00> : vector<4x1024xf32>
    %257 = tpu.matmul %255, %256, %cst_171 {dimension_numbers = #tpu.dot_dimension_numbers<[1], [0], [0], [1], [0, 0, 1, 1], [], []>} : vector<4x73xbf16>, vector<73x1024xbf16>, vector<4x1024xf32> -> vector<4x1024xf32>
    %c0_172 = arith.constant 0 : index
    %c0_173 = arith.constant 0 : index
    %258 = vector.load %arg7[%c0_172, %c0_173] : memref<4x1024xf32, #tpu.memory_space<vmem>>, vector<4x1024xf32>
    tpu.vector_store %arg7[%c0_172, %c0_173], %257 {strides = array<i32>} : memref<4x1024xf32, #tpu.memory_space<vmem>>, vector<4x1024xf32>,
    return
  }
  func.func @transform_0(%arg0: i32) -> (i32, i32) {
    %c0_i32 = arith.constant 0 : i32
    %c0_i32_0 = arith.constant 0 : i32
    %c0_i32_1 = arith.constant 0 : i32
    return %c0_i32, %c0_i32_0 : i32, i32
  }
  func.func @transform_1(%arg0: i32) -> (i32, i32) {
    %c0_i32 = arith.constant 0 : i32
    %c0_i32_0 = arith.constant 0 : i32
    %c0_i32_1 = arith.constant 0 : i32
    return %c0_i32, %c0_i32_0 : i32, i32
  }
  func.func @transform_2(%arg0: i32) -> (i32, i32) {
    %c0_i32 = arith.constant 0 : i32
    %c0_i32_0 = arith.constant 0 : i32
    %c0_i32_1 = arith.constant 0 : i32
    return %c0_i32, %c0_i32_0 : i32, i32
  }
  func.func @transform_3(%arg0: i32) -> (i32, i32) {
    %c0_i32 = arith.constant 0 : i32
    %c0_i32_0 = arith.constant 0 : i32
    %c0_i32_1 = arith.constant 0 : i32
    return %c0_i32, %c0_i32_0 : i32, i32
  }
  func.func @transform_4(%arg0: i32) -> (i32, i32) {
    %c0_i32 = arith.constant 0 : i32
    %c0_i32_0 = arith.constant 0 : i32
    %c0_i32_1 = arith.constant 0 : i32
    return %c0_i32, %c0_i32_0 : i32, i32
  }
  func.func @transform_5(%arg0: i32) -> (i32, i32) {
    %c0_i32 = arith.constant 0 : i32
    %c0_i32_0 = arith.constant 0 : i32
    %c0_i32_1 = arith.constant 0 : i32
    return %c0_i32, %c0_i32_0 : i32, i32
  }
  func.func @transform_6(%arg0: i32) -> (i32, i32) {
    %c0_i32 = arith.constant 0 : i32
    %c0_i32_0 = arith.constant 0 : i32
    %c0_i32_1 = arith.constant 0 : i32
    return %c0_i32, %c0_i32_0 : i32, i32
  }
}

</mosaic_0001>

<bundles_post_ra>
// kernel: forward.1
= control target key start
LH: loop header
LB: loop body
LE: loop exit
PB: predicated region body
PF: predicated region fallthrough
CT: control target
= control target key end

     0   :  { %11 = vsyncpa [#allocation5], 0  ;;  %s15704_s0 = inlined_call_operand.vmem [shape: bf16[6,256], index: 0, kind: input, shape index: {}]   ;;  %s15705_s1 = inlined_call_operand.vmem [shape: bf16[256,576], index: 1, kind: input, shape index: {}]   ;;  %s15706_s2 = inlined_call_operand.hbm [shape: bf16[64,2560], index: 2, kind: input, shape index: {}]   ;;  %s15707_s3 = inlined_call_operand.hbm [shape: bf16[16,896], index: 3, kind: input, shape index: {}]   ;;  %s15708_s4 = inlined_call_operand.hbm [shape: bf16[256,9216], index: 4, kind: input, shape index: {}]   ;;  %s15709_s5 = inlined_call_operand.hbm [shape: bf16[32,1408], index: 5, kind: input, shape index: {}]   ;;  %s15710_s6 = inlined_call_operand.vmem [shape: f32[4,1024], index: 6, kind: output, shape index: {}]  }
   0x1   :  { %12 = vsyncpa [#allocation7], 0 }
   0x2   :  { %13 = vsyncpa [#allocation10], 0  ;;  %s14829_s21 = smov [#allocation6]  }
   0x3   :  { %s35_s22 = sshll.u32 %s14829_s21, 4  ;;  %s36_s22 = int_to_ptr.vmem [resolvable:$true] %s35_s22 }
   0x4   :  { %s14751_s23 = scalar_lea.vmem %s36_s22, 896  ;;  %p14756_p1 = scmp.lt.s32.totalorder %s36_s22, %s36_s22 }
   0x5   :  { %p14752_p0 = scmp.ne.s32.totalorder %s36_s22, %s14751_s23  ;;  %p14757_p2 = scmp.lt.s32.totalorder %s14751_s23, %s14751_s23 }
   0x7   :  { %p14758_p3 = por %p14757_p2, %p14756_p1 }
   0x9   :  { %p14759_p4 = pnand %p14758_p3, %p14752_p0 }
   0xb   :  { %14762 = shalt.err (!%p14759_p4)
}
   0xc   :  { %s14830_s24 = smov 448   ;;  %s14831_s25 = smov 28  }
   0xd   :  { %41 = dma.hbm_to_vmem [thread:$0]  %s15707_s3, 896, %s36_s22, [#allocation7], %s14830_s24, %s14830_s24, %s14831_s25  }
   0xe   :  { %s14832_s28 = smov [#allocation4]  }
   0xf   :  { %s23_s29 = sshll.u32 %s14832_s28, 4  ;;  %s24_s29 = int_to_ptr.vmem [resolvable:$true] %s23_s29 }
  0x10   :  { %s14771_s30 = scalar_lea.vmem %s24_s29, 10240  ;;  %p14776_p6 = scmp.lt.s32.totalorder %s24_s29, %s24_s29 }
  0x11   :  { %p14772_p5 = scmp.ne.s32.totalorder %s24_s29, %s14771_s30  ;;  %p14777_p7 = scmp.lt.s32.totalorder %s14771_s30, %s14771_s30 }
  0x13   :  { %p14778_p8 = por %p14777_p7, %p14776_p6 }
  0x15   :  { %p14779_p9 = pnand %p14778_p8, %p14772_p5 }
  0x17   :  { %14782 = shalt.err (!%p14779_p9)
}
  0x18   :  { %s14833_s7 = smov 1280   ;;  %s14834_s8 = smov 80  }
  0x19   :  { %29 = dma.hbm_to_vmem [thread:$0]  %s15706_s2, 10240, %s24_s29, [#allocation5], %s14833_s7, %s14833_s7, %s14834_s8  }
  0x1a   :  { %s14835_s11 = smov [#allocation8]  }
  0x1b   :  { %s47_s12 = sshll.u32 %s14835_s11, 4  ;;  %s48_s12 = int_to_ptr.vmem [resolvable:$true] %s47_s12 }
  0x1c   :  { %s14791_s3 = scalar_lea.vmem %s48_s12, 147456  ;;  %p14796_p11 = scmp.lt.s32.totalorder %s48_s12, %s48_s12 }
  0x1d   :  { %p14792_p10 = scmp.ne.s32.totalorder %s48_s12, %s14791_s3  ;;  %p14797_p12 = scmp.lt.s32.totalorder %s14791_s3, %s14791_s3 }
  0x1f   :  { %p14798_p13 = por %p14797_p12, %p14796_p11 }
  0x21   :  { %p14799_p0 = pnand %p14798_p13, %p14792_p10 }
  0x23   :  { %14802 = shalt.err (!%p14799_p0)
}
  0x24   :  { %s14836_s13 = smov 4608   ;;  %s14837_s14 = smov 288  }
  0x25   :  { %53 = dma.hbm_to_vmem [thread:$0]  %s15708_s4, 147456, %s48_s12, [#allocation7], %s14836_s13, %s14836_s13, %s14837_s14  }
  0x26   :  { %s14838_s17 = smov [#allocation9]  }
  0x27   :  { %s59_s18 = sshll.u32 %s14838_s17, 4  ;;  %s60_s18 = int_to_ptr.vmem [resolvable:$true] %s59_s18 }
  0x28   :  { %s14811_s2 = scalar_lea.vmem %s60_s18, 2816  ;;  %p14816_p2 = scmp.lt.s32.totalorder %s60_s18, %s60_s18 }
  0x29   :  { %p14812_p1 = scmp.ne.s32.totalorder %s60_s18, %s14811_s2  ;;  %p14817_p3 = scmp.lt.s32.totalorder %s14811_s2, %s14811_s2 }
  0x2b   :  { %p14818_p4 = por %p14817_p3, %p14816_p2 }
  0x2d   :  { %p14819_p5 = pnand %p14818_p4, %p14812_p1 }
  0x2f   :  { %14822 = shalt.err (!%p14819_p5)
}
  0x30   :  { %s14839_s19 = smov 704   ;;  %s14840_s20 = smov 44  }
  0x31   :  { %65 = dma.hbm_to_vmem [thread:$0]  %s15709_s5, 2816, %s60_s18, [#allocation10], %s14839_s19, %s14839_s19, %s14840_s20  }
  0x32   :  { %14823 = dma.done.wait [#allocation5], 10240  }
  0x33   :  { %14824 = vsyncadd [#allocation5], 4294957056 }
  0x34   :  { %14825 = dma.done.wait [#allocation7], 148352  }
  0x35   :  { %14826 = vsyncadd [#allocation7], 4294818944 }
  0x36   :  { %14827 = dma.done.wait [#allocation10], 2816  }
  0x37   :  { %14828 = vsyncadd [#allocation10], 4294964480  ;;  %v14436_v0 = vld [vmem:[%s15705_s1 + $0x124] ss:$20 sps:$4 sm:$0xff]   ;;  %v14438_v1 = vld [vmem:[%s15705_s1 + $0x120] ss:$20 sps:$4 sm:$0xff]  }
  0x38   :  { %641 = vmatprep.subr.bf16.mxu1 %v14436_v0  ;;  %v14439_v2 = vld [vmem:[%s15705_s1 + $0x11c] ss:$20 sps:$4 sm:$0xff]   ;;  %v14441_v3 = vld [vmem:[%s15705_s1 + $0x118] ss:$20 sps:$4 sm:$0xff]   ;;  %v14445_v6 = vld [vmem:[%s15705_s1 + $0xf4] ss:$20 sps:$4 sm:$0xff]  }
  0x39   :  { %642 = vmatpush1.bf16.msra.mxu1 %v14438_v1  ;;  %v14442_v4 = vld [vmem:[%s15705_s1 + $0xfc] ss:$20 sps:$4 sm:$0xff]   ;;  %v14444_v5 = vld [vmem:[%s15705_s1 + $0xf8] ss:$20 sps:$4 sm:$0xff]   ;;  %600 = vmatprep.subr.bf16.mxu0 %v14439_v2  ;;  %v14448_v8 = vld [vmem:[%s15705_s1 + $0xd4] ss:$20 sps:$4 sm:$0xff]  }
  0x3a   :  { %601 = vmatpush1.bf16.msra.mxu0 %v14441_v3  ;;  %643 = vmatprep.subr.bf16.mxu1 %v14442_v4  ;;  %v14447_v7 = vld [vmem:[%s15705_s1 + $0xf0] ss:$20 sps:$4 sm:$0xff]   ;;  %v14451_v10 = vld [vmem:[%s15705_s1 + $0xcc] ss:$20 sps:$4 sm:$0xff]   ;;  %v14453_v12 = vld [vmem:[%s15705_s1 + $0xc8] ss:$20 sps:$4 sm:$0xff]  }
  0x3b   :  { %602 = vmatprep.subr.bf16.mxu0 %v14445_v6  ;;  %v14450_v9 = vld [vmem:[%s15705_s1 + $0xd0] ss:$20 sps:$4 sm:$0xff]   ;;  %v14454_v11 = vld [vmem:[%s15705_s1 + $0xac] ss:$20 sps:$4 sm:$0xff]   ;;  %v14456_v14 = vld [vmem:[%s15705_s1 + $0xa8] ss:$20 sps:$4 sm:$0xff]  }
  0x3c   :  { %v14457_v13 = vld [vmem:[%s15705_s1 + $0xa4] ss:$20 sps:$4 sm:$0xff]   ;;  %v14459_v16 = vld [vmem:[%s15705_s1 + $0xa0] ss:$20 sps:$4 sm:$0xff]   ;;  %v14463_v17 = vld [vmem:[%s15705_s1 + $0x7c] ss:$20 sps:$4 sm:$0xff]  }
  0x3d   :  { %644 = vmatpush1.bf16.msra.mxu1 %v14444_v5  ;;  %v14460_v15 = vld [vmem:[%s15705_s1 + $0x84] ss:$20 sps:$4 sm:$0xff]   ;;  %v14462_v18 = vld [vmem:[%s15705_s1 + $0x80] ss:$20 sps:$4 sm:$0xff]   ;;  %v14466_v19 = vld [vmem:[%s15705_s1 + $0x5c] ss:$20 sps:$4 sm:$0xff]  }
  0x3e   :  { %645 = vmatprep.subr.bf16.mxu1 %v14448_v8  ;;  %603 = vmatpush1.bf16.msra.mxu0 %v14447_v7  ;;  %v14465_v20 = vld [vmem:[%s15705_s1 + $0x78] ss:$20 sps:$4 sm:$0xff]   ;;  %v14469_v21 = vld [vmem:[%s15705_s1 + $0x54] ss:$20 sps:$4 sm:$0xff]   ;;  %v14471_v24 = vld [vmem:[%s15705_s1 + $0x50] ss:$20 sps:$4 sm:$0xff]  }
  0x3f   :  { %604 = vmatprep.subr.bf16.mxu0 %v14451_v10  ;;  %v14468_v22 = vld [vmem:[%s15705_s1 + $0x58] ss:$20 sps:$4 sm:$0xff]   ;;  %v14472_v23 = vld [vmem:[%s15705_s1 + $0x34] ss:$20 sps:$4 sm:$0xff]   ;;  %v14474_v26 = vld [vmem:[%s15705_s1 + $0x30] ss:$20 sps:$4 sm:$0xff]  }
  0x40   :  { %v14475_v25 = vld [vmem:[%s15705_s1 + $0x2c] ss:$20 sps:$4 sm:$0xff]   ;;  %v14477_v28 = vld [vmem:[%s15705_s1 + $0x28] ss:$20 sps:$4 sm:$0xff]   ;;  %v14481_v29 = vld [vmem:[%s15705_s1 + $0x4] ss:$20 sps:$4 sm:$0xff]  }
  0x41   :  { %646 = vmatpush1.bf16.msra.mxu1 %v14450_v9  ;;  %v14478_v27 = vld [vmem:[%s15705_s1 + $0xc] ss:$20 sps:$4 sm:$0xff]   ;;  %v14480_v30 = vld [vmem:[%s15705_s1 + $0x8] ss:$20 sps:$4 sm:$0xff]   ;;  %v14484_v31 = vld [vmem:[%s15705_s1 + $0x264] ss:$20 sps:$4 sm:$0xff]  }
  0x42   :  { %647 = vmatprep.subr.bf16.mxu1 %v14454_v11  ;;  %605 = vmatpush1.bf16.msra.mxu0 %v14453_v12  ;;  %v14483_v32 = vld [vmem:[%s15705_s1] ss:$20 sps:$4 sm:$0xff]   ;;  %v14487_v33 = vld [vmem:[%s15705_s1 + $0x25c] ss:$20 sps:$4 sm:$0xff]   ;;  %v14489_v36 = vld [vmem:[%s15705_s1 + $0x258] ss:$20 sps:$4 sm:$0xff]  }
  0x43   :  { %606 = vmatprep.subr.bf16.mxu0 %v14457_v13  ;;  %v14486_v34 = vld [vmem:[%s15705_s1 + $0x260] ss:$20 sps:$4 sm:$0xff]   ;;  %v14490_v35 = vld [vmem:[%s15705_s1 + $0x23c] ss:$20 sps:$4 sm:$0xff]   ;;  %v14492_v38 = vld [vmem:[%s15705_s1 + $0x238] ss:$20 sps:$4 sm:$0xff]  }
  0x44   :  { %v14493_v37 = vld [vmem:[%s15705_s1 + $0x234] ss:$20 sps:$4 sm:$0xff]   ;;  %v14495_v40 = vld [vmem:[%s15705_s1 + $0x230] ss:$20 sps:$4 sm:$0xff]   ;;  %v14499_v41 = vld [vmem:[%s15705_s1 + $0x20c] ss:$20 sps:$4 sm:$0xff]  }
  0x45   :  { %648 = vmatpush1.bf16.msra.mxu1 %v14456_v14  ;;  %v14496_v39 = vld [vmem:[%s15705_s1 + $0x214] ss:$20 sps:$4 sm:$0xff]   ;;  %v14498_v42 = vld [vmem:[%s15705_s1 + $0x210] ss:$20 sps:$4 sm:$0xff]   ;;  %v14502_v43 = vld [vmem:[%s15705_s1 + $0x1ec] ss:$20 sps:$4 sm:$0xff]  }
  0x46   :  { %649 = vmatprep.subr.bf16.mxu1 %v14460_v15  ;;  %607 = vmatpush1.bf16.msra.mxu0 %v14459_v16  ;;  %v14501_v44 = vld [vmem:[%s15705_s1 + $0x208] ss:$20 sps:$4 sm:$0xff]   ;;  %v14505_v46 = vld [vmem:[%s15705_s1 + $0x1e4] ss:$20 sps:$4 sm:$0xff]   ;;  %v14507_v48 = vld [vmem:[%s15705_s1 + $0x1e0] ss:$20 sps:$4 sm:$0xff]  }
  0x47   :  { %608 = vmatprep.subr.bf16.mxu0 %v14463_v17  ;;  %v14504_v45 = vld [vmem:[%s15705_s1 + $0x1e8] ss:$20 sps:$4 sm:$0xff]   ;;  %v80_v47 = vld [vmem:[%s15704_s0] sm:$0x77]  ;;  %v14513_v53 = vld [vmem:[%s15705_s1 + $0x1b8] ss:$20 sps:$4 sm:$0xff]  }
  0x48   :  { %v12649_v49 = vcombine.high %v80_v47, %v80_v47  ;;  %v14508_v50 = vld [vmem:[%s15705_s1 + $0x1c4] ss:$20 sps:$4 sm:$0xff]   ;;  %v14510_v51 = vld [vmem:[%s15705_s1 + $0x1c0] ss:$20 sps:$4 sm:$0xff]   ;;  %v14511_v52 = vld [vmem:[%s15705_s1 + $0x1bc] ss:$20 sps:$4 sm:$0xff]   ;;  %v12648_v3 = vcombine.low %v80_v47, %v80_v47 }
  0x49   :  { %650 = vmatpush1.bf16.msra.mxu1 %v14462_v18  ;;  %v14514_v54 = vld [vmem:[%s15705_s1 + $0x19c] ss:$20 sps:$4 sm:$0xff]   ;;  %v14516_v55 = vld [vmem:[%s15705_s1 + $0x198] ss:$20 sps:$4 sm:$0xff]   ;;  %v14517_v56 = vld [vmem:[%s15705_s1 + $0x194] ss:$20 sps:$4 sm:$0xff]  }
  0x4a   :  { %651 = vmatprep.subr.bf16.mxu1 %v14466_v19  ;;  %609 = vmatpush1.bf16.msra.mxu0 %v14465_v20  ;;  %v14519_v57 = vld [vmem:[%s15705_s1 + $0x190] ss:$20 sps:$4 sm:$0xff]   ;;  %v14520_v58 = vld [vmem:[%s15705_s1 + $0x174] ss:$20 sps:$4 sm:$0xff]   ;;  %v14523_v60 = vld [vmem:[%s15705_s1 + $0x16c] ss:$20 sps:$4 sm:$0xff]  }
  0x4b   :  { %610 = vmatprep.subr.bf16.mxu0 %v14469_v21  ;;  %673 = vmatprep.mubr.bf16.mxu1 %v12649_v49  ;;  %v14522_v59 = vld [vmem:[%s15705_s1 + $0x170] ss:$20 sps:$4 sm:$0xff]   ;;  %v14525_v61 = vld [vmem:[%s15705_s1 + $0x168] ss:$20 sps:$4 sm:$0xff]   ;;  %v14526_v62 = vld [vmem:[%s15705_s1 + $0x14c] ss:$20 sps:$4 sm:$0xff]  }
  0x4c   :  { %632 = vmatprep.mubr.bf16.mxu0 %v12649_v49  ;;  %v14528_v63 = vld [vmem:[%s15705_s1 + $0x148] ss:$20 sps:$4 sm:$0xff]   ;;  %v14529_v0 = vld [vmem:[%s15705_s1 + $0x144] ss:$20 sps:$4 sm:$0xff]   ;;  %v14531_v1 = vld [vmem:[%s15705_s1 + $0x140] ss:$20 sps:$4 sm:$0xff]  }
  0x4d   :  { %652 = vmatpush1.bf16.msra.mxu1 %v14468_v22  ;;  %v14534_v2 = vld [vmem:[%s15705_s1 + $0x268] ss:$20 sps:$4 sm:$0xff]   ;;  %v14536_v5 = vld [vmem:[%s15705_s1 + $0x240] ss:$20 sps:$4 sm:$0xff]   ;;  %v14538_v7 = vld [vmem:[%s15705_s1 + $0x218] ss:$20 sps:$4 sm:$0xff]  }
  0x4e   :  { %653 = vmatprep.subr.bf16.mxu1 %v14472_v23  ;;  %611 = vmatpush1.bf16.msra.mxu0 %v14471_v24  ;;  %v14535_v4 = vld [vmem:[%s15705_s1 + $0x128] ss:$20 sps:$4 sm:$0xff]   ;;  %v14537_v6 = vld [vmem:[%s15705_s1 + $0x100] ss:$20 sps:$4 sm:$0xff]   ;;  %v14539_v8 = vld [vmem:[%s15705_s1 + $0xd8] ss:$20 sps:$4 sm:$0xff]  }
  0x4f   :  { %612 = vmatprep.subr.bf16.mxu0 %v14475_v25  ;;  %v14540_v9 = vld [vmem:[%s15705_s1 + $0x1f0] ss:$20 sps:$4 sm:$0xff]   ;;  %v14542_v11 = vld [vmem:[%s15705_s1 + $0x1c8] ss:$20 sps:$4 sm:$0xff]   ;;  %v14544_v13 = vld [vmem:[%s15705_s1 + $0x1a0] ss:$20 sps:$4 sm:$0xff]  }
  0x50   :  { %v14541_v10 = vld [vmem:[%s15705_s1 + $0xb0] ss:$20 sps:$4 sm:$0xff]   ;;  %v14543_v12 = vld [vmem:[%s15705_s1 + $0x88] ss:$20 sps:$4 sm:$0xff]   ;;  %v14545_v14 = vld [vmem:[%s15705_s1 + $0x60] ss:$20 sps:$4 sm:$0xff]  }
  0x51   :  { %654 = vmatpush1.bf16.msra.mxu1 %v14474_v26  ;;  %v14546_v15 = vld [vmem:[%s15705_s1 + $0x178] ss:$20 sps:$4 sm:$0xff]   ;;  %v14548_v17 = vld [vmem:[%s15705_s1 + $0x150] ss:$20 sps:$4 sm:$0xff]   ;;  %vm727_vm0 = vcmask 518144   ;;  %v14841_v21 = vmov 0.0  }
  0x52   :  { %655 = vmatprep.subr.bf16.mxu1 %v14478_v27  ;;  %613 = vmatpush1.bf16.msra.mxu0 %v14477_v28  ;;  %v14547_v16 = vld [vmem:[%s15705_s1 + $0x38] ss:$20 sps:$4 sm:$0xff]   ;;  %v14549_v18 = vld [vmem:[%s15705_s1 + $0x10] ss:$20 sps:$4 sm:$0xff]   ;;  %vm751_vm1 = vcmask 519170   ;;  %s14842_s1 = smov 64  }
  0x53   :  { %614 = vmatprep.subr.bf16.mxu0 %v14481_v29  ;;  %vm753_vm2 = vcmask 516096   ;;  %vm14843_vm3 = vmmov 0   ;;  %vm823_vm4 = vcmask 1042432   ;;  %vm740_vm5 = vcmask 519171   ;;  %s14845_s20 = smov 16   ;;  %s14846_s21 = smov 32  }
  0x54   :  { %vm742_vm6 = vcmask 517120   ;;  %vm759_vm7 = vcmask 519169   ;;  %vm819_vm8 = vcmask 441344   ;;  %vm867_vm9 = vcmask 523264   ;;  %s14847_s22 = smov 48   ;;  %s14848_s4 = smov 96  }
  0x55   :  { %656 = vmatpush1.bf16.msra.mxu1 %v14480_v30  ;;  %vm978_vm10 = vcmask 125952   ;;  %vm1059_vm11 = vcmask 1043456   ;;  %s14849_s23 = smov 112   ;;  %vm1055_vm12 = vcmask 588800   ;;  %vm1104_vm13 = vcmask 130048  }
  0x56   :  { %657 = vmatprep.subr.bf16.mxu1 %v14484_v31  ;;  %615 = vmatpush1.bf16.msra.mxu0 %v14483_v32  ;;  %vm1784_vm14 = vcmask 519168   ;;  %vm2226_vm15 = vcmask 392192  }
  0x57   :  { %616 = vmatprep.subr.bf16.mxu0 %v14487_v33 }
  0x59   :  { %658 = vmatpush2.bf16.msra.mxu1 %v14486_v34 }
  0x5a   :  { %659 = vmatprep.subr.bf16.mxu1 %v14490_v35  ;;  %617 = vmatpush2.bf16.msra.mxu0 %v14489_v36 }
  0x5b   :  { %618 = vmatprep.subr.bf16.mxu0 %v14493_v37 }
  0x5d   :  { %660 = vmatpush2.bf16.msra.mxu1 %v14492_v38 }
  0x5e   :  { %661 = vmatprep.subr.bf16.mxu1 %v14496_v39  ;;  %619 = vmatpush2.bf16.msra.mxu0 %v14495_v40 }
  0x5f   :  { %620 = vmatprep.subr.bf16.mxu0 %v14499_v41 }
  0x61   :  { %662 = vmatpush2.bf16.msra.mxu1 %v14498_v42 }
  0x62   :  { %663 = vmatprep.subr.bf16.mxu1 %v14502_v43  ;;  %621 = vmatpush2.bf16.msra.mxu0 %v14501_v44 }
  0x63   :  { %622 = vmatprep.subr.bf16.mxu0 %v14505_v46 }
  0x65   :  { %664 = vmatpush2.bf16.msra.mxu1 %v14504_v45 }
  0x66   :  { %665 = vmatprep.subr.bf16.mxu1 %v14508_v50  ;;  %623 = vmatpush2.bf16.msra.mxu0 %v14507_v48 }
  0x67   :  { %624 = vmatprep.subr.bf16.mxu0 %v14511_v52 }
  0x69   :  { %666 = vmatpush2.bf16.msra.mxu1 %v14510_v51 }
  0x6a   :  { %667 = vmatprep.subr.bf16.mxu1 %v14514_v54  ;;  %625 = vmatpush2.bf16.msra.mxu0 %v14513_v53 }
  0x6b   :  { %626 = vmatprep.subr.bf16.mxu0 %v14517_v56 }
  0x6d   :  { %668 = vmatpush2.bf16.msra.mxu1 %v14516_v55 }
  0x6e   :  { %669 = vmatprep.subr.bf16.mxu1 %v14520_v58  ;;  %627 = vmatpush2.bf16.msra.mxu0 %v14519_v57 }
  0x6f   :  { %628 = vmatprep.subr.bf16.mxu0 %v14523_v60 }
  0x71   :  { %670 = vmatpush2.bf16.msra.mxu1 %v14522_v59 }
  0x72   :  { %671 = vmatprep.subr.bf16.mxu1 %v14526_v62  ;;  %629 = vmatpush2.bf16.msra.mxu0 %v14525_v61 }
  0x73   :  { %630 = vmatprep.subr.bf16.mxu0 %v14529_v0 }
  0x75   :  { %672 = vmatpush2.bf16.msra.mxu1 %v14528_v63 }
  0x76   :  { %631 = vmatpush2.bf16.msra.mxu0 %v14531_v1  ;;  %14374 = vmatprep.subr.bf16.mxu1 %v14841_v21  ;;  %v790_v1 = vld [vmem:[#allocation9] sm:$0xf] }
  0x77   :  { %14315 = vmatprep.subr.bf16.mxu0 %v14534_v2 }
  0x78   :  { %674 = vmatmul.mubr.bf16.vlgmr.msra.gmra.mxu1 %v12648_v3 }
  0x79   :  { %633 = vmatmul.mubr.bf16.vlgmr.msra.gmra.mxu0 %v12648_v3  ;;  %14382 = vmatprep.mubr.msk.bf16.mxu1 %vm14843_vm3, %v14841_v21 }
  0x7a   :  { %14316 = vmatpush3.bf16.msra.mxu0 %v14535_v4  ;;  %714 = vmatprep.mubr.bf16.mxu0 %v12649_v49 }
  0x7b   :  { %14317 = vmatprep.subr.bf16.mxu0 %v14536_v5 }
  0x7e   :  { %14318 = vmatpush3.bf16.msra.mxu0 %v14537_v6 }
  0x7f   :  { %14319 = vmatprep.subr.bf16.mxu0 %v14538_v7 }
  0x82   :  { %14320 = vmatpush3.bf16.msra.mxu0 %v14539_v8 }
  0x83   :  { %14321 = vmatprep.subr.bf16.mxu0 %v14540_v9 }
  0x86   :  { %14322 = vmatpush3.bf16.msra.mxu0 %v14541_v10 }
  0x87   :  { %14323 = vmatprep.subr.bf16.mxu0 %v14542_v11 }
  0x8a   :  { %14324 = vmatpush3.bf16.msra.mxu0 %v14543_v12  ;;  %v14551_v12 = vld [vmem:[#allocation4 + $0x1e0] ss:$80 sps:$4 sm:$0xff]  }
  0x8b   :  { %14325 = vmatprep.subr.bf16.mxu0 %v14544_v13  ;;  %v14553_v13 = vld [vmem:[#allocation4 + $0x1e4] ss:$80 sps:$4 sm:$0xff]  }
  0x8e   :  { %14326 = vmatpush3.bf16.msra.mxu0 %v14545_v14  ;;  %v14556_v14 = vld [vmem:[#allocation4 + $0x144] ss:$80 sps:$4 sm:$0xff]  }
  0x8f   :  { %14327 = vmatprep.subr.bf16.mxu0 %v14546_v15  ;;  %v14554_v15 = vld [vmem:[#allocation4 + $0x140] ss:$80 sps:$4 sm:$0xff]  }
  0x92   :  { %14328 = vmatpush3.bf16.msra.mxu0 %v14547_v16  ;;  %v14844_v16 = vmov 0  }
  0x93   :  { %14329 = vmatprep.subr.bf16.mxu0 %v14548_v17  ;;  %v14559_v17 = vld [vmem:[#allocation4 + $0xa4] ss:$80 sps:$4 sm:$0xff]  }
  0x96   :  { %14330 = vmatpush3.bf16.msra.mxu0 %v14549_v18  ;;  %v14557_v18 = vld [vmem:[#allocation4 + $0xa0] ss:$80 sps:$4 sm:$0xff]  }
  0x97   :  { %14386 = vmatprep.subr.bf16.mxu0 %v14841_v21 }
  0x99   :  { %715 = vmatmul.mubr.bf16.vlgmr.msra.gmra.mxu0 %v12648_v3 }
  0x9a   :  { %14396 = vmatprep.mubr.msk.bf16.mxu0 %vm14843_vm3, %v14841_v21 }
 0x138   :  { %v675_v19 = vpop.f32.mrf.mxu1 }
 0x139   :  { %v724_v20 = vpack.c.bf16 %v675_v19, %v675_v19  ;;  %v634_v22 = vpop.f32.mrf.mxu0  ;;  %v14562_v19 = vld [vmem:[#allocation4 + $0x4] ss:$80 sps:$4 sm:$0xff]  }
 0x13a   :  { %v677_v23 = vpop.f32.mrf.mxu1  ;;  %v722_v24 = vpack.c.bf16 %v634_v22, %v634_v22 }
 0x13b   :  { %761 = vst.msk [vmem:[#allocation2 + $0x60] sm:$0x7] %vm727_vm0, %v724_v20  ;;  %v14219_v25 = vpack.c.bf16 %v677_v23, %v677_v23  ;;  %v765_v26 = vrot.slane %v724_v20, 5  ;;  %v636_v27 = vpop.f32.mrf.mxu0  ;;  %v14560_v20 = vld [vmem:[#allocation4] ss:$80 sps:$4 sm:$0xff]  }
 0x13c   :  { %v679_v28 = vpop.f32.mrf.mxu1  ;;  %728 = vst.msk [vmem:[#allocation2] sm:$0x7] %vm727_vm0, %v722_v24  ;;  %v732_v29 = vrot.slane %v722_v24, 5  ;;  %v14217_v31 = vpack.c.bf16 %v636_v27, %v636_v27 }
 0x13d   :  { %v778_v30 = vrot.slane %v14219_v25, 6  ;;  %767 = vrot.lane.b32.xlu1 %v765_v26, %s14842_s1  ;;  %v638_v32 = vpop.f32.mrf.mxu0  ;;  %v766_v34 = vrot.slane %v765_v26, 4  ;;  %v784_v41 = vrot.slane %v14219_v25, 7 }
 0x13e   :  { %v680_v33 = vpop.f32.mrf.mxu1  ;;  %v747_v36 = vrot.slane %v14217_v31, 6  ;;  %v755_v37 = vrot.slane %v14217_v31, 7  ;;  %v733_v40 = vrot.slane %v732_v29, 4 }
 0x13f   :  { %v779_v35 = vrot.slane %v778_v30, 4  ;;  %782 = vst.msk [vmem:[#allocation2 + $0x80] sm:$0xc] %vm751_vm1, %v778_v30  ;;  %769 = vrot.lane.b32.xlu0 %v766_v34, %s14842_s1  ;;  %v639_v38 = vpop.f32.mrf.mxu0 }
 0x140   :  { %v748_v39 = vrot.slane %v747_v36, 4  ;;  %752 = vst.msk [vmem:[#allocation2 + $0x20] sm:$0xc] %vm751_vm1, %v747_v36  ;;  %vm12175_vm1 = vsmask.f32 256 }
 0x141   :  { %783 = vst.msk [vmem:[#allocation2 + $0xa0] sm:$0x1] %vm753_vm2, %v779_v35  ;;  %756 = vrot.lane.b32.xlu1 %v755_v37, %s14842_s1 }
 0x142   :  { %754 = vst.msk [vmem:[#allocation2 + $0x40] sm:$0x1] %vm753_vm2, %v748_v39  ;;  %vm12177_vm2 = vcmask 1044484  }
 0x143   :  { %785 = vrot.lane.b32.xlu0 %v784_v41, %s14842_s1 }
 0x145   :  { %736 = vrot.lane.b32.xlu1 %v733_v40, %s14842_s1 }
 0x147   :  { %734 = vrot.lane.b32.xlu0 %v732_v29, %s14842_s1 }
 0x159   :  { %v14331_v42 = vpop.f32.mrf.mxu0 }
 0x15b   :  { %v14332_v43 = vpop.f32.mrf.mxu0 }
 0x15c   :  { %v14333_v44 = vadd.f32 %v14332_v43, %v14331_v42 }
 0x15d   :  { %v14334_v45 = vpop.f32.mrf.mxu0 }
 0x15e   :  { %v726_v46 = vpack.c.bf16 %v14333_v44, %v14333_v44 }
 0x15f   :  { %v14335_v47 = vpop.f32.mrf.mxu0 }
 0x160   :  { %789 = vst.msk [vmem:[#allocation2 + $0xc0] sm:$0x7] %vm727_vm0, %v726_v46  ;;  %vm12174_vm0 = vcmask 1040384  }
 0x167   :  { %v14550_v48 = vld [vmem:[#allocation2 + $0xc0] ss:$0 sps:$4 sm:$0x77]  }
 0x168   :  { %v825_v49 = vsel %vm823_vm4, %v14550_v48, 0  ;;  %vm12176_vm4 = vmand %vm12174_vm0, %vm12175_vm1 }
 0x169   :  { %14375 = vmatpush3.bf16.msra.mxu1 %v825_v49 }
 0x16a   :  { %14376 = vmatprep.subr.bf16.mxu1 %v14841_v21 }
 0x1af   :  { %v768_v50 = vpop.permute.xlu1 %767 }
 0x1b0   :  { %773 = vst.msk [vmem:[#allocation2 + $0x60] sm:$0x8] %vm740_vm5, %v768_v50 }
 0x1b1   :  { %v770_v51 = vpop.permute.xlu0 %769 }
 0x1b2   :  { %774 = vst.msk [vmem:[#allocation2 + $0x80] sm:$0x3] %vm742_vm6, %v770_v51 }
 0x1b3   :  { %v757_v52 = vpop.permute.xlu1 %756 }
 0x1b4   :  { %760 = vst.msk [vmem:[#allocation2 + $0x40] sm:$0xe] %vm759_vm7, %v757_v52 }
 0x1b5   :  { %v786_v53 = vpop.permute.xlu0 %785 }
 0x1b6   :  { %788 = vst.msk [vmem:[#allocation2 + $0xa0] sm:$0xe] %vm759_vm7, %v786_v53  ;;  %vm12430_vm7 = vcmask 1044480  }
 0x1b7   :  { %v737_v54 = vpop.permute.xlu1 %736  ;;  %v794_v60 = vld [vmem:[#allocation2 + $0x60] sm:$0xf] }
 0x1b8   :  { %743 = vst.msk [vmem:[#allocation2 + $0x20] sm:$0x3] %vm742_vm6, %v737_v54 }
 0x1b9   :  { %v735_v55 = vpop.permute.xlu0 %734  ;;  %v795_v56 = vld [vmem:[#allocation2 + $0x80] sm:$0xf] }
 0x1ba   :  { %741 = vst.msk [vmem:[#allocation2] sm:$0x8] %vm740_vm5, %v735_v55 }
 0x1bb   :  { %v793_v59 = vld [vmem:[#allocation2 + $0x40] sm:$0xf] }
 0x1bc   :  { %v12735_v61 = vcombine.low %v793_v59, %v794_v60 }
 0x1bd   :  { %v796_v57 = vld [vmem:[#allocation2 + $0xa0] sm:$0xf] }
 0x1be   :  { %v12736_v58 = vcombine.low %v795_v56, %v796_v57  ;;  %v14564_v56 = vld [vmem:[#allocation9 + $0x4] ss:$44 sps:$4 sm:$0xff]  }
 0x1bf   :  { %v792_v63 = vld [vmem:[#allocation2 + $0x20] sm:$0xf] }
 0x1c0   :  { %14377 = vmatpush3.bf16.msra.mxu1 %v12736_v58 }
 0x1c1   :  { %14378 = vmatprep.subr.bf16.mxu1 %v14841_v21  ;;  %v791_v62 = vld [vmem:[#allocation2] sm:$0xf] }
 0x1c2   :  { %v12734_v0 = vcombine.low %v791_v62, %v792_v63 }
 0x1c4   :  { %14379 = vmatpush3.bf16.msra.mxu1 %v12735_v61 }
 0x1c5   :  { %14380 = vmatprep.subr.bf16.mxu1 %v14841_v21 }
 0x1c8   :  { %14381 = vmatpush3.bf16.msra.mxu1 %v12734_v0 }
 0x1c9   :  { %943 = vmatprep.subr.bf16.mxu1 %v14553_v13 }
 0x1cb   :  { %14383 = vmatmul.mubr.msk.bf16.vlgmr.msra.gmra.mxu1 %vm819_vm8, %v790_v1  ;;  %vm12426_vm8 = vcmask 596992  }
 0x1cc   :  { %944 = vmatpush1.bf16.msra.mxu1 %v14551_v12  ;;  %967 = vmatprep.mubr.bf16.mxu1 %v14844_v16  ;;  %v14570_v12 = vld [vmem:[#allocation6 + $0xc] ss:$28 sps:$4 sm:$0xff]  }
 0x1cd   :  { %945 = vmatprep.subr.bf16.mxu1 %v14556_v14 }
 0x1d0   :  { %946 = vmatpush1.bf16.msra.mxu1 %v14554_v15 }
 0x1d1   :  { %947 = vmatprep.subr.bf16.mxu1 %v14559_v17 }
 0x1d4   :  { %948 = vmatpush1.bf16.msra.mxu1 %v14557_v18 }
 0x1d5   :  { %949 = vmatprep.subr.bf16.mxu1 %v14562_v19 }
 0x1d8   :  { %950 = vmatpush1.bf16.msra.mxu1 %v14560_v20 }
 0x28b   :  { %v861_v2 = vpop.f32.mrf.mxu1 }
 0x28c   :  { %v868_v3 = vsel %vm867_vm9, %v861_v2, 0.0 }
 0x28d   :  { %869 = vadd.xlane.f32.xlu0 %v868_v3  ;;  %v14384_v4 = vpop.f32.mrf.mxu1 }
 0x28f   :  { %v864_v5 = vpop.f32.mrf.mxu1 }
 0x291   :  { %v14385_v6 = vpop.f32.mrf.mxu1 }
 0x316   :  { %v870_v7 = vpop.xlane.xlu0 %869 }
 0x317   :  { %v872_v8 = vmul.f32 0.015625, %v870_v7 }
 0x319   :  { %v873_v9 = vsub.f32 %v861_v2, %v872_v8 }
 0x31b   :  { %v874_v10 = vmul.f32 %v873_v9, %v873_v9 }
 0x31d   :  { %v875_v11 = vsel %vm867_vm9, %v874_v10, 0.0  ;;  %v14567_v10 = vld [vmem:[#allocation6 + $0x4] ss:$28 sps:$4 sm:$0xff]  }
 0x31e   :  { %876 = vadd.xlane.f32.xlu1 %v875_v11  ;;  %1164 = vmatprep.subr.bf16.mxu1 %v14567_v10  ;;  %v14568_v11 = vld [vmem:[#allocation6 + $0x8] ss:$28 sps:$4 sm:$0xff]  }
 0x3a7   :  { %v877_v22 = vpop.xlane.xlu1 %876 }
 0x3a8   :  { %v878_v23 = vmul.f32 0.015625, %v877_v22 }
 0x3aa   :  { %v879_v24 = vadd.f32 1e-05, %v878_v23 }
 0x3ac   :  { %14699 = vrsqrt.f32 %v879_v24 }
 0x3b9   :  { %v14700_v25 = vpop.eup %14699 }
 0x3ba   :  { %v881_v26 = vmul.f32 %v14700_v25, %v873_v9  ;;  %v14565_v9 = vld [vmem:[#allocation6] ss:$28 sps:$4 sm:$0xff]  }
 0x3bc   :  { %v882_v27 = vmax.f32 %v881_v26, 0.0 }
 0x3be   :  { %v15167_v28 = vpack.c.bf16 %v882_v27, %v882_v27 }
 0x3c0   :  { %12747 = vmatmul.mubr.msk.bf16.vlgmr.msra.gmra.mxu1 %vm867_vm9, %v15167_v28 }
 0x3c1   :  { %1182 = vmatprep.mubr.bf16.mxu1 %v14844_v16  ;;  %1165 = vmatpush1.bf16.msra.mxu1 %v14565_v9 }
 0x3c2   :  { %1369 = vmatprep.subr.bf16.mxu1 %v14844_v16 }
 0x480   :  { %v969_v29 = vpop.f32.mrf.mxu1 }
 0x481   :  { %v976_v30 = vpack.c.bf16 %v969_v29, %v969_v29 }
 0x482   :  { %v971_v31 = vpop.f32.mrf.mxu1 }
 0x483   :  { %979 = vst.msk [vmem:[#allocation2] sm:$0xf] %vm978_vm10, %v976_v30  ;;  %v977_v32 = vpack.c.bf16 %v971_v31, %v971_v31  ;;  %1007 = vrot.lane.b32.xlu1 %v976_v30, %s14845_s20  ;;  %1003 = vrot.lane.b32.xlu0 %v976_v30, %s14846_s21 }
 0x484   :  { %v973_v33 = vpop.f32.mrf.mxu1 }
 0x485   :  { %1011 = vst.msk [vmem:[#allocation2 + $0x100] sm:$0xf] %vm978_vm10, %v977_v32 }
 0x486   :  { %v974_v34 = vpop.f32.mrf.mxu1 }
 0x487   :  { %999 = vrot.lane.b32.xlu1 %v976_v30, %s14847_s22  ;;  %995 = vrot.lane.b32.xlu0 %v976_v30, %s14842_s1 }
 0x48a   :  { %v1014_v53 = vld [vmem:[#allocation2] sm:$0xf] }
 0x48b   :  { %991 = vrot.lane.b32.xlu1 %v976_v30, %s14834_s8  ;;  %987 = vrot.lane.b32.xlu0 %v976_v30, %s14848_s4 }
 0x48c   :  { %v14563_v35 = vld [vmem:[#allocation2 + $0x100] ss:$0 sps:$4 sm:$0xff]  }
 0x48d   :  { %v1061_v36 = vsel %vm1059_vm11, %v14563_v35, 0 }
 0x48e   :  { %14387 = vmatpush3.bf16.msra.mxu0 %v1061_v36 }
 0x48f   :  { %983 = vrot.lane.b32.xlu0 %v976_v30, %s14849_s23  ;;  %14388 = vmatprep.subr.bf16.mxu0 %v14841_v21 }
 0x4f5   :  { %v1008_v37 = vpop.permute.xlu1 %1007  ;;  %v1004_v38 = vpop.permute.xlu0 %1003 }
 0x4f6   :  { %1010 = vst.msk [vmem:[#allocation2 + $0xe0] sm:$0xf] %vm978_vm10, %v1008_v37  ;;  %1006 = vst.msk [vmem:[#allocation2 + $0xc0] sm:$0xf] %vm978_vm10, %v1004_v38 }
 0x4f9   :  { %v1000_v39 = vpop.permute.xlu1 %999  ;;  %v996_v40 = vpop.permute.xlu0 %995 }
 0x4fa   :  { %1002 = vst.msk [vmem:[#allocation2 + $0xa0] sm:$0xf] %vm978_vm10, %v1000_v39  ;;  %998 = vst.msk [vmem:[#allocation2 + $0x80] sm:$0xf] %vm978_vm10, %v996_v40 }
 0x4fd   :  { %v992_v41 = vpop.permute.xlu1 %991  ;;  %v988_v42 = vpop.permute.xlu0 %987  ;;  %v1020_v43 = vld [vmem:[#allocation2 + $0xc0] sm:$0xf] }
 0x4fe   :  { %v1021_v44 = vld [vmem:[#allocation2 + $0xe0] sm:$0xf]  ;;  %994 = vst.msk [vmem:[#allocation2 + $0x60] sm:$0xf] %vm978_vm10, %v992_v41  ;;  %990 = vst.msk [vmem:[#allocation2 + $0x40] sm:$0xf] %vm978_vm10, %v988_v42 }
 0x4ff   :  { %v12753_v45 = vcombine.low %v1020_v43, %v1021_v44 }
 0x501   :  { %14389 = vmatpush3.bf16.msra.mxu0 %v12753_v45  ;;  %v984_v46 = vpop.permute.xlu0 %983  ;;  %v1018_v47 = vld [vmem:[#allocation2 + $0x80] sm:$0xf] }
 0x502   :  { %14390 = vmatprep.subr.bf16.mxu0 %v14841_v21  ;;  %v1019_v48 = vld [vmem:[#allocation2 + $0xa0] sm:$0xf]  ;;  %986 = vst.msk [vmem:[#allocation2 + $0x20] sm:$0xf] %vm978_vm10, %v984_v46  ;;  %v14572_v46 = vld [vmem:[#allocation9 + $0xc] ss:$44 sps:$4 sm:$0xff]  }
 0x503   :  { %v12752_v49 = vcombine.low %v1018_v47, %v1019_v48 }
 0x505   :  { %14391 = vmatpush3.bf16.msra.mxu0 %v12752_v49  ;;  %v1016_v50 = vld [vmem:[#allocation2 + $0x40] sm:$0xf] }
 0x506   :  { %14392 = vmatprep.subr.bf16.mxu0 %v14841_v21  ;;  %v1017_v51 = vld [vmem:[#allocation2 + $0x60] sm:$0xf] }
 0x507   :  { %v12751_v52 = vcombine.low %v1016_v50, %v1017_v51 }
 0x509   :  { %14393 = vmatpush3.bf16.msra.mxu0 %v12751_v52  ;;  %v1015_v54 = vld [vmem:[#allocation2 + $0x20] sm:$0xf] }
 0x50a   :  { %14394 = vmatprep.subr.bf16.mxu0 %v14841_v21  ;;  %v12750_v55 = vcombine.low %v1014_v53, %v1015_v54 }
 0x50d   :  { %14395 = vmatpush3.bf16.msra.mxu0 %v12750_v55 }
 0x50e   :  { %1579 = vmatprep.subr.bf16.mxu0 %v14570_v12 }
 0x510   :  { %14397 = vmatmul.mubr.msk.bf16.vlgmr.msra.gmra.mxu0 %vm1055_vm12, %v14564_v56 }
 0x511   :  { %1597 = vmatprep.mubr.bf16.mxu0 %v14844_v16  ;;  %1580 = vmatpush1.bf16.msra.mxu0 %v14568_v11 }
 0x5d0   :  { %v1097_v57 = vpop.f32.mrf.mxu0 }
 0x5d1   :  { %v1105_v58 = vsel %vm1104_vm13, %v1097_v57, 0.0 }
 0x5d2   :  { %1106 = vadd.xlane.f32.xlu1 %v1105_v58  ;;  %v14398_v59 = vpop.f32.mrf.mxu0 }
 0x5d4   :  { %v1100_v60 = vpop.f32.mrf.mxu0 }
 0x5d5   :  { %v1108_v61 = vsel %vm1104_vm13, %v1100_v60, 0.0 }
 0x5d6   :  { %1109 = vadd.xlane.f32.xlu0 %v1108_v61  ;;  %v14399_v62 = vpop.f32.mrf.mxu0 }
 0x65b   :  { %v1107_v63 = vpop.xlane.xlu1 %1106 }
 0x65c   :  { %v1112_v0 = vmul.f32 0.0625, %v1107_v63 }
 0x65e   :  { %v1114_v1 = vsub.f32 %v1097_v57, %v1112_v0 }
 0x65f   :  { %v1110_v2 = vpop.xlane.xlu0 %1109 }
 0x660   :  { %v1113_v3 = vmul.f32 0.0625, %v1110_v2  ;;  %v1116_v4 = vmul.f32 %v1114_v1, %v1114_v1 }
 0x662   :  { %v1115_v5 = vsub.f32 %v1100_v60, %v1113_v3  ;;  %v1118_v6 = vsel %vm1104_vm13, %v1116_v4, 0.0 }
 0x663   :  { %1119 = vadd.xlane.f32.xlu0 %v1118_v6 }
 0x664   :  { %v1117_v7 = vmul.f32 %v1115_v5, %v1115_v5 }
 0x666   :  { %v1121_v8 = vsel %vm1104_vm13, %v1117_v7, 0.0 }
 0x667   :  { %1122 = vadd.xlane.f32.xlu1 %v1121_v8 }
 0x6ec   :  { %v1120_v13 = vpop.xlane.xlu0 %1119 }
 0x6ed   :  { %v1124_v14 = vmul.f32 0.0625, %v1120_v13 }
 0x6ef   :  { %v1126_v15 = vadd.f32 1e-05, %v1124_v14 }
 0x6f0   :  { %v1123_v17 = vpop.xlane.xlu1 %1122 }
 0x6f1   :  { %14701 = vrsqrt.f32 %v1126_v15  ;;  %v1125_v18 = vmul.f32 0.0625, %v1123_v17 }
 0x6f3   :  { %v1127_v19 = vadd.f32 1e-05, %v1125_v18 }
 0x6f5   :  { %14703 = vrsqrt.f32 %v1127_v19 }
 0x6fe   :  { %v14702_v20 = vpop.eup %14701 }
 0x6ff   :  { %v1130_v22 = vmul.f32 %v14702_v20, %v1114_v1 }
 0x701   :  { %v1132_v23 = vmax.f32 %v1130_v22, 0.0 }
 0x702   :  { %v14704_v24 = vpop.eup %14703 }
 0x703   :  { %v1131_v25 = vmul.f32 %v14704_v24, %v1115_v5  ;;  %v14225_v26 = vpack.c.bf16 %v1132_v23, %v1132_v23 }
 0x705   :  { %v1133_v27 = vmax.f32 %v1131_v25, 0.0  ;;  %1483 = vst.msk [vmem:[#allocation3] sm:$0xf] %vm978_vm10, %v14225_v26 }
 0x707   :  { %v1134_v29 = vpack.c.bf16 %v1133_v27, %v1132_v23  ;;  %v14226_v30 = vpack.c.bf16 %v1133_v27, %v1133_v27  ;;  %v14574_v27 = vld [vmem:[#allocation9 + $0x8] ss:$44 sps:$4 sm:$0xff]  }
 0x709   :  { %12758 = vmatmul.mubr.msk.bf16.vlgmr.msra.gmra.mxu1 %vm1104_vm13, %v1134_v29  ;;  %1484 = vst.msk [vmem:[#allocation3 + $0x4] sm:$0xf] %vm978_vm10, %v14226_v30  ;;  %v14575_v29 = vld [vmem:[#allocation9 + $0x64] ss:$44 sps:$4 sm:$0xff]   ;;  %v14578_v30 = vld [vmem:[#allocation6 + $0x18] ss:$28 sps:$4 sm:$0xff]  }
 0x70a   :  { %12776 = vmatprep.mubr.msk.bf16.mxu1 %vm1104_vm13, %v14572_v46 }
 0x710   :  { %v15202_v31 = vld [vmem:[#allocation3] sm:$0xff]  }
 0x711   :  { %2325 = vst.msk [vmem:[#allocation3] sm:$0xf] %vm1784_vm14, %v15167_v28  ;;  %12792 = vmatmul.mubr.msk.bf16.vlgmr.msra.gmra.mxu0 %vm1104_vm13, %v15202_v31 }
 0x712   :  { %1607 = vmatprep.mubr.bf16.mxu0 %v14844_v16 }
 0x7c9   :  { %v1184_v32 = vpop.f32.mrf.mxu1 }
 0x7ca   :  { %v14221_v33 = vpack.c.bf16 %v1184_v32, %v1184_v32  ;;  %v14577_v32 = vld [vmem:[#allocation9 + $0x60] ss:$44 sps:$4 sm:$0xff]  }
 0x7cb   :  { %v1186_v34 = vpop.f32.mrf.mxu1 }
 0x7cc   :  { %1202 = vst.msk [vmem:[#allocation2] sm:$0xf] %vm978_vm10, %v14221_v33  ;;  %v14223_v35 = vpack.c.bf16 %v1186_v34, %v1186_v34  ;;  %1252 = vrot.lane.b32.xlu0 %v14221_v33, %s14845_s20 }
 0x7cd   :  { %v1188_v36 = vpop.f32.mrf.mxu1 }
 0x7ce   :  { %1267 = vst.msk [vmem:[#allocation2 + $0x200] sm:$0xf] %vm978_vm10, %v14223_v35  ;;  %v14222_v37 = vpack.c.bf16 %v1188_v36, %v1188_v36 }
 0x7cf   :  { %v1190_v38 = vpop.f32.mrf.mxu1 }
 0x7d0   :  { %1203 = vst.msk [vmem:[#allocation2 + $0x20] sm:$0xf] %vm978_vm10, %v14222_v37  ;;  %v14224_v28 = vpack.c.bf16 %v1190_v38, %v1190_v38  ;;  %1246 = vrot.lane.b32.xlu0 %v14222_v37, %s14846_s21  ;;  %1254 = vrot.lane.b32.xlu1 %v14222_v37, %s14845_s20 }
 0x7d1   :  { %v1599_v39 = vpop.f32.mrf.mxu0 }
 0x7d2   :  { %1268 = vst.msk [vmem:[#allocation2 + $0x220] sm:$0xf] %vm978_vm10, %v14224_v28  ;;  %v15216_v40 = vpack.c.bf16 %v1599_v39, %v1599_v39 }
 0x7d3   :  { %v15218_v41 = vld [vmem:[#allocation2] sm:$0xf]  ;;  %v1601_v42 = vpop.f32.mrf.mxu0 }
 0x7d4   :  { %1238 = vrot.lane.b32.xlu0 %v14222_v37, %s14847_s22  ;;  %1244 = vrot.lane.b32.xlu1 %v14221_v33, %s14846_s21  ;;  %1785 = vst.msk [vmem:[#allocation2] sm:$0xf] %vm1784_vm14, %v15216_v40  ;;  %v15251_v60 = vpack.c.bf16 %v1601_v42, %v1601_v42 }
 0x7d5   :  { %v1603_v43 = vpop.f32.mrf.mxu0  ;;  %v1289_v25 = vld [vmem:[#allocation2 + $0x200] sm:$0xf] }
 0x7d6   :  { %v15224_v44 = vpack.c.bf16 %v1603_v43, %v1603_v43 }
 0x7d7   :  { %v15226_v45 = vld [vmem:[#allocation2 + $0x20] sm:$0xf]  ;;  %v1605_v50 = vpop.f32.mrf.mxu0 }
 0x7d8   :  { %1230 = vrot.lane.b32.xlu0 %v14222_v37, %s14842_s1  ;;  %1236 = vrot.lane.b32.xlu1 %v14221_v33, %s14847_s22  ;;  %1786 = vst.msk [vmem:[#allocation2 + $0x20] sm:$0xf] %vm1784_vm14, %v15224_v44  ;;  %v15245_v53 = vpack.c.bf16 %v1605_v50, %v1605_v50  ;;  %v12767_v23 = vcombine.low %v15218_v41, %v15226_v45 }
 0x7d9   :  { %v1290_v24 = vld [vmem:[#allocation2 + $0x220] sm:$0xf] }
 0x7da   :  { %v12775_v26 = vcombine.low %v1289_v25, %v1290_v24 }
 0x7dc   :  { %1222 = vrot.lane.b32.xlu0 %v14222_v37, %s14834_s8  ;;  %1228 = vrot.lane.b32.xlu1 %v14221_v33, %s14842_s1 }
 0x7e0   :  { %1214 = vrot.lane.b32.xlu0 %v14222_v37, %s14848_s4  ;;  %1220 = vrot.lane.b32.xlu1 %v14221_v33, %s14834_s8 }
 0x7e4   :  { %1206 = vrot.lane.b32.xlu0 %v14222_v37, %s14849_s23  ;;  %1212 = vrot.lane.b32.xlu1 %v14221_v33, %s14848_s4 }
 0x7e8   :  { %1204 = vrot.lane.b32.xlu1 %v14221_v33, %s14849_s23 }
 0x83e   :  { %v1253_v47 = vpop.permute.xlu0 %1252 }
 0x83f   :  { %1258 = vst.msk [vmem:[#allocation2 + $0x1c0] sm:$0xf] %vm978_vm10, %v1253_v47 }
 0x842   :  { %v1247_v48 = vpop.permute.xlu0 %1246  ;;  %v1255_v49 = vpop.permute.xlu1 %1254 }
 0x843   :  { %1251 = vst.msk [vmem:[#allocation2 + $0x1a0] sm:$0xf] %vm978_vm10, %v1247_v48  ;;  %1259 = vst.msk [vmem:[#allocation2 + $0x1e0] sm:$0xf] %vm978_vm10, %v1255_v49 }
 0x846   :  { %v1239_v51 = vpop.permute.xlu0 %1238  ;;  %v1245_v52 = vpop.permute.xlu1 %1244  ;;  %v1287_v57 = vld [vmem:[#allocation2 + $0x1c0] sm:$0xf] }
 0x847   :  { %1243 = vst.msk [vmem:[#allocation2 + $0x160] sm:$0xf] %vm978_vm10, %v1239_v51  ;;  %1250 = vst.msk [vmem:[#allocation2 + $0x180] sm:$0xf] %vm978_vm10, %v1245_v52 }
 0x84a   :  { %v1286_v54 = vld [vmem:[#allocation2 + $0x1a0] sm:$0xf]  ;;  %v1231_v55 = vpop.permute.xlu0 %1230  ;;  %v1237_v56 = vpop.permute.xlu1 %1236 }
 0x84b   :  { %v1288_v58 = vld [vmem:[#allocation2 + $0x1e0] sm:$0xf]  ;;  %1837 = vst.msk [vmem:[#allocation2 + $0x1a0] sm:$0xf] %vm1784_vm14, %v15245_v53 }
 0x84c   :  { %1235 = vst.msk [vmem:[#allocation2 + $0x120] sm:$0xf] %vm978_vm10, %v1231_v55  ;;  %1242 = vst.msk [vmem:[#allocation2 + $0x140] sm:$0xf] %vm978_vm10, %v1237_v56  ;;  %v12774_v59 = vcombine.low %v1287_v57, %v1288_v58 }
 0x84e   :  { %1370 = vmatpush1.bf16.msra.mxu1 %v12774_v59  ;;  %v1285_v61 = vld [vmem:[#allocation2 + $0x180] sm:$0xf]  ;;  %v1223_v62 = vpop.permute.xlu0 %1222  ;;  %v1229_v63 = vpop.permute.xlu1 %1228 }
 0x84f   :  { %1371 = vmatprep.subr.bf16.mxu1 %v14844_v16  ;;  %1836 = vst.msk [vmem:[#allocation2 + $0x180] sm:$0xf] %vm1784_vm14, %v15251_v60  ;;  %v12773_v0 = vcombine.low %v1285_v61, %v1286_v54  ;;  %v1284_v4 = vld [vmem:[#allocation2 + $0x160] sm:$0xf] }
 0x850   :  { %1227 = vst.msk [vmem:[#allocation2 + $0xe0] sm:$0xf] %vm978_vm10, %v1223_v62  ;;  %1234 = vst.msk [vmem:[#allocation2 + $0x100] sm:$0xf] %vm978_vm10, %v1229_v63 }
 0x852   :  { %1372 = vmatpush1.bf16.msra.mxu1 %v12773_v0  ;;  %v1215_v1 = vpop.permute.xlu0 %1214  ;;  %v1221_v2 = vpop.permute.xlu1 %1220 }
 0x853   :  { %1373 = vmatprep.subr.bf16.mxu1 %v14844_v16  ;;  %v1283_v3 = vld [vmem:[#allocation2 + $0x140] sm:$0xf]  ;;  %1219 = vst.msk [vmem:[#allocation2 + $0xa0] sm:$0xf] %vm978_vm10, %v1215_v1  ;;  %1226 = vst.msk [vmem:[#allocation2 + $0xc0] sm:$0xf] %vm978_vm10, %v1221_v2 }
 0x854   :  { %v12772_v5 = vcombine.low %v1283_v3, %v1284_v4  ;;  %v1282_v9 = vld [vmem:[#allocation2 + $0x120] sm:$0xf] }
 0x856   :  { %1374 = vmatpush1.bf16.msra.mxu1 %v12772_v5  ;;  %v1207_v6 = vpop.permute.xlu0 %1206  ;;  %v1213_v7 = vpop.permute.xlu1 %1212 }
 0x857   :  { %1375 = vmatprep.subr.bf16.mxu1 %v14844_v16  ;;  %v1281_v8 = vld [vmem:[#allocation2 + $0x100] sm:$0xf]  ;;  %1211 = vst.msk [vmem:[#allocation2 + $0x60] sm:$0xf] %vm978_vm10, %v1207_v6  ;;  %1218 = vst.msk [vmem:[#allocation2 + $0x80] sm:$0xf] %vm978_vm10, %v1213_v7 }
 0x858   :  { %v12771_v10 = vcombine.low %v1281_v8, %v1282_v9  ;;  %v1280_v13 = vld [vmem:[#allocation2 + $0xe0] sm:$0xf] }
 0x85a   :  { %1376 = vmatpush1.bf16.msra.mxu1 %v12771_v10  ;;  %v1205_v11 = vpop.permute.xlu1 %1204  ;;  %v1279_v12 = vld [vmem:[#allocation2 + $0xc0] sm:$0xf]  ;;  %v14579_v10 = vld [vmem:[#allocation6 + $0x10] ss:$28 sps:$4 sm:$0xff]  }
 0x85b   :  { %1377 = vmatprep.subr.bf16.mxu1 %v14844_v16  ;;  %1210 = vst.msk [vmem:[#allocation2 + $0x40] sm:$0xf] %vm978_vm10, %v1205_v11  ;;  %v12770_v14 = vcombine.low %v1279_v12, %v1280_v13  ;;  %v1278_v17 = vld [vmem:[#allocation2 + $0xa0] sm:$0xf]  ;;  %v14581_v11 = vld [vmem:[#allocation6 + $0x14] ss:$28 sps:$4 sm:$0xff]  }
 0x85c   :  { %1642 = vmatprep.subr.bf16.mxu0 %v14581_v11 }
 0x85d   :  { %1643 = vmatpush1.bf16.msra.mxu0 %v14579_v10 }
 0x85e   :  { %1378 = vmatpush1.bf16.msra.mxu1 %v12770_v14  ;;  %v1277_v15 = vld [vmem:[#allocation2 + $0x80] sm:$0xf] }
 0x85f   :  { %1379 = vmatprep.subr.bf16.mxu1 %v14844_v16  ;;  %v12769_v18 = vcombine.low %v1277_v15, %v1278_v17  ;;  %v1276_v20 = vld [vmem:[#allocation2 + $0x60] sm:$0xf] }
 0x862   :  { %1380 = vmatpush1.bf16.msra.mxu1 %v12769_v18  ;;  %v1275_v19 = vld [vmem:[#allocation2 + $0x40] sm:$0xf] }
 0x863   :  { %1381 = vmatprep.subr.bf16.mxu1 %v14844_v16  ;;  %v12768_v22 = vcombine.low %v1275_v19, %v1276_v20 }
 0x866   :  { %1382 = vmatpush1.bf16.msra.mxu1 %v12768_v22 }
 0x867   :  { %1383 = vmatprep.subr.bf16.mxu1 %v14844_v16 }
 0x86a   :  { %1384 = vmatpush1.bf16.msra.mxu1 %v12767_v23 }
 0x86b   :  { %1399 = vmatprep.subr.bf16.mxu1 %v14844_v16 }
 0x86e   :  { %1400 = vmatpush2.bf16.msra.mxu1 %v12775_v26 }
 0x86f   :  { %14400 = vmatprep.subr.bf16.mxu1 %v14841_v21 }
 0x871   :  { %1402 = vmatmul.mubr.bf16.vlgmr.msra.gmra.mxu1 %v14574_v27 }
 0x872   :  { %12777 = vmatprep.mubr.msk.bf16.mxu1 %vm1104_vm13, %v14575_v29  ;;  %14401 = vmatpush3.bf16.msra.mxu1 %v14578_v30 }
 0x873   :  { %2270 = vmatprep.subr.bf16.mxu1 %v14844_v16 }
 0x879   :  { %1410 = vmatmul.mubr.bf16.gmra.mxu1 %v14577_v32 }
 0x87a   :  { %14402 = vmatprep.mubr.msk.bf16.mxu1 %vm14843_vm3, %v14841_v21 }
 0x881   :  { %14403 = vmatmul.mubr.msk.bf16.vlgmr.msra.gmra.mxu1 %vm1104_vm13, %v15202_v31 }
 0x882   :  { %14406 = vmatprep.mubr.msk.bf16.mxu1 %vm14843_vm3, %v14841_v21 }
 0x931   :  { %v1403_v33 = vpop.f32.mrf.mxu1 }
 0x932   :  { %v1418_v34 = vsel %vm1104_vm13, %v1403_v33, 0.0 }
 0x933   :  { %1419 = vadd.xlane.f32.xlu1 %v1418_v34  ;;  %v1405_v35 = vpop.f32.mrf.mxu1 }
 0x935   :  { %v1406_v36 = vpop.f32.mrf.mxu1 }
 0x936   :  { %v1421_v37 = vsel %vm1104_vm13, %v1406_v36, 0.0 }
 0x937   :  { %1422 = vadd.xlane.f32.xlu0 %v1421_v37  ;;  %v1408_v38 = vpop.f32.mrf.mxu1 }
 0x939   :  { %v1411_v28 = vpop.f32.mrf.mxu1 }
 0x93a   :  { %v1424_v39 = vsel %vm1104_vm13, %v1411_v28, 0.0 }
 0x93b   :  { %1425 = vadd.xlane.f32.xlu0 %v1424_v39  ;;  %v1413_v41 = vpop.f32.mrf.mxu1 }
 0x93d   :  { %v1414_v42 = vpop.f32.mrf.mxu1 }
 0x93e   :  { %v1427_v43 = vsel %vm1104_vm13, %v1414_v42, 0.0 }
 0x93f   :  { %1428 = vadd.xlane.f32.xlu1 %v1427_v43  ;;  %v1416_v45 = vpop.f32.mrf.mxu1 }
 0x941   :  { %v1725_v46 = vpop.f32.mrf.mxu1 }
 0x942   :  { %v14255_v47 = vpack.c.bf16 %v1725_v46, %v1725_v46 }
 0x943   :  { %v14404_v48 = vpop.f32.mrf.mxu1 }
 0x944   :  { %1989 = vst.msk [vmem:[#allocation2 + $0x600] sm:$0xf] %vm1784_vm14, %v14255_v47 }
 0x945   :  { %v1728_v49 = vpop.f32.mrf.mxu1 }
 0x946   :  { %v14256_v50 = vpack.c.bf16 %v1728_v49, %v1728_v49 }
 0x947   :  { %v14405_v51 = vpop.f32.mrf.mxu1 }
 0x948   :  { %1990 = vst.msk [vmem:[#allocation2 + $0x620] sm:$0xf] %vm1784_vm14, %v14256_v50 }
 0x9bc   :  { %v1420_v52 = vpop.xlane.xlu1 %1419 }
 0x9bd   :  { %v1430_v54 = vmul.f32 0.0625, %v1420_v52 }
 0x9bf   :  { %v1434_v55 = vsub.f32 %v1403_v33, %v1430_v54 }
 0x9c0   :  { %v1423_v56 = vpop.xlane.xlu0 %1422 }
 0x9c1   :  { %v1431_v57 = vmul.f32 0.0625, %v1423_v56  ;;  %v1438_v58 = vmul.f32 %v1434_v55, %v1434_v55 }
 0x9c3   :  { %v1435_v59 = vsub.f32 %v1406_v36, %v1431_v57  ;;  %v1442_v61 = vsel %vm1104_vm13, %v1438_v58, 0.0 }
 0x9c4   :  { %1443 = vadd.xlane.f32.xlu0 %v1442_v61  ;;  %v1426_v62 = vpop.xlane.xlu0 %1425 }
 0x9c5   :  { %v1432_v63 = vmul.f32 0.0625, %v1426_v62  ;;  %v1439_v0 = vmul.f32 %v1435_v59, %v1435_v59 }
 0x9c7   :  { %v1436_v1 = vsub.f32 %v1411_v28, %v1432_v63  ;;  %v1445_v2 = vsel %vm1104_vm13, %v1439_v0, 0.0 }
 0x9c8   :  { %1446 = vadd.xlane.f32.xlu1 %v1445_v2  ;;  %v1429_v3 = vpop.xlane.xlu1 %1428 }
 0x9c9   :  { %v1433_v4 = vmul.f32 0.0625, %v1429_v3  ;;  %v1440_v5 = vmul.f32 %v1436_v1, %v1436_v1 }
 0x9cb   :  { %v1437_v6 = vsub.f32 %v1414_v42, %v1433_v4  ;;  %v1448_v7 = vsel %vm1104_vm13, %v1440_v5, 0.0 }
 0x9cc   :  { %1449 = vadd.xlane.f32.xlu0 %v1448_v7 }
 0x9cd   :  { %v1441_v8 = vmul.f32 %v1437_v6, %v1437_v6 }
 0x9cf   :  { %v1451_v9 = vsel %vm1104_vm13, %v1441_v8, 0.0 }
 0x9d0   :  { %1452 = vadd.xlane.f32.xlu1 %v1451_v9 }
 0xa4d   :  { %v1444_v12 = vpop.xlane.xlu0 %1443 }
 0xa4e   :  { %v1454_v13 = vmul.f32 0.0625, %v1444_v12 }
 0xa50   :  { %v1458_v14 = vadd.f32 1e-05, %v1454_v13 }
 0xa51   :  { %v1447_v15 = vpop.xlane.xlu1 %1446 }
 0xa52   :  { %14705 = vrsqrt.f32 %v1458_v14  ;;  %v1455_v17 = vmul.f32 0.0625, %v1447_v15 }
 0xa54   :  { %v1459_v18 = vadd.f32 1e-05, %v1455_v17 }
 0xa55   :  { %v1450_v19 = vpop.xlane.xlu0 %1449 }
 0xa56   :  { %14707 = vrsqrt.f32 %v1459_v18  ;;  %v1456_v20 = vmul.f32 0.0625, %v1450_v19 }
 0xa58   :  { %v1460_v22 = vadd.f32 1e-05, %v1456_v20 }
 0xa59   :  { %v1453_v23 = vpop.xlane.xlu1 %1452 }
 0xa5a   :  { %14709 = vrsqrt.f32 %v1460_v22  ;;  %v1457_v24 = vmul.f32 0.0625, %v1453_v23 }
 0xa5c   :  { %v1461_v25 = vadd.f32 1e-05, %v1457_v24 }
 0xa5e   :  { %14711 = vrsqrt.f32 %v1461_v25 }
 0xa5f   :  { %v14706_v26 = vpop.eup %14705 }
 0xa60   :  { %v1466_v27 = vmul.f32 %v14706_v26, %v1434_v55 }
 0xa62   :  { %v1470_v29 = vmax.f32 %v1466_v27, 0.0 }
 0xa63   :  { %v14708_v30 = vpop.eup %14707 }
 0xa64   :  { %v14227_v32 = vpack.c.bf16 %v1470_v29, %v1470_v29  ;;  %v1467_v33 = vmul.f32 %v14708_v30, %v1435_v59 }
 0xa66   :  { %1499 = vst.msk [vmem:[#allocation3 + $0x8] sm:$0xf] %vm978_vm10, %v14227_v32  ;;  %v1471_v34 = vmax.f32 %v1467_v33, 0.0 }
 0xa67   :  { %v14710_v35 = vpop.eup %14709 }
 0xa68   :  { %v14228_v36 = vpack.c.bf16 %v1471_v34, %v1471_v34  ;;  %v1468_v37 = vmul.f32 %v14710_v35, %v1436_v1 }
 0xa6a   :  { %1500 = vst.msk [vmem:[#allocation3 + $0xc] sm:$0xf] %vm978_vm10, %v14228_v36  ;;  %v1472_v38 = vmax.f32 %v1468_v37, 0.0 }
 0xa6b   :  { %v14712_v28 = vpop.eup %14711 }
 0xa6c   :  { %v14229_v39 = vpack.c.bf16 %v1472_v38, %v1472_v38  ;;  %v1469_v41 = vmul.f32 %v14712_v28, %v1437_v6  ;;  %v15385_v28 = vld [vmem:[#allocation9 + $0x18] sm:$0xff] }
 0xa6e   :  { %1501 = vst.msk [vmem:[#allocation3 + $0x10] sm:$0xf] %vm978_vm10, %v14229_v39  ;;  %v1473_v42 = vmax.f32 %v1469_v41, 0.0  ;;  %v12834_v39 = vcombine.high %v15385_v28, %v15385_v28 }
 0xa70   :  { %v14230_v43 = vpack.c.bf16 %v1473_v42, %v1473_v42 }
 0xa71   :  { %v14582_v45 = vld [vmem:[#allocation3 + $0x8] sm:$0xff]  }
 0xa72   :  { %1502 = vst.msk [vmem:[#allocation3 + $0x14] sm:$0xf] %vm978_vm10, %v14230_v43  ;;  %12793 = vmatmul.mubr.msk.bf16.gmra.mxu0 %vm1104_vm13, %v14582_v45  ;;  %14407 = vmatmul.mubr.msk.bf16.gmra.mxu1 %vm1104_vm13, %v14582_v45 }
 0xa73   :  { %1617 = vmatprep.mubr.bf16.mxu0 %v14844_v16  ;;  %14410 = vmatprep.mubr.msk.bf16.mxu1 %vm14843_vm3, %v14841_v21  ;;  %vm12178_vm3 = vsmask.f32 4352 }
 0xa74   :  { %vm12179_vm5 = vmand %vm12177_vm2, %vm12178_vm3 }
 0xa75   :  { %vm15459_vm6 = vmor %vm12179_vm5, %vm12176_vm4 }
 0xa79   :  { %v14583_v46 = vld [vmem:[#allocation3 + $0x10] sm:$0xff]  }
 0xa7a   :  { %12794 = vmatmul.mubr.msk.bf16.gmra.mxu0 %vm1104_vm13, %v14583_v46  ;;  %14411 = vmatmul.mubr.msk.bf16.gmra.mxu1 %vm1104_vm13, %v14583_v46 }
 0xa7b   :  { %1660 = vmatprep.mubr.bf16.mxu0 %v14844_v16  ;;  %12862 = vmatprep.mubr.msk.bf16.mxu1 %vm2226_vm15, %v12834_v39 }
 0xa82   :  { %12795 = vmatmul.mubr.msk.bf16.vlgmr.msra.gmra.mxu0 %vm1104_vm13, %v15202_v31 }
 0xa83   :  { %1670 = vmatprep.mubr.bf16.mxu0 %v14844_v16 }
 0xa8a   :  { %12796 = vmatmul.mubr.msk.bf16.gmra.mxu0 %vm1104_vm13, %v14582_v45 }
 0xa8b   :  { %1680 = vmatprep.mubr.bf16.mxu0 %v14844_v16 }
 0xa92   :  { %12797 = vmatmul.mubr.msk.bf16.gmra.mxu0 %vm1104_vm13, %v14583_v46 }
 0xb32   :  { %v1609_v47 = vpop.f32.mrf.mxu0  ;;  %v1733_v21 = vpop.f32.mrf.mxu1 }
 0xb33   :  { %v15309_v48 = vpack.c.bf16 %v1609_v47, %v1609_v47  ;;  %v14257_v49 = vpack.c.bf16 %v1733_v21, %v1733_v21 }
 0xb34   :  { %v1611_v50 = vpop.f32.mrf.mxu0  ;;  %v14408_v51 = vpop.f32.mrf.mxu1 }
 0xb35   :  { %1787 = vst.msk [vmem:[#allocation2 + $0x40] sm:$0xf] %vm1784_vm14, %v15309_v48  ;;  %1991 = vst.msk [vmem:[#allocation2 + $0x640] sm:$0xf] %vm1784_vm14, %v14257_v49  ;;  %v15314_v31 = vpack.c.bf16 %v1611_v50, %v1611_v50 }
 0xb36   :  { %v1613_v52 = vpop.f32.mrf.mxu0  ;;  %v1736_v54 = vpop.f32.mrf.mxu1 }
 0xb37   :  { %1838 = vst.msk [vmem:[#allocation2 + $0x1c0] sm:$0xf] %vm1784_vm14, %v15314_v31  ;;  %v15318_v55 = vpack.c.bf16 %v1613_v52, %v1613_v52  ;;  %v14258_v56 = vpack.c.bf16 %v1736_v54, %v1736_v54  ;;  %v2009_v54 = vld [vmem:[#allocation2 + $0x180] sm:$0xf] }
 0xb38   :  { %v1615_v57 = vpop.f32.mrf.mxu0  ;;  %v14409_v58 = vpop.f32.mrf.mxu1 }
 0xb39   :  { %1788 = vst.msk [vmem:[#allocation2 + $0x60] sm:$0xf] %vm1784_vm14, %v15318_v55  ;;  %1992 = vst.msk [vmem:[#allocation2 + $0x660] sm:$0xf] %vm1784_vm14, %v14258_v56  ;;  %v15323_v59 = vpack.c.bf16 %v1615_v57, %v1615_v57  ;;  %v2010_v56 = vld [vmem:[#allocation2 + $0x1a0] sm:$0xf] }
 0xb3a   :  { %v1619_v61 = vpop.f32.mrf.mxu0  ;;  %v1741_v62 = vpop.f32.mrf.mxu1  ;;  %v12841_v58 = vcombine.low %v2009_v54, %v2010_v56 }
 0xb3b   :  { %1839 = vst.msk [vmem:[#allocation2 + $0x1e0] sm:$0xf] %vm1784_vm14, %v15323_v59  ;;  %v15327_v63 = vpack.c.bf16 %v1619_v61, %v1619_v61  ;;  %v14259_v0 = vpack.c.bf16 %v1741_v62, %v1741_v62 }
 0xb3c   :  { %v1621_v1 = vpop.f32.mrf.mxu0  ;;  %v14412_v2 = vpop.f32.mrf.mxu1 }
 0xb3d   :  { %1789 = vst.msk [vmem:[#allocation2 + $0x80] sm:$0xf] %vm1784_vm14, %v15327_v63  ;;  %1993 = vst.msk [vmem:[#allocation2 + $0x680] sm:$0xf] %vm1784_vm14, %v14259_v0  ;;  %v14241_v3 = vpack.c.bf16 %v1621_v1, %v1621_v1 }
 0xb3e   :  { %v1623_v4 = vpop.f32.mrf.mxu0  ;;  %v1744_v5 = vpop.f32.mrf.mxu1  ;;  %v2011_v49 = vld [vmem:[#allocation2 + $0x1c0] sm:$0xf] }
 0xb3f   :  { %1840 = vst.msk [vmem:[#allocation2 + $0x200] sm:$0xf] %vm1784_vm14, %v14241_v3  ;;  %v14236_v6 = vpack.c.bf16 %v1623_v4, %v1623_v4  ;;  %v14260_v7 = vpack.c.bf16 %v1744_v5, %v1744_v5 }
 0xb40   :  { %v1625_v8 = vpop.f32.mrf.mxu0  ;;  %v14413_v9 = vpop.f32.mrf.mxu1 }
 0xb41   :  { %1790 = vst.msk [vmem:[#allocation2 + $0xa0] sm:$0xf] %vm1784_vm14, %v14236_v6  ;;  %1994 = vst.msk [vmem:[#allocation2 + $0x6a0] sm:$0xf] %vm1784_vm14, %v14260_v7  ;;  %v14242_v10 = vpack.c.bf16 %v1625_v8, %v1625_v8 }
 0xb42   :  { %v1662_v11 = vpop.f32.mrf.mxu0  ;;  %v2012_v45 = vld [vmem:[#allocation2 + $0x1e0] sm:$0xf] }
 0xb43   :  { %1841 = vst.msk [vmem:[#allocation2 + $0x220] sm:$0xf] %vm1784_vm14, %v14242_v10  ;;  %v14243_v12 = vpack.c.bf16 %v1662_v11, %v1662_v11  ;;  %v12842_v51 = vcombine.low %v2011_v49, %v2012_v45 }
 0xb44   :  { %v1664_v13 = vpop.f32.mrf.mxu0 }
 0xb45   :  { %1887 = vst.msk [vmem:[#allocation2 + $0x300] sm:$0xf] %vm1784_vm14, %v14243_v12  ;;  %v14249_v14 = vpack.c.bf16 %v1664_v13, %v1664_v13  ;;  %1893 = vrot.lane.b32.xlu1 %v14243_v12, %s14842_s1 }
 0xb46   :  { %v1666_v15 = vpop.f32.mrf.mxu0 }
 0xb47   :  { %1938 = vst.msk [vmem:[#allocation2 + $0x480] sm:$0xf] %vm1784_vm14, %v14249_v14  ;;  %v14244_v17 = vpack.c.bf16 %v1666_v15, %v1666_v15 }
 0xb48   :  { %v1668_v18 = vpop.f32.mrf.mxu0 }
 0xb49   :  { %1888 = vst.msk [vmem:[#allocation2 + $0x320] sm:$0xf] %vm1784_vm14, %v14244_v17  ;;  %v14250_v19 = vpack.c.bf16 %v1668_v18, %v1668_v18  ;;  %1944 = vrot.lane.b32.xlu1 %v14249_v14, %s14842_s1  ;;  %1895 = vrot.lane.b32.xlu0 %v14244_v17, %s14842_s1 }
 0xb4a   :  { %v1672_v20 = vpop.f32.mrf.mxu0 }
 0xb4b   :  { %1939 = vst.msk [vmem:[#allocation2 + $0x4a0] sm:$0xf] %vm1784_vm14, %v14250_v19  ;;  %v14245_v22 = vpack.c.bf16 %v1672_v20, %v1672_v20 }
 0xb4c   :  { %v1674_v23 = vpop.f32.mrf.mxu0  ;;  %v2021_v17 = vld [vmem:[#allocation2 + $0x300] sm:$0xf] }
 0xb4d   :  { %1889 = vst.msk [vmem:[#allocation2 + $0x340] sm:$0xf] %vm1784_vm14, %v14245_v22  ;;  %v14251_v24 = vpack.c.bf16 %v1674_v23, %v1674_v23  ;;  %1946 = vrot.lane.b32.xlu0 %v14250_v19, %s14842_s1 }
 0xb4e   :  { %v1676_v25 = vpop.f32.mrf.mxu0 }
 0xb4f   :  { %1940 = vst.msk [vmem:[#allocation2 + $0x4c0] sm:$0xf] %vm1784_vm14, %v14251_v24  ;;  %v14246_v26 = vpack.c.bf16 %v1676_v25, %v1676_v25  ;;  %1948 = vrot.lane.b32.xlu1 %v14251_v24, %s14842_s1 }
 0xb50   :  { %v1678_v27 = vpop.f32.mrf.mxu0  ;;  %v2022_v8 = vld [vmem:[#allocation2 + $0x320] sm:$0xf] }
 0xb51   :  { %1890 = vst.msk [vmem:[#allocation2 + $0x360] sm:$0xf] %vm1784_vm14, %v14246_v26  ;;  %v14252_v29 = vpack.c.bf16 %v1678_v27, %v1678_v27  ;;  %v12847_v18 = vcombine.low %v2021_v17, %v2022_v8 }
 0xb52   :  { %v1682_v30 = vpop.f32.mrf.mxu0  ;;  %v2034_v45 = vld [vmem:[#allocation2 + $0x4a0] sm:$0xf] }
 0xb53   :  { %1941 = vst.msk [vmem:[#allocation2 + $0x4e0] sm:$0xf] %vm1784_vm14, %v14252_v29  ;;  %v14247_v32 = vpack.c.bf16 %v1682_v30, %v1682_v30  ;;  %1950 = vrot.lane.b32.xlu0 %v14252_v29, %s14842_s1 }
 0xb54   :  { %v1684_v33 = vpop.f32.mrf.mxu0 }
 0xb55   :  { %1891 = vst.msk [vmem:[#allocation2 + $0x380] sm:$0xf] %vm1784_vm14, %v14247_v32  ;;  %v14253_v34 = vpack.c.bf16 %v1684_v33, %v1684_v33 }
 0xb56   :  { %v1686_v35 = vpop.f32.mrf.mxu0 }
 0xb57   :  { %1942 = vst.msk [vmem:[#allocation2 + $0x500] sm:$0xf] %vm1784_vm14, %v14253_v34  ;;  %v14248_v36 = vpack.c.bf16 %v1686_v35, %v1686_v35  ;;  %1952 = vrot.lane.b32.xlu0 %v14253_v34, %s14842_s1 }
 0xb58   :  { %v1688_v37 = vpop.f32.mrf.mxu0 }
 0xb59   :  { %1892 = vst.msk [vmem:[#allocation2 + $0x3a0] sm:$0xf] %vm1784_vm14, %v14248_v36  ;;  %v14254_v38 = vpack.c.bf16 %v1688_v37, %v1688_v37 }
 0xb5b   :  { %1943 = vst.msk [vmem:[#allocation2 + $0x520] sm:$0xf] %vm1784_vm14, %v14254_v38  ;;  %1801 = vrot.lane.b32.xlu0 %v14236_v6, %s14842_s1  ;;  %1954 = vrot.lane.b32.xlu1 %v14254_v38, %s14842_s1  ;;  %v2036_v38 = vld [vmem:[#allocation2 + $0x4e0] sm:$0xf] }
 0xb5e   :  { %v2037_v35 = vld [vmem:[#allocation2 + $0x500] sm:$0xf] }
 0xb5f   :  { %1797 = vrot.lane.b32.xlu0 %v15318_v55, %s14842_s1  ;;  %1799 = vrot.lane.b32.xlu1 %v15327_v63, %s14842_s1  ;;  %v2024_v55 = vld [vmem:[#allocation2 + $0x360] sm:$0xf] }
 0xb60   :  { %v2026_v21 = vld [vmem:[#allocation2 + $0x3a0] sm:$0xf] }
 0xb62   :  { %v2038_v29 = vld [vmem:[#allocation2 + $0x520] sm:$0xf] }
 0xb63   :  { %1852 = vrot.lane.b32.xlu0 %v14242_v10, %s14842_s1  ;;  %1795 = vrot.lane.b32.xlu1 %v15309_v48, %s14842_s1  ;;  %v12855_v37 = vcombine.low %v2037_v35, %v2038_v29 }
 0xb67   :  { %1793 = vrot.lane.b32.xlu0 %v15224_v44, %s14842_s1  ;;  %1850 = vrot.lane.b32.xlu1 %v14241_v3, %s14842_s1  ;;  %v15381_v44 = vld [vmem:[#allocation9 + $0x10] sm:$0xff] }
 0xb6b   :  { %1903 = vrot.lane.b32.xlu0 %v14248_v36, %s14842_s1  ;;  %1791 = vrot.lane.b32.xlu1 %v15216_v40, %s14842_s1  ;;  %v12832_v40 = vcombine.high %v15381_v44, %v15381_v44 }
 0xb6d   :  { %2262 = vmatprep.mubr.bf16.mxu0 %v12832_v40 }
 0xb6f   :  { %1848 = vrot.lane.b32.xlu0 %v15323_v59, %s14842_s1  ;;  %1901 = vrot.lane.b32.xlu1 %v14247_v32, %s14842_s1  ;;  %v2023_v59 = vld [vmem:[#allocation2 + $0x340] sm:$0xf] }
 0xb70   :  { %v12848_v61 = vcombine.low %v2023_v59, %v2024_v55 }
 0xb73   :  { %1899 = vrot.lane.b32.xlu0 %v14246_v26, %s14842_s1  ;;  %1846 = vrot.lane.b32.xlu1 %v15314_v31, %s14842_s1  ;;  %v2025_v31 = vld [vmem:[#allocation2 + $0x380] sm:$0xf] }
 0xb74   :  { %v12849_v52 = vcombine.low %v2025_v31, %v2026_v21  ;;  %v2033_v21 = vld [vmem:[#allocation2 + $0x480] sm:$0xf] }
 0xb77   :  { %1844 = vrot.lane.b32.xlu0 %v15245_v53, %s14842_s1  ;;  %1897 = vrot.lane.b32.xlu1 %v14245_v22, %s14842_s1 }
 0xb7b   :  { %1842 = vrot.lane.b32.xlu1 %v15251_v60, %s14842_s1 }
 0xbb7   :  { %v1894_v41 = vpop.permute.xlu1 %1893 }
 0xbb8   :  { %1911 = vst.msk [vmem:[#allocation2 + $0x3c0] sm:$0xf] %vm1784_vm14, %v1894_v41 }
 0xbbb   :  { %v1945_v53 = vpop.permute.xlu1 %1944  ;;  %v1896_v42 = vpop.permute.xlu0 %1895 }
 0xbbc   :  { %1962 = vst.msk [vmem:[#allocation2 + $0x540] sm:$0xf] %vm1784_vm14, %v1945_v53  ;;  %1912 = vst.msk [vmem:[#allocation2 + $0x3e0] sm:$0xf] %vm1784_vm14, %v1896_v42  ;;  %v2035_v42 = vld [vmem:[#allocation2 + $0x4c0] sm:$0xf] }
 0xbbf   :  { %v1947_v60 = vpop.permute.xlu0 %1946  ;;  %v2027_v46 = vld [vmem:[#allocation2 + $0x3c0] sm:$0xf] }
 0xbc0   :  { %1963 = vst.msk [vmem:[#allocation2 + $0x560] sm:$0xf] %vm1784_vm14, %v1947_v60 }
 0xbc1   :  { %v1949_v43 = vpop.permute.xlu1 %1948 }
 0xbc2   :  { %1964 = vst.msk [vmem:[#allocation2 + $0x580] sm:$0xf] %vm1784_vm14, %v1949_v43  ;;  %v12854_v43 = vcombine.low %v2035_v42, %v2036_v38  ;;  %v14591_v42 = vld [vmem:[#allocation4 + $0x1f8] ss:$80 sps:$4 sm:$0xff]  }
 0xbc3   :  { %v2028_v47 = vld [vmem:[#allocation2 + $0x3e0] sm:$0xf] }
 0xbc4   :  { %v12850_v48 = vcombine.low %v2027_v46, %v2028_v47  ;;  %v2039_v25 = vld [vmem:[#allocation2 + $0x540] sm:$0xf] }
 0xbc5   :  { %v1951_v50 = vpop.permute.xlu0 %1950 }
 0xbc6   :  { %1965 = vst.msk [vmem:[#allocation2 + $0x5a0] sm:$0xf] %vm1784_vm14, %v1951_v50  ;;  %14352 = vmatprep.subr.bf16.mxu0 %v12850_v48  ;;  %v12853_v48 = vcombine.low %v2033_v21, %v2034_v45  ;;  %v2002_v50 = vld [vmem:[#allocation2 + $0xa0] sm:$0xf]  ;;  %v14605_v21 = vld [vmem:[#allocation4 + $0xbc] ss:$80 sps:$4 sm:$0xff]  }
 0xbc7   :  { %14353 = vmatpush3.bf16.msra.mxu0 %v12842_v51  ;;  %v2040_v19 = vld [vmem:[#allocation2 + $0x560] sm:$0xf] }
 0xbc8   :  { %14354 = vmatprep.subr.bf16.mxu0 %v12849_v52  ;;  %v12856_v27 = vcombine.low %v2039_v25, %v2040_v19  ;;  %v12831_v19 = vcombine.low %v15381_v44, %v15381_v44  ;;  %v14594_v45 = vld [vmem:[#allocation4 + $0x148] ss:$80 sps:$4 sm:$0xff]  }
 0xbc9   :  { %v1953_v57 = vpop.permute.xlu0 %1952  ;;  %v2041_v13 = vld [vmem:[#allocation2 + $0x580] sm:$0xf] }
 0xbca   :  { %1966 = vst.msk [vmem:[#allocation2 + $0x5c0] sm:$0xf] %vm1784_vm14, %v1953_v57  ;;  %v2001_v57 = vld [vmem:[#allocation2 + $0x80] sm:$0xf] }
 0xbcb   :  { %14355 = vmatpush3.bf16.msra.mxu0 %v12841_v58  ;;  %v12837_v58 = vcombine.low %v2001_v57, %v2002_v50  ;;  %v14608_v50 = vld [vmem:[#allocation4 + $0xc] ss:$80 sps:$4 sm:$0xff]  }
 0xbcc   :  { %14356 = vmatprep.subr.bf16.mxu0 %v12848_v61 }
 0xbcd   :  { %v1802_v62 = vpop.permute.xlu0 %1801  ;;  %v1955_v63 = vpop.permute.xlu1 %1954  ;;  %v2042_v7 = vld [vmem:[#allocation2 + $0x5a0] sm:$0xf] }
 0xbce   :  { %1814 = vst.msk [vmem:[#allocation2 + $0x160] sm:$0xf] %vm1784_vm14, %v1802_v62  ;;  %1967 = vst.msk [vmem:[#allocation2 + $0x5e0] sm:$0xf] %vm1784_vm14, %v1955_v63  ;;  %v12857_v15 = vcombine.low %v2041_v13, %v2042_v7  ;;  %v2050_v63 = vld [vmem:[#allocation2 + $0x6a0] sm:$0xf] }
 0xbcf   :  { %v1999_v7 = vld [vmem:[#allocation2 + $0x40] sm:$0xf] }
 0xbd0   :  { %v2047_v13 = vld [vmem:[#allocation2 + $0x640] sm:$0xf] }
 0xbd1   :  { %v1798_v0 = vpop.permute.xlu0 %1797  ;;  %v1800_v1 = vpop.permute.xlu1 %1799  ;;  %v2043_v4 = vld [vmem:[#allocation2 + $0x5c0] sm:$0xf] }
 0xbd2   :  { %1812 = vst.msk [vmem:[#allocation2 + $0x120] sm:$0xf] %vm1784_vm14, %v1798_v0  ;;  %1813 = vst.msk [vmem:[#allocation2 + $0x140] sm:$0xf] %vm1784_vm14, %v1800_v1  ;;  %v2049_v0 = vld [vmem:[#allocation2 + $0x680] sm:$0xf] }
 0xbd3   :  { %v2000_v1 = vld [vmem:[#allocation2 + $0x60] sm:$0xf] }
 0xbd4   :  { %v12836_v8 = vcombine.low %v1999_v7, %v2000_v1  ;;  %v14615_v1 = vld [vmem:[#allocation4 + $0x208] ss:$80 sps:$4 sm:$0xff]   ;;  %v14627_v7 = vld [vmem:[#allocation4 + $0xb4] ss:$80 sps:$4 sm:$0xff]  }
 0xbd5   :  { %v1853_v2 = vpop.permute.xlu0 %1852  ;;  %v1796_v3 = vpop.permute.xlu1 %1795  ;;  %v2044_v5 = vld [vmem:[#allocation2 + $0x5e0] sm:$0xf] }
 0xbd6   :  { %1865 = vst.msk [vmem:[#allocation2 + $0x2e0] sm:$0xf] %vm1784_vm14, %v1853_v2  ;;  %1811 = vst.msk [vmem:[#allocation2 + $0x100] sm:$0xf] %vm1784_vm14, %v1796_v3  ;;  %v12858_v6 = vcombine.low %v2043_v4, %v2044_v5  ;;  %v2008_v12 = vld [vmem:[#allocation2 + $0x160] sm:$0xf] }
 0xbd7   :  { %v2014_v4 = vld [vmem:[#allocation2 + $0x220] sm:$0xf] }
 0xbd8   :  { %2271 = vmatpush1.bf16.msra.mxu1 %v12858_v6  ;;  %v12861_v6 = vcombine.low %v2049_v0, %v2050_v63  ;;  %v14612_v0 = vld [vmem:[#allocation4 + $0x1f0] ss:$80 sps:$4 sm:$0xff]  }
 0xbd9   :  { %v1794_v9 = vpop.permute.xlu0 %1793  ;;  %v1851_v10 = vpop.permute.xlu1 %1850  ;;  %2272 = vmatprep.subr.bf16.mxu1 %v14844_v16  ;;  %v2007_v11 = vld [vmem:[#allocation2 + $0x140] sm:$0xf] }
 0xbda   :  { %1810 = vst.msk [vmem:[#allocation2 + $0xe0] sm:$0xf] %vm1784_vm14, %v1794_v9  ;;  %1864 = vst.msk [vmem:[#allocation2 + $0x2c0] sm:$0xf] %vm1784_vm14, %v1851_v10  ;;  %v12840_v14 = vcombine.low %v2007_v11, %v2008_v12  ;;  %v2006_v24 = vld [vmem:[#allocation2 + $0x120] sm:$0xf] }
 0xbdb   :  { %v2013_v9 = vld [vmem:[#allocation2 + $0x200] sm:$0xf] }
 0xbdc   :  { %14357 = vmatpush3.bf16.msra.mxu0 %v12840_v14  ;;  %2273 = vmatpush1.bf16.msra.mxu1 %v12857_v15  ;;  %v2048_v10 = vld [vmem:[#allocation2 + $0x660] sm:$0xf]  ;;  %v12843_v11 = vcombine.low %v2013_v9, %v2014_v4  ;;  %v14624_v4 = vld [vmem:[#allocation4 + $0x16c] ss:$80 sps:$4 sm:$0xff]   ;;  %v14625_v9 = vld [vmem:[#allocation4 + $0xb0] ss:$80 sps:$4 sm:$0xff]  }
 0xbdd   :  { %v1904_v20 = vpop.permute.xlu0 %1903  ;;  %14358 = vmatprep.subr.bf16.mxu0 %v12847_v18  ;;  %v1792_v22 = vpop.permute.xlu1 %1791  ;;  %2274 = vmatprep.subr.bf16.mxu1 %v14844_v16  ;;  %v2005_v23 = vld [vmem:[#allocation2 + $0x100] sm:$0xf]  ;;  %v12860_v14 = vcombine.low %v2047_v13, %v2048_v10  ;;  %v14631_v13 = vld [vmem:[#allocation4 + $0x10] ss:$80 sps:$4 sm:$0xff]  }
 0xbde   :  { %1916 = vst.msk [vmem:[#allocation2 + $0x460] sm:$0xf] %vm1784_vm14, %v1904_v20  ;;  %1809 = vst.msk [vmem:[#allocation2 + $0xc0] sm:$0xf] %vm1784_vm14, %v1792_v22  ;;  %v12839_v26 = vcombine.low %v2005_v23, %v2006_v24  ;;  %v2020_v34 = vld [vmem:[#allocation2 + $0x2e0] sm:$0xf]  ;;  %v12833_v23 = vcombine.low %v15385_v28, %v15385_v28 }
 0xbdf   :  { %v1998_v12 = vld [vmem:[#allocation2 + $0x20] sm:$0xf] }
 0xbe0   :  { %14359 = vmatpush3.bf16.msra.mxu0 %v12839_v26  ;;  %2275 = vmatpush1.bf16.msra.mxu1 %v12856_v27  ;;  %v1997_v15 = vld [vmem:[#allocation2] sm:$0xf] }
 0xbe1   :  { %v1849_v30 = vpop.permute.xlu0 %1848  ;;  %v1902_v32 = vpop.permute.xlu1 %1901  ;;  %2276 = vmatprep.subr.bf16.mxu1 %v14844_v16  ;;  %v2019_v33 = vld [vmem:[#allocation2 + $0x2c0] sm:$0xf]  ;;  %v12835_v17 = vcombine.low %v1997_v15, %v1998_v12  ;;  %v14636_v12 = vld [vmem:[#allocation4 + $0x2c] ss:$80 sps:$4 sm:$0xff]   ;;  %v14639_v15 = vld [vmem:[#allocation4 + $0x204] ss:$80 sps:$4 sm:$0xff]  }
 0xbe2   :  { %1863 = vst.msk [vmem:[#allocation2 + $0x2a0] sm:$0xf] %vm1784_vm14, %v1849_v30  ;;  %1915 = vst.msk [vmem:[#allocation2 + $0x440] sm:$0xf] %vm1784_vm14, %v1902_v32  ;;  %v12846_v36 = vcombine.low %v2019_v33, %v2020_v34  ;;  %v2004_v53 = vld [vmem:[#allocation2 + $0xe0] sm:$0xf] }
 0xbe3   :  { %v2046_v18 = vld [vmem:[#allocation2 + $0x620] sm:$0xf] }
 0xbe4   :  { %14360 = vmatprep.subr.bf16.mxu0 %v12846_v36  ;;  %2277 = vmatpush1.bf16.msra.mxu1 %v12855_v37  ;;  %v2045_v20 = vld [vmem:[#allocation2 + $0x600] sm:$0xf] }
 0xbe5   :  { %v1900_v40 = vpop.permute.xlu0 %1899  ;;  %v1847_v39 = vpop.permute.xlu1 %1846  ;;  %2278 = vmatprep.subr.bf16.mxu1 %v14844_v16  ;;  %v2003_v41 = vld [vmem:[#allocation2 + $0xc0] sm:$0xf]  ;;  %v12859_v22 = vcombine.low %v2045_v20, %v2046_v18  ;;  %v14637_v18 = vld [vmem:[#allocation4 + $0x200] ss:$80 sps:$4 sm:$0xff]   ;;  %v14645_v20 = vld [vmem:[#allocation4 + $0x164] ss:$80 sps:$4 sm:$0xff]  }
 0xbe6   :  { %1914 = vst.msk [vmem:[#allocation2 + $0x420] sm:$0xf] %vm1784_vm14, %v1900_v40  ;;  %1862 = vst.msk [vmem:[#allocation2 + $0x280] sm:$0xf] %vm1784_vm14, %v1847_v39  ;;  %v12838_v60 = vcombine.low %v2003_v41, %v2004_v53  ;;  %v2032_v54 = vld [vmem:[#allocation2 + $0x460] sm:$0xf] }
 0xbe7   :  { %v14590_v39 = vld [vmem:[#allocation4 + $0x1ec] ss:$80 sps:$4 sm:$0xff]   ;;  %v14588_v53 = vld [vmem:[#allocation4 + $0x1e8] ss:$80 sps:$4 sm:$0xff]  }
 0xbe8   :  { %14361 = vmatpush3.bf16.msra.mxu0 %v12838_v60  ;;  %2279 = vmatpush1.bf16.msra.mxu1 %v12854_v43  ;;  %v14593_v41 = vld [vmem:[#allocation4 + $0x1fc] ss:$80 sps:$4 sm:$0xff]   ;;  %v14628_v10 = vld [vmem:[#allocation4 + $0xc8] ss:$80 sps:$4 sm:$0xff]  }
 0xbe9   :  { %v1845_v46 = vpop.permute.xlu0 %1844  ;;  %v1898_v47 = vpop.permute.xlu1 %1897  ;;  %2280 = vmatprep.subr.bf16.mxu1 %v14844_v16  ;;  %v2031_v49 = vld [vmem:[#allocation2 + $0x440] sm:$0xf]  ;;  %v14596_v60 = vld [vmem:[#allocation4 + $0x14c] ss:$80 sps:$4 sm:$0xff]  }
 0xbea   :  { %1861 = vst.msk [vmem:[#allocation2 + $0x260] sm:$0xf] %vm1784_vm14, %v1845_v46  ;;  %1913 = vst.msk [vmem:[#allocation2 + $0x400] sm:$0xf] %vm1784_vm14, %v1898_v47  ;;  %v2018_v52 = vld [vmem:[#allocation2 + $0x2a0] sm:$0xf]  ;;  %v12852_v56 = vcombine.low %v2031_v49, %v2032_v54 }
 0xbeb   :  { %v14599_v43 = vld [vmem:[#allocation4 + $0x15c] ss:$80 sps:$4 sm:$0xff]   ;;  %v14597_v46 = vld [vmem:[#allocation4 + $0x158] ss:$80 sps:$4 sm:$0xff]   ;;  %v14614_v54 = vld [vmem:[#allocation4 + $0x1f4] ss:$80 sps:$4 sm:$0xff]  }
 0xbec   :  { %2281 = vmatpush1.bf16.msra.mxu1 %v12853_v48  ;;  %v14602_v47 = vld [vmem:[#allocation4 + $0xac] ss:$80 sps:$4 sm:$0xff]   ;;  %v14600_v48 = vld [vmem:[#allocation4 + $0xa8] ss:$80 sps:$4 sm:$0xff]  }
 0xbed   :  { %v1843_v51 = vpop.permute.xlu1 %1842  ;;  %2282 = vmatprep.subr.bf16.mxu1 %v14844_v16  ;;  %v2017_v31 = vld [vmem:[#allocation2 + $0x280] sm:$0xf] }
 0xbee   :  { %1860 = vst.msk [vmem:[#allocation2 + $0x240] sm:$0xf] %vm1784_vm14, %v1843_v51  ;;  %v12845_v55 = vcombine.low %v2017_v31, %v2018_v52  ;;  %v2030_v61 = vld [vmem:[#allocation2 + $0x420] sm:$0xf]  ;;  %v14611_v52 = vld [vmem:[#allocation4 + $0x1c] ss:$80 sps:$4 sm:$0xff]  }
 0xbef   :  { %v14603_v49 = vld [vmem:[#allocation4 + $0xb8] ss:$80 sps:$4 sm:$0xff]  }
 0xbf0   :  { %14362 = vmatprep.subr.bf16.mxu0 %v12845_v55  ;;  %2283 = vmatpush1.bf16.msra.mxu1 %v12852_v56  ;;  %v14606_v51 = vld [vmem:[#allocation4 + $0x8] ss:$80 sps:$4 sm:$0xff]   ;;  %v14617_v55 = vld [vmem:[#allocation4 + $0x20c] ss:$80 sps:$4 sm:$0xff]  }
 0xbf1   :  { %14363 = vmatpush3.bf16.msra.mxu0 %v12837_v58  ;;  %2284 = vmatprep.subr.bf16.mxu1 %v14844_v16  ;;  %v2029_v59 = vld [vmem:[#allocation2 + $0x400] sm:$0xf] }
 0xbf2   :  { %v12851_v62 = vcombine.low %v2029_v59, %v2030_v61  ;;  %v2016_v3 = vld [vmem:[#allocation2 + $0x260] sm:$0xf] }
 0xbf3   :  { %v14609_v31 = vld [vmem:[#allocation4 + $0x18] ss:$80 sps:$4 sm:$0xff]  }
 0xbf4   :  { %2285 = vmatpush1.bf16.msra.mxu1 %v12851_v62 }
 0xbf5   :  { %2296 = vmatprep.subr.bf16.mxu1 %v14844_v16  ;;  %v2015_v2 = vld [vmem:[#allocation2 + $0x240] sm:$0xf] }
 0xbf6   :  { %v12844_v5 = vcombine.low %v2015_v2, %v2016_v3  ;;  %v14621_v2 = vld [vmem:[#allocation4 + $0x154] ss:$80 sps:$4 sm:$0xff]  }
 0xbf8   :  { %14364 = vmatprep.subr.bf16.mxu0 %v12844_v5  ;;  %2297 = vmatpush2.bf16.msra.mxu1 %v12861_v6  ;;  %v14619_v5 = vld [vmem:[#allocation4 + $0x150] ss:$80 sps:$4 sm:$0xff]   ;;  %v14622_v6 = vld [vmem:[#allocation4 + $0x168] ss:$80 sps:$4 sm:$0xff]  }
 0xbf9   :  { %14365 = vmatpush3.bf16.msra.mxu0 %v12836_v8  ;;  %2298 = vmatprep.subr.bf16.mxu1 %v14844_v16  ;;  %v14630_v8 = vld [vmem:[#allocation4 + $0xcc] ss:$80 sps:$4 sm:$0xff]  }
 0xbfa   :  { %14366 = vmatprep.subr.bf16.mxu0 %v12843_v11  ;;  %v14633_v11 = vld [vmem:[#allocation4 + $0x14] ss:$80 sps:$4 sm:$0xff]  }
 0xbfc   :  { %2299 = vmatpush2.bf16.msra.mxu1 %v12860_v14  ;;  %v14634_v14 = vld [vmem:[#allocation4 + $0x28] ss:$80 sps:$4 sm:$0xff]  }
 0xbfd   :  { %14367 = vmatpush3.bf16.msra.mxu0 %v12835_v17  ;;  %2300 = vmatprep.subr.bf16.mxu1 %v14844_v16  ;;  %v14642_v17 = vld [vmem:[#allocation4 + $0x21c] ss:$80 sps:$4 sm:$0xff]  }
 0xbfe   :  { %2777 = vmatprep.subr.bf16.mxu0 %v14590_v39  ;;  %v14670_v39 = vld [vmem:[#allocation4 + $0x188] ss:$80 sps:$4 sm:$0xff]  }
 0xc00   :  { %2263 = vmatmul.mubr.bf16.vlgmr.msra.gmra.mxu0 %v12831_v19  ;;  %2301 = vmatpush2.bf16.msra.mxu1 %v12859_v22  ;;  %v14640_v19 = vld [vmem:[#allocation4 + $0x218] ss:$80 sps:$4 sm:$0xff]   ;;  %v14648_v22 = vld [vmem:[#allocation4 + $0x17c] ss:$80 sps:$4 sm:$0xff]  }
 0xc01   :  { %2801 = vmatprep.mubr.bf16.mxu0 %v14844_v16  ;;  %2863 = vmatprep.subr.bf16.mxu1 %v14593_v41  ;;  %v14675_v41 = vld [vmem:[#allocation4 + $0xd4] ss:$80 sps:$4 sm:$0xff]  }
 0xc02   :  { %2778 = vmatpush1.bf16.msra.mxu0 %v14588_v53  ;;  %v14678_v53 = vld [vmem:[#allocation4 + $0xec] ss:$80 sps:$4 sm:$0xff]  }
 0xc03   :  { %2303 = vmatmul.mubr.bf16.vlgmr.msra.gmra.mxu1 %v12833_v23  ;;  %2779 = vmatprep.subr.bf16.mxu0 %v14596_v60  ;;  %v14643_v23 = vld [vmem:[#allocation4 + $0x160] ss:$80 sps:$4 sm:$0xff]   ;;  %v14676_v60 = vld [vmem:[#allocation4 + $0xe8] ss:$80 sps:$4 sm:$0xff]  }
 0xc04   :  { %2887 = vmatprep.mubr.bf16.mxu1 %v14844_v16  ;;  %2864 = vmatpush1.bf16.msra.mxu1 %v14591_v42  ;;  %v14673_v42 = vld [vmem:[#allocation4 + $0xd0] ss:$80 sps:$4 sm:$0xff]  }
 0xc05   :  { %2865 = vmatprep.subr.bf16.mxu1 %v14599_v43  ;;  %v14681_v43 = vld [vmem:[#allocation4 + $0x34] ss:$80 sps:$4 sm:$0xff]  }
 0xc06   :  { %2780 = vmatpush1.bf16.msra.mxu0 %v14594_v45  ;;  %v14684_v45 = vld [vmem:[#allocation4 + $0x4c] ss:$80 sps:$4 sm:$0xff]  }
 0xc07   :  { %2781 = vmatprep.subr.bf16.mxu0 %v14602_v47  ;;  %v14682_v47 = vld [vmem:[#allocation4 + $0x48] ss:$80 sps:$4 sm:$0xff]  }
 0xc08   :  { %2866 = vmatpush1.bf16.msra.mxu1 %v14597_v46  ;;  %v14679_v46 = vld [vmem:[#allocation4 + $0x30] ss:$80 sps:$4 sm:$0xff]  }
 0xc09   :  { %2867 = vmatprep.subr.bf16.mxu1 %v14605_v21  ;;  %v14687_v21 = vld [vmem:[#allocation4 + $0x224] ss:$80 sps:$4 sm:$0xff]  }
 0xc0a   :  { %2782 = vmatpush1.bf16.msra.mxu0 %v14600_v48  ;;  %v14685_v48 = vld [vmem:[#allocation4 + $0x220] ss:$80 sps:$4 sm:$0xff]  }
 0xc0b   :  { %2783 = vmatprep.subr.bf16.mxu0 %v14608_v50  ;;  %v14688_v50 = vld [vmem:[#allocation4 + $0x180] ss:$80 sps:$4 sm:$0xff]  }
 0xc0c   :  { %2868 = vmatpush1.bf16.msra.mxu1 %v14603_v49  ;;  %v14690_v49 = vld [vmem:[#allocation4 + $0x184] ss:$80 sps:$4 sm:$0xff]  }
 0xc0d   :  { %2869 = vmatprep.subr.bf16.mxu1 %v14611_v52  ;;  %v14696_v52 = vld [vmem:[#allocation4 + $0x44] ss:$80 sps:$4 sm:$0xff]  }
 0xc0e   :  { %2784 = vmatpush1.bf16.msra.mxu0 %v14606_v51  ;;  %v14693_v51 = vld [vmem:[#allocation4 + $0xe4] ss:$80 sps:$4 sm:$0xff]  }
 0xc0f   :  { %2820 = vmatprep.subr.bf16.mxu0 %v14614_v54  ;;  %v14694_v54 = vld [vmem:[#allocation4 + $0x40] ss:$80 sps:$4 sm:$0xff]  }
 0xc10   :  { %2870 = vmatpush1.bf16.msra.mxu1 %v14609_v31  ;;  %v14691_v31 = vld [vmem:[#allocation4 + $0xe0] ss:$80 sps:$4 sm:$0xff]  }
 0xc11   :  { %2949 = vmatprep.subr.bf16.mxu1 %v14617_v55 }
 0xcc0   :  { %v14368_v24 = vpop.f32.mrf.mxu0 }
 0xcc2   :  { %v14369_v25 = vpop.f32.mrf.mxu0 }
 0xcc3   :  { %v14370_v26 = vadd.f32 %v14369_v25, %v14368_v24  ;;  %v2304_v27 = vpop.f32.mrf.mxu1  ;;  %v14646_v24 = vld [vmem:[#allocation4 + $0x178] ss:$80 sps:$4 sm:$0xff]   ;;  %v14651_v25 = vld [vmem:[#allocation4 + $0xc4] ss:$80 sps:$4 sm:$0xff]  }
 0xcc4   :  { %v14371_v44 = vpop.f32.mrf.mxu0 }
 0xcc5   :  { %v2305_v29 = vadd.f32 %v14370_v26, %v2304_v27  ;;  %v2306_v30 = vpop.f32.mrf.mxu1  ;;  %v14654_v26 = vld [vmem:[#allocation4 + $0xdc] ss:$80 sps:$4 sm:$0xff]   ;;  %v14649_v27 = vld [vmem:[#allocation4 + $0xc0] ss:$80 sps:$4 sm:$0xff]   ;;  %v14652_v44 = vld [vmem:[#allocation4 + $0xd8] ss:$80 sps:$4 sm:$0xff]  }
 0xcc6   :  { %v14372_v32 = vpop.f32.mrf.mxu0  ;;  %v14660_v30 = vld [vmem:[#allocation4 + $0x3c] ss:$80 sps:$4 sm:$0xff]  }
 0xcc7   :  { %v2307_v33 = vpop.f32.mrf.mxu1  ;;  %v2310_v34 = vsel %vm867_vm9, %v2305_v29, 0.0  ;;  %v14655_v32 = vld [vmem:[#allocation4 + $0x20] ss:$80 sps:$4 sm:$0xff]  }
 0xcc8   :  { %2311 = vadd.xlane.f32.xlu1 %v2310_v34  ;;  %v14658_v33 = vld [vmem:[#allocation4 + $0x38] ss:$80 sps:$4 sm:$0xff]   ;;  %v14663_v34 = vld [vmem:[#allocation4 + $0x214] ss:$80 sps:$4 sm:$0xff]  }
 0xcc9   :  { %v2308_v28 = vpop.f32.mrf.mxu1 }
 0xcca   :  { %v14666_v28 = vld [vmem:[#allocation4 + $0x22c] ss:$80 sps:$4 sm:$0xff]  }
 0xd51   :  { %v2312_v35 = vpop.xlane.xlu1 %2311 }
 0xd52   :  { %v2313_v36 = vmul.f32 0.015625, %v2312_v35  ;;  %v14661_v35 = vld [vmem:[#allocation4 + $0x210] ss:$80 sps:$4 sm:$0xff]  }
 0xd54   :  { %v2314_v37 = vsub.f32 %v2305_v29, %v2313_v36  ;;  %v14657_v29 = vld [vmem:[#allocation4 + $0x24] ss:$80 sps:$4 sm:$0xff]   ;;  %v14664_v36 = vld [vmem:[#allocation4 + $0x228] ss:$80 sps:$4 sm:$0xff]  }
 0xd56   :  { %v2315_v38 = vmul.f32 %v2314_v37, %v2314_v37 }
 0xd58   :  { %v2316_v40 = vsel %vm867_vm9, %v2315_v38, 0.0  ;;  %v14672_v38 = vld [vmem:[#allocation4 + $0x18c] ss:$80 sps:$4 sm:$0xff]  }
 0xd59   :  { %2317 = vadd.xlane.f32.xlu0 %v2316_v40  ;;  %v14667_v40 = vld [vmem:[#allocation4 + $0x170] ss:$80 sps:$4 sm:$0xff]  }
 0xde2   :  { %v2318_v56 = vpop.xlane.xlu0 %2317 }
 0xde3   :  { %v2319_v57 = vmul.f32 0.015625, %v2318_v56  ;;  %v12184_v56 = vld [vmem:[#allocation2 + $0x128] sm:$0x11] }
 0xde5   :  { %v2320_v58 = vadd.f32 1e-05, %v2319_v57  ;;  %v12187_v57 = vld [vmem:[#allocation2 + $0x130] sm:$0x11] }
 0xde7   :  { %14713 = vrsqrt.f32 %v2320_v58  ;;  %v12190_v58 = vld [vmem:[#allocation2 + $0x138] sm:$0x11] }
 0xdf4   :  { %v14714_v59 = vpop.eup %14713 }
 0xdf5   :  { %v2322_v61 = vmul.f32 %v14714_v59, %v2314_v37  ;;  %v14669_v37 = vld [vmem:[#allocation4 + $0x174] ss:$80 sps:$4 sm:$0xff]   ;;  %v12185_v59 = vsel %vm15459_vm6, 1065369472, %v12184_v56 }
 0xdf6   :  { %12186 = vst [vmem:[#allocation2 + $0x128] sm:$0x11] %v12185_v59 }
 0xdf7   :  { %v2323_v62 = vmax.f32 %v2322_v61, 0.0  ;;  %v12188_v61 = vsel %vm15459_vm6, 1065369472, %v12187_v57 }
 0xdf8   :  { %12189 = vst [vmem:[#allocation2 + $0x130] sm:$0x11] %v12188_v61 }
 0xdf9   :  { %v2324_v63 = vpack.c.bf16 %v2323_v62, %v2323_v62  ;;  %v12191_v62 = vsel %vm15459_vm6, 1065369472, %v12190_v58 }
 0xdfa   :  { %12192 = vst [vmem:[#allocation2 + $0x138] sm:$0x11] %v12191_v62 }
 0xdfb   :  { %2326 = vst.msk [vmem:[#allocation3 + $0x4] sm:$0xf] %vm1784_vm14, %v2324_v63  ;;  %v15469_v63 = vld [vmem:[#allocation9 + $0x20] sm:$0xff] }
 0xe02   :  { %v15432_v3 = vld [vmem:[#allocation3] sm:$0xff]  }
 0xe03   :  { %12936 = vmatmul.mubr.msk.bf16.vlgmr.msra.gmra.mxu0 %vm867_vm9, %v15432_v3  ;;  %12938 = vmatmul.mubr.msk.bf16.vlgmr.msra.gmra.mxu1 %vm867_vm9, %v15432_v3 }
 0xe04   :  { %2821 = vmatpush1.bf16.msra.mxu0 %v14612_v0  ;;  %2950 = vmatpush1.bf16.msra.mxu1 %v14615_v1  ;;  %v12964_v0 = vcombine.high %v15469_v63, %v15469_v63 }
 0xe05   :  { %2822 = vmatprep.subr.bf16.mxu0 %v14621_v2  ;;  %2951 = vmatprep.subr.bf16.mxu1 %v14624_v4 }
 0xe06   :  { %2844 = vmatprep.mubr.bf16.mxu0 %v14844_v16  ;;  %2973 = vmatprep.mubr.bf16.mxu1 %v14844_v16 }
 0xe08   :  { %2823 = vmatpush1.bf16.msra.mxu0 %v14619_v5  ;;  %2952 = vmatpush1.bf16.msra.mxu1 %v14622_v6 }
 0xe09   :  { %2824 = vmatprep.subr.bf16.mxu0 %v14627_v7  ;;  %2953 = vmatprep.subr.bf16.mxu1 %v14630_v8 }
 0xe0c   :  { %2825 = vmatpush1.bf16.msra.mxu0 %v14625_v9  ;;  %2954 = vmatpush1.bf16.msra.mxu1 %v14628_v10 }
 0xe0d   :  { %2826 = vmatprep.subr.bf16.mxu0 %v14633_v11  ;;  %2955 = vmatprep.subr.bf16.mxu1 %v14636_v12 }
 0xe10   :  { %2827 = vmatpush1.bf16.msra.mxu0 %v14631_v13  ;;  %2956 = vmatpush1.bf16.msra.mxu1 %v14634_v14 }
 0xe11   :  { %2906 = vmatprep.subr.bf16.mxu0 %v14639_v15  ;;  %3035 = vmatprep.subr.bf16.mxu1 %v14642_v17 }
 0xe13   :  { %12937 = vmatmul.mubr.msk.bf16.vlgmr.msra.gmra.mxu0 %vm867_vm9, %v15432_v3  ;;  %12940 = vmatmul.mubr.msk.bf16.vlgmr.msra.gmra.mxu1 %vm867_vm9, %v15432_v3 }
 0xe14   :  { %2907 = vmatpush1.bf16.msra.mxu0 %v14637_v18  ;;  %3036 = vmatpush1.bf16.msra.mxu1 %v14640_v19 }
 0xe15   :  { %2908 = vmatprep.subr.bf16.mxu0 %v14645_v20  ;;  %3037 = vmatprep.subr.bf16.mxu1 %v14648_v22 }
 0xe16   :  { %2930 = vmatprep.mubr.bf16.mxu0 %v14844_v16  ;;  %3059 = vmatprep.mubr.bf16.mxu1 %v14844_v16 }
 0xe18   :  { %2909 = vmatpush1.bf16.msra.mxu0 %v14643_v23  ;;  %3038 = vmatpush1.bf16.msra.mxu1 %v14646_v24 }
 0xe19   :  { %2910 = vmatprep.subr.bf16.mxu0 %v14651_v25  ;;  %3039 = vmatprep.subr.bf16.mxu1 %v14654_v26 }
 0xe1c   :  { %2911 = vmatpush1.bf16.msra.mxu0 %v14649_v27  ;;  %3040 = vmatpush1.bf16.msra.mxu1 %v14652_v44 }
 0xe1d   :  { %2912 = vmatprep.subr.bf16.mxu0 %v14657_v29  ;;  %3041 = vmatprep.subr.bf16.mxu1 %v14660_v30 }
 0xe20   :  { %2913 = vmatpush1.bf16.msra.mxu0 %v14655_v32  ;;  %3042 = vmatpush1.bf16.msra.mxu1 %v14658_v33 }
 0xe21   :  { %2992 = vmatprep.subr.bf16.mxu0 %v14663_v34  ;;  %3121 = vmatprep.subr.bf16.mxu1 %v14666_v28 }
 0xe23   :  { %12939 = vmatmul.mubr.msk.bf16.vlgmr.msra.gmra.mxu0 %vm867_vm9, %v15432_v3  ;;  %12942 = vmatmul.mubr.msk.bf16.vlgmr.msra.gmra.mxu1 %vm867_vm9, %v15432_v3 }
 0xe24   :  { %2993 = vmatpush1.bf16.msra.mxu0 %v14661_v35  ;;  %3122 = vmatpush1.bf16.msra.mxu1 %v14664_v36 }
 0xe25   :  { %2994 = vmatprep.subr.bf16.mxu0 %v14669_v37  ;;  %3123 = vmatprep.subr.bf16.mxu1 %v14672_v38 }
 0xe26   :  { %3016 = vmatprep.mubr.bf16.mxu0 %v14844_v16  ;;  %3145 = vmatprep.mubr.bf16.mxu1 %v14844_v16 }
 0xe28   :  { %2995 = vmatpush1.bf16.msra.mxu0 %v14667_v40  ;;  %3124 = vmatpush1.bf16.msra.mxu1 %v14670_v39 }
 0xe29   :  { %2996 = vmatprep.subr.bf16.mxu0 %v14675_v41  ;;  %3125 = vmatprep.subr.bf16.mxu1 %v14678_v53 }
 0xe2c   :  { %2997 = vmatpush1.bf16.msra.mxu0 %v14673_v42  ;;  %3126 = vmatpush1.bf16.msra.mxu1 %v14676_v60 }
 0xe2d   :  { %2998 = vmatprep.subr.bf16.mxu0 %v14681_v43  ;;  %3127 = vmatprep.subr.bf16.mxu1 %v14684_v45 }
 0xe30   :  { %2999 = vmatpush1.bf16.msra.mxu0 %v14679_v46  ;;  %3128 = vmatpush1.bf16.msra.mxu1 %v14682_v47 }
 0xe31   :  { %3078 = vmatprep.subr.bf16.mxu0 %v14687_v21 }
 0xe33   :  { %12941 = vmatmul.mubr.msk.bf16.vlgmr.msra.gmra.mxu0 %vm867_vm9, %v15432_v3  ;;  %12944 = vmatmul.mubr.msk.bf16.vlgmr.msra.gmra.mxu1 %vm867_vm9, %v15432_v3 }
 0xe34   :  { %3079 = vmatpush1.bf16.msra.mxu0 %v14685_v48  ;;  %3102 = vmatprep.mubr.bf16.mxu0 %v14844_v16 }
 0xe35   :  { %3080 = vmatprep.subr.bf16.mxu0 %v14690_v49 }
 0xe38   :  { %3081 = vmatpush1.bf16.msra.mxu0 %v14688_v50 }
 0xe39   :  { %3082 = vmatprep.subr.bf16.mxu0 %v14693_v51 }
 0xe3c   :  { %3083 = vmatpush1.bf16.msra.mxu0 %v14691_v31 }
 0xe3d   :  { %3084 = vmatprep.subr.bf16.mxu0 %v14696_v52 }
 0xe40   :  { %3085 = vmatpush1.bf16.msra.mxu0 %v14694_v54 }
 0xe43   :  { %12943 = vmatmul.mubr.msk.bf16.vlgmr.msra.gmra.mxu0 %vm867_vm9, %v15432_v3 }
 0xe44   :  { %12983 = vmatprep.mubr.msk.bf16.mxu0 %vm1104_vm13, %v12964_v0 }
 0xec3   :  { %v15474_v1 = vpop.f32.mrf.mxu0  ;;  %v15476_v2 = vpop.f32.mrf.mxu1 }
 0xec5   :  { %v15478_v3 = vpop.f32.mrf.mxu0  ;;  %v15480_v4 = vpop.f32.mrf.mxu1 }
 0xec7   :  { %v15482_v5 = vpop.f32.mrf.mxu0  ;;  %v15484_v6 = vpop.f32.mrf.mxu1 }
 0xec8   :  { %v14718_v10 = vpack.c.bf16 %v15484_v6, %v15476_v2  ;;  %v14720_v12 = vpack.c.bf16 %v15482_v5, %v15474_v1  ;;  %v12963_v2 = vcombine.low %v15469_v63, %v15469_v63  ;;  %v4002_v1 = vld [vmem:[#allocation8 + $0x10e0] sm:$0xff]  ;;  %v3967_v5 = vld [vmem:[#allocation8 + $0xfc8] sm:$0xff] }
 0xec9   :  { %v15486_v7 = vpop.f32.mrf.mxu0  ;;  %v15488_v8 = vpop.f32.mrf.mxu1  ;;  %v3930_v63 = vld [vmem:[#allocation8 + $0xea0] sm:$0xff] }
 0xeca   :  { %v14717_v9 = vpack.c.bf16 %v15488_v8, %v15480_v4  ;;  %v14719_v11 = vpack.c.bf16 %v15486_v7, %v15478_v3 }
 0xed3   :  { %v15498_v13 = vpop.f32.mrf.mxu1  ;;  %v15500_v15 = vpop.f32.mrf.mxu0 }
 0xed5   :  { %v2977_v14 = vpop.f32.mrf.mxu1  ;;  %v15502_v20 = vpop.f32.mrf.mxu0 }
 0xed7   :  { %v2979_v17 = vpop.f32.mrf.mxu1  ;;  %v15504_v22 = vpop.f32.mrf.mxu0 }
 0xed8   :  { %v14728_v59 = vpack.c.bf16 %v2979_v17, %v15498_v13  ;;  %v14732_v13 = vpack.c.bf16 %v15504_v22, %v15500_v15  ;;  %v4003_v15 = vld [vmem:[#allocation8 + $0x10e8] sm:$0xff] }
 0xed9   :  { %v2981_v18 = vpop.f32.mrf.mxu1  ;;  %v15506_v23 = vpop.f32.mrf.mxu0  ;;  %v3895_v22 = vld [vmem:[#allocation8 + $0xd88] sm:$0xff] }
 0xeda   :  { %v14270_v19 = vpack.c.bf16 %v2981_v18, %v2979_v17  ;;  %v14727_v58 = vpack.c.bf16 %v2981_v18, %v2977_v14  ;;  %v14731_v0 = vpack.c.bf16 %v15506_v23, %v15502_v20  ;;  %v3894_v17 = vld [vmem:[#allocation8 + $0xd80] sm:$0xff]  ;;  %v13490_v18 = vcombine.low %v3967_v5, %v4003_v15  ;;  %v3931_v23 = vld [vmem:[#allocation8 + $0xea8] sm:$0xff] }
 0xedb   :  { %v13417_v20 = vcombine.high %v3894_v17, %v3930_v63 }
 0xedc   :  { %3233 = vst [vmem:[#allocation2 + $0x120] sm:$0xff] %v14270_v19  ;;  %v13491_v19 = vcombine.high %v3967_v5, %v4003_v15  ;;  %v4578_v5 = vld [vmem:[#allocation8 + $0x22e0] sm:$0xff] }
 0xee3   :  { %v3061_v24 = vpop.f32.mrf.mxu1  ;;  %v12181_v25 = vld [vmem:[#allocation2 + $0x120] sm:$0x11]  ;;  %v2932_v27 = vpop.f32.mrf.mxu0 }
 0xee4   :  { %v12182_v26 = vsel %vm15459_vm6, 1065369472, %v12181_v25  ;;  %v13419_v25 = vcombine.high %v3895_v22, %v3931_v23 }
 0xee5   :  { %v3063_v44 = vpop.f32.mrf.mxu1  ;;  %12183 = vst [vmem:[#allocation2 + $0x120] sm:$0x11] %v12182_v26  ;;  %v2934_v32 = vpop.f32.mrf.mxu0  ;;  %v3858_v26 = vld [vmem:[#allocation8 + $0xc60] sm:$0xff] }
 0xee6   :  { %v14273_v29 = vpack.c.bf16 %v3063_v44, %v3061_v24 }
 0xee7   :  { %v3065_v30 = vpop.f32.mrf.mxu1  ;;  %v2936_v28 = vpop.f32.mrf.mxu0 }
 0xee8   :  { %3256 = vst [vmem:[#allocation2 + $0x180] sm:$0xff] %v14273_v29  ;;  %v14724_v55 = vpack.c.bf16 %v3065_v30, %v3061_v24  ;;  %v14730_v62 = vpack.c.bf16 %v2936_v28, %v2932_v27  ;;  %v3822_v24 = vld [vmem:[#allocation8 + $0xb40] sm:$0xff]  ;;  %v3823_v27 = vld [vmem:[#allocation8 + $0xb48] sm:$0xff]  ;;  %v13416_v29 = vcombine.low %v3894_v17, %v3930_v63 }
 0xee9   :  { %v3067_v33 = vpop.f32.mrf.mxu1  ;;  %v2938_v35 = vpop.f32.mrf.mxu0  ;;  %v3786_v28 = vld [vmem:[#allocation8 + $0xa20] sm:$0xff] }
 0xeea   :  { %v14274_v34 = vpack.c.bf16 %v3067_v33, %v3065_v30  ;;  %v14723_v54 = vpack.c.bf16 %v3067_v33, %v3063_v44  ;;  %v14729_v61 = vpack.c.bf16 %v2938_v35, %v2934_v32  ;;  %v3859_v44 = vld [vmem:[#allocation8 + $0xc68] sm:$0xff]  ;;  %v13418_v30 = vcombine.low %v3895_v22, %v3931_v23 }
 0xeeb   :  { %v13345_v32 = vcombine.high %v3822_v24, %v3858_v26  ;;  %v13347_v33 = vcombine.high %v3823_v27, %v3859_v44  ;;  %v3751_v35 = vld [vmem:[#allocation8 + $0x908] sm:$0xff] }
 0xeec   :  { %3257 = vst [vmem:[#allocation2 + $0x1a0] sm:$0xff] %v14274_v34  ;;  %v3750_v34 = vld [vmem:[#allocation8 + $0x900] sm:$0xff]  ;;  %v4471_v22 = vld [vmem:[#allocation8 + $0x1f88] sm:$0xff] }
 0xeed   :  { %v4507_v23 = vld [vmem:[#allocation8 + $0x20a8] sm:$0xff] }
 0xef3   :  { %v3018_v36 = vpop.f32.mrf.mxu0  ;;  %v3147_v37 = vpop.f32.mrf.mxu1 }
 0xef5   :  { %v3020_v38 = vpop.f32.mrf.mxu0  ;;  %v3149_v40 = vpop.f32.mrf.mxu1 }
 0xef6   :  { %v14271_v39 = vpack.c.bf16 %v3020_v38, %v3018_v36  ;;  %v14277_v41 = vpack.c.bf16 %v3149_v40, %v3147_v37 }
 0xef7   :  { %v3022_v53 = vpop.f32.mrf.mxu0  ;;  %v3151_v42 = vpop.f32.mrf.mxu1 }
 0xef8   :  { %3244 = vst [vmem:[#allocation2 + $0x140] sm:$0xff] %v14271_v39  ;;  %3280 = vst [vmem:[#allocation2 + $0x200] sm:$0xff] %v14277_v41  ;;  %v14726_v57 = vpack.c.bf16 %v3022_v53, %v3018_v36  ;;  %v14734_v4 = vpack.c.bf16 %v3151_v42, %v3147_v37  ;;  %v3787_v36 = vld [vmem:[#allocation8 + $0xa28] sm:$0xff]  ;;  %v13344_v37 = vcombine.low %v3822_v24, %v3858_v26  ;;  %v3678_v41 = vld [vmem:[#allocation8 + $0x6c0] sm:$0xff] }
 0xef9   :  { %v3024_v60 = vpop.f32.mrf.mxu0  ;;  %v3153_v43 = vpop.f32.mrf.mxu1  ;;  %v13275_v39 = vcombine.high %v3751_v35, %v3787_v36 }
 0xefa   :  { %v14272_v45 = vpack.c.bf16 %v3024_v60, %v3022_v53  ;;  %v14278_v46 = vpack.c.bf16 %v3153_v43, %v3151_v42  ;;  %v14725_v56 = vpack.c.bf16 %v3024_v60, %v3020_v38  ;;  %v14733_v14 = vpack.c.bf16 %v3153_v43, %v3149_v40  ;;  %v3714_v53 = vld [vmem:[#allocation8 + $0x7e0] sm:$0xff]  ;;  %v3679_v42 = vld [vmem:[#allocation8 + $0x6c8] sm:$0xff] }
 0xefb   :  { %v13346_v38 = vcombine.low %v3823_v27, %v3859_v44  ;;  %v13273_v40 = vcombine.high %v3750_v34, %v3786_v28  ;;  %v3715_v60 = vld [vmem:[#allocation8 + $0x7e8] sm:$0xff]  ;;  %v13272_v43 = vcombine.low %v3750_v34, %v3786_v28  ;;  %v13995_v27 = vcombine.high %v4471_v22, %v4507_v23 }
 0xefc   :  { %3245 = vst [vmem:[#allocation2 + $0x160] sm:$0xff] %v14272_v45  ;;  %3281 = vst [vmem:[#allocation2 + $0x220] sm:$0xff] %v14278_v46  ;;  %v13274_v45 = vcombine.low %v3751_v35, %v3787_v36  ;;  %v13201_v46 = vcombine.high %v3678_v41, %v3714_v53 }
 0xf03   :  { %v3104_v47 = vpop.f32.mrf.mxu0 }
 0xf05   :  { %v3106_v21 = vpop.f32.mrf.mxu0 }
 0xf06   :  { %v14275_v48 = vpack.c.bf16 %v3106_v21, %v3104_v47 }
 0xf07   :  { %v3108_v49 = vpop.f32.mrf.mxu0 }
 0xf08   :  { %3268 = vst [vmem:[#allocation2 + $0x1c0] sm:$0xff] %v14275_v48  ;;  %v14721_v31 = vpack.c.bf16 %v3108_v49, %v3104_v47  ;;  %v13203_v47 = vcombine.high %v3679_v42, %v3715_v60  ;;  %v3642_v48 = vld [vmem:[#allocation8 + $0x5a0] sm:$0xff] }
 0xf09   :  { %v3110_v50 = vpop.f32.mrf.mxu0 }
 0xf0a   :  { %v14276_v51 = vpack.c.bf16 %v3110_v50, %v3108_v49  ;;  %v14722_v52 = vpack.c.bf16 %v3110_v50, %v3106_v21  ;;  %v3606_v21 = vld [vmem:[#allocation8 + $0x480] sm:$0xff]  ;;  %v3607_v49 = vld [vmem:[#allocation8 + $0x488] sm:$0xff] }
 0xf0b   :  { %v3643_v50 = vld [vmem:[#allocation8 + $0x5a8] sm:$0xff] }
 0xf0c   :  { %3269 = vst [vmem:[#allocation2 + $0x1e0] sm:$0xff] %v14276_v51  ;;  %3400 = vmatprep.subr.bf16.mxu0 %v14722_v52  ;;  %v13200_v51 = vcombine.low %v3678_v41, %v3714_v53  ;;  %v13129_v52 = vcombine.high %v3606_v21, %v3642_v48  ;;  %v4435_v41 = vld [vmem:[#allocation8 + $0x1e68] sm:$0xff] }
 0xf0d   :  { %3401 = vmatpush1.bf16.msra.mxu0 %v14721_v31  ;;  %v13202_v31 = vcombine.low %v3679_v42, %v3715_v60  ;;  %v4362_v60 = vld [vmem:[#allocation8 + $0x1c20] sm:$0xff] }
 0xf0e   :  { %3402 = vmatprep.subr.bf16.mxu0 %v14723_v54  ;;  %v13131_v54 = vcombine.high %v3607_v49, %v3643_v50 }
 0xf11   :  { %3403 = vmatpush1.bf16.msra.mxu0 %v14724_v55  ;;  %v3534_v55 = vld [vmem:[#allocation8 + $0x240] sm:$0xff] }
 0xf12   :  { %3404 = vmatprep.subr.bf16.mxu0 %v14725_v56  ;;  %v3570_v56 = vld [vmem:[#allocation8 + $0x360] sm:$0xff] }
 0xf15   :  { %3405 = vmatpush1.bf16.msra.mxu0 %v14726_v57  ;;  %v3535_v57 = vld [vmem:[#allocation8 + $0x248] sm:$0xff] }
 0xf16   :  { %3406 = vmatprep.subr.bf16.mxu0 %v14727_v58  ;;  %v3571_v58 = vld [vmem:[#allocation8 + $0x368] sm:$0xff] }
 0xf19   :  { %3407 = vmatpush1.bf16.msra.mxu0 %v14728_v59  ;;  %v13128_v59 = vcombine.low %v3606_v21, %v3642_v48 }
 0xf1a   :  { %3408 = vmatprep.subr.bf16.mxu0 %v14729_v61  ;;  %v13130_v61 = vcombine.low %v3607_v49, %v3643_v50  ;;  %v4254_v49 = vld [vmem:[#allocation8 + $0x18c0] sm:$0xff] }
 0xf1b   :  { %v4290_v50 = vld [vmem:[#allocation8 + $0x19e0] sm:$0xff] }
 0xf1d   :  { %3409 = vmatpush1.bf16.msra.mxu0 %v14730_v62  ;;  %v13057_v62 = vcombine.high %v3534_v55, %v3570_v56 }
 0xf1e   :  { %3410 = vmatprep.subr.bf16.mxu0 %v14717_v9 }
 0xf21   :  { %3411 = vmatpush1.bf16.msra.mxu0 %v14718_v10  ;;  %v3966_v10 = vld [vmem:[#allocation8 + $0xfc0] sm:$0xff] }
 0xf22   :  { %3412 = vmatprep.subr.bf16.mxu0 %v14731_v0  ;;  %v13059_v0 = vcombine.high %v3535_v57, %v3571_v58 }
 0xf25   :  { %3413 = vmatpush1.bf16.msra.mxu0 %v14732_v13  ;;  %v3462_v13 = vld [vmem:[#allocation8] sm:$0xff] }
 0xf26   :  { %3414 = vmatprep.subr.bf16.mxu0 %v14719_v11  ;;  %v13488_v11 = vcombine.low %v3966_v10, %v4002_v1 }
 0xf29   :  { %3415 = vmatpush1.bf16.msra.mxu0 %v14720_v12  ;;  %v13489_v12 = vcombine.high %v3966_v10, %v4002_v1  ;;  %v4542_v1 = vld [vmem:[#allocation8 + $0x21c0] sm:$0xff] }
 0xf2a   :  { %3430 = vmatprep.subr.bf16.mxu0 %v14733_v14  ;;  %v3498_v14 = vld [vmem:[#allocation8 + $0x120] sm:$0xff]  ;;  %v14065_v63 = vcombine.high %v4542_v1, %v4578_v5  ;;  %v14064_v24 = vcombine.low %v4542_v1, %v4578_v5 }
 0xf2b   :  { %10374 = vmatprep.subr.bf16.mxu1 %v13489_v12  ;;  %v4579_v12 = vld [vmem:[#allocation8 + $0x22e8] sm:$0xff]  ;;  %v12984_v15 = vcombine.low %v3462_v13, %v3498_v14 }
 0xf2c   :  { %10375 = vmatpush1.bf16.msra.mxu1 %v13488_v11  ;;  %v4543_v11 = vld [vmem:[#allocation8 + $0x21c8] sm:$0xff] }
 0xf2d   :  { %3431 = vmatpush2.bf16.msra.mxu0 %v14734_v4  ;;  %10376 = vmatprep.subr.bf16.mxu1 %v13417_v20  ;;  %v3463_v4 = vld [vmem:[#allocation8 + $0x8] sm:$0xff]  ;;  %v4506_v20 = vld [vmem:[#allocation8 + $0x20a0] sm:$0xff] }
 0xf2e   :  { %10415 = vmatprep.subr.bf16.mxu0 %v13491_v19  ;;  %v4470_v19 = vld [vmem:[#allocation8 + $0x1f80] sm:$0xff] }
 0xf2f   :  { %v13993_v26 = vcombine.high %v4470_v19, %v4506_v20  ;;  %v13992_v44 = vcombine.low %v4470_v19, %v4506_v20 }
 0xf30   :  { %3433 = vmatmul.mubr.bf16.vlgmr.msra.gmra.mxu0 %v12963_v2  ;;  %10377 = vmatpush1.bf16.msra.mxu1 %v13416_v29  ;;  %v3499_v2 = vld [vmem:[#allocation8 + $0x128] sm:$0xff]  ;;  %v13994_v29 = vcombine.low %v4471_v22, %v4507_v23  ;;  %v3968_v22 = vld [vmem:[#allocation8 + $0xfd0] sm:$0xff] }
 0xf31   :  { %10416 = vmatpush1.bf16.msra.mxu0 %v13490_v18  ;;  %10378 = vmatprep.subr.bf16.mxu1 %v13345_v32  ;;  %v12987_v10 = vcombine.high %v3463_v4, %v3499_v2  ;;  %v12986_v17 = vcombine.low %v3463_v4, %v3499_v2  ;;  %v14067_v18 = vcombine.high %v4543_v11, %v4579_v12  ;;  %v4110_v4 = vld [vmem:[#allocation8 + $0x1440] sm:$0xff]  ;;  %v4004_v23 = vld [vmem:[#allocation8 + $0x10f0] sm:$0xff] }
 0xf32   :  { %10417 = vmatprep.subr.bf16.mxu0 %v13419_v25  ;;  %v14066_v25 = vcombine.low %v4543_v11, %v4579_v12  ;;  %v4146_v2 = vld [vmem:[#allocation8 + $0x1560] sm:$0xff] }
 0xf33   :  { %v4038_v11 = vld [vmem:[#allocation8 + $0x1200] sm:$0xff] }
 0xf34   :  { %10379 = vmatpush1.bf16.msra.mxu1 %v13344_v37  ;;  %v4398_v37 = vld [vmem:[#allocation8 + $0x1d40] sm:$0xff] }
 0xf35   :  { %10418 = vmatpush1.bf16.msra.mxu0 %v13418_v30  ;;  %10380 = vmatprep.subr.bf16.mxu1 %v13273_v40  ;;  %v4399_v40 = vld [vmem:[#allocation8 + $0x1d48] sm:$0xff]  ;;  %v4074_v12 = vld [vmem:[#allocation8 + $0x1320] sm:$0xff] }
 0xf36   :  { %10419 = vmatprep.subr.bf16.mxu0 %v13347_v33  ;;  %v13922_v42 = vcombine.low %v4399_v40, %v4435_v41 }
 0xf38   :  { %10381 = vmatpush1.bf16.msra.mxu1 %v13272_v43  ;;  %v4327_v43 = vld [vmem:[#allocation8 + $0x1b08] sm:$0xff] }
 0xf39   :  { %10420 = vmatpush1.bf16.msra.mxu0 %v13346_v38  ;;  %10382 = vmatprep.subr.bf16.mxu1 %v13201_v46  ;;  %v4434_v38 = vld [vmem:[#allocation8 + $0x1e60] sm:$0xff]  ;;  %v4363_v46 = vld [vmem:[#allocation8 + $0x1c28] sm:$0xff] }
 0xf3a   :  { %10421 = vmatprep.subr.bf16.mxu0 %v13275_v39  ;;  %v13921_v39 = vcombine.high %v4398_v37, %v4434_v38  ;;  %v13920_v53 = vcombine.low %v4398_v37, %v4434_v38  ;;  %v13850_v21 = vcombine.low %v4327_v43, %v4363_v46  ;;  %v13851_v48 = vcombine.high %v4327_v43, %v4363_v46  ;;  %v3825_v46 = vld [vmem:[#allocation8 + $0xb58] sm:$0xff] }
 0xf3c   :  { %10383 = vmatpush1.bf16.msra.mxu1 %v13200_v51  ;;  %v4255_v51 = vld [vmem:[#allocation8 + $0x18c8] sm:$0xff] }
 0xf3d   :  { %10422 = vmatpush1.bf16.msra.mxu0 %v13274_v45  ;;  %10384 = vmatprep.subr.bf16.mxu1 %v13129_v52  ;;  %v4291_v52 = vld [vmem:[#allocation8 + $0x19e8] sm:$0xff] }
 0xf3e   :  { %10423 = vmatprep.subr.bf16.mxu0 %v13203_v47 }
 0xf40   :  { %10385 = vmatpush1.bf16.msra.mxu1 %v13128_v59  ;;  %v4183_v59 = vld [vmem:[#allocation8 + $0x1688] sm:$0xff] }
 0xf41   :  { %10424 = vmatpush1.bf16.msra.mxu0 %v13202_v31  ;;  %10386 = vmatprep.subr.bf16.mxu1 %v13057_v62  ;;  %v13777_v31 = vcombine.high %v4254_v49, %v4290_v50  ;;  %v4219_v62 = vld [vmem:[#allocation8 + $0x17a8] sm:$0xff] }
 0xf42   :  { %10425 = vmatprep.subr.bf16.mxu0 %v13131_v54  ;;  %v13776_v54 = vcombine.low %v4254_v49, %v4290_v50  ;;  %v3752_v50 = vld [vmem:[#allocation8 + $0x910] sm:$0xff] }
 0xf45   :  { %10426 = vmatpush1.bf16.msra.mxu0 %v13130_v61 }
 0xf46   :  { %10427 = vmatprep.subr.bf16.mxu0 %v13059_v0 }
 0xff0   :  { %v15529_v6 = vpop.f32.mrf.mxu0 }
 0xff2   :  { %v15531_v8 = vpop.f32.mrf.mxu0 }
 0xff3   :  { %v3441_v3 = vadd.f32 %v15531_v8, %v15529_v6 }
 0xff4   :  { %v3438_v7 = vpop.f32.mrf.mxu0 }
 0xff5   :  { %3442 = vadd.xlane.f32.xlu0 %v3441_v3  ;;  %v13056_v3 = vcombine.low %v3534_v55, %v3570_v56  ;;  %v13058_v7 = vcombine.low %v3535_v57, %v3571_v58  ;;  %v13778_v55 = vcombine.low %v4255_v51, %v4291_v52  ;;  %v13779_v56 = vcombine.high %v4255_v51, %v4291_v52  ;;  %v4182_v57 = vld [vmem:[#allocation8 + $0x1680] sm:$0xff]  ;;  %v3788_v51 = vld [vmem:[#allocation8 + $0xa30] sm:$0xff]  ;;  %v3789_v52 = vld [vmem:[#allocation8 + $0xa38] sm:$0xff] }
 0xff6   :  { %v3439_v9 = vpop.f32.mrf.mxu0  ;;  %v4218_v58 = vld [vmem:[#allocation8 + $0x17a0] sm:$0xff] }
 0xff7   :  { %v12985_v9 = vcombine.high %v3462_v13, %v3498_v14  ;;  %10387 = vmatpush1.bf16.msra.mxu1 %v13056_v3  ;;  %10428 = vmatpush1.bf16.msra.mxu0 %v13058_v7  ;;  %v13705_v61 = vcombine.high %v4182_v57, %v4218_v58  ;;  %v13704_v0 = vcombine.low %v4182_v57, %v4218_v58  ;;  %v4111_v3 = vld [vmem:[#allocation8 + $0x1448] sm:$0xff]  ;;  %v3680_v58 = vld [vmem:[#allocation8 + $0x6d0] sm:$0xff] }
 0xff8   :  { %10429 = vmatprep.subr.bf16.mxu0 %v12987_v10  ;;  %v13706_v13 = vcombine.low %v4183_v59, %v4219_v62  ;;  %v13707_v14 = vcombine.high %v4183_v59, %v4219_v62  ;;  %v13633_v7 = vcombine.high %v4110_v4, %v4146_v2  ;;  %v13632_v10 = vcombine.low %v4110_v4, %v4146_v2  ;;  %v3716_v59 = vld [vmem:[#allocation8 + $0x7f0] sm:$0xff]  ;;  %v3717_v62 = vld [vmem:[#allocation8 + $0x7f8] sm:$0xff] }
 0xff9   :  { %10388 = vmatprep.subr.bf16.mxu1 %v12985_v9  ;;  %v4147_v9 = vld [vmem:[#allocation8 + $0x1568] sm:$0xff]  ;;  %v3608_v2 = vld [vmem:[#allocation8 + $0x490] sm:$0xff] }
 0xffa   :  { %v13634_v1 = vcombine.low %v4111_v3, %v4147_v9  ;;  %v13635_v5 = vcombine.high %v4111_v3, %v4147_v9  ;;  %v3644_v3 = vld [vmem:[#allocation8 + $0x5b0] sm:$0xff]  ;;  %v3645_v9 = vld [vmem:[#allocation8 + $0x5b8] sm:$0xff] }
 0xffb   :  { %10389 = vmatpush1.bf16.msra.mxu1 %v12984_v15  ;;  %10430 = vmatpush1.bf16.msra.mxu0 %v12986_v17  ;;  %v4039_v15 = vld [vmem:[#allocation8 + $0x1208] sm:$0xff]  ;;  %v13561_v17 = vcombine.high %v4038_v11, %v4074_v12 }
 0xffc   :  { %10390 = vmatprep.subr.bf16.mxu1 %v14065_v63  ;;  %10431 = vmatprep.subr.bf16.mxu0 %v14067_v18  ;;  %v4075_v63 = vld [vmem:[#allocation8 + $0x1328] sm:$0xff]  ;;  %v13560_v18 = vcombine.low %v4038_v11, %v4074_v12  ;;  %v3536_v12 = vld [vmem:[#allocation8 + $0x250] sm:$0xff] }
 0xffd   :  { %v13562_v19 = vcombine.low %v4039_v15, %v4075_v63  ;;  %v13563_v20 = vcombine.high %v4039_v15, %v4075_v63  ;;  %v3572_v15 = vld [vmem:[#allocation8 + $0x370] sm:$0xff]  ;;  %v3573_v63 = vld [vmem:[#allocation8 + $0x378] sm:$0xff] }
 0xfff   :  { %10391 = vmatpush2.bf16.msra.mxu1 %v14064_v24  ;;  %10432 = vmatpush2.bf16.msra.mxu0 %v14066_v25  ;;  %v3969_v24 = vld [vmem:[#allocation8 + $0xfd8] sm:$0xff]  ;;  %v13493_v25 = vcombine.high %v3968_v22, %v4004_v23 }
0x1000   :  { %10392 = vmatprep.subr.bf16.mxu1 %v13993_v26  ;;  %10433 = vmatprep.subr.bf16.mxu0 %v13995_v27  ;;  %v4005_v26 = vld [vmem:[#allocation8 + $0x10f8] sm:$0xff]  ;;  %v13492_v27 = vcombine.low %v3968_v22, %v4004_v23  ;;  %v3464_v23 = vld [vmem:[#allocation8 + $0x10] sm:$0xff] }
0x1003   :  { %10393 = vmatpush2.bf16.msra.mxu1 %v13992_v44  ;;  %10434 = vmatpush2.bf16.msra.mxu0 %v13994_v29  ;;  %v13494_v44 = vcombine.low %v3969_v24, %v4005_v26  ;;  %v13495_v29 = vcombine.high %v3969_v24, %v4005_v26  ;;  %v3500_v24 = vld [vmem:[#allocation8 + $0x130] sm:$0xff]  ;;  %v3501_v26 = vld [vmem:[#allocation8 + $0x138] sm:$0xff] }
0x1004   :  { %10394 = vmatprep.subr.bf16.mxu1 %v13921_v39  ;;  %v3896_v39 = vld [vmem:[#allocation8 + $0xd90] sm:$0xff] }
0x1007   :  { %10395 = vmatpush2.bf16.msra.mxu1 %v13920_v53  ;;  %v3897_v53 = vld [vmem:[#allocation8 + $0xd98] sm:$0xff] }
0x107e   :  { %v3443_v30 = vpop.xlane.xlu0 %3442 }
0x107f   :  { %v3445_v32 = vmul.f32 0.00390625, %v3443_v30 }
0x1081   :  { %v15536_v33 = vsub.f32 %v15529_v6, %v3445_v32  ;;  %v15539_v34 = vsub.f32 %v15531_v8, %v3445_v32  ;;  %v13923_v6 = vcombine.high %v4399_v40, %v4435_v41  ;;  %v4326_v8 = vld [vmem:[#allocation8 + $0x1b00] sm:$0xff]  ;;  %v3932_v41 = vld [vmem:[#allocation8 + $0xeb0] sm:$0xff] }
0x1082   :  { %v13849_v45 = vcombine.high %v4326_v8, %v4362_v60  ;;  %v13848_v47 = vcombine.low %v4326_v8, %v4362_v60  ;;  %v3824_v60 = vld [vmem:[#allocation8 + $0xb50] sm:$0xff]  ;;  %v13421_v43 = vcombine.high %v3896_v39, %v3932_v41 }
0x1083   :  { %v3448_v28 = vmul.f32 %v15536_v33, %v15536_v33  ;;  %v3449_v35 = vmul.f32 %v15539_v34, %v15539_v34  ;;  %10435 = vmatprep.subr.bf16.mxu0 %v13923_v6 }
0x1084   :  { %10436 = vmatpush2.bf16.msra.mxu0 %v13922_v42  ;;  %10396 = vmatprep.subr.bf16.mxu1 %v13849_v45  ;;  %v3933_v42 = vld [vmem:[#allocation8 + $0xeb8] sm:$0xff] }
0x1085   :  { %v3450_v36 = vadd.f32 %v3449_v35, %v3448_v28  ;;  %10437 = vmatprep.subr.bf16.mxu0 %v13851_v48  ;;  %10397 = vmatpush2.bf16.msra.mxu1 %v13848_v47  ;;  %v13423_v45 = vcombine.high %v3897_v53, %v3933_v42  ;;  %v13420_v47 = vcombine.low %v3896_v39, %v3932_v41  ;;  %v4472_v41 = vld [vmem:[#allocation8 + $0x1f90] sm:$0xff] }
0x1086   :  { %10398 = vmatprep.subr.bf16.mxu1 %v13777_v31  ;;  %v3753_v31 = vld [vmem:[#allocation8 + $0x918] sm:$0xff] }
0x1087   :  { %3451 = vadd.xlane.f32.xlu1 %v3450_v36  ;;  %v13279_v57 = vcombine.high %v3753_v31, %v3789_v52 }
0x1088   :  { %10438 = vmatpush2.bf16.msra.mxu0 %v13850_v21  ;;  %v13422_v21 = vcombine.low %v3897_v53, %v3933_v42  ;;  %v4508_v53 = vld [vmem:[#allocation8 + $0x20b0] sm:$0xff]  ;;  %v4473_v42 = vld [vmem:[#allocation8 + $0x1f98] sm:$0xff] }
0x1089   :  { %10439 = vmatprep.subr.bf16.mxu0 %v13779_v56  ;;  %10399 = vmatpush2.bf16.msra.mxu1 %v13776_v54  ;;  %v13277_v56 = vcombine.high %v3752_v50, %v3788_v51 }
0x108a   :  { %10400 = vmatprep.subr.bf16.mxu1 %v13705_v61  ;;  %v3681_v61 = vld [vmem:[#allocation8 + $0x6d8] sm:$0xff] }
0x108b   :  { %v13207_v4 = vcombine.high %v3681_v61, %v3717_v62 }
0x108c   :  { %10440 = vmatpush2.bf16.msra.mxu0 %v13778_v55 }
0x108d   :  { %10441 = vmatprep.subr.bf16.mxu0 %v13707_v14  ;;  %10401 = vmatpush2.bf16.msra.mxu1 %v13704_v0  ;;  %v13276_v0 = vcombine.low %v3752_v50, %v3788_v51  ;;  %v13205_v14 = vcombine.high %v3680_v58, %v3716_v59 }
0x108e   :  { %10402 = vmatprep.subr.bf16.mxu1 %v13633_v7  ;;  %v3609_v7 = vld [vmem:[#allocation8 + $0x498] sm:$0xff] }
0x108f   :  { %v13135_v11 = vcombine.high %v3609_v7, %v3645_v9 }
0x1090   :  { %10442 = vmatpush2.bf16.msra.mxu0 %v13706_v13  ;;  %v13278_v13 = vcombine.low %v3753_v31, %v3789_v52  ;;  %v4328_v52 = vld [vmem:[#allocation8 + $0x1b10] sm:$0xff] }
0x1091   :  { %10443 = vmatprep.subr.bf16.mxu0 %v13635_v5  ;;  %10403 = vmatpush2.bf16.msra.mxu1 %v13632_v10  ;;  %v13204_v10 = vcombine.low %v3680_v58, %v3716_v59  ;;  %v13133_v5 = vcombine.high %v3608_v2, %v3644_v3 }
0x1092   :  { %10404 = vmatprep.subr.bf16.mxu1 %v13561_v17  ;;  %v3537_v17 = vld [vmem:[#allocation8 + $0x258] sm:$0xff] }
0x1093   :  { %v13063_v22 = vcombine.high %v3537_v17, %v3573_v63 }
0x1094   :  { %10444 = vmatpush2.bf16.msra.mxu0 %v13634_v1  ;;  %v13206_v1 = vcombine.low %v3681_v61, %v3717_v62  ;;  %v4256_v62 = vld [vmem:[#allocation8 + $0x18d0] sm:$0xff] }
0x1095   :  { %10445 = vmatprep.subr.bf16.mxu0 %v13563_v20  ;;  %10405 = vmatpush2.bf16.msra.mxu1 %v13560_v18  ;;  %v13132_v18 = vcombine.low %v3608_v2, %v3644_v3  ;;  %v13061_v20 = vcombine.high %v3536_v12, %v3572_v15 }
0x1096   :  { %10456 = vmatprep.subr.bf16.mxu1 %v13493_v25  ;;  %v3465_v25 = vld [vmem:[#allocation8 + $0x18] sm:$0xff] }
0x1098   :  { %10446 = vmatpush2.bf16.msra.mxu0 %v13562_v19  ;;  %v13134_v19 = vcombine.low %v3609_v7, %v3645_v9  ;;  %v4184_v9 = vld [vmem:[#allocation8 + $0x1690] sm:$0xff] }
0x1099   :  { %10497 = vmatprep.subr.bf16.mxu0 %v13495_v29  ;;  %v12989_v29 = vcombine.high %v3464_v23, %v3500_v24 }
0x1110   :  { %v3452_v30 = vpop.xlane.xlu1 %3451 }
0x1111   :  { %v3453_v32 = vmul.f32 0.00390625, %v3452_v30  ;;  %v12991_v30 = vcombine.high %v3465_v25, %v3501_v26 }
0x1113   :  { %v3454_v28 = vadd.f32 1e-05, %v3453_v32  ;;  %v4544_v32 = vld [vmem:[#allocation8 + $0x21d0] sm:$0xff] }
0x1115   :  { %14715 = vrsqrt.f32 %v3454_v28  ;;  %v4580_v28 = vld [vmem:[#allocation8 + $0x22f0] sm:$0xff] }
0x1122   :  { %v14716_v35 = vpop.eup %14715 }
0x1123   :  { %v3456_v36 = vmul.f32 %v14716_v35, %v15536_v33  ;;  %v3457_v37 = vmul.f32 %v14716_v35, %v15539_v34  ;;  %v3860_v33 = vld [vmem:[#allocation8 + $0xc70] sm:$0xff]  ;;  %v3861_v34 = vld [vmem:[#allocation8 + $0xc78] sm:$0xff] }
0x1124   :  { %v13349_v48 = vcombine.high %v3824_v60, %v3860_v33  ;;  %v13351_v49 = vcombine.high %v3825_v46, %v3861_v34  ;;  %v13348_v54 = vcombine.low %v3824_v60, %v3860_v33  ;;  %v13350_v55 = vcombine.low %v3825_v46, %v3861_v34  ;;  %v4545_v35 = vld [vmem:[#allocation8 + $0x21d8] sm:$0xff]  ;;  %v4400_v34 = vld [vmem:[#allocation8 + $0x1d50] sm:$0xff] }
0x1125   :  { %v3458_v38 = vmax.f32 %v3456_v36, 0.0  ;;  %v3459_v40 = vmax.f32 %v3457_v37, 0.0  ;;  %v4581_v36 = vld [vmem:[#allocation8 + $0x22f8] sm:$0xff]  ;;  %v12988_v37 = vcombine.low %v3464_v23, %v3500_v24  ;;  %v13997_v33 = vcombine.high %v4472_v41, %v4508_v53 }
0x1126   :  { %v14071_v39 = vcombine.high %v4545_v35, %v4581_v36  ;;  %v4509_v60 = vld [vmem:[#allocation8 + $0x20b8] sm:$0xff] }
0x1127   :  { %v15547_v6 = vpack.c.bf16 %v3458_v38, %v3458_v38  ;;  %v15549_v8 = vpack.c.bf16 %v3459_v40, %v3459_v40  ;;  %v12990_v38 = vcombine.low %v3465_v25, %v3501_v26  ;;  %v14069_v40 = vcombine.high %v4544_v32, %v4580_v28  ;;  %v4040_v26 = vld [vmem:[#allocation8 + $0x1210] sm:$0xff] }
0x1128   :  { %v13999_v46 = vcombine.high %v4473_v42, %v4509_v60  ;;  %v13998_v50 = vcombine.low %v4473_v42, %v4509_v60  ;;  %v3898_v60 = vld [vmem:[#allocation8 + $0xda0] sm:$0xff] }
0x1129   :  { %10406 = vmatprep.mubr.bf16.mxu1 %v15549_v8  ;;  %10447 = vmatprep.mubr.bf16.mxu0 %v15549_v8 }
0x112a   :  { %10407 = vmatmul.mubr.bf16.vlgmr.msra.gmra.mxu1 %v15547_v6  ;;  %10448 = vmatmul.mubr.bf16.vlgmr.msra.gmra.mxu0 %v15547_v6 }
0x112b   :  { %10457 = vmatpush1.bf16.msra.mxu1 %v13492_v27  ;;  %10498 = vmatpush1.bf16.msra.mxu0 %v13494_v44  ;;  %v13060_v27 = vcombine.low %v3536_v12, %v3572_v15  ;;  %v13062_v44 = vcombine.low %v3537_v17, %v3573_v63  ;;  %v4112_v63 = vld [vmem:[#allocation8 + $0x1450] sm:$0xff] }
0x112c   :  { %10488 = vmatprep.mubr.bf16.mxu1 %v15549_v8  ;;  %10529 = vmatprep.mubr.bf16.mxu0 %v15549_v8 }
0x112d   :  { %10458 = vmatprep.subr.bf16.mxu1 %v13421_v43  ;;  %10499 = vmatprep.subr.bf16.mxu0 %v13423_v45  ;;  %v14068_v43 = vcombine.low %v4544_v32, %v4580_v28  ;;  %v14070_v45 = vcombine.low %v4545_v35, %v4581_v36  ;;  %v3970_v36 = vld [vmem:[#allocation8 + $0xfe0] sm:$0xff] }
0x112f   :  { %10459 = vmatpush1.bf16.msra.mxu1 %v13420_v47  ;;  %10500 = vmatpush1.bf16.msra.mxu0 %v13422_v21  ;;  %v4436_v47 = vld [vmem:[#allocation8 + $0x1e70] sm:$0xff]  ;;  %v4401_v21 = vld [vmem:[#allocation8 + $0x1d58] sm:$0xff] }
0x1130   :  { %10460 = vmatprep.subr.bf16.mxu1 %v13349_v48  ;;  %10501 = vmatprep.subr.bf16.mxu0 %v13351_v49  ;;  %v4437_v48 = vld [vmem:[#allocation8 + $0x1e78] sm:$0xff]  ;;  %v13996_v49 = vcombine.low %v4472_v41, %v4508_v53  ;;  %v13925_v51 = vcombine.high %v4400_v34, %v4436_v47 }
0x1131   :  { %v13927_v31 = vcombine.high %v4401_v21, %v4437_v48  ;;  %v13926_v58 = vcombine.low %v4401_v21, %v4437_v48  ;;  %v3826_v48 = vld [vmem:[#allocation8 + $0xb60] sm:$0xff] }
0x1133   :  { %10461 = vmatpush1.bf16.msra.mxu1 %v13348_v54  ;;  %10502 = vmatpush1.bf16.msra.mxu0 %v13350_v55  ;;  %v4364_v54 = vld [vmem:[#allocation8 + $0x1c30] sm:$0xff]  ;;  %v4329_v55 = vld [vmem:[#allocation8 + $0x1b18] sm:$0xff] }
0x1134   :  { %10462 = vmatprep.subr.bf16.mxu1 %v13277_v56  ;;  %10503 = vmatprep.subr.bf16.mxu0 %v13279_v57  ;;  %v4365_v56 = vld [vmem:[#allocation8 + $0x1c38] sm:$0xff]  ;;  %v13924_v57 = vcombine.low %v4400_v34, %v4436_v47  ;;  %v13853_v59 = vcombine.high %v4328_v52, %v4364_v54 }
0x1135   :  { %v13855_v61 = vcombine.high %v4329_v55, %v4365_v56  ;;  %v13854_v2 = vcombine.low %v4329_v55, %v4365_v56  ;;  %v3754_v56 = vld [vmem:[#allocation8 + $0x920] sm:$0xff] }
0x1137   :  { %10463 = vmatpush1.bf16.msra.mxu1 %v13276_v0  ;;  %10504 = vmatpush1.bf16.msra.mxu0 %v13278_v13  ;;  %v4292_v0 = vld [vmem:[#allocation8 + $0x19f0] sm:$0xff]  ;;  %v4257_v13 = vld [vmem:[#allocation8 + $0x18d8] sm:$0xff] }
0x1138   :  { %10464 = vmatprep.subr.bf16.mxu1 %v13205_v14  ;;  %10505 = vmatprep.subr.bf16.mxu0 %v13207_v4  ;;  %v4293_v14 = vld [vmem:[#allocation8 + $0x19f8] sm:$0xff]  ;;  %v13852_v4 = vcombine.low %v4328_v52, %v4364_v54  ;;  %v13781_v3 = vcombine.high %v4256_v62, %v4292_v0 }
0x1139   :  { %v13783_v7 = vcombine.high %v4257_v13, %v4293_v14  ;;  %v13782_v12 = vcombine.low %v4257_v13, %v4293_v14  ;;  %v3682_v14 = vld [vmem:[#allocation8 + $0x6e0] sm:$0xff] }
0x113b   :  { %10465 = vmatpush1.bf16.msra.mxu1 %v13204_v10  ;;  %10506 = vmatpush1.bf16.msra.mxu0 %v13206_v1  ;;  %v4220_v10 = vld [vmem:[#allocation8 + $0x17b0] sm:$0xff]  ;;  %v4185_v1 = vld [vmem:[#allocation8 + $0x1698] sm:$0xff] }
0x113c   :  { %10466 = vmatprep.subr.bf16.mxu1 %v13133_v5  ;;  %10507 = vmatprep.subr.bf16.mxu0 %v13135_v11  ;;  %v4221_v5 = vld [vmem:[#allocation8 + $0x17b8] sm:$0xff]  ;;  %v13780_v11 = vcombine.low %v4256_v62, %v4292_v0  ;;  %v13709_v15 = vcombine.high %v4184_v9, %v4220_v10 }
0x113d   :  { %v13711_v17 = vcombine.high %v4185_v1, %v4221_v5  ;;  %v13710_v23 = vcombine.low %v4185_v1, %v4221_v5  ;;  %v3610_v5 = vld [vmem:[#allocation8 + $0x4a0] sm:$0xff] }
0x113f   :  { %10467 = vmatpush1.bf16.msra.mxu1 %v13132_v18  ;;  %10508 = vmatpush1.bf16.msra.mxu0 %v13134_v19  ;;  %v4148_v18 = vld [vmem:[#allocation8 + $0x1570] sm:$0xff]  ;;  %v4113_v19 = vld [vmem:[#allocation8 + $0x1458] sm:$0xff] }
0x1140   :  { %10468 = vmatprep.subr.bf16.mxu1 %v13061_v20  ;;  %10509 = vmatprep.subr.bf16.mxu0 %v13063_v22  ;;  %v4149_v20 = vld [vmem:[#allocation8 + $0x1578] sm:$0xff]  ;;  %v13708_v22 = vcombine.low %v4184_v9, %v4220_v10  ;;  %v13637_v24 = vcombine.high %v4112_v63, %v4148_v18 }
0x1141   :  { %v13639_v25 = vcombine.high %v4113_v19, %v4149_v20  ;;  %v13638_v32 = vcombine.low %v4113_v19, %v4149_v20  ;;  %v3538_v20 = vld [vmem:[#allocation8 + $0x260] sm:$0xff] }
0x1143   :  { %10469 = vmatpush1.bf16.msra.mxu1 %v13060_v27  ;;  %10510 = vmatpush1.bf16.msra.mxu0 %v13062_v44  ;;  %v4076_v27 = vld [vmem:[#allocation8 + $0x1330] sm:$0xff]  ;;  %v4041_v44 = vld [vmem:[#allocation8 + $0x1218] sm:$0xff] }
0x1144   :  { %10470 = vmatprep.subr.bf16.mxu1 %v12989_v29  ;;  %10511 = vmatprep.subr.bf16.mxu0 %v12991_v30  ;;  %v4077_v29 = vld [vmem:[#allocation8 + $0x1338] sm:$0xff]  ;;  %v13636_v30 = vcombine.low %v4112_v63, %v4148_v18  ;;  %v13565_v28 = vcombine.high %v4040_v26, %v4076_v27 }
0x1145   :  { %v13567_v35 = vcombine.high %v4041_v44, %v4077_v29  ;;  %v13566_v41 = vcombine.low %v4041_v44, %v4077_v29  ;;  %v3466_v29 = vld [vmem:[#allocation8 + $0x20] sm:$0xff] }
0x1147   :  { %10471 = vmatpush1.bf16.msra.mxu1 %v12988_v37  ;;  %10512 = vmatpush1.bf16.msra.mxu0 %v12990_v38  ;;  %v4006_v37 = vld [vmem:[#allocation8 + $0x1100] sm:$0xff]  ;;  %v3971_v38 = vld [vmem:[#allocation8 + $0xfe8] sm:$0xff] }
0x1148   :  { %10472 = vmatprep.subr.bf16.mxu1 %v14069_v40  ;;  %10513 = vmatprep.subr.bf16.mxu0 %v14071_v39  ;;  %v4007_v40 = vld [vmem:[#allocation8 + $0x1108] sm:$0xff]  ;;  %v13564_v39 = vcombine.low %v4040_v26, %v4076_v27  ;;  %v13497_v53 = vcombine.high %v3970_v36, %v4006_v37 }
0x1149   :  { %v13499_v42 = vcombine.high %v3971_v38, %v4007_v40  ;;  %v13498_v34 = vcombine.low %v3971_v38, %v4007_v40  ;;  %v4546_v40 = vld [vmem:[#allocation8 + $0x21e0] sm:$0xff] }
0x114b   :  { %10473 = vmatpush2.bf16.msra.mxu1 %v14068_v43  ;;  %10514 = vmatpush2.bf16.msra.mxu0 %v14070_v45  ;;  %v3934_v43 = vld [vmem:[#allocation8 + $0xec0] sm:$0xff]  ;;  %v3899_v45 = vld [vmem:[#allocation8 + $0xda8] sm:$0xff] }
0x114c   :  { %10474 = vmatprep.subr.bf16.mxu1 %v13997_v33  ;;  %10515 = vmatprep.subr.bf16.mxu0 %v13999_v46  ;;  %v3935_v33 = vld [vmem:[#allocation8 + $0xec8] sm:$0xff]  ;;  %v13496_v46 = vcombine.low %v3970_v36, %v4006_v37  ;;  %v13425_v47 = vcombine.high %v3898_v60, %v3934_v43 }
0x114d   :  { %v13427_v21 = vcombine.high %v3899_v45, %v3935_v33  ;;  %v13426_v52 = vcombine.low %v3899_v45, %v3935_v33  ;;  %v4474_v33 = vld [vmem:[#allocation8 + $0x1fa0] sm:$0xff] }
0x114f   :  { %10475 = vmatpush2.bf16.msra.mxu1 %v13996_v49  ;;  %10516 = vmatpush2.bf16.msra.mxu0 %v13998_v50  ;;  %v3862_v49 = vld [vmem:[#allocation8 + $0xc80] sm:$0xff]  ;;  %v3827_v50 = vld [vmem:[#allocation8 + $0xb68] sm:$0xff] }
0x1150   :  { %10476 = vmatprep.subr.bf16.mxu1 %v13925_v51  ;;  %10517 = vmatprep.subr.bf16.mxu0 %v13927_v31  ;;  %v3863_v51 = vld [vmem:[#allocation8 + $0xc88] sm:$0xff]  ;;  %v13424_v31 = vcombine.low %v3898_v60, %v3934_v43  ;;  %v13353_v54 = vcombine.high %v3826_v48, %v3862_v49 }
0x1151   :  { %v13355_v55 = vcombine.high %v3827_v50, %v3863_v51  ;;  %v13354_v62 = vcombine.low %v3827_v50, %v3863_v51  ;;  %v4402_v51 = vld [vmem:[#allocation8 + $0x1d60] sm:$0xff] }
0x1153   :  { %10477 = vmatpush2.bf16.msra.mxu1 %v13924_v57  ;;  %10518 = vmatpush2.bf16.msra.mxu0 %v13926_v58  ;;  %v3790_v57 = vld [vmem:[#allocation8 + $0xa40] sm:$0xff]  ;;  %v3755_v58 = vld [vmem:[#allocation8 + $0x928] sm:$0xff] }
0x1154   :  { %10478 = vmatprep.subr.bf16.mxu1 %v13853_v59  ;;  %10519 = vmatprep.subr.bf16.mxu0 %v13855_v61  ;;  %v3791_v59 = vld [vmem:[#allocation8 + $0xa48] sm:$0xff]  ;;  %v13352_v61 = vcombine.low %v3826_v48, %v3862_v49  ;;  %v13281_v0 = vcombine.high %v3754_v56, %v3790_v57 }
0x1155   :  { %v13283_v13 = vcombine.high %v3755_v58, %v3791_v59  ;;  %v13282_v9 = vcombine.low %v3755_v58, %v3791_v59  ;;  %v4330_v59 = vld [vmem:[#allocation8 + $0x1b20] sm:$0xff] }
0x1157   :  { %10479 = vmatpush2.bf16.msra.mxu1 %v13852_v4  ;;  %10520 = vmatpush2.bf16.msra.mxu0 %v13854_v2  ;;  %v3718_v4 = vld [vmem:[#allocation8 + $0x800] sm:$0xff]  ;;  %v3683_v2 = vld [vmem:[#allocation8 + $0x6e8] sm:$0xff] }
0x1158   :  { %10480 = vmatprep.subr.bf16.mxu1 %v13781_v3  ;;  %10521 = vmatprep.subr.bf16.mxu0 %v13783_v7  ;;  %v3719_v3 = vld [vmem:[#allocation8 + $0x808] sm:$0xff]  ;;  %v13280_v7 = vcombine.low %v3754_v56, %v3790_v57  ;;  %v13209_v10 = vcombine.high %v3682_v14, %v3718_v4 }
0x1159   :  { %v13211_v1 = vcombine.high %v3683_v2, %v3719_v3  ;;  %v13210_v63 = vcombine.low %v3683_v2, %v3719_v3  ;;  %v4258_v3 = vld [vmem:[#allocation8 + $0x18e0] sm:$0xff] }
0x115b   :  { %10481 = vmatpush2.bf16.msra.mxu1 %v13780_v11  ;;  %10522 = vmatpush2.bf16.msra.mxu0 %v13782_v12  ;;  %v3646_v11 = vld [vmem:[#allocation8 + $0x5c0] sm:$0xff]  ;;  %v3611_v12 = vld [vmem:[#allocation8 + $0x4a8] sm:$0xff] }
0x115c   :  { %10482 = vmatprep.subr.bf16.mxu1 %v13709_v15  ;;  %10523 = vmatprep.subr.bf16.mxu0 %v13711_v17  ;;  %v3647_v15 = vld [vmem:[#allocation8 + $0x5c8] sm:$0xff]  ;;  %v13208_v17 = vcombine.low %v3682_v14, %v3718_v4  ;;  %v13137_v18 = vcombine.high %v3610_v5, %v3646_v11 }
0x115d   :  { %v13139_v19 = vcombine.high %v3611_v12, %v3647_v15  ;;  %v13138_v26 = vcombine.low %v3611_v12, %v3647_v15  ;;  %v4186_v15 = vld [vmem:[#allocation8 + $0x16a0] sm:$0xff] }
0x115f   :  { %10483 = vmatpush2.bf16.msra.mxu1 %v13708_v22  ;;  %10524 = vmatpush2.bf16.msra.mxu0 %v13710_v23  ;;  %v3574_v22 = vld [vmem:[#allocation8 + $0x380] sm:$0xff]  ;;  %v3539_v23 = vld [vmem:[#allocation8 + $0x268] sm:$0xff] }
0x1160   :  { %10484 = vmatprep.subr.bf16.mxu1 %v13637_v24  ;;  %10525 = vmatprep.subr.bf16.mxu0 %v13639_v25  ;;  %v3575_v24 = vld [vmem:[#allocation8 + $0x388] sm:$0xff]  ;;  %v13136_v25 = vcombine.low %v3610_v5, %v3646_v11  ;;  %v13065_v27 = vcombine.high %v3538_v20, %v3574_v22 }
0x1161   :  { %v13067_v44 = vcombine.high %v3539_v23, %v3575_v24  ;;  %v13066_v36 = vcombine.low %v3539_v23, %v3575_v24  ;;  %v4114_v24 = vld [vmem:[#allocation8 + $0x1460] sm:$0xff] }
0x1163   :  { %10485 = vmatpush2.bf16.msra.mxu1 %v13636_v30  ;;  %10526 = vmatpush2.bf16.msra.mxu0 %v13638_v32  ;;  %v3502_v30 = vld [vmem:[#allocation8 + $0x140] sm:$0xff]  ;;  %v3467_v32 = vld [vmem:[#allocation8 + $0x28] sm:$0xff] }
0x1164   :  { %10486 = vmatprep.subr.bf16.mxu1 %v13565_v28  ;;  %10527 = vmatprep.subr.bf16.mxu0 %v13567_v35  ;;  %v3503_v28 = vld [vmem:[#allocation8 + $0x148] sm:$0xff]  ;;  %v13064_v35 = vcombine.low %v3538_v20, %v3574_v22  ;;  %v12993_v37 = vcombine.high %v3466_v29, %v3502_v30 }
0x1165   :  { %v12995_v38 = vcombine.high %v3467_v32, %v3503_v28  ;;  %v12994_v60 = vcombine.low %v3467_v32, %v3503_v28  ;;  %v4042_v28 = vld [vmem:[#allocation8 + $0x1220] sm:$0xff] }
0x1167   :  { %10487 = vmatpush2.bf16.msra.mxu1 %v13564_v39  ;;  %10528 = vmatpush2.bf16.msra.mxu0 %v13566_v41  ;;  %v4582_v39 = vld [vmem:[#allocation8 + $0x2300] sm:$0xff]  ;;  %v4547_v41 = vld [vmem:[#allocation8 + $0x21e8] sm:$0xff] }
0x1168   :  { %10538 = vmatprep.subr.bf16.mxu1 %v13497_v53  ;;  %10579 = vmatprep.subr.bf16.mxu0 %v13499_v42  ;;  %v4583_v53 = vld [vmem:[#allocation8 + $0x2308] sm:$0xff]  ;;  %v12992_v42 = vcombine.low %v3466_v29, %v3502_v30  ;;  %v14073_v43 = vcombine.high %v4546_v40, %v4582_v39 }
0x1169   :  { %v14075_v45 = vcombine.high %v4547_v41, %v4583_v53  ;;  %v14074_v48 = vcombine.low %v4547_v41, %v4583_v53  ;;  %v3972_v53 = vld [vmem:[#allocation8 + $0xff0] sm:$0xff] }
0x116a   :  { %10489 = vmatmul.mubr.bf16.vlgmr.msra.gmra.mxu1 %v15547_v6  ;;  %10530 = vmatmul.mubr.bf16.vlgmr.msra.gmra.mxu0 %v15547_v6 }
0x116b   :  { %10539 = vmatpush1.bf16.msra.mxu1 %v13496_v46  ;;  %10570 = vmatprep.mubr.bf16.mxu1 %v15549_v8  ;;  %v4510_v46 = vld [vmem:[#allocation8 + $0x20c0] sm:$0xff] }
0x116c   :  { %10580 = vmatpush1.bf16.msra.mxu0 %v13498_v34  ;;  %10611 = vmatprep.mubr.bf16.mxu0 %v15549_v8  ;;  %v4475_v34 = vld [vmem:[#allocation8 + $0x1fa8] sm:$0xff]  ;;  %v14001_v49 = vcombine.high %v4474_v33, %v4510_v46 }
0x116d   :  { %10540 = vmatprep.subr.bf16.mxu1 %v13425_v47  ;;  %10581 = vmatprep.subr.bf16.mxu0 %v13427_v21  ;;  %v4511_v47 = vld [vmem:[#allocation8 + $0x20c8] sm:$0xff]  ;;  %v14072_v21 = vcombine.low %v4546_v40, %v4582_v39 }
0x116e   :  { %v14003_v50 = vcombine.high %v4475_v34, %v4511_v47  ;;  %v14002_v56 = vcombine.low %v4475_v34, %v4511_v47  ;;  %v3900_v47 = vld [vmem:[#allocation8 + $0xdb0] sm:$0xff] }
0x116f   :  { %10541 = vmatpush1.bf16.msra.mxu1 %v13424_v31  ;;  %v4438_v31 = vld [vmem:[#allocation8 + $0x1e80] sm:$0xff] }
0x1170   :  { %10582 = vmatpush1.bf16.msra.mxu0 %v13426_v52  ;;  %10542 = vmatprep.subr.bf16.mxu1 %v13353_v54  ;;  %v4403_v52 = vld [vmem:[#allocation8 + $0x1d68] sm:$0xff]  ;;  %v13929_v57 = vcombine.high %v4402_v51, %v4438_v31 }
0x1171   :  { %10583 = vmatprep.subr.bf16.mxu0 %v13355_v55  ;;  %v4439_v54 = vld [vmem:[#allocation8 + $0x1e88] sm:$0xff]  ;;  %v14000_v55 = vcombine.low %v4474_v33, %v4510_v46 }
0x1172   :  { %v13931_v58 = vcombine.high %v4403_v52, %v4439_v54  ;;  %v13930_v14 = vcombine.low %v4403_v52, %v4439_v54  ;;  %v3828_v52 = vld [vmem:[#allocation8 + $0xb70] sm:$0xff] }
0x1173   :  { %10543 = vmatpush1.bf16.msra.mxu1 %v13352_v61  ;;  %v4366_v61 = vld [vmem:[#allocation8 + $0x1c40] sm:$0xff]  ;;  %v3864_v54 = vld [vmem:[#allocation8 + $0xc90] sm:$0xff] }
0x1174   :  { %10584 = vmatpush1.bf16.msra.mxu0 %v13354_v62  ;;  %10544 = vmatprep.subr.bf16.mxu1 %v13281_v0  ;;  %v4331_v62 = vld [vmem:[#allocation8 + $0x1b28] sm:$0xff]  ;;  %v13857_v4 = vcombine.high %v4330_v59, %v4366_v61 }
0x1175   :  { %10585 = vmatprep.subr.bf16.mxu0 %v13283_v13  ;;  %v4367_v0 = vld [vmem:[#allocation8 + $0x1c48] sm:$0xff]  ;;  %v13928_v13 = vcombine.low %v4402_v51, %v4438_v31 }
0x1176   :  { %v13859_v2 = vcombine.high %v4331_v62, %v4367_v0  ;;  %v13858_v5 = vcombine.low %v4331_v62, %v4367_v0  ;;  %v3756_v0 = vld [vmem:[#allocation8 + $0x930] sm:$0xff] }
0x1177   :  { %10545 = vmatpush1.bf16.msra.mxu1 %v13280_v7  ;;  %v4294_v7 = vld [vmem:[#allocation8 + $0x1a00] sm:$0xff] }
0x1178   :  { %10586 = vmatpush1.bf16.msra.mxu0 %v13282_v9  ;;  %10546 = vmatprep.subr.bf16.mxu1 %v13209_v10  ;;  %v4259_v9 = vld [vmem:[#allocation8 + $0x18e8] sm:$0xff]  ;;  %v13785_v11 = vcombine.high %v4258_v3, %v4294_v7 }
0x1179   :  { %10587 = vmatprep.subr.bf16.mxu0 %v13211_v1  ;;  %v4295_v10 = vld [vmem:[#allocation8 + $0x1a08] sm:$0xff]  ;;  %v13856_v1 = vcombine.low %v4330_v59, %v4366_v61  ;;  %v13357_v61 = vcombine.high %v3828_v52, %v3864_v54 }
0x117a   :  { %v13787_v12 = vcombine.high %v4259_v9, %v4295_v10  ;;  %v13786_v20 = vcombine.low %v4259_v9, %v4295_v10  ;;  %v3684_v10 = vld [vmem:[#allocation8 + $0x6f0] sm:$0xff] }
0x117b   :  { %10547 = vmatpush1.bf16.msra.mxu1 %v13208_v17  ;;  %v4222_v17 = vld [vmem:[#allocation8 + $0x17c0] sm:$0xff] }
0x117c   :  { %10588 = vmatpush1.bf16.msra.mxu0 %v13210_v63  ;;  %10548 = vmatprep.subr.bf16.mxu1 %v13137_v18  ;;  %v4187_v63 = vld [vmem:[#allocation8 + $0x16a8] sm:$0xff]  ;;  %v13713_v22 = vcombine.high %v4186_v15, %v4222_v17 }
0x117d   :  { %10589 = vmatprep.subr.bf16.mxu0 %v13139_v19  ;;  %v4223_v18 = vld [vmem:[#allocation8 + $0x17c8] sm:$0xff]  ;;  %v13784_v19 = vcombine.low %v4258_v3, %v4294_v7 }
0x117e   :  { %v13715_v23 = vcombine.high %v4187_v63, %v4223_v18  ;;  %v13714_v29 = vcombine.low %v4187_v63, %v4223_v18  ;;  %v3612_v18 = vld [vmem:[#allocation8 + $0x4b0] sm:$0xff] }
0x117f   :  { %10549 = vmatpush1.bf16.msra.mxu1 %v13136_v25  ;;  %v4150_v25 = vld [vmem:[#allocation8 + $0x1580] sm:$0xff] }
0x1180   :  { %10590 = vmatpush1.bf16.msra.mxu0 %v13138_v26  ;;  %10550 = vmatprep.subr.bf16.mxu1 %v13065_v27  ;;  %v4115_v26 = vld [vmem:[#allocation8 + $0x1468] sm:$0xff]  ;;  %v13641_v30 = vcombine.high %v4114_v24, %v4150_v25 }
0x1181   :  { %10591 = vmatprep.subr.bf16.mxu0 %v13067_v44  ;;  %v4151_v27 = vld [vmem:[#allocation8 + $0x1588] sm:$0xff]  ;;  %v13712_v44 = vcombine.low %v4186_v15, %v4222_v17 }
0x1182   :  { %v13643_v32 = vcombine.high %v4115_v26, %v4151_v27  ;;  %v13642_v40 = vcombine.low %v4115_v26, %v4151_v27  ;;  %v3540_v27 = vld [vmem:[#allocation8 + $0x270] sm:$0xff] }
0x1183   :  { %10551 = vmatpush1.bf16.msra.mxu1 %v13064_v35  ;;  %v4078_v35 = vld [vmem:[#allocation8 + $0x1340] sm:$0xff] }
0x1184   :  { %10592 = vmatpush1.bf16.msra.mxu0 %v13066_v36  ;;  %10552 = vmatprep.subr.bf16.mxu1 %v12993_v37  ;;  %v4043_v36 = vld [vmem:[#allocation8 + $0x1228] sm:$0xff]  ;;  %v13569_v39 = vcombine.high %v4042_v28, %v4078_v35 }
0x1185   :  { %10593 = vmatprep.subr.bf16.mxu0 %v12995_v38  ;;  %v4079_v37 = vld [vmem:[#allocation8 + $0x1348] sm:$0xff]  ;;  %v13640_v38 = vcombine.low %v4114_v24, %v4150_v25 }
0x1186   :  { %v13571_v41 = vcombine.high %v4043_v36, %v4079_v37  ;;  %v13570_v33 = vcombine.low %v4043_v36, %v4079_v37  ;;  %v3468_v37 = vld [vmem:[#allocation8 + $0x30] sm:$0xff] }
0x1187   :  { %10553 = vmatpush1.bf16.msra.mxu1 %v12992_v42  ;;  %v4008_v42 = vld [vmem:[#allocation8 + $0x1110] sm:$0xff] }
0x1188   :  { %10594 = vmatpush1.bf16.msra.mxu0 %v12994_v60  ;;  %10554 = vmatprep.subr.bf16.mxu1 %v14073_v43  ;;  %v3973_v60 = vld [vmem:[#allocation8 + $0xff8] sm:$0xff]  ;;  %v13501_v46 = vcombine.high %v3972_v53, %v4008_v42 }
0x1189   :  { %10595 = vmatprep.subr.bf16.mxu0 %v14075_v45  ;;  %v4009_v43 = vld [vmem:[#allocation8 + $0x1118] sm:$0xff]  ;;  %v13568_v45 = vcombine.low %v4042_v28, %v4078_v35 }
0x118a   :  { %v13503_v34 = vcombine.high %v3973_v60, %v4009_v43  ;;  %v13502_v51 = vcombine.low %v3973_v60, %v4009_v43  ;;  %v4548_v43 = vld [vmem:[#allocation8 + $0x21f0] sm:$0xff] }
0x118b   :  { %10555 = vmatpush2.bf16.msra.mxu1 %v14072_v21  ;;  %v3936_v21 = vld [vmem:[#allocation8 + $0xed0] sm:$0xff] }
0x118c   :  { %10596 = vmatpush2.bf16.msra.mxu0 %v14074_v48  ;;  %10556 = vmatprep.subr.bf16.mxu1 %v14001_v49  ;;  %v13500_v48 = vcombine.low %v3972_v53, %v4008_v42  ;;  %v3901_v49 = vld [vmem:[#allocation8 + $0xdb8] sm:$0xff]  ;;  %v13429_v31 = vcombine.high %v3900_v47, %v3936_v21 }
0x118d   :  { %10597 = vmatprep.subr.bf16.mxu0 %v14003_v50  ;;  %v3937_v50 = vld [vmem:[#allocation8 + $0xed8] sm:$0xff] }
0x118e   :  { %v13430_v59 = vcombine.low %v3901_v49, %v3937_v50 }
0x118f   :  { %10557 = vmatpush2.bf16.msra.mxu1 %v14000_v55  ;;  %v13431_v55 = vcombine.high %v3901_v49, %v3937_v50  ;;  %v4476_v49 = vld [vmem:[#allocation8 + $0x1fb0] sm:$0xff] }
0x1190   :  { %10598 = vmatpush2.bf16.msra.mxu0 %v14002_v56  ;;  %10558 = vmatprep.subr.bf16.mxu1 %v13929_v57  ;;  %v3829_v56 = vld [vmem:[#allocation8 + $0xb78] sm:$0xff]  ;;  %v4512_v50 = vld [vmem:[#allocation8 + $0x20d0] sm:$0xff] }
0x1191   :  { %10599 = vmatprep.subr.bf16.mxu0 %v13931_v58  ;;  %v3865_v57 = vld [vmem:[#allocation8 + $0xc98] sm:$0xff]  ;;  %v13428_v58 = vcombine.low %v3900_v47, %v3936_v21 }
0x1192   :  { %v13359_v62 = vcombine.high %v3829_v56, %v3865_v57  ;;  %v13358_v3 = vcombine.low %v3829_v56, %v3865_v57  ;;  %v4404_v57 = vld [vmem:[#allocation8 + $0x1d70] sm:$0xff] }
0x1193   :  { %10559 = vmatpush2.bf16.msra.mxu1 %v13928_v13  ;;  %v3792_v13 = vld [vmem:[#allocation8 + $0xa50] sm:$0xff] }
0x1194   :  { %10600 = vmatpush2.bf16.msra.mxu0 %v13930_v14  ;;  %10560 = vmatprep.subr.bf16.mxu1 %v13857_v4  ;;  %v3757_v14 = vld [vmem:[#allocation8 + $0x938] sm:$0xff]  ;;  %v13285_v7 = vcombine.high %v3756_v0, %v3792_v13 }
0x1195   :  { %10601 = vmatprep.subr.bf16.mxu0 %v13859_v2  ;;  %v3793_v4 = vld [vmem:[#allocation8 + $0xa58] sm:$0xff]  ;;  %v13356_v2 = vcombine.low %v3828_v52, %v3864_v54 }
0x1196   :  { %v13287_v9 = vcombine.high %v3757_v14, %v3793_v4  ;;  %v13286_v15 = vcombine.low %v3757_v14, %v3793_v4  ;;  %v4332_v4 = vld [vmem:[#allocation8 + $0x1b30] sm:$0xff] }
0x1197   :  { %10561 = vmatpush2.bf16.msra.mxu1 %v13856_v1  ;;  %v3720_v1 = vld [vmem:[#allocation8 + $0x810] sm:$0xff] }
0x1198   :  { %10602 = vmatpush2.bf16.msra.mxu0 %v13858_v5  ;;  %10562 = vmatprep.subr.bf16.mxu1 %v13785_v11  ;;  %v3685_v5 = vld [vmem:[#allocation8 + $0x6f8] sm:$0xff]  ;;  %v13213_v17 = vcombine.high %v3684_v10, %v3720_v1 }
0x1199   :  { %10603 = vmatprep.subr.bf16.mxu0 %v13787_v12  ;;  %v3721_v11 = vld [vmem:[#allocation8 + $0x818] sm:$0xff]  ;;  %v13284_v12 = vcombine.low %v3756_v0, %v3792_v13 }
0x119a   :  { %v13215_v63 = vcombine.high %v3685_v5, %v3721_v11  ;;  %v13214_v24 = vcombine.low %v3685_v5, %v3721_v11  ;;  %v4260_v11 = vld [vmem:[#allocation8 + $0x18f0] sm:$0xff] }
0x119b   :  { %10563 = vmatpush2.bf16.msra.mxu1 %v13784_v19  ;;  %v3648_v19 = vld [vmem:[#allocation8 + $0x5d0] sm:$0xff] }
0x119c   :  { %10604 = vmatpush2.bf16.msra.mxu0 %v13786_v20  ;;  %10564 = vmatprep.subr.bf16.mxu1 %v13713_v22  ;;  %v3613_v20 = vld [vmem:[#allocation8 + $0x4b8] sm:$0xff]  ;;  %v13141_v25 = vcombine.high %v3612_v18, %v3648_v19 }
0x119d   :  { %10605 = vmatprep.subr.bf16.mxu0 %v13715_v23  ;;  %v3649_v22 = vld [vmem:[#allocation8 + $0x5d8] sm:$0xff]  ;;  %v13212_v23 = vcombine.low %v3684_v10, %v3720_v1 }
0x119e   :  { %v13143_v26 = vcombine.high %v3613_v20, %v3649_v22  ;;  %v13142_v28 = vcombine.low %v3613_v20, %v3649_v22  ;;  %v4188_v22 = vld [vmem:[#allocation8 + $0x16b0] sm:$0xff] }
0x119f   :  { %10565 = vmatpush2.bf16.msra.mxu1 %v13712_v44  ;;  %v3576_v44 = vld [vmem:[#allocation8 + $0x390] sm:$0xff] }
0x11a0   :  { %10606 = vmatpush2.bf16.msra.mxu0 %v13714_v29  ;;  %10566 = vmatprep.subr.bf16.mxu1 %v13641_v30  ;;  %v3541_v29 = vld [vmem:[#allocation8 + $0x278] sm:$0xff]  ;;  %v13069_v35 = vcombine.high %v3540_v27, %v3576_v44 }
0x11a1   :  { %10607 = vmatprep.subr.bf16.mxu0 %v13643_v32  ;;  %v3577_v30 = vld [vmem:[#allocation8 + $0x398] sm:$0xff]  ;;  %v13140_v32 = vcombine.low %v3612_v18, %v3648_v19 }
0x11a2   :  { %v13071_v36 = vcombine.high %v3541_v29, %v3577_v30  ;;  %v13070_v53 = vcombine.low %v3541_v29, %v3577_v30  ;;  %v4116_v30 = vld [vmem:[#allocation8 + $0x1470] sm:$0xff] }
0x11a3   :  { %10567 = vmatpush2.bf16.msra.mxu1 %v13640_v38  ;;  %v3504_v38 = vld [vmem:[#allocation8 + $0x150] sm:$0xff] }
0x11a4   :  { %10608 = vmatpush2.bf16.msra.mxu0 %v13642_v40  ;;  %10568 = vmatprep.subr.bf16.mxu1 %v13569_v39  ;;  %v3469_v40 = vld [vmem:[#allocation8 + $0x38] sm:$0xff]  ;;  %v12997_v42 = vcombine.high %v3468_v37, %v3504_v38 }
0x11a5   :  { %10609 = vmatprep.subr.bf16.mxu0 %v13571_v41  ;;  %v3505_v39 = vld [vmem:[#allocation8 + $0x158] sm:$0xff]  ;;  %v13068_v41 = vcombine.low %v3540_v27, %v3576_v44 }
0x11a6   :  { %v12999_v60 = vcombine.high %v3469_v40, %v3505_v39  ;;  %v12998_v47 = vcombine.low %v3469_v40, %v3505_v39  ;;  %v4044_v39 = vld [vmem:[#allocation8 + $0x1230] sm:$0xff] }
0x11a7   :  { %10569 = vmatpush2.bf16.msra.mxu1 %v13568_v45  ;;  %v4584_v45 = vld [vmem:[#allocation8 + $0x2310] sm:$0xff] }
0x11a8   :  { %10610 = vmatpush2.bf16.msra.mxu0 %v13570_v33  ;;  %10620 = vmatprep.subr.bf16.mxu1 %v13501_v46  ;;  %v4549_v33 = vld [vmem:[#allocation8 + $0x21f8] sm:$0xff]  ;;  %v14077_v21 = vcombine.high %v4548_v43, %v4584_v45  ;;  %v14076_v52 = vcombine.low %v4548_v43, %v4584_v45 }
0x11a9   :  { %10661 = vmatprep.subr.bf16.mxu0 %v13503_v34  ;;  %v4585_v46 = vld [vmem:[#allocation8 + $0x2318] sm:$0xff]  ;;  %v12996_v34 = vcombine.low %v3468_v37, %v3504_v38 }
0x11aa   :  { %10571 = vmatmul.mubr.bf16.vlgmr.msra.gmra.mxu1 %v15547_v6  ;;  %v14078_v54 = vcombine.low %v4549_v33, %v4585_v46 }
0x11ab   :  { %10612 = vmatmul.mubr.bf16.vlgmr.msra.gmra.mxu0 %v15547_v6  ;;  %10621 = vmatpush1.bf16.msra.mxu1 %v13500_v48  ;;  %v14079_v48 = vcombine.high %v4549_v33, %v4585_v46  ;;  %v3974_v46 = vld [vmem:[#allocation8 + $0x1000] sm:$0xff] }
0x11ac   :  { %10652 = vmatprep.mubr.bf16.mxu1 %v15549_v8  ;;  %10662 = vmatpush1.bf16.msra.mxu0 %v13502_v51  ;;  %v4477_v51 = vld [vmem:[#allocation8 + $0x1fb8] sm:$0xff] }
0x11ad   :  { %10693 = vmatprep.mubr.bf16.mxu0 %v15549_v8  ;;  %10622 = vmatprep.subr.bf16.mxu1 %v13429_v31  ;;  %v4513_v31 = vld [vmem:[#allocation8 + $0x20d8] sm:$0xff] }
0x11ae   :  { %10663 = vmatprep.subr.bf16.mxu0 %v13431_v55  ;;  %v14005_v55 = vcombine.high %v4476_v49, %v4512_v50  ;;  %v14007_v56 = vcombine.high %v4477_v51, %v4513_v31  ;;  %v14006_v0 = vcombine.low %v4477_v51, %v4513_v31  ;;  %v3902_v31 = vld [vmem:[#allocation8 + $0xdc0] sm:$0xff] }
0x11af   :  { %10623 = vmatpush1.bf16.msra.mxu1 %v13428_v58  ;;  %v4440_v58 = vld [vmem:[#allocation8 + $0x1e90] sm:$0xff] }
0x11b0   :  { %10664 = vmatpush1.bf16.msra.mxu0 %v13430_v59  ;;  %10624 = vmatprep.subr.bf16.mxu1 %v13357_v61  ;;  %v4405_v59 = vld [vmem:[#allocation8 + $0x1d78] sm:$0xff]  ;;  %v13933_v13 = vcombine.high %v4404_v57, %v4440_v58 }
0x11b1   :  { %10665 = vmatprep.subr.bf16.mxu0 %v13359_v62  ;;  %v4441_v61 = vld [vmem:[#allocation8 + $0x1e98] sm:$0xff]  ;;  %v14004_v62 = vcombine.low %v4476_v49, %v4512_v50 }
0x11b2   :  { %v13935_v14 = vcombine.high %v4405_v59, %v4441_v61  ;;  %v13934_v10 = vcombine.low %v4405_v59, %v4441_v61  ;;  %v3830_v59 = vld [vmem:[#allocation8 + $0xb80] sm:$0xff] }
0x11b3   :  { %10625 = vmatpush1.bf16.msra.mxu1 %v13356_v2  ;;  %v4368_v2 = vld [vmem:[#allocation8 + $0x1c50] sm:$0xff]  ;;  %v3866_v61 = vld [vmem:[#allocation8 + $0xca0] sm:$0xff] }
0x11b4   :  { %10666 = vmatpush1.bf16.msra.mxu0 %v13358_v3  ;;  %10626 = vmatprep.subr.bf16.mxu1 %v13285_v7  ;;  %v4333_v3 = vld [vmem:[#allocation8 + $0x1b38] sm:$0xff]  ;;  %v13861_v1 = vcombine.high %v4332_v4, %v4368_v2 }
0x11b5   :  { %10667 = vmatprep.subr.bf16.mxu0 %v13287_v9  ;;  %v4369_v7 = vld [vmem:[#allocation8 + $0x1c58] sm:$0xff]  ;;  %v13932_v9 = vcombine.low %v4404_v57, %v4440_v58 }
0x11b6   :  { %v13863_v5 = vcombine.high %v4333_v3, %v4369_v7  ;;  %v13862_v18 = vcombine.low %v4333_v3, %v4369_v7 }
0x11b7   :  { %10627 = vmatpush1.bf16.msra.mxu1 %v13284_v12  ;;  %v4296_v12 = vld [vmem:[#allocation8 + $0x1a10] sm:$0xff] }
0x11b8   :  { %10668 = vmatpush1.bf16.msra.mxu0 %v13286_v15  ;;  %10628 = vmatprep.subr.bf16.mxu1 %v13213_v17  ;;  %v4261_v15 = vld [vmem:[#allocation8 + $0x18f8] sm:$0xff]  ;;  %v13789_v19 = vcombine.high %v4260_v11, %v4296_v12 }
0x11b9   :  { %10669 = vmatprep.subr.bf16.mxu0 %v13215_v63  ;;  %v4297_v17 = vld [vmem:[#allocation8 + $0x1a18] sm:$0xff]  ;;  %v13860_v63 = vcombine.low %v4332_v4, %v4368_v2  ;;  %v3867_v4 = vld [vmem:[#allocation8 + $0xca8] sm:$0xff] }
0x11ba   :  { %v13791_v20 = vcombine.high %v4261_v15, %v4297_v17  ;;  %v13790_v27 = vcombine.low %v4261_v15, %v4297_v17  ;;  %v3794_v15 = vld [vmem:[#allocation8 + $0xa60] sm:$0xff] }
0x11bb   :  { %10629 = vmatpush1.bf16.msra.mxu1 %v13212_v23  ;;  %v4224_v23 = vld [vmem:[#allocation8 + $0x17d0] sm:$0xff] }
0x11bc   :  { %10670 = vmatpush1.bf16.msra.mxu0 %v13214_v24  ;;  %10630 = vmatprep.subr.bf16.mxu1 %v13141_v25  ;;  %v4189_v24 = vld [vmem:[#allocation8 + $0x16b8] sm:$0xff]  ;;  %v13717_v44 = vcombine.high %v4188_v22, %v4224_v23 }
0x11bd   :  { %10671 = vmatprep.subr.bf16.mxu0 %v13143_v26  ;;  %v4225_v25 = vld [vmem:[#allocation8 + $0x17d8] sm:$0xff]  ;;  %v13788_v26 = vcombine.low %v4260_v11, %v4296_v12  ;;  %v3758_v12 = vld [vmem:[#allocation8 + $0x940] sm:$0xff] }
0x11be   :  { %v13719_v29 = vcombine.high %v4189_v24, %v4225_v25  ;;  %v13718_v37 = vcombine.low %v4189_v24, %v4225_v25  ;;  %v13289_v25 = vcombine.high %v3758_v12, %v3794_v15 }
0x11bf   :  { %10631 = vmatpush1.bf16.msra.mxu1 %v13140_v32  ;;  %v4152_v32 = vld [vmem:[#allocation8 + $0x1590] sm:$0xff] }
0x11c0   :  { %10672 = vmatpush1.bf16.msra.mxu0 %v13142_v28  ;;  %10632 = vmatprep.subr.bf16.mxu1 %v13069_v35  ;;  %v4117_v28 = vld [vmem:[#allocation8 + $0x1478] sm:$0xff]  ;;  %v13645_v38 = vcombine.high %v4116_v30, %v4152_v32 }
0x11c1   :  { %10673 = vmatprep.subr.bf16.mxu0 %v13071_v36  ;;  %v4153_v35 = vld [vmem:[#allocation8 + $0x1598] sm:$0xff]  ;;  %v13716_v36 = vcombine.low %v4188_v22, %v4224_v23 }
0x11c2   :  { %v13647_v40 = vcombine.high %v4117_v28, %v4153_v35  ;;  %v13646_v43 = vcombine.low %v4117_v28, %v4153_v35 }
0x11c3   :  { %10633 = vmatpush1.bf16.msra.mxu1 %v13068_v41  ;;  %v4080_v41 = vld [vmem:[#allocation8 + $0x1350] sm:$0xff] }
0x11c4   :  { %10674 = vmatpush1.bf16.msra.mxu0 %v13070_v53  ;;  %10634 = vmatprep.subr.bf16.mxu1 %v12997_v42  ;;  %v4045_v53 = vld [vmem:[#allocation8 + $0x1238] sm:$0xff]  ;;  %v13573_v45 = vcombine.high %v4044_v39, %v4080_v41 }
0x11c5   :  { %10675 = vmatprep.subr.bf16.mxu0 %v12999_v60  ;;  %v4081_v42 = vld [vmem:[#allocation8 + $0x1358] sm:$0xff]  ;;  %v13644_v60 = vcombine.low %v4116_v30, %v4152_v32  ;;  %v3723_v30 = vld [vmem:[#allocation8 + $0x828] sm:$0xff]  ;;  %v13288_v32 = vcombine.low %v3758_v12, %v3794_v15  ;;  %v4442_v12 = vld [vmem:[#allocation8 + $0x1ea0] sm:$0xff] }
0x11c6   :  { %v13575_v33 = vcombine.high %v4045_v53, %v4081_v42  ;;  %v13574_v49 = vcombine.low %v4045_v53, %v4081_v42  ;;  %v4407_v15 = vld [vmem:[#allocation8 + $0x1d88] sm:$0xff] }
0x11c7   :  { %10635 = vmatpush1.bf16.msra.mxu1 %v12996_v34  ;;  %v4010_v34 = vld [vmem:[#allocation8 + $0x1120] sm:$0xff] }
0x11c8   :  { %10676 = vmatpush1.bf16.msra.mxu0 %v12998_v47  ;;  %10636 = vmatprep.subr.bf16.mxu1 %v14077_v21  ;;  %v3975_v47 = vld [vmem:[#allocation8 + $0x1008] sm:$0xff]  ;;  %v13505_v50 = vcombine.high %v3974_v46, %v4010_v34 }
0x11c9   :  { %10677 = vmatprep.subr.bf16.mxu0 %v14079_v48  ;;  %v4011_v21 = vld [vmem:[#allocation8 + $0x1128] sm:$0xff]  ;;  %v13572_v48 = vcombine.low %v4044_v39, %v4080_v41 }
0x11ca   :  { %v13507_v51 = vcombine.high %v3975_v47, %v4011_v21  ;;  %v13506_v57 = vcombine.low %v3975_v47, %v4011_v21  ;;  %v3651_v39 = vld [vmem:[#allocation8 + $0x5e8] sm:$0xff] }
0x11cb   :  { %10637 = vmatpush2.bf16.msra.mxu1 %v14076_v52  ;;  %v3938_v52 = vld [vmem:[#allocation8 + $0xee0] sm:$0xff] }
0x11cc   :  { %10678 = vmatpush2.bf16.msra.mxu0 %v14078_v54  ;;  %10638 = vmatprep.subr.bf16.mxu1 %v14005_v55  ;;  %v13504_v54 = vcombine.low %v3974_v46, %v4010_v34  ;;  %v3903_v55 = vld [vmem:[#allocation8 + $0xdc8] sm:$0xff]  ;;  %v13433_v58 = vcombine.high %v3902_v31, %v3938_v52  ;;  %v13432_v2 = vcombine.low %v3902_v31, %v3938_v52 }
0x11cd   :  { %10679 = vmatprep.subr.bf16.mxu0 %v14007_v56  ;;  %v3939_v56 = vld [vmem:[#allocation8 + $0xee8] sm:$0xff] }
0x11ce   :  { %v3579_v46 = vld [vmem:[#allocation8 + $0x3a8] sm:$0xff] }
0x11cf   :  { %10639 = vmatpush2.bf16.msra.mxu1 %v14004_v62  ;;  %v3507_v31 = vld [vmem:[#allocation8 + $0x168] sm:$0xff] }
0x11d0   :  { %10680 = vmatpush2.bf16.msra.mxu0 %v14006_v0  ;;  %10640 = vmatprep.subr.bf16.mxu1 %v13933_v13  ;;  %v13435_v13 = vcombine.high %v3903_v55, %v3939_v56 }
0x11d1   :  { %10681 = vmatprep.subr.bf16.mxu0 %v13935_v14  ;;  %v3831_v14 = vld [vmem:[#allocation8 + $0xb88] sm:$0xff] }
0x11d2   :  { %v13363_v11 = vcombine.high %v3831_v14, %v3867_v4  ;;  %v13362_v24 = vcombine.low %v3831_v14, %v3867_v4  ;;  %v4478_v4 = vld [vmem:[#allocation8 + $0x1fc0] sm:$0xff] }
0x11d3   :  { %10641 = vmatpush2.bf16.msra.mxu1 %v13932_v9  ;;  %v13434_v9 = vcombine.low %v3903_v55, %v3939_v56 }
0x11d4   :  { %10682 = vmatpush2.bf16.msra.mxu0 %v13934_v10  ;;  %10642 = vmatprep.subr.bf16.mxu1 %v13861_v1  ;;  %v13361_v10 = vcombine.high %v3830_v59, %v3866_v61 }
0x11d5   :  { %10683 = vmatprep.subr.bf16.mxu0 %v13863_v5 }
0x11d7   :  { %10643 = vmatpush2.bf16.msra.mxu1 %v13860_v63 }
0x11d8   :  { %10684 = vmatpush2.bf16.msra.mxu0 %v13862_v18  ;;  %10644 = vmatprep.subr.bf16.mxu1 %v13789_v19  ;;  %v3759_v18 = vld [vmem:[#allocation8 + $0x948] sm:$0xff] }
0x11d9   :  { %10685 = vmatprep.subr.bf16.mxu0 %v13791_v20  ;;  %v3795_v19 = vld [vmem:[#allocation8 + $0xa68] sm:$0xff]  ;;  %v13360_v20 = vcombine.low %v3830_v59, %v3866_v61 }
0x11da   :  { %v13290_v28 = vcombine.low %v3759_v18, %v3795_v19  ;;  %v4551_v59 = vld [vmem:[#allocation8 + $0x2208] sm:$0xff] }
0x11db   :  { %10645 = vmatpush2.bf16.msra.mxu1 %v13788_v26  ;;  %v13291_v26 = vcombine.high %v3759_v18, %v3795_v19  ;;  %v4587_v61 = vld [vmem:[#allocation8 + $0x2328] sm:$0xff] }
0x11dc   :  { %10686 = vmatpush2.bf16.msra.mxu0 %v13790_v27  ;;  %10646 = vmatprep.subr.bf16.mxu1 %v13717_v44  ;;  %v3686_v27 = vld [vmem:[#allocation8 + $0x700] sm:$0xff]  ;;  %v14083_v14 = vcombine.high %v4551_v59, %v4587_v61 }
0x11dd   :  { %10687 = vmatprep.subr.bf16.mxu0 %v13719_v29  ;;  %v3722_v44 = vld [vmem:[#allocation8 + $0x820] sm:$0xff]  ;;  %v3687_v29 = vld [vmem:[#allocation8 + $0x708] sm:$0xff] }
0x11de   :  { %v13217_v35 = vcombine.high %v3686_v27, %v3722_v44  ;;  %v13216_v41 = vcombine.low %v3686_v27, %v3722_v44  ;;  %v13218_v53 = vcombine.low %v3687_v29, %v3723_v30 }
0x11df   :  { %10647 = vmatpush2.bf16.msra.mxu1 %v13716_v36  ;;  %v13219_v36 = vcombine.high %v3687_v29, %v3723_v30  ;;  %v4262_v30 = vld [vmem:[#allocation8 + $0x1900] sm:$0xff] }
0x11e0   :  { %10688 = vmatpush2.bf16.msra.mxu0 %v13718_v37  ;;  %10648 = vmatprep.subr.bf16.mxu1 %v13645_v38  ;;  %v3614_v37 = vld [vmem:[#allocation8 + $0x4c0] sm:$0xff] }
0x11e1   :  { %10689 = vmatprep.subr.bf16.mxu0 %v13647_v40  ;;  %v3650_v38 = vld [vmem:[#allocation8 + $0x5e0] sm:$0xff]  ;;  %v3615_v40 = vld [vmem:[#allocation8 + $0x4c8] sm:$0xff] }
0x11e2   :  { %v13145_v42 = vcombine.high %v3614_v37, %v3650_v38  ;;  %v13144_v34 = vcombine.low %v3614_v37, %v3650_v38  ;;  %v13146_v47 = vcombine.low %v3615_v40, %v3651_v39 }
0x11e3   :  { %10649 = vmatpush2.bf16.msra.mxu1 %v13644_v60  ;;  %v13147_v60 = vcombine.high %v3615_v40, %v3651_v39  ;;  %v4190_v39 = vld [vmem:[#allocation8 + $0x16c0] sm:$0xff] }
0x11e4   :  { %10690 = vmatpush2.bf16.msra.mxu0 %v13646_v43  ;;  %10650 = vmatprep.subr.bf16.mxu1 %v13573_v45  ;;  %v3542_v43 = vld [vmem:[#allocation8 + $0x280] sm:$0xff] }
0x11e5   :  { %10691 = vmatprep.subr.bf16.mxu0 %v13575_v33  ;;  %v3578_v45 = vld [vmem:[#allocation8 + $0x3a0] sm:$0xff]  ;;  %v3543_v33 = vld [vmem:[#allocation8 + $0x288] sm:$0xff] }
0x11e6   :  { %v13073_v21 = vcombine.high %v3542_v43, %v3578_v45  ;;  %v13072_v52 = vcombine.low %v3542_v43, %v3578_v45 }
0x11e7   :  { %10651 = vmatpush2.bf16.msra.mxu1 %v13572_v48  ;;  %v13075_v48 = vcombine.high %v3543_v33, %v3579_v46 }
0x11e8   :  { %10692 = vmatpush2.bf16.msra.mxu0 %v13574_v49  ;;  %10702 = vmatprep.subr.bf16.mxu1 %v13505_v50  ;;  %v3470_v49 = vld [vmem:[#allocation8 + $0x40] sm:$0xff] }
0x11e9   :  { %10743 = vmatprep.subr.bf16.mxu0 %v13507_v51  ;;  %v3506_v50 = vld [vmem:[#allocation8 + $0x160] sm:$0xff]  ;;  %v3471_v51 = vld [vmem:[#allocation8 + $0x48] sm:$0xff] }
0x11ea   :  { %10653 = vmatmul.mubr.bf16.vlgmr.msra.gmra.mxu1 %v15547_v6  ;;  %v10408_v62 = vpop.f32.mrf.mxu1  ;;  %v10449_v0 = vpop.f32.mrf.mxu0  ;;  %v13001_v55 = vcombine.high %v3470_v49, %v3506_v50  ;;  %v13003_v56 = vcombine.high %v3471_v51, %v3507_v31 }
0x11eb   :  { %10694 = vmatmul.mubr.bf16.vlgmr.msra.gmra.mxu0 %v15547_v6  ;;  %10703 = vmatpush1.bf16.msra.mxu1 %v13504_v54  ;;  %v13074_v54 = vcombine.low %v3543_v33, %v3579_v46  ;;  %v4118_v46 = vld [vmem:[#allocation8 + $0x1480] sm:$0xff] }
0x11ec   :  { %10734 = vmatprep.mubr.bf16.mxu1 %v15549_v8  ;;  %10744 = vmatpush1.bf16.msra.mxu0 %v13506_v57  ;;  %v10410_v3 = vpop.f32.mrf.mxu1  ;;  %v10451_v7 = vpop.f32.mrf.mxu0  ;;  %v4550_v57 = vld [vmem:[#allocation8 + $0x2200] sm:$0xff] }
0x11ed   :  { %10775 = vmatprep.mubr.bf16.mxu0 %v15549_v8  ;;  %v14279_v1 = vpack.c.bf16 %v10410_v3, %v10408_v62  ;;  %v14280_v5 = vpack.c.bf16 %v10451_v7, %v10449_v0  ;;  %10704 = vmatprep.subr.bf16.mxu1 %v13433_v58  ;;  %v4586_v58 = vld [vmem:[#allocation8 + $0x2320] sm:$0xff]  ;;  %v13000_v62 = vcombine.low %v3470_v49, %v3506_v50  ;;  %v4479_v3 = vld [vmem:[#allocation8 + $0x1fc8] sm:$0xff] }
0x11ee   :  { %10745 = vmatprep.subr.bf16.mxu0 %v13435_v13  ;;  %v10412_v17 = vpop.f32.mrf.mxu1  ;;  %v10453_v63 = vpop.f32.mrf.mxu0  ;;  %v13002_v0 = vcombine.low %v3471_v51, %v3507_v31  ;;  %v14081_v13 = vcombine.high %v4550_v57, %v4586_v58  ;;  %v4515_v7 = vld [vmem:[#allocation8 + $0x20e8] sm:$0xff]  ;;  %v4046_v31 = vld [vmem:[#allocation8 + $0x1240] sm:$0xff] }
0x11ef   :  { %11946 = vst [vmem:[#allocation2] sm:$0xff] %v14279_v1  ;;  %11947 = vst [vmem:[#allocation2 + $0x8] sm:$0xff] %v14280_v5  ;;  %10705 = vmatpush1.bf16.msra.mxu1 %v13432_v2  ;;  %v4514_v2 = vld [vmem:[#allocation8 + $0x20e0] sm:$0xff]  ;;  %v14011_v5 = vcombine.high %v4479_v3, %v4515_v7  ;;  %v4443_v17 = vld [vmem:[#allocation8 + $0x1ea8] sm:$0xff]  ;;  %v14010_v18 = vcombine.low %v4479_v3, %v4515_v7 }
0x11f0   :  { %10746 = vmatpush1.bf16.msra.mxu0 %v13434_v9  ;;  %v10413_v22 = vpop.f32.mrf.mxu1  ;;  %v10454_v23 = vpop.f32.mrf.mxu0  ;;  %10706 = vmatprep.subr.bf16.mxu1 %v13361_v10  ;;  %v14080_v9 = vcombine.low %v4550_v57, %v4586_v58  ;;  %v14082_v10 = vcombine.low %v4551_v59, %v4587_v61  ;;  %v14009_v1 = vcombine.high %v4478_v4, %v4514_v2  ;;  %v3976_v61 = vld [vmem:[#allocation8 + $0x1010] sm:$0xff] }
0x11f1   :  { %10747 = vmatprep.subr.bf16.mxu0 %v13363_v11  ;;  %v4406_v11 = vld [vmem:[#allocation8 + $0x1d80] sm:$0xff]  ;;  %v14008_v63 = vcombine.low %v4478_v4, %v4514_v2  ;;  %v13938_v27 = vcombine.low %v4407_v15, %v4443_v17  ;;  %v3904_v7 = vld [vmem:[#allocation8 + $0xdd0] sm:$0xff] }
0x11f2   :  { %v13937_v19 = vcombine.high %v4406_v11, %v4442_v12  ;;  %v4334_v22 = vld [vmem:[#allocation8 + $0x1b40] sm:$0xff] }
0x11f3   :  { %10707 = vmatpush1.bf16.msra.mxu1 %v13360_v20  ;;  %v13939_v20 = vcombine.high %v4407_v15, %v4443_v17  ;;  %v4370_v23 = vld [vmem:[#allocation8 + $0x1c60] sm:$0xff]  ;;  %v3832_v15 = vld [vmem:[#allocation8 + $0xb90] sm:$0xff] }
0x11f4   :  { %10748 = vmatpush1.bf16.msra.mxu0 %v13362_v24  ;;  %10708 = vmatprep.subr.bf16.mxu1 %v13289_v25  ;;  %v4335_v24 = vld [vmem:[#allocation8 + $0x1b48] sm:$0xff]  ;;  %v13865_v44 = vcombine.high %v4334_v22, %v4370_v23  ;;  %v3868_v17 = vld [vmem:[#allocation8 + $0xcb0] sm:$0xff] }
0x11f5   :  { %10749 = vmatprep.subr.bf16.mxu0 %v13291_v26  ;;  %v4371_v25 = vld [vmem:[#allocation8 + $0x1c68] sm:$0xff]  ;;  %v13936_v26 = vcombine.low %v4406_v11, %v4442_v12 }
0x11f6   :  { %v13867_v29 = vcombine.high %v4335_v24, %v4371_v25  ;;  %v13866_v37 = vcombine.low %v4335_v24, %v4371_v25 }
0x11f7   :  { %10709 = vmatpush1.bf16.msra.mxu1 %v13288_v32  ;;  %v4298_v32 = vld [vmem:[#allocation8 + $0x1a20] sm:$0xff] }
0x11f8   :  { %10750 = vmatpush1.bf16.msra.mxu0 %v13290_v28  ;;  %10710 = vmatprep.subr.bf16.mxu1 %v13217_v35  ;;  %v4263_v28 = vld [vmem:[#allocation8 + $0x1908] sm:$0xff]  ;;  %v13793_v38 = vcombine.high %v4262_v30, %v4298_v32 }
0x11f9   :  { %10751 = vmatprep.subr.bf16.mxu0 %v13219_v36  ;;  %v4299_v35 = vld [vmem:[#allocation8 + $0x1a28] sm:$0xff]  ;;  %v13864_v36 = vcombine.low %v4334_v22, %v4370_v23  ;;  %v3869_v22 = vld [vmem:[#allocation8 + $0xcb8] sm:$0xff] }
0x11fa   :  { %v13795_v40 = vcombine.high %v4263_v28, %v4299_v35  ;;  %v13794_v43 = vcombine.low %v4263_v28, %v4299_v35  ;;  %v3796_v28 = vld [vmem:[#allocation8 + $0xa70] sm:$0xff] }
0x11fb   :  { %10711 = vmatpush1.bf16.msra.mxu1 %v13216_v41  ;;  %v4226_v41 = vld [vmem:[#allocation8 + $0x17e0] sm:$0xff] }
0x11fc   :  { %10752 = vmatpush1.bf16.msra.mxu0 %v13218_v53  ;;  %10712 = vmatprep.subr.bf16.mxu1 %v13145_v42  ;;  %v4191_v53 = vld [vmem:[#allocation8 + $0x16c8] sm:$0xff]  ;;  %v13721_v45 = vcombine.high %v4190_v39, %v4226_v41 }
0x11fd   :  { %10753 = vmatprep.subr.bf16.mxu0 %v13147_v60  ;;  %v4227_v42 = vld [vmem:[#allocation8 + $0x17e8] sm:$0xff]  ;;  %v13792_v60 = vcombine.low %v4262_v30, %v4298_v32  ;;  %v3760_v32 = vld [vmem:[#allocation8 + $0x950] sm:$0xff] }
0x11fe   :  { %v13723_v33 = vcombine.high %v4191_v53, %v4227_v42  ;;  %v13722_v49 = vcombine.low %v4191_v53, %v4227_v42  ;;  %v13293_v42 = vcombine.high %v3760_v32, %v3796_v28 }
0x11ff   :  { %10713 = vmatpush1.bf16.msra.mxu1 %v13144_v34  ;;  %v4154_v34 = vld [vmem:[#allocation8 + $0x15a0] sm:$0xff] }
0x1200   :  { %10754 = vmatpush1.bf16.msra.mxu0 %v13146_v47  ;;  %10714 = vmatprep.subr.bf16.mxu1 %v13073_v21  ;;  %v4119_v47 = vld [vmem:[#allocation8 + $0x1488] sm:$0xff]  ;;  %v13649_v50 = vcombine.high %v4118_v46, %v4154_v34 }
0x1201   :  { %10755 = vmatprep.subr.bf16.mxu0 %v13075_v48  ;;  %v4155_v21 = vld [vmem:[#allocation8 + $0x15a8] sm:$0xff]  ;;  %v13720_v48 = vcombine.low %v4190_v39, %v4226_v41 }
0x1202   :  { %v13651_v51 = vcombine.high %v4119_v47, %v4155_v21  ;;  %v13650_v57 = vcombine.low %v4119_v47, %v4155_v21 }
0x1203   :  { %10715 = vmatpush1.bf16.msra.mxu1 %v13072_v52  ;;  %v4082_v52 = vld [vmem:[#allocation8 + $0x1360] sm:$0xff] }
0x1204   :  { %10756 = vmatpush1.bf16.msra.mxu0 %v13074_v54  ;;  %10716 = vmatprep.subr.bf16.mxu1 %v13001_v55  ;;  %v4047_v54 = vld [vmem:[#allocation8 + $0x1248] sm:$0xff]  ;;  %v13577_v58 = vcombine.high %v4046_v31, %v4082_v52 }
0x1205   :  { %10757 = vmatprep.subr.bf16.mxu0 %v13003_v56  ;;  %v4083_v55 = vld [vmem:[#allocation8 + $0x1368] sm:$0xff]  ;;  %v13648_v56 = vcombine.low %v4118_v46, %v4154_v34  ;;  %v3725_v46 = vld [vmem:[#allocation8 + $0x838] sm:$0xff]  ;;  %v13292_v34 = vcombine.low %v3760_v32, %v3796_v28  ;;  %v4444_v32 = vld [vmem:[#allocation8 + $0x1eb0] sm:$0xff] }
0x1206   :  { %v13579_v59 = vcombine.high %v4047_v54, %v4083_v55  ;;  %v13578_v4 = vcombine.low %v4047_v54, %v4083_v55  ;;  %v4409_v28 = vld [vmem:[#allocation8 + $0x1d98] sm:$0xff] }
0x1207   :  { %10717 = vmatpush1.bf16.msra.mxu1 %v13000_v62  ;;  %v4012_v62 = vld [vmem:[#allocation8 + $0x1130] sm:$0xff] }
0x1208   :  { %10758 = vmatpush1.bf16.msra.mxu0 %v13002_v0  ;;  %10718 = vmatprep.subr.bf16.mxu1 %v14081_v13  ;;  %v3977_v0 = vld [vmem:[#allocation8 + $0x1018] sm:$0xff]  ;;  %v13509_v2 = vcombine.high %v3976_v61, %v4012_v62 }
0x1209   :  { %10759 = vmatprep.subr.bf16.mxu0 %v14083_v14  ;;  %v4013_v13 = vld [vmem:[#allocation8 + $0x1138] sm:$0xff]  ;;  %v13576_v14 = vcombine.low %v4046_v31, %v4082_v52 }
0x120a   :  { %v13511_v3 = vcombine.high %v3977_v0, %v4013_v13  ;;  %v13510_v11 = vcombine.low %v3977_v0, %v4013_v13  ;;  %v3653_v31 = vld [vmem:[#allocation8 + $0x5f8] sm:$0xff] }
0x120b   :  { %10719 = vmatpush2.bf16.msra.mxu1 %v14080_v9  ;;  %v3940_v9 = vld [vmem:[#allocation8 + $0xef0] sm:$0xff] }
0x120c   :  { %10760 = vmatpush2.bf16.msra.mxu0 %v14082_v10  ;;  %10720 = vmatprep.subr.bf16.mxu1 %v14009_v1  ;;  %v13508_v10 = vcombine.low %v3976_v61, %v4012_v62  ;;  %v3905_v1 = vld [vmem:[#allocation8 + $0xdd8] sm:$0xff]  ;;  %v13437_v12 = vcombine.high %v3904_v7, %v3940_v9  ;;  %v13436_v23 = vcombine.low %v3904_v7, %v3940_v9 }
0x120d   :  { %10761 = vmatprep.subr.bf16.mxu0 %v14011_v5  ;;  %v3941_v5 = vld [vmem:[#allocation8 + $0xef8] sm:$0xff] }
0x120e   :  { %v3581_v61 = vld [vmem:[#allocation8 + $0x3b8] sm:$0xff] }
0x120f   :  { %10721 = vmatpush2.bf16.msra.mxu1 %v14008_v63  ;;  %v3509_v7 = vld [vmem:[#allocation8 + $0x178] sm:$0xff] }
0x1210   :  { %10762 = vmatpush2.bf16.msra.mxu0 %v14010_v18  ;;  %10722 = vmatprep.subr.bf16.mxu1 %v13937_v19  ;;  %v13439_v19 = vcombine.high %v3905_v1, %v3941_v5 }
0x1211   :  { %10763 = vmatprep.subr.bf16.mxu0 %v13939_v20  ;;  %v3833_v20 = vld [vmem:[#allocation8 + $0xb98] sm:$0xff] }
0x1212   :  { %v13367_v30 = vcombine.high %v3833_v20, %v3869_v22  ;;  %v13366_v53 = vcombine.low %v3833_v20, %v3869_v22  ;;  %v4480_v22 = vld [vmem:[#allocation8 + $0x1fd0] sm:$0xff] }
0x1213   :  { %10723 = vmatpush2.bf16.msra.mxu1 %v13936_v26  ;;  %v13438_v26 = vcombine.low %v3905_v1, %v3941_v5 }
0x1214   :  { %10764 = vmatpush2.bf16.msra.mxu0 %v13938_v27  ;;  %10724 = vmatprep.subr.bf16.mxu1 %v13865_v44  ;;  %v13365_v27 = vcombine.high %v3832_v15, %v3868_v17 }
0x1215   :  { %10765 = vmatprep.subr.bf16.mxu0 %v13867_v29 }
0x1217   :  { %10725 = vmatpush2.bf16.msra.mxu1 %v13864_v36 }
0x1218   :  { %10766 = vmatpush2.bf16.msra.mxu0 %v13866_v37  ;;  %10726 = vmatprep.subr.bf16.mxu1 %v13793_v38  ;;  %v3761_v37 = vld [vmem:[#allocation8 + $0x958] sm:$0xff] }
0x1219   :  { %10767 = vmatprep.subr.bf16.mxu0 %v13795_v40  ;;  %v3797_v38 = vld [vmem:[#allocation8 + $0xa78] sm:$0xff]  ;;  %v13364_v40 = vcombine.low %v3832_v15, %v3868_v17 }
0x121a   :  { %v13294_v47 = vcombine.low %v3761_v37, %v3797_v38  ;;  %v4553_v15 = vld [vmem:[#allocation8 + $0x2218] sm:$0xff] }
0x121b   :  { %10727 = vmatpush2.bf16.msra.mxu1 %v13792_v60  ;;  %v13295_v60 = vcombine.high %v3761_v37, %v3797_v38  ;;  %v4589_v17 = vld [vmem:[#allocation8 + $0x2338] sm:$0xff] }
0x121c   :  { %10768 = vmatpush2.bf16.msra.mxu0 %v13794_v43  ;;  %10728 = vmatprep.subr.bf16.mxu1 %v13721_v45  ;;  %v3688_v43 = vld [vmem:[#allocation8 + $0x710] sm:$0xff]  ;;  %v14087_v20 = vcombine.high %v4553_v15, %v4589_v17 }
0x121d   :  { %10769 = vmatprep.subr.bf16.mxu0 %v13723_v33  ;;  %v3724_v45 = vld [vmem:[#allocation8 + $0x830] sm:$0xff]  ;;  %v3689_v33 = vld [vmem:[#allocation8 + $0x718] sm:$0xff] }
0x121e   :  { %v13221_v21 = vcombine.high %v3688_v43, %v3724_v45  ;;  %v13220_v52 = vcombine.low %v3688_v43, %v3724_v45  ;;  %v13222_v54 = vcombine.low %v3689_v33, %v3725_v46 }
0x121f   :  { %10729 = vmatpush2.bf16.msra.mxu1 %v13720_v48  ;;  %v13223_v48 = vcombine.high %v3689_v33, %v3725_v46  ;;  %v4264_v46 = vld [vmem:[#allocation8 + $0x1910] sm:$0xff] }
0x1220   :  { %10770 = vmatpush2.bf16.msra.mxu0 %v13722_v49  ;;  %10730 = vmatprep.subr.bf16.mxu1 %v13649_v50  ;;  %v3616_v49 = vld [vmem:[#allocation8 + $0x4d0] sm:$0xff] }
0x1221   :  { %10771 = vmatprep.subr.bf16.mxu0 %v13651_v51  ;;  %v3652_v50 = vld [vmem:[#allocation8 + $0x5f0] sm:$0xff]  ;;  %v3617_v51 = vld [vmem:[#allocation8 + $0x4d8] sm:$0xff] }
0x1222   :  { %v13149_v55 = vcombine.high %v3616_v49, %v3652_v50  ;;  %v13148_v62 = vcombine.low %v3616_v49, %v3652_v50  ;;  %v13150_v0 = vcombine.low %v3617_v51, %v3653_v31 }
0x1223   :  { %10731 = vmatpush2.bf16.msra.mxu1 %v13648_v56  ;;  %v13151_v56 = vcombine.high %v3617_v51, %v3653_v31  ;;  %v4192_v31 = vld [vmem:[#allocation8 + $0x16d0] sm:$0xff] }
0x1224   :  { %10772 = vmatpush2.bf16.msra.mxu0 %v13650_v57  ;;  %10732 = vmatprep.subr.bf16.mxu1 %v13577_v58  ;;  %v3544_v57 = vld [vmem:[#allocation8 + $0x290] sm:$0xff] }
0x1225   :  { %10773 = vmatprep.subr.bf16.mxu0 %v13579_v59  ;;  %v3580_v58 = vld [vmem:[#allocation8 + $0x3b0] sm:$0xff]  ;;  %v3545_v59 = vld [vmem:[#allocation8 + $0x298] sm:$0xff] }
0x1226   :  { %v13077_v13 = vcombine.high %v3544_v57, %v3580_v58  ;;  %v13076_v9 = vcombine.low %v3544_v57, %v3580_v58 }
0x1227   :  { %10733 = vmatpush2.bf16.msra.mxu1 %v13576_v14  ;;  %v13079_v14 = vcombine.high %v3545_v59, %v3581_v61 }
0x1228   :  { %10774 = vmatpush2.bf16.msra.mxu0 %v13578_v4  ;;  %10784 = vmatprep.subr.bf16.mxu1 %v13509_v2  ;;  %v3472_v4 = vld [vmem:[#allocation8 + $0x50] sm:$0xff] }
0x1229   :  { %10825 = vmatprep.subr.bf16.mxu0 %v13511_v3  ;;  %v3508_v2 = vld [vmem:[#allocation8 + $0x170] sm:$0xff]  ;;  %v3473_v3 = vld [vmem:[#allocation8 + $0x58] sm:$0xff] }
0x122a   :  { %v10490_v63 = vpop.f32.mrf.mxu1  ;;  %v10531_v18 = vpop.f32.mrf.mxu0  ;;  %10735 = vmatmul.mubr.bf16.vlgmr.msra.gmra.mxu1 %v15547_v6  ;;  %v13005_v1 = vcombine.high %v3472_v4, %v3508_v2  ;;  %v13007_v5 = vcombine.high %v3473_v3, %v3509_v7 }
0x122b   :  { %10776 = vmatmul.mubr.bf16.vlgmr.msra.gmra.mxu0 %v15547_v6  ;;  %10785 = vmatpush1.bf16.msra.mxu1 %v13508_v10  ;;  %v13078_v10 = vcombine.low %v3545_v59, %v3581_v61  ;;  %v4120_v61 = vld [vmem:[#allocation8 + $0x1490] sm:$0xff] }
0x122c   :  { %10816 = vmatprep.mubr.bf16.mxu1 %v15549_v8  ;;  %10826 = vmatpush1.bf16.msra.mxu0 %v13510_v11  ;;  %v10492_v24 = vpop.f32.mrf.mxu1  ;;  %v10533_v25 = vpop.f32.mrf.mxu0  ;;  %v4552_v11 = vld [vmem:[#allocation8 + $0x2210] sm:$0xff] }
0x122d   :  { %10857 = vmatprep.mubr.bf16.mxu0 %v15549_v8  ;;  %v14281_v44 = vpack.c.bf16 %v10492_v24, %v10490_v63  ;;  %v14282_v29 = vpack.c.bf16 %v10533_v25, %v10531_v18  ;;  %10786 = vmatprep.subr.bf16.mxu1 %v13437_v12  ;;  %v4588_v12 = vld [vmem:[#allocation8 + $0x2330] sm:$0xff]  ;;  %v13004_v63 = vcombine.low %v3472_v4, %v3508_v2  ;;  %v4481_v24 = vld [vmem:[#allocation8 + $0x1fd8] sm:$0xff] }
0x122e   :  { %v10494_v35 = vpop.f32.mrf.mxu1  ;;  %v10535_v36 = vpop.f32.mrf.mxu0  ;;  %10827 = vmatprep.subr.bf16.mxu0 %v13439_v19  ;;  %v13006_v18 = vcombine.low %v3473_v3, %v3509_v7  ;;  %v14085_v19 = vcombine.high %v4552_v11, %v4588_v12  ;;  %v4517_v25 = vld [vmem:[#allocation8 + $0x20f8] sm:$0xff]  ;;  %v4048_v7 = vld [vmem:[#allocation8 + $0x1250] sm:$0xff] }
0x122f   :  { %11948 = vst [vmem:[#allocation2 + $0x10] sm:$0xff] %v14281_v44  ;;  %11949 = vst [vmem:[#allocation2 + $0x18] sm:$0xff] %v14282_v29  ;;  %10787 = vmatpush1.bf16.msra.mxu1 %v13436_v23  ;;  %v4516_v23 = vld [vmem:[#allocation8 + $0x20f0] sm:$0xff]  ;;  %v14015_v29 = vcombine.high %v4481_v24, %v4517_v25  ;;  %v4445_v35 = vld [vmem:[#allocation8 + $0x1eb8] sm:$0xff]  ;;  %v14014_v37 = vcombine.low %v4481_v24, %v4517_v25 }
0x1230   :  { %10828 = vmatpush1.bf16.msra.mxu0 %v13438_v26  ;;  %v10495_v39 = vpop.f32.mrf.mxu1  ;;  %v10536_v41 = vpop.f32.mrf.mxu0  ;;  %10788 = vmatprep.subr.bf16.mxu1 %v13365_v27  ;;  %v14084_v26 = vcombine.low %v4552_v11, %v4588_v12  ;;  %v14086_v27 = vcombine.low %v4553_v15, %v4589_v17  ;;  %v14013_v44 = vcombine.high %v4480_v22, %v4516_v23  ;;  %v3978_v17 = vld [vmem:[#allocation8 + $0x1020] sm:$0xff] }
0x1231   :  { %10829 = vmatprep.subr.bf16.mxu0 %v13367_v30  ;;  %v4408_v30 = vld [vmem:[#allocation8 + $0x1d90] sm:$0xff]  ;;  %v14012_v36 = vcombine.low %v4480_v22, %v4516_v23  ;;  %v13942_v43 = vcombine.low %v4409_v28, %v4445_v35  ;;  %v3906_v25 = vld [vmem:[#allocation8 + $0xde0] sm:$0xff] }
0x1232   :  { %v13941_v38 = vcombine.high %v4408_v30, %v4444_v32  ;;  %v4336_v39 = vld [vmem:[#allocation8 + $0x1b50] sm:$0xff] }
0x1233   :  { %10789 = vmatpush1.bf16.msra.mxu1 %v13364_v40  ;;  %v13943_v40 = vcombine.high %v4409_v28, %v4445_v35  ;;  %v4372_v41 = vld [vmem:[#allocation8 + $0x1c70] sm:$0xff]  ;;  %v3834_v28 = vld [vmem:[#allocation8 + $0xba0] sm:$0xff] }
0x1234   :  { %10830 = vmatpush1.bf16.msra.mxu0 %v13366_v53  ;;  %10790 = vmatprep.subr.bf16.mxu1 %v13293_v42  ;;  %v4337_v53 = vld [vmem:[#allocation8 + $0x1b58] sm:$0xff]  ;;  %v13869_v45 = vcombine.high %v4336_v39, %v4372_v41  ;;  %v3870_v35 = vld [vmem:[#allocation8 + $0xcc0] sm:$0xff] }
0x1235   :  { %10831 = vmatprep.subr.bf16.mxu0 %v13295_v60  ;;  %v4373_v42 = vld [vmem:[#allocation8 + $0x1c78] sm:$0xff]  ;;  %v13940_v60 = vcombine.low %v4408_v30, %v4444_v32 }
0x1236   :  { %v13871_v33 = vcombine.high %v4337_v53, %v4373_v42  ;;  %v13870_v49 = vcombine.low %v4337_v53, %v4373_v42 }
0x1237   :  { %10791 = vmatpush1.bf16.msra.mxu1 %v13292_v34  ;;  %v4300_v34 = vld [vmem:[#allocation8 + $0x1a30] sm:$0xff] }
0x1238   :  { %10832 = vmatpush1.bf16.msra.mxu0 %v13294_v47  ;;  %10792 = vmatprep.subr.bf16.mxu1 %v13221_v21  ;;  %v4265_v47 = vld [vmem:[#allocation8 + $0x1918] sm:$0xff]  ;;  %v13797_v50 = vcombine.high %v4264_v46, %v4300_v34 }
0x1239   :  { %10833 = vmatprep.subr.bf16.mxu0 %v13223_v48  ;;  %v4301_v21 = vld [vmem:[#allocation8 + $0x1a38] sm:$0xff]  ;;  %v13868_v48 = vcombine.low %v4336_v39, %v4372_v41 }
0x123a   :  { %v13799_v51 = vcombine.high %v4265_v47, %v4301_v21  ;;  %v13798_v57 = vcombine.low %v4265_v47, %v4301_v21 }
0x123b   :  { %10793 = vmatpush1.bf16.msra.mxu1 %v13220_v52  ;;  %v4228_v52 = vld [vmem:[#allocation8 + $0x17f0] sm:$0xff] }
0x123c   :  { %10834 = vmatpush1.bf16.msra.mxu0 %v13222_v54  ;;  %10794 = vmatprep.subr.bf16.mxu1 %v13149_v55  ;;  %v4193_v54 = vld [vmem:[#allocation8 + $0x16d8] sm:$0xff]  ;;  %v13725_v58 = vcombine.high %v4192_v31, %v4228_v52 }
0x123d   :  { %10835 = vmatprep.subr.bf16.mxu0 %v13151_v56  ;;  %v4229_v55 = vld [vmem:[#allocation8 + $0x17f8] sm:$0xff]  ;;  %v13796_v56 = vcombine.low %v4264_v46, %v4300_v34  ;;  %v3762_v46 = vld [vmem:[#allocation8 + $0x960] sm:$0xff] }
0x123e   :  { %v13727_v59 = vcombine.high %v4193_v54, %v4229_v55  ;;  %v13726_v4 = vcombine.low %v4193_v54, %v4229_v55  ;;  %v3798_v34 = vld [vmem:[#allocation8 + $0xa80] sm:$0xff] }
0x123f   :  { %10795 = vmatpush1.bf16.msra.mxu1 %v13148_v62  ;;  %v4156_v62 = vld [vmem:[#allocation8 + $0x15b0] sm:$0xff]  ;;  %v13297_v54 = vcombine.high %v3762_v46, %v3798_v34 }
0x1240   :  { %10836 = vmatpush1.bf16.msra.mxu0 %v13150_v0  ;;  %10796 = vmatprep.subr.bf16.mxu1 %v13077_v13  ;;  %v4121_v0 = vld [vmem:[#allocation8 + $0x1498] sm:$0xff]  ;;  %v13653_v2 = vcombine.high %v4120_v61, %v4156_v62 }
0x1241   :  { %10837 = vmatprep.subr.bf16.mxu0 %v13079_v14  ;;  %v4157_v13 = vld [vmem:[#allocation8 + $0x15b8] sm:$0xff]  ;;  %v13724_v14 = vcombine.low %v4192_v31, %v4228_v52 }
0x1242   :  { %v13655_v3 = vcombine.high %v4121_v0, %v4157_v13  ;;  %v13654_v11 = vcombine.low %v4121_v0, %v4157_v13 }
0x1243   :  { %10797 = vmatpush1.bf16.msra.mxu1 %v13076_v9  ;;  %v4084_v9 = vld [vmem:[#allocation8 + $0x1370] sm:$0xff] }
0x1244   :  { %10838 = vmatpush1.bf16.msra.mxu0 %v13078_v10  ;;  %10798 = vmatprep.subr.bf16.mxu1 %v13005_v1  ;;  %v4049_v10 = vld [vmem:[#allocation8 + $0x1258] sm:$0xff]  ;;  %v13581_v12 = vcombine.high %v4048_v7, %v4084_v9 }
0x1245   :  { %10839 = vmatprep.subr.bf16.mxu0 %v13007_v5  ;;  %v4085_v1 = vld [vmem:[#allocation8 + $0x1378] sm:$0xff]  ;;  %v13652_v5 = vcombine.low %v4120_v61, %v4156_v62  ;;  %v3727_v61 = vld [vmem:[#allocation8 + $0x848] sm:$0xff]  ;;  %v13296_v62 = vcombine.low %v3762_v46, %v3798_v34  ;;  %v4410_v46 = vld [vmem:[#allocation8 + $0x1da0] sm:$0xff] }
0x1246   :  { %v13583_v15 = vcombine.high %v4049_v10, %v4085_v1  ;;  %v13582_v22 = vcombine.low %v4049_v10, %v4085_v1  ;;  %v4446_v34 = vld [vmem:[#allocation8 + $0x1ec0] sm:$0xff] }
0x1247   :  { %10799 = vmatpush1.bf16.msra.mxu1 %v13004_v63  ;;  %v4014_v63 = vld [vmem:[#allocation8 + $0x1140] sm:$0xff] }
0x1248   :  { %10840 = vmatpush1.bf16.msra.mxu0 %v13006_v18  ;;  %10800 = vmatprep.subr.bf16.mxu1 %v14085_v19  ;;  %v3979_v18 = vld [vmem:[#allocation8 + $0x1028] sm:$0xff]  ;;  %v13513_v23 = vcombine.high %v3978_v17, %v4014_v63 }
0x1249   :  { %10841 = vmatprep.subr.bf16.mxu0 %v14087_v20  ;;  %v4015_v19 = vld [vmem:[#allocation8 + $0x1148] sm:$0xff]  ;;  %v13580_v20 = vcombine.low %v4048_v7, %v4084_v9 }
0x124a   :  { %v13515_v24 = vcombine.high %v3979_v18, %v4015_v19  ;;  %v13514_v30 = vcombine.low %v3979_v18, %v4015_v19  ;;  %v3655_v7 = vld [vmem:[#allocation8 + $0x608] sm:$0xff] }
0x124b   :  { %10801 = vmatpush2.bf16.msra.mxu1 %v14084_v26  ;;  %v3942_v26 = vld [vmem:[#allocation8 + $0xf00] sm:$0xff] }
0x124c   :  { %10842 = vmatpush2.bf16.msra.mxu0 %v14086_v27  ;;  %10802 = vmatprep.subr.bf16.mxu1 %v14013_v44  ;;  %v13512_v27 = vcombine.low %v3978_v17, %v4014_v63  ;;  %v3907_v44 = vld [vmem:[#allocation8 + $0xde8] sm:$0xff]  ;;  %v13441_v32 = vcombine.high %v3906_v25, %v3942_v26  ;;  %v13440_v41 = vcombine.low %v3906_v25, %v3942_v26 }
0x124d   :  { %10843 = vmatprep.subr.bf16.mxu0 %v14015_v29  ;;  %v3943_v29 = vld [vmem:[#allocation8 + $0xf08] sm:$0xff] }
0x124e   :  { %v13442_v42 = vcombine.low %v3907_v44, %v3943_v29  ;;  %v3583_v17 = vld [vmem:[#allocation8 + $0x3c8] sm:$0xff] }
0x124f   :  { %10803 = vmatpush2.bf16.msra.mxu1 %v14012_v36  ;;  %v3511_v25 = vld [vmem:[#allocation8 + $0x188] sm:$0xff] }
0x1250   :  { %10844 = vmatpush2.bf16.msra.mxu0 %v14014_v37  ;;  %10804 = vmatprep.subr.bf16.mxu1 %v13941_v38  ;;  %v13443_v37 = vcombine.high %v3907_v44, %v3943_v29  ;;  %v3835_v38 = vld [vmem:[#allocation8 + $0xba8] sm:$0xff] }
0x1251   :  { %10845 = vmatprep.subr.bf16.mxu0 %v13943_v40  ;;  %v3871_v40 = vld [vmem:[#allocation8 + $0xcc8] sm:$0xff] }
0x1252   :  { %v13370_v52 = vcombine.low %v3835_v38, %v3871_v40 }
0x1253   :  { %10805 = vmatpush2.bf16.msra.mxu1 %v13940_v60  ;;  %v13369_v60 = vcombine.high %v3834_v28, %v3870_v35 }
0x1254   :  { %10846 = vmatpush2.bf16.msra.mxu0 %v13942_v43  ;;  %10806 = vmatprep.subr.bf16.mxu1 %v13869_v45 }
0x1255   :  { %10847 = vmatprep.subr.bf16.mxu0 %v13871_v33  ;;  %v13371_v33 = vcombine.high %v3835_v38, %v3871_v40 }
0x1257   :  { %10807 = vmatpush2.bf16.msra.mxu1 %v13868_v48  ;;  %v3763_v48 = vld [vmem:[#allocation8 + $0x968] sm:$0xff] }
0x1258   :  { %10848 = vmatpush2.bf16.msra.mxu0 %v13870_v49  ;;  %10808 = vmatprep.subr.bf16.mxu1 %v13797_v50  ;;  %v3799_v49 = vld [vmem:[#allocation8 + $0xa88] sm:$0xff] }
0x1259   :  { %10849 = vmatprep.subr.bf16.mxu0 %v13799_v51  ;;  %v13368_v51 = vcombine.low %v3834_v28, %v3870_v35  ;;  %v13298_v0 = vcombine.low %v3763_v48, %v3799_v49  ;;  %v4555_v28 = vld [vmem:[#allocation8 + $0x2228] sm:$0xff] }
0x125a   :  { %v4591_v35 = vld [vmem:[#allocation8 + $0x2348] sm:$0xff] }
0x125b   :  { %10809 = vmatpush2.bf16.msra.mxu1 %v13796_v56  ;;  %v13299_v56 = vcombine.high %v3763_v48, %v3799_v49  ;;  %v14091_v40 = vcombine.high %v4555_v28, %v4591_v35 }
0x125c   :  { %10850 = vmatpush2.bf16.msra.mxu0 %v13798_v57  ;;  %10810 = vmatprep.subr.bf16.mxu1 %v13725_v58  ;;  %v3690_v57 = vld [vmem:[#allocation8 + $0x720] sm:$0xff] }
0x125d   :  { %10851 = vmatprep.subr.bf16.mxu0 %v13727_v59  ;;  %v3726_v58 = vld [vmem:[#allocation8 + $0x840] sm:$0xff]  ;;  %v3691_v59 = vld [vmem:[#allocation8 + $0x728] sm:$0xff] }
0x125e   :  { %v13225_v13 = vcombine.high %v3690_v57, %v3726_v58  ;;  %v13224_v9 = vcombine.low %v3690_v57, %v3726_v58  ;;  %v13226_v10 = vcombine.low %v3691_v59, %v3727_v61 }
0x125f   :  { %10811 = vmatpush2.bf16.msra.mxu1 %v13724_v14  ;;  %v13227_v14 = vcombine.high %v3691_v59, %v3727_v61  ;;  %v4266_v61 = vld [vmem:[#allocation8 + $0x1920] sm:$0xff] }
0x1260   :  { %10852 = vmatpush2.bf16.msra.mxu0 %v13726_v4  ;;  %10812 = vmatprep.subr.bf16.mxu1 %v13653_v2  ;;  %v3618_v4 = vld [vmem:[#allocation8 + $0x4e0] sm:$0xff] }
0x1261   :  { %10853 = vmatprep.subr.bf16.mxu0 %v13655_v3  ;;  %v3654_v2 = vld [vmem:[#allocation8 + $0x600] sm:$0xff]  ;;  %v3619_v3 = vld [vmem:[#allocation8 + $0x4e8] sm:$0xff] }
0x1262   :  { %v13153_v1 = vcombine.high %v3618_v4, %v3654_v2  ;;  %v13152_v63 = vcombine.low %v3618_v4, %v3654_v2  ;;  %v13154_v18 = vcombine.low %v3619_v3, %v3655_v7 }
0x1263   :  { %10813 = vmatpush2.bf16.msra.mxu1 %v13652_v5  ;;  %v13155_v5 = vcombine.high %v3619_v3, %v3655_v7  ;;  %v4194_v7 = vld [vmem:[#allocation8 + $0x16e0] sm:$0xff] }
0x1264   :  { %10854 = vmatpush2.bf16.msra.mxu0 %v13654_v11  ;;  %10814 = vmatprep.subr.bf16.mxu1 %v13581_v12  ;;  %v3546_v11 = vld [vmem:[#allocation8 + $0x2a0] sm:$0xff] }
0x1265   :  { %10855 = vmatprep.subr.bf16.mxu0 %v13583_v15  ;;  %v3582_v12 = vld [vmem:[#allocation8 + $0x3c0] sm:$0xff]  ;;  %v3547_v15 = vld [vmem:[#allocation8 + $0x2a8] sm:$0xff] }
0x1266   :  { %v13081_v19 = vcombine.high %v3546_v11, %v3582_v12  ;;  %v13080_v26 = vcombine.low %v3546_v11, %v3582_v12 }
0x1267   :  { %10815 = vmatpush2.bf16.msra.mxu1 %v13580_v20  ;;  %v13083_v20 = vcombine.high %v3547_v15, %v3583_v17 }
0x1268   :  { %10856 = vmatpush2.bf16.msra.mxu0 %v13582_v22  ;;  %10866 = vmatprep.subr.bf16.mxu1 %v13513_v23  ;;  %v3474_v22 = vld [vmem:[#allocation8 + $0x60] sm:$0xff] }
0x1269   :  { %10907 = vmatprep.subr.bf16.mxu0 %v13515_v24  ;;  %v3510_v23 = vld [vmem:[#allocation8 + $0x180] sm:$0xff]  ;;  %v3475_v24 = vld [vmem:[#allocation8 + $0x68] sm:$0xff] }
0x126a   :  { %v10572_v36 = vpop.f32.mrf.mxu1  ;;  %10817 = vmatmul.mubr.bf16.vlgmr.msra.gmra.mxu1 %v15547_v6  ;;  %v13009_v44 = vcombine.high %v3474_v22, %v3510_v23  ;;  %v13011_v29 = vcombine.high %v3475_v24, %v3511_v25 }
0x126b   :  { %v10613_v39 = vpop.f32.mrf.mxu0  ;;  %10858 = vmatmul.mubr.bf16.vlgmr.msra.gmra.mxu0 %v15547_v6  ;;  %10867 = vmatpush1.bf16.msra.mxu1 %v13512_v27  ;;  %v13082_v27 = vcombine.low %v3547_v15, %v3583_v17  ;;  %v4122_v17 = vld [vmem:[#allocation8 + $0x14a0] sm:$0xff] }
0x126c   :  { %10898 = vmatprep.mubr.bf16.mxu1 %v15549_v8  ;;  %10908 = vmatpush1.bf16.msra.mxu0 %v13514_v30  ;;  %v10574_v53 = vpop.f32.mrf.mxu1  ;;  %v4554_v30 = vld [vmem:[#allocation8 + $0x2220] sm:$0xff] }
0x126d   :  { %10939 = vmatprep.mubr.bf16.mxu0 %v15549_v8  ;;  %v14283_v43 = vpack.c.bf16 %v10574_v53, %v10572_v36  ;;  %v10615_v45 = vpop.f32.mrf.mxu0  ;;  %10868 = vmatprep.subr.bf16.mxu1 %v13441_v32  ;;  %v4590_v32 = vld [vmem:[#allocation8 + $0x2340] sm:$0xff]  ;;  %v13008_v36 = vcombine.low %v3474_v22, %v3510_v23  ;;  %v4483_v53 = vld [vmem:[#allocation8 + $0x1fe8] sm:$0xff] }
0x126e   :  { %v14284_v47 = vpack.c.bf16 %v10615_v45, %v10613_v39  ;;  %v10576_v21 = vpop.f32.mrf.mxu1  ;;  %10909 = vmatprep.subr.bf16.mxu0 %v13443_v37  ;;  %v13010_v37 = vcombine.low %v3475_v24, %v3511_v25  ;;  %v14089_v38 = vcombine.high %v4554_v30, %v4590_v32  ;;  %v4482_v39 = vld [vmem:[#allocation8 + $0x1fe0] sm:$0xff] }
0x126f   :  { %11974 = vst [vmem:[#allocation2 + $0x20] sm:$0xff] %v14283_v43  ;;  %v10617_v50 = vpop.f32.mrf.mxu0  ;;  %10869 = vmatpush1.bf16.msra.mxu1 %v13440_v41  ;;  %v4518_v41 = vld [vmem:[#allocation8 + $0x2100] sm:$0xff]  ;;  %v14090_v43 = vcombine.low %v4555_v28, %v4591_v35  ;;  %v4447_v21 = vld [vmem:[#allocation8 + $0x1ec8] sm:$0xff]  ;;  %v3980_v35 = vld [vmem:[#allocation8 + $0x1030] sm:$0xff] }
0x1270   :  { %11975 = vst [vmem:[#allocation2 + $0x28] sm:$0xff] %v14284_v47  ;;  %10910 = vmatpush1.bf16.msra.mxu0 %v13442_v42  ;;  %v10577_v31 = vpop.f32.mrf.mxu1  ;;  %10870 = vmatprep.subr.bf16.mxu1 %v13369_v60  ;;  %v4519_v42 = vld [vmem:[#allocation8 + $0x2108] sm:$0xff]  ;;  %v14088_v60 = vcombine.low %v4554_v30, %v4590_v32  ;;  %v14017_v45 = vcombine.high %v4482_v39, %v4518_v41  ;;  %v4050_v25 = vld [vmem:[#allocation8 + $0x1260] sm:$0xff] }
0x1271   :  { %v10618_v55 = vpop.f32.mrf.mxu0  ;;  %10911 = vmatprep.subr.bf16.mxu0 %v13371_v33  ;;  %v14019_v33 = vcombine.high %v4483_v53, %v4519_v42  ;;  %v4411_v47 = vld [vmem:[#allocation8 + $0x1da8] sm:$0xff]  ;;  %v14016_v48 = vcombine.low %v4482_v39, %v4518_v41  ;;  %v14018_v49 = vcombine.low %v4483_v53, %v4519_v42  ;;  %v13945_v50 = vcombine.high %v4410_v46, %v4446_v34  ;;  %v4338_v31 = vld [vmem:[#allocation8 + $0x1b60] sm:$0xff]  ;;  %v3908_v42 = vld [vmem:[#allocation8 + $0xdf0] sm:$0xff] }
0x1272   :  { %v4375_v55 = vld [vmem:[#allocation8 + $0x1c88] sm:$0xff]  ;;  %v13946_v57 = vcombine.low %v4411_v47, %v4447_v21 }
0x1273   :  { %10871 = vmatpush1.bf16.msra.mxu1 %v13368_v51  ;;  %v13947_v51 = vcombine.high %v4411_v47, %v4447_v21  ;;  %v3836_v47 = vld [vmem:[#allocation8 + $0xbb0] sm:$0xff] }
0x1274   :  { %10912 = vmatpush1.bf16.msra.mxu0 %v13370_v52  ;;  %10872 = vmatprep.subr.bf16.mxu1 %v13297_v54  ;;  %v4374_v52 = vld [vmem:[#allocation8 + $0x1c80] sm:$0xff]  ;;  %v4339_v54 = vld [vmem:[#allocation8 + $0x1b68] sm:$0xff]  ;;  %v3872_v21 = vld [vmem:[#allocation8 + $0xcd0] sm:$0xff] }
0x1275   :  { %10913 = vmatprep.subr.bf16.mxu0 %v13299_v56  ;;  %v13944_v56 = vcombine.low %v4410_v46, %v4446_v34  ;;  %v13873_v58 = vcombine.high %v4338_v31, %v4374_v52  ;;  %v13875_v59 = vcombine.high %v4339_v54, %v4375_v55  ;;  %v13874_v4 = vcombine.low %v4339_v54, %v4375_v55 }
0x1277   :  { %10873 = vmatpush1.bf16.msra.mxu1 %v13296_v62  ;;  %v4302_v62 = vld [vmem:[#allocation8 + $0x1a40] sm:$0xff] }
0x1278   :  { %10914 = vmatpush1.bf16.msra.mxu0 %v13298_v0  ;;  %10874 = vmatprep.subr.bf16.mxu1 %v13225_v13  ;;  %v4267_v0 = vld [vmem:[#allocation8 + $0x1928] sm:$0xff]  ;;  %v13801_v2 = vcombine.high %v4266_v61, %v4302_v62 }
0x1279   :  { %10915 = vmatprep.subr.bf16.mxu0 %v13227_v14  ;;  %v4303_v13 = vld [vmem:[#allocation8 + $0x1a48] sm:$0xff]  ;;  %v13872_v14 = vcombine.low %v4338_v31, %v4374_v52 }
0x127a   :  { %v13803_v3 = vcombine.high %v4267_v0, %v4303_v13  ;;  %v13802_v11 = vcombine.low %v4267_v0, %v4303_v13 }
0x127b   :  { %10875 = vmatpush1.bf16.msra.mxu1 %v13224_v9  ;;  %v4230_v9 = vld [vmem:[#allocation8 + $0x1800] sm:$0xff] }
0x127c   :  { %10916 = vmatpush1.bf16.msra.mxu0 %v13226_v10  ;;  %10876 = vmatprep.subr.bf16.mxu1 %v13153_v1  ;;  %v4195_v10 = vld [vmem:[#allocation8 + $0x16e8] sm:$0xff]  ;;  %v13729_v12 = vcombine.high %v4194_v7, %v4230_v9 }
0x127d   :  { %10917 = vmatprep.subr.bf16.mxu0 %v13155_v5  ;;  %v4231_v1 = vld [vmem:[#allocation8 + $0x1808] sm:$0xff]  ;;  %v13800_v5 = vcombine.low %v4266_v61, %v4302_v62  ;;  %v3764_v61 = vld [vmem:[#allocation8 + $0x970] sm:$0xff] }
0x127e   :  { %v13731_v15 = vcombine.high %v4195_v10, %v4231_v1  ;;  %v13730_v22 = vcombine.low %v4195_v10, %v4231_v1  ;;  %v3800_v62 = vld [vmem:[#allocation8 + $0xa90] sm:$0xff] }
0x127f   :  { %10877 = vmatpush1.bf16.msra.mxu1 %v13152_v63  ;;  %v4158_v63 = vld [vmem:[#allocation8 + $0x15c0] sm:$0xff]  ;;  %v13301_v10 = vcombine.high %v3764_v61, %v3800_v62 }
0x1280   :  { %10918 = vmatpush1.bf16.msra.mxu0 %v13154_v18  ;;  %10878 = vmatprep.subr.bf16.mxu1 %v13081_v19  ;;  %v4123_v18 = vld [vmem:[#allocation8 + $0x14a8] sm:$0xff]  ;;  %v13657_v23 = vcombine.high %v4122_v17, %v4158_v63 }
0x1281   :  { %10919 = vmatprep.subr.bf16.mxu0 %v13083_v20  ;;  %v4159_v19 = vld [vmem:[#allocation8 + $0x15c8] sm:$0xff]  ;;  %v13728_v20 = vcombine.low %v4194_v7, %v4230_v9 }
0x1282   :  { %v13659_v24 = vcombine.high %v4123_v18, %v4159_v19  ;;  %v13658_v30 = vcombine.low %v4123_v18, %v4159_v19 }
0x1283   :  { %10879 = vmatpush1.bf16.msra.mxu1 %v13080_v26  ;;  %v4086_v26 = vld [vmem:[#allocation8 + $0x1380] sm:$0xff] }
0x1284   :  { %10920 = vmatpush1.bf16.msra.mxu0 %v13082_v27  ;;  %10880 = vmatprep.subr.bf16.mxu1 %v13009_v44  ;;  %v4051_v27 = vld [vmem:[#allocation8 + $0x1268] sm:$0xff]  ;;  %v13585_v32 = vcombine.high %v4050_v25, %v4086_v26 }
0x1285   :  { %10921 = vmatprep.subr.bf16.mxu0 %v13011_v29  ;;  %v4087_v44 = vld [vmem:[#allocation8 + $0x1388] sm:$0xff]  ;;  %v13656_v29 = vcombine.low %v4122_v17, %v4158_v63  ;;  %v3729_v17 = vld [vmem:[#allocation8 + $0x858] sm:$0xff]  ;;  %v13300_v63 = vcombine.low %v3764_v61, %v3800_v62  ;;  %v4412_v61 = vld [vmem:[#allocation8 + $0x1db0] sm:$0xff] }
0x1286   :  { %v13587_v28 = vcombine.high %v4051_v27, %v4087_v44  ;;  %v13586_v39 = vcombine.low %v4051_v27, %v4087_v44  ;;  %v4448_v62 = vld [vmem:[#allocation8 + $0x1ed0] sm:$0xff] }
0x1287   :  { %10881 = vmatpush1.bf16.msra.mxu1 %v13008_v36  ;;  %v4016_v36 = vld [vmem:[#allocation8 + $0x1150] sm:$0xff] }
0x1288   :  { %10922 = vmatpush1.bf16.msra.mxu0 %v13010_v37  ;;  %10882 = vmatprep.subr.bf16.mxu1 %v14089_v38  ;;  %v3981_v37 = vld [vmem:[#allocation8 + $0x1038] sm:$0xff]  ;;  %v13517_v41 = vcombine.high %v3980_v35, %v4016_v36 }
0x1289   :  { %10923 = vmatprep.subr.bf16.mxu0 %v14091_v40  ;;  %v4017_v38 = vld [vmem:[#allocation8 + $0x1158] sm:$0xff]  ;;  %v13584_v40 = vcombine.low %v4050_v25, %v4086_v26 }
0x128a   :  { %v13519_v53 = vcombine.high %v3981_v37, %v4017_v38  ;;  %v13518_v46 = vcombine.low %v3981_v37, %v4017_v38  ;;  %v3657_v25 = vld [vmem:[#allocation8 + $0x618] sm:$0xff] }
0x128b   :  { %10883 = vmatpush2.bf16.msra.mxu1 %v14088_v60  ;;  %v3944_v60 = vld [vmem:[#allocation8 + $0xf10] sm:$0xff] }
0x128c   :  { %10924 = vmatpush2.bf16.msra.mxu0 %v14090_v43  ;;  %10884 = vmatprep.subr.bf16.mxu1 %v14017_v45  ;;  %v13516_v43 = vcombine.low %v3980_v35, %v4016_v36  ;;  %v3909_v45 = vld [vmem:[#allocation8 + $0xdf8] sm:$0xff]  ;;  %v13445_v34 = vcombine.high %v3908_v42, %v3944_v60  ;;  %v13444_v52 = vcombine.low %v3908_v42, %v3944_v60 }
0x128d   :  { %10925 = vmatprep.subr.bf16.mxu0 %v14019_v33  ;;  %v3945_v33 = vld [vmem:[#allocation8 + $0xf18] sm:$0xff] }
0x128e   :  { %v13446_v55 = vcombine.low %v3909_v45, %v3945_v33  ;;  %v3585_v35 = vld [vmem:[#allocation8 + $0x3d8] sm:$0xff] }
0x128f   :  { %10885 = vmatpush2.bf16.msra.mxu1 %v14016_v48  ;;  %v3513_v42 = vld [vmem:[#allocation8 + $0x198] sm:$0xff] }
0x1290   :  { %10926 = vmatpush2.bf16.msra.mxu0 %v14018_v49  ;;  %10886 = vmatprep.subr.bf16.mxu1 %v13945_v50  ;;  %v13447_v49 = vcombine.high %v3909_v45, %v3945_v33  ;;  %v3837_v50 = vld [vmem:[#allocation8 + $0xbb8] sm:$0xff] }
0x1291   :  { %10927 = vmatprep.subr.bf16.mxu0 %v13947_v51  ;;  %v3873_v51 = vld [vmem:[#allocation8 + $0xcd8] sm:$0xff] }
0x1292   :  { %v13374_v9 = vcombine.low %v3837_v50, %v3873_v51 }
0x1293   :  { %10887 = vmatpush2.bf16.msra.mxu1 %v13944_v56  ;;  %v13373_v56 = vcombine.high %v3836_v47, %v3872_v21 }
0x1294   :  { %10928 = vmatpush2.bf16.msra.mxu0 %v13946_v57  ;;  %10888 = vmatprep.subr.bf16.mxu1 %v13873_v58 }
0x1295   :  { %10929 = vmatprep.subr.bf16.mxu0 %v13875_v59  ;;  %v13375_v59 = vcombine.high %v3837_v50, %v3873_v51 }
0x1297   :  { %10889 = vmatpush2.bf16.msra.mxu1 %v13872_v14  ;;  %v3765_v14 = vld [vmem:[#allocation8 + $0x978] sm:$0xff] }
0x1298   :  { %10930 = vmatpush2.bf16.msra.mxu0 %v13874_v4  ;;  %10890 = vmatprep.subr.bf16.mxu1 %v13801_v2  ;;  %v3801_v4 = vld [vmem:[#allocation8 + $0xa98] sm:$0xff] }
0x1299   :  { %10931 = vmatprep.subr.bf16.mxu0 %v13803_v3  ;;  %v13372_v3 = vcombine.low %v3836_v47, %v3872_v21  ;;  %v13302_v18 = vcombine.low %v3765_v14, %v3801_v4  ;;  %v4557_v47 = vld [vmem:[#allocation8 + $0x2238] sm:$0xff] }
0x129a   :  { %v4593_v21 = vld [vmem:[#allocation8 + $0x2358] sm:$0xff] }
0x129b   :  { %10891 = vmatpush2.bf16.msra.mxu1 %v13800_v5  ;;  %v13303_v5 = vcombine.high %v3765_v14, %v3801_v4  ;;  %v14095_v51 = vcombine.high %v4557_v47, %v4593_v21 }
0x129c   :  { %10932 = vmatpush2.bf16.msra.mxu0 %v13802_v11  ;;  %10892 = vmatprep.subr.bf16.mxu1 %v13729_v12  ;;  %v3692_v11 = vld [vmem:[#allocation8 + $0x730] sm:$0xff] }
0x129d   :  { %10933 = vmatprep.subr.bf16.mxu0 %v13731_v15  ;;  %v3728_v12 = vld [vmem:[#allocation8 + $0x850] sm:$0xff]  ;;  %v3693_v15 = vld [vmem:[#allocation8 + $0x738] sm:$0xff] }
0x129e   :  { %v13229_v19 = vcombine.high %v3692_v11, %v3728_v12  ;;  %v13228_v26 = vcombine.low %v3692_v11, %v3728_v12  ;;  %v13230_v27 = vcombine.low %v3693_v15, %v3729_v17 }
0x129f   :  { %10893 = vmatpush2.bf16.msra.mxu1 %v13728_v20  ;;  %v13231_v20 = vcombine.high %v3693_v15, %v3729_v17  ;;  %v4268_v17 = vld [vmem:[#allocation8 + $0x1930] sm:$0xff] }
0x12a0   :  { %10934 = vmatpush2.bf16.msra.mxu0 %v13730_v22  ;;  %10894 = vmatprep.subr.bf16.mxu1 %v13657_v23  ;;  %v3620_v22 = vld [vmem:[#allocation8 + $0x4f0] sm:$0xff] }
0x12a1   :  { %10935 = vmatprep.subr.bf16.mxu0 %v13659_v24  ;;  %v3656_v23 = vld [vmem:[#allocation8 + $0x610] sm:$0xff]  ;;  %v3621_v24 = vld [vmem:[#allocation8 + $0x4f8] sm:$0xff] }
0x12a2   :  { %v13157_v44 = vcombine.high %v3620_v22, %v3656_v23  ;;  %v13156_v36 = vcombine.low %v3620_v22, %v3656_v23  ;;  %v13158_v37 = vcombine.low %v3621_v24, %v3657_v25 }
0x12a3   :  { %10895 = vmatpush2.bf16.msra.mxu1 %v13656_v29  ;;  %v13159_v29 = vcombine.high %v3621_v24, %v3657_v25  ;;  %v4196_v25 = vld [vmem:[#allocation8 + $0x16f0] sm:$0xff] }
0x12a4   :  { %10936 = vmatpush2.bf16.msra.mxu0 %v13658_v30  ;;  %10896 = vmatprep.subr.bf16.mxu1 %v13585_v32  ;;  %v3548_v30 = vld [vmem:[#allocation8 + $0x2b0] sm:$0xff] }
0x12a5   :  { %10937 = vmatprep.subr.bf16.mxu0 %v13587_v28  ;;  %v3584_v32 = vld [vmem:[#allocation8 + $0x3d0] sm:$0xff]  ;;  %v3549_v28 = vld [vmem:[#allocation8 + $0x2b8] sm:$0xff] }
0x12a6   :  { %v13085_v38 = vcombine.high %v3548_v30, %v3584_v32  ;;  %v13084_v60 = vcombine.low %v3548_v30, %v3584_v32 }
0x12a7   :  { %10897 = vmatpush2.bf16.msra.mxu1 %v13584_v40  ;;  %v13087_v40 = vcombine.high %v3549_v28, %v3585_v35 }
0x12a8   :  { %10938 = vmatpush2.bf16.msra.mxu0 %v13586_v39  ;;  %10948 = vmatprep.subr.bf16.mxu1 %v13517_v41  ;;  %v3476_v39 = vld [vmem:[#allocation8 + $0x70] sm:$0xff] }
0x12a9   :  { %10989 = vmatprep.subr.bf16.mxu0 %v13519_v53  ;;  %v3512_v41 = vld [vmem:[#allocation8 + $0x190] sm:$0xff]  ;;  %v3477_v53 = vld [vmem:[#allocation8 + $0x78] sm:$0xff] }
0x12aa   :  { %v10654_v48 = vpop.f32.mrf.mxu1  ;;  %10899 = vmatmul.mubr.bf16.vlgmr.msra.gmra.mxu1 %v15547_v6  ;;  %v13013_v45 = vcombine.high %v3476_v39, %v3512_v41  ;;  %v13015_v33 = vcombine.high %v3477_v53, %v3513_v42 }
0x12ab   :  { %v10695_v31 = vpop.f32.mrf.mxu0  ;;  %10940 = vmatmul.mubr.bf16.vlgmr.msra.gmra.mxu0 %v15547_v6  ;;  %10949 = vmatpush1.bf16.msra.mxu1 %v13516_v43  ;;  %v13086_v43 = vcombine.low %v3549_v28, %v3585_v35  ;;  %v4124_v35 = vld [vmem:[#allocation8 + $0x14b0] sm:$0xff] }
0x12ac   :  { %10980 = vmatprep.mubr.bf16.mxu1 %v15549_v8  ;;  %10990 = vmatpush1.bf16.msra.mxu0 %v13518_v46  ;;  %v10656_v54 = vpop.f32.mrf.mxu1  ;;  %v4556_v46 = vld [vmem:[#allocation8 + $0x2230] sm:$0xff] }
0x12ad   :  { %11021 = vmatprep.mubr.bf16.mxu0 %v15549_v8  ;;  %v14285_v57 = vpack.c.bf16 %v10656_v54, %v10654_v48  ;;  %v10697_v58 = vpop.f32.mrf.mxu0  ;;  %10950 = vmatprep.subr.bf16.mxu1 %v13445_v34  ;;  %v4592_v34 = vld [vmem:[#allocation8 + $0x2350] sm:$0xff]  ;;  %v13012_v48 = vcombine.low %v3476_v39, %v3512_v41  ;;  %v4485_v54 = vld [vmem:[#allocation8 + $0x1ff8] sm:$0xff] }
0x12ae   :  { %v14286_v0 = vpack.c.bf16 %v10697_v58, %v10695_v31  ;;  %v10658_v13 = vpop.f32.mrf.mxu1  ;;  %10991 = vmatprep.subr.bf16.mxu0 %v13447_v49  ;;  %v13014_v49 = vcombine.low %v3477_v53, %v3513_v42  ;;  %v14093_v50 = vcombine.high %v4556_v46, %v4592_v34  ;;  %v4484_v31 = vld [vmem:[#allocation8 + $0x1ff0] sm:$0xff] }
0x12af   :  { %11976 = vst [vmem:[#allocation2 + $0x30] sm:$0xff] %v14285_v57  ;;  %v10699_v2 = vpop.f32.mrf.mxu0  ;;  %10951 = vmatpush1.bf16.msra.mxu1 %v13444_v52  ;;  %v4520_v52 = vld [vmem:[#allocation8 + $0x2110] sm:$0xff]  ;;  %v14094_v57 = vcombine.low %v4557_v47, %v4593_v21  ;;  %v4449_v13 = vld [vmem:[#allocation8 + $0x1ed8] sm:$0xff]  ;;  %v3982_v21 = vld [vmem:[#allocation8 + $0x1040] sm:$0xff] }
0x12b0   :  { %11977 = vst [vmem:[#allocation2 + $0x38] sm:$0xff] %v14286_v0  ;;  %10992 = vmatpush1.bf16.msra.mxu0 %v13446_v55  ;;  %v10659_v7 = vpop.f32.mrf.mxu1  ;;  %10952 = vmatprep.subr.bf16.mxu1 %v13373_v56  ;;  %v4521_v55 = vld [vmem:[#allocation8 + $0x2118] sm:$0xff]  ;;  %v14092_v56 = vcombine.low %v4556_v46, %v4592_v34  ;;  %v14021_v58 = vcombine.high %v4484_v31, %v4520_v52  ;;  %v4052_v42 = vld [vmem:[#allocation8 + $0x1270] sm:$0xff] }
0x12b1   :  { %v10700_v1 = vpop.f32.mrf.mxu0  ;;  %10993 = vmatprep.subr.bf16.mxu0 %v13375_v59  ;;  %v14023_v59 = vcombine.high %v4485_v54, %v4521_v55  ;;  %v4413_v0 = vld [vmem:[#allocation8 + $0x1db8] sm:$0xff]  ;;  %v14020_v14 = vcombine.low %v4484_v31, %v4520_v52  ;;  %v14022_v4 = vcombine.low %v4485_v54, %v4521_v55  ;;  %v13949_v2 = vcombine.high %v4412_v61, %v4448_v62  ;;  %v4340_v7 = vld [vmem:[#allocation8 + $0x1b70] sm:$0xff]  ;;  %v3910_v55 = vld [vmem:[#allocation8 + $0xe00] sm:$0xff] }
0x12b2   :  { %v4377_v1 = vld [vmem:[#allocation8 + $0x1c98] sm:$0xff]  ;;  %v13950_v11 = vcombine.low %v4413_v0, %v4449_v13 }
0x12b3   :  { %10953 = vmatpush1.bf16.msra.mxu1 %v13372_v3  ;;  %v13951_v3 = vcombine.high %v4413_v0, %v4449_v13  ;;  %v3838_v0 = vld [vmem:[#allocation8 + $0xbc0] sm:$0xff] }
0x12b4   :  { %10994 = vmatpush1.bf16.msra.mxu0 %v13374_v9  ;;  %10954 = vmatprep.subr.bf16.mxu1 %v13301_v10  ;;  %v4376_v9 = vld [vmem:[#allocation8 + $0x1c90] sm:$0xff]  ;;  %v4341_v10 = vld [vmem:[#allocation8 + $0x1b78] sm:$0xff]  ;;  %v3874_v13 = vld [vmem:[#allocation8 + $0xce0] sm:$0xff] }
0x12b5   :  { %10995 = vmatprep.subr.bf16.mxu0 %v13303_v5  ;;  %v13948_v5 = vcombine.low %v4412_v61, %v4448_v62  ;;  %v13877_v12 = vcombine.high %v4340_v7, %v4376_v9  ;;  %v13879_v15 = vcombine.high %v4341_v10, %v4377_v1  ;;  %v13878_v22 = vcombine.low %v4341_v10, %v4377_v1 }
0x12b7   :  { %10955 = vmatpush1.bf16.msra.mxu1 %v13300_v63  ;;  %v4304_v63 = vld [vmem:[#allocation8 + $0x1a50] sm:$0xff] }
0x12b8   :  { %10996 = vmatpush1.bf16.msra.mxu0 %v13302_v18  ;;  %10956 = vmatprep.subr.bf16.mxu1 %v13229_v19  ;;  %v4269_v18 = vld [vmem:[#allocation8 + $0x1938] sm:$0xff]  ;;  %v13805_v23 = vcombine.high %v4268_v17, %v4304_v63 }
0x12b9   :  { %10997 = vmatprep.subr.bf16.mxu0 %v13231_v20  ;;  %v4305_v19 = vld [vmem:[#allocation8 + $0x1a58] sm:$0xff]  ;;  %v13876_v20 = vcombine.low %v4340_v7, %v4376_v9 }
0x12ba   :  { %v13807_v24 = vcombine.high %v4269_v18, %v4305_v19  ;;  %v13806_v30 = vcombine.low %v4269_v18, %v4305_v19 }
0x12bb   :  { %10957 = vmatpush1.bf16.msra.mxu1 %v13228_v26  ;;  %v4232_v26 = vld [vmem:[#allocation8 + $0x1810] sm:$0xff] }
0x12bc   :  { %10998 = vmatpush1.bf16.msra.mxu0 %v13230_v27  ;;  %10958 = vmatprep.subr.bf16.mxu1 %v13157_v44  ;;  %v4197_v27 = vld [vmem:[#allocation8 + $0x16f8] sm:$0xff]  ;;  %v13733_v32 = vcombine.high %v4196_v25, %v4232_v26 }
0x12bd   :  { %10999 = vmatprep.subr.bf16.mxu0 %v13159_v29  ;;  %v4233_v44 = vld [vmem:[#allocation8 + $0x1818] sm:$0xff]  ;;  %v13804_v29 = vcombine.low %v4268_v17, %v4304_v63  ;;  %v3766_v17 = vld [vmem:[#allocation8 + $0x980] sm:$0xff] }
0x12be   :  { %v13735_v28 = vcombine.high %v4197_v27, %v4233_v44  ;;  %v13734_v39 = vcombine.low %v4197_v27, %v4233_v44  ;;  %v3802_v63 = vld [vmem:[#allocation8 + $0xaa0] sm:$0xff] }
0x12bf   :  { %10959 = vmatpush1.bf16.msra.mxu1 %v13156_v36  ;;  %v4160_v36 = vld [vmem:[#allocation8 + $0x15d0] sm:$0xff]  ;;  %v13305_v27 = vcombine.high %v3766_v17, %v3802_v63 }
0x12c0   :  { %11000 = vmatpush1.bf16.msra.mxu0 %v13158_v37  ;;  %10960 = vmatprep.subr.bf16.mxu1 %v13085_v38  ;;  %v4125_v37 = vld [vmem:[#allocation8 + $0x14b8] sm:$0xff]  ;;  %v13661_v41 = vcombine.high %v4124_v35, %v4160_v36 }
0x12c1   :  { %11001 = vmatprep.subr.bf16.mxu0 %v13087_v40  ;;  %v4161_v38 = vld [vmem:[#allocation8 + $0x15d8] sm:$0xff]  ;;  %v13732_v40 = vcombine.low %v4196_v25, %v4232_v26 }
0x12c2   :  { %v13663_v53 = vcombine.high %v4125_v37, %v4161_v38  ;;  %v13662_v46 = vcombine.low %v4125_v37, %v4161_v38 }
0x12c3   :  { %10961 = vmatpush1.bf16.msra.mxu1 %v13084_v60  ;;  %v4088_v60 = vld [vmem:[#allocation8 + $0x1390] sm:$0xff] }
0x12c4   :  { %11002 = vmatpush1.bf16.msra.mxu0 %v13086_v43  ;;  %10962 = vmatprep.subr.bf16.mxu1 %v13013_v45  ;;  %v4053_v43 = vld [vmem:[#allocation8 + $0x1278] sm:$0xff]  ;;  %v13589_v34 = vcombine.high %v4052_v42, %v4088_v60 }
0x12c5   :  { %11003 = vmatprep.subr.bf16.mxu0 %v13015_v33  ;;  %v4089_v45 = vld [vmem:[#allocation8 + $0x1398] sm:$0xff]  ;;  %v13660_v33 = vcombine.low %v4124_v35, %v4160_v36  ;;  %v3731_v35 = vld [vmem:[#allocation8 + $0x868] sm:$0xff]  ;;  %v13304_v36 = vcombine.low %v3766_v17, %v3802_v63  ;;  %v4414_v17 = vld [vmem:[#allocation8 + $0x1dc0] sm:$0xff] }
0x12c6   :  { %v13591_v47 = vcombine.high %v4053_v43, %v4089_v45  ;;  %v13590_v31 = vcombine.low %v4053_v43, %v4089_v45  ;;  %v4450_v63 = vld [vmem:[#allocation8 + $0x1ee0] sm:$0xff] }
0x12c7   :  { %10963 = vmatpush1.bf16.msra.mxu1 %v13012_v48  ;;  %v4018_v48 = vld [vmem:[#allocation8 + $0x1160] sm:$0xff] }
0x12c8   :  { %11004 = vmatpush1.bf16.msra.mxu0 %v13014_v49  ;;  %10964 = vmatprep.subr.bf16.mxu1 %v14093_v50  ;;  %v3983_v49 = vld [vmem:[#allocation8 + $0x1048] sm:$0xff]  ;;  %v13521_v52 = vcombine.high %v3982_v21, %v4018_v48 }
0x12c9   :  { %11005 = vmatprep.subr.bf16.mxu0 %v14095_v51  ;;  %v4019_v50 = vld [vmem:[#allocation8 + $0x1168] sm:$0xff]  ;;  %v13588_v51 = vcombine.low %v4052_v42, %v4088_v60 }
0x12ca   :  { %v13523_v54 = vcombine.high %v3983_v49, %v4019_v50  ;;  %v13522_v61 = vcombine.low %v3983_v49, %v4019_v50  ;;  %v3659_v42 = vld [vmem:[#allocation8 + $0x628] sm:$0xff] }
0x12cb   :  { %10965 = vmatpush2.bf16.msra.mxu1 %v14092_v56  ;;  %v3946_v56 = vld [vmem:[#allocation8 + $0xf20] sm:$0xff] }
0x12cc   :  { %11006 = vmatpush2.bf16.msra.mxu0 %v14094_v57  ;;  %10966 = vmatprep.subr.bf16.mxu1 %v14021_v58  ;;  %v13520_v57 = vcombine.low %v3982_v21, %v4018_v48  ;;  %v3911_v58 = vld [vmem:[#allocation8 + $0xe08] sm:$0xff]  ;;  %v13449_v62 = vcombine.high %v3910_v55, %v3946_v56  ;;  %v13448_v9 = vcombine.low %v3910_v55, %v3946_v56 }
0x12cd   :  { %11007 = vmatprep.subr.bf16.mxu0 %v14023_v59  ;;  %v3947_v59 = vld [vmem:[#allocation8 + $0xf28] sm:$0xff] }
0x12ce   :  { %v13450_v1 = vcombine.low %v3911_v58, %v3947_v59  ;;  %v3587_v21 = vld [vmem:[#allocation8 + $0x3e8] sm:$0xff] }
0x12cf   :  { %10967 = vmatpush2.bf16.msra.mxu1 %v14020_v14  ;;  %v3515_v55 = vld [vmem:[#allocation8 + $0x1a8] sm:$0xff] }
0x12d0   :  { %11008 = vmatpush2.bf16.msra.mxu0 %v14022_v4  ;;  %10968 = vmatprep.subr.bf16.mxu1 %v13949_v2  ;;  %v13451_v4 = vcombine.high %v3911_v58, %v3947_v59  ;;  %v3839_v2 = vld [vmem:[#allocation8 + $0xbc8] sm:$0xff] }
0x12d1   :  { %11009 = vmatprep.subr.bf16.mxu0 %v13951_v3  ;;  %v3875_v3 = vld [vmem:[#allocation8 + $0xce8] sm:$0xff] }
0x12d2   :  { %v13378_v26 = vcombine.low %v3839_v2, %v3875_v3 }
0x12d3   :  { %10969 = vmatpush2.bf16.msra.mxu1 %v13948_v5  ;;  %v13377_v5 = vcombine.high %v3838_v0, %v3874_v13 }
0x12d4   :  { %11010 = vmatpush2.bf16.msra.mxu0 %v13950_v11  ;;  %10970 = vmatprep.subr.bf16.mxu1 %v13877_v12 }
0x12d5   :  { %11011 = vmatprep.subr.bf16.mxu0 %v13879_v15  ;;  %v13379_v15 = vcombine.high %v3839_v2, %v3875_v3 }
0x12d7   :  { %10971 = vmatpush2.bf16.msra.mxu1 %v13876_v20  ;;  %v3767_v20 = vld [vmem:[#allocation8 + $0x988] sm:$0xff] }
0x12d8   :  { %11012 = vmatpush2.bf16.msra.mxu0 %v13878_v22  ;;  %10972 = vmatprep.subr.bf16.mxu1 %v13805_v23  ;;  %v3803_v22 = vld [vmem:[#allocation8 + $0xaa8] sm:$0xff] }
0x12d9   :  { %11013 = vmatprep.subr.bf16.mxu0 %v13807_v24  ;;  %v13376_v24 = vcombine.low %v3838_v0, %v3874_v13  ;;  %v13306_v37 = vcombine.low %v3767_v20, %v3803_v22  ;;  %v4559_v0 = vld [vmem:[#allocation8 + $0x2248] sm:$0xff] }
0x12da   :  { %v4595_v13 = vld [vmem:[#allocation8 + $0x2368] sm:$0xff] }
0x12db   :  { %10973 = vmatpush2.bf16.msra.mxu1 %v13804_v29  ;;  %v13307_v29 = vcombine.high %v3767_v20, %v3803_v22  ;;  %v14099_v3 = vcombine.high %v4559_v0, %v4595_v13 }
0x12dc   :  { %11014 = vmatpush2.bf16.msra.mxu0 %v13806_v30  ;;  %10974 = vmatprep.subr.bf16.mxu1 %v13733_v32  ;;  %v3694_v30 = vld [vmem:[#allocation8 + $0x740] sm:$0xff] }
0x12dd   :  { %11015 = vmatprep.subr.bf16.mxu0 %v13735_v28  ;;  %v3730_v32 = vld [vmem:[#allocation8 + $0x860] sm:$0xff]  ;;  %v3695_v28 = vld [vmem:[#allocation8 + $0x748] sm:$0xff] }
0x12de   :  { %v13233_v38 = vcombine.high %v3694_v30, %v3730_v32  ;;  %v13232_v60 = vcombine.low %v3694_v30, %v3730_v32  ;;  %v13234_v43 = vcombine.low %v3695_v28, %v3731_v35 }
0x12df   :  { %10975 = vmatpush2.bf16.msra.mxu1 %v13732_v40  ;;  %v13235_v40 = vcombine.high %v3695_v28, %v3731_v35  ;;  %v4270_v35 = vld [vmem:[#allocation8 + $0x1940] sm:$0xff] }
0x12e0   :  { %11016 = vmatpush2.bf16.msra.mxu0 %v13734_v39  ;;  %10976 = vmatprep.subr.bf16.mxu1 %v13661_v41  ;;  %v3622_v39 = vld [vmem:[#allocation8 + $0x500] sm:$0xff] }
0x12e1   :  { %11017 = vmatprep.subr.bf16.mxu0 %v13663_v53  ;;  %v3658_v41 = vld [vmem:[#allocation8 + $0x620] sm:$0xff]  ;;  %v3623_v53 = vld [vmem:[#allocation8 + $0x508] sm:$0xff] }
0x12e2   :  { %v13161_v45 = vcombine.high %v3622_v39, %v3658_v41  ;;  %v13160_v48 = vcombine.low %v3622_v39, %v3658_v41  ;;  %v13162_v49 = vcombine.low %v3623_v53, %v3659_v42 }
0x12e3   :  { %10977 = vmatpush2.bf16.msra.mxu1 %v13660_v33  ;;  %v13163_v33 = vcombine.high %v3623_v53, %v3659_v42  ;;  %v4198_v42 = vld [vmem:[#allocation8 + $0x1700] sm:$0xff] }
0x12e4   :  { %11018 = vmatpush2.bf16.msra.mxu0 %v13662_v46  ;;  %10978 = vmatprep.subr.bf16.mxu1 %v13589_v34  ;;  %v3550_v46 = vld [vmem:[#allocation8 + $0x2c0] sm:$0xff] }
0x12e5   :  { %11019 = vmatprep.subr.bf16.mxu0 %v13591_v47  ;;  %v3586_v34 = vld [vmem:[#allocation8 + $0x3e0] sm:$0xff]  ;;  %v3551_v47 = vld [vmem:[#allocation8 + $0x2c8] sm:$0xff] }
0x12e6   :  { %v13089_v50 = vcombine.high %v3550_v46, %v3586_v34  ;;  %v13088_v56 = vcombine.low %v3550_v46, %v3586_v34 }
0x12e7   :  { %10979 = vmatpush2.bf16.msra.mxu1 %v13588_v51  ;;  %v13091_v51 = vcombine.high %v3551_v47, %v3587_v21 }
0x12e8   :  { %11020 = vmatpush2.bf16.msra.mxu0 %v13590_v31  ;;  %11030 = vmatprep.subr.bf16.mxu1 %v13521_v52  ;;  %v3478_v31 = vld [vmem:[#allocation8 + $0x80] sm:$0xff] }
0x12e9   :  { %11071 = vmatprep.subr.bf16.mxu0 %v13523_v54  ;;  %v3514_v52 = vld [vmem:[#allocation8 + $0x1a0] sm:$0xff]  ;;  %v3479_v54 = vld [vmem:[#allocation8 + $0x88] sm:$0xff] }
0x12ea   :  { %v10736_v14 = vpop.f32.mrf.mxu1  ;;  %10981 = vmatmul.mubr.bf16.vlgmr.msra.gmra.mxu1 %v15547_v6  ;;  %v13017_v58 = vcombine.high %v3478_v31, %v3514_v52  ;;  %v13019_v59 = vcombine.high %v3479_v54, %v3515_v55 }
0x12eb   :  { %v10777_v7 = vpop.f32.mrf.mxu0  ;;  %11022 = vmatmul.mubr.bf16.vlgmr.msra.gmra.mxu0 %v15547_v6  ;;  %11031 = vmatpush1.bf16.msra.mxu1 %v13520_v57  ;;  %v13090_v57 = vcombine.low %v3551_v47, %v3587_v21  ;;  %v4126_v21 = vld [vmem:[#allocation8 + $0x14c0] sm:$0xff] }
0x12ec   :  { %11062 = vmatprep.mubr.bf16.mxu1 %v15549_v8  ;;  %11072 = vmatpush1.bf16.msra.mxu0 %v13522_v61  ;;  %v10738_v10 = vpop.f32.mrf.mxu1  ;;  %v4558_v61 = vld [vmem:[#allocation8 + $0x2240] sm:$0xff] }
0x12ed   :  { %11103 = vmatprep.mubr.bf16.mxu0 %v15549_v8  ;;  %v14287_v11 = vpack.c.bf16 %v10738_v10, %v10736_v14  ;;  %v10779_v12 = vpop.f32.mrf.mxu0  ;;  %11032 = vmatprep.subr.bf16.mxu1 %v13449_v62  ;;  %v4594_v62 = vld [vmem:[#allocation8 + $0x2360] sm:$0xff]  ;;  %v13016_v14 = vcombine.low %v3478_v31, %v3514_v52  ;;  %v4487_v10 = vld [vmem:[#allocation8 + $0x2008] sm:$0xff] }
0x12ee   :  { %v14288_v18 = vpack.c.bf16 %v10779_v12, %v10777_v7  ;;  %v10740_v19 = vpop.f32.mrf.mxu1  ;;  %11073 = vmatprep.subr.bf16.mxu0 %v13451_v4  ;;  %v13018_v4 = vcombine.low %v3479_v54, %v3515_v55  ;;  %v14097_v2 = vcombine.high %v4558_v61, %v4594_v62  ;;  %v4486_v7 = vld [vmem:[#allocation8 + $0x2000] sm:$0xff] }
0x12ef   :  { %12002 = vst [vmem:[#allocation2 + $0x40] sm:$0xff] %v14287_v11  ;;  %v10781_v23 = vpop.f32.mrf.mxu0  ;;  %11033 = vmatpush1.bf16.msra.mxu1 %v13448_v9  ;;  %v4522_v9 = vld [vmem:[#allocation8 + $0x2120] sm:$0xff]  ;;  %v14098_v11 = vcombine.low %v4559_v0, %v4595_v13  ;;  %v4451_v19 = vld [vmem:[#allocation8 + $0x1ee8] sm:$0xff]  ;;  %v3984_v13 = vld [vmem:[#allocation8 + $0x1050] sm:$0xff] }
0x12f0   :  { %12003 = vst [vmem:[#allocation2 + $0x48] sm:$0xff] %v14288_v18  ;;  %11074 = vmatpush1.bf16.msra.mxu0 %v13450_v1  ;;  %v10741_v25 = vpop.f32.mrf.mxu1  ;;  %11034 = vmatprep.subr.bf16.mxu1 %v13377_v5  ;;  %v4523_v1 = vld [vmem:[#allocation8 + $0x2128] sm:$0xff]  ;;  %v14096_v5 = vcombine.low %v4558_v61, %v4594_v62  ;;  %v14025_v12 = vcombine.high %v4486_v7, %v4522_v9  ;;  %v4054_v55 = vld [vmem:[#allocation8 + $0x1280] sm:$0xff] }
0x12f1   :  { %v10782_v44 = vpop.f32.mrf.mxu0  ;;  %11075 = vmatprep.subr.bf16.mxu0 %v13379_v15  ;;  %v14027_v15 = vcombine.high %v4487_v10, %v4523_v1  ;;  %v4415_v18 = vld [vmem:[#allocation8 + $0x1dc8] sm:$0xff]  ;;  %v14024_v20 = vcombine.low %v4486_v7, %v4522_v9  ;;  %v14026_v22 = vcombine.low %v4487_v10, %v4523_v1  ;;  %v13953_v23 = vcombine.high %v4414_v17, %v4450_v63  ;;  %v4342_v25 = vld [vmem:[#allocation8 + $0x1b80] sm:$0xff]  ;;  %v3912_v1 = vld [vmem:[#allocation8 + $0xe10] sm:$0xff] }
0x12f2   :  { %v4379_v44 = vld [vmem:[#allocation8 + $0x1ca8] sm:$0xff]  ;;  %v13954_v30 = vcombine.low %v4415_v18, %v4451_v19 }
0x12f3   :  { %11035 = vmatpush1.bf16.msra.mxu1 %v13376_v24  ;;  %v13955_v24 = vcombine.high %v4415_v18, %v4451_v19  ;;  %v3840_v18 = vld [vmem:[#allocation8 + $0xbd0] sm:$0xff] }
0x12f4   :  { %11076 = vmatpush1.bf16.msra.mxu0 %v13378_v26  ;;  %11036 = vmatprep.subr.bf16.mxu1 %v13305_v27  ;;  %v4378_v26 = vld [vmem:[#allocation8 + $0x1ca0] sm:$0xff]  ;;  %v4343_v27 = vld [vmem:[#allocation8 + $0x1b88] sm:$0xff]  ;;  %v3876_v19 = vld [vmem:[#allocation8 + $0xcf0] sm:$0xff] }
0x12f5   :  { %11077 = vmatprep.subr.bf16.mxu0 %v13307_v29  ;;  %v13952_v29 = vcombine.low %v4414_v17, %v4450_v63  ;;  %v13881_v32 = vcombine.high %v4342_v25, %v4378_v26  ;;  %v13883_v28 = vcombine.high %v4343_v27, %v4379_v44  ;;  %v13882_v39 = vcombine.low %v4343_v27, %v4379_v44 }
0x12f7   :  { %11037 = vmatpush1.bf16.msra.mxu1 %v13304_v36  ;;  %v4306_v36 = vld [vmem:[#allocation8 + $0x1a60] sm:$0xff] }
0x12f8   :  { %11078 = vmatpush1.bf16.msra.mxu0 %v13306_v37  ;;  %11038 = vmatprep.subr.bf16.mxu1 %v13233_v38  ;;  %v4271_v37 = vld [vmem:[#allocation8 + $0x1948] sm:$0xff]  ;;  %v13809_v41 = vcombine.high %v4270_v35, %v4306_v36 }
0x12f9   :  { %11079 = vmatprep.subr.bf16.mxu0 %v13235_v40  ;;  %v4307_v38 = vld [vmem:[#allocation8 + $0x1a68] sm:$0xff]  ;;  %v13880_v40 = vcombine.low %v4342_v25, %v4378_v26 }
0x12fa   :  { %v13811_v53 = vcombine.high %v4271_v37, %v4307_v38  ;;  %v13810_v46 = vcombine.low %v4271_v37, %v4307_v38 }
0x12fb   :  { %11039 = vmatpush1.bf16.msra.mxu1 %v13232_v60  ;;  %v4234_v60 = vld [vmem:[#allocation8 + $0x1820] sm:$0xff] }
0x12fc   :  { %11080 = vmatpush1.bf16.msra.mxu0 %v13234_v43  ;;  %11040 = vmatprep.subr.bf16.mxu1 %v13161_v45  ;;  %v4199_v43 = vld [vmem:[#allocation8 + $0x1708] sm:$0xff]  ;;  %v13737_v34 = vcombine.high %v4198_v42, %v4234_v60 }
0x12fd   :  { %11081 = vmatprep.subr.bf16.mxu0 %v13163_v33  ;;  %v4235_v45 = vld [vmem:[#allocation8 + $0x1828] sm:$0xff]  ;;  %v13808_v33 = vcombine.low %v4270_v35, %v4306_v36  ;;  %v3768_v35 = vld [vmem:[#allocation8 + $0x990] sm:$0xff] }
0x12fe   :  { %v13739_v47 = vcombine.high %v4199_v43, %v4235_v45  ;;  %v13738_v31 = vcombine.low %v4199_v43, %v4235_v45  ;;  %v3804_v36 = vld [vmem:[#allocation8 + $0xab0] sm:$0xff] }
0x12ff   :  { %11041 = vmatpush1.bf16.msra.mxu1 %v13160_v48  ;;  %v4162_v48 = vld [vmem:[#allocation8 + $0x15e0] sm:$0xff]  ;;  %v13309_v43 = vcombine.high %v3768_v35, %v3804_v36 }
0x1300   :  { %11082 = vmatpush1.bf16.msra.mxu0 %v13162_v49  ;;  %11042 = vmatprep.subr.bf16.mxu1 %v13089_v50  ;;  %v4127_v49 = vld [vmem:[#allocation8 + $0x14c8] sm:$0xff]  ;;  %v13665_v52 = vcombine.high %v4126_v21, %v4162_v48 }
0x1301   :  { %11083 = vmatprep.subr.bf16.mxu0 %v13091_v51  ;;  %v4163_v50 = vld [vmem:[#allocation8 + $0x15e8] sm:$0xff]  ;;  %v13736_v51 = vcombine.low %v4198_v42, %v4234_v60 }
0x1302   :  { %v13667_v54 = vcombine.high %v4127_v49, %v4163_v50  ;;  %v13666_v61 = vcombine.low %v4127_v49, %v4163_v50 }
0x1303   :  { %11043 = vmatpush1.bf16.msra.mxu1 %v13088_v56  ;;  %v4090_v56 = vld [vmem:[#allocation8 + $0x13a0] sm:$0xff] }
0x1304   :  { %11084 = vmatpush1.bf16.msra.mxu0 %v13090_v57  ;;  %11044 = vmatprep.subr.bf16.mxu1 %v13017_v58  ;;  %v4055_v57 = vld [vmem:[#allocation8 + $0x1288] sm:$0xff]  ;;  %v13593_v62 = vcombine.high %v4054_v55, %v4090_v56 }
0x1305   :  { %11085 = vmatprep.subr.bf16.mxu0 %v13019_v59  ;;  %v4091_v58 = vld [vmem:[#allocation8 + $0x13a8] sm:$0xff]  ;;  %v13664_v59 = vcombine.low %v4126_v21, %v4162_v48  ;;  %v3733_v21 = vld [vmem:[#allocation8 + $0x878] sm:$0xff]  ;;  %v13308_v48 = vcombine.low %v3768_v35, %v3804_v36  ;;  %v4416_v35 = vld [vmem:[#allocation8 + $0x1dd0] sm:$0xff] }
0x1306   :  { %v13595_v0 = vcombine.high %v4055_v57, %v4091_v58  ;;  %v13594_v7 = vcombine.low %v4055_v57, %v4091_v58  ;;  %v4452_v36 = vld [vmem:[#allocation8 + $0x1ef0] sm:$0xff] }
0x1307   :  { %11045 = vmatpush1.bf16.msra.mxu1 %v13016_v14  ;;  %v4020_v14 = vld [vmem:[#allocation8 + $0x1170] sm:$0xff] }
0x1308   :  { %11086 = vmatpush1.bf16.msra.mxu0 %v13018_v4  ;;  %11046 = vmatprep.subr.bf16.mxu1 %v14097_v2  ;;  %v3985_v4 = vld [vmem:[#allocation8 + $0x1058] sm:$0xff]  ;;  %v13525_v9 = vcombine.high %v3984_v13, %v4020_v14 }
0x1309   :  { %11087 = vmatprep.subr.bf16.mxu0 %v14099_v3  ;;  %v4021_v2 = vld [vmem:[#allocation8 + $0x1178] sm:$0xff]  ;;  %v13592_v3 = vcombine.low %v4054_v55, %v4090_v56 }
0x130a   :  { %v13527_v10 = vcombine.high %v3985_v4, %v4021_v2  ;;  %v13526_v17 = vcombine.low %v3985_v4, %v4021_v2  ;;  %v3661_v55 = vld [vmem:[#allocation8 + $0x638] sm:$0xff] }
0x130b   :  { %11047 = vmatpush2.bf16.msra.mxu1 %v14096_v5  ;;  %v3948_v5 = vld [vmem:[#allocation8 + $0xf30] sm:$0xff] }
0x130c   :  { %11088 = vmatpush2.bf16.msra.mxu0 %v14098_v11  ;;  %11048 = vmatprep.subr.bf16.mxu1 %v14025_v12  ;;  %v13524_v11 = vcombine.low %v3984_v13, %v4020_v14  ;;  %v3913_v12 = vld [vmem:[#allocation8 + $0xe18] sm:$0xff]  ;;  %v13453_v63 = vcombine.high %v3912_v1, %v3948_v5  ;;  %v13452_v26 = vcombine.low %v3912_v1, %v3948_v5 }
0x130d   :  { %11089 = vmatprep.subr.bf16.mxu0 %v14027_v15  ;;  %v3949_v15 = vld [vmem:[#allocation8 + $0xf38] sm:$0xff] }
0x130e   :  { %v13454_v44 = vcombine.low %v3913_v12, %v3949_v15  ;;  %v3589_v13 = vld [vmem:[#allocation8 + $0x3f8] sm:$0xff] }
0x130f   :  { %11049 = vmatpush2.bf16.msra.mxu1 %v14024_v20  ;;  %v3517_v1 = vld [vmem:[#allocation8 + $0x1b8] sm:$0xff] }
0x1310   :  { %11090 = vmatpush2.bf16.msra.mxu0 %v14026_v22  ;;  %11050 = vmatprep.subr.bf16.mxu1 %v13953_v23  ;;  %v13455_v22 = vcombine.high %v3913_v12, %v3949_v15  ;;  %v3841_v23 = vld [vmem:[#allocation8 + $0xbd8] sm:$0xff] }
0x1311   :  { %11091 = vmatprep.subr.bf16.mxu0 %v13955_v24  ;;  %v3877_v24 = vld [vmem:[#allocation8 + $0xcf8] sm:$0xff] }
0x1312   :  { %v13382_v60 = vcombine.low %v3841_v23, %v3877_v24 }
0x1313   :  { %11051 = vmatpush2.bf16.msra.mxu1 %v13952_v29  ;;  %v13381_v29 = vcombine.high %v3840_v18, %v3876_v19 }
0x1314   :  { %11092 = vmatpush2.bf16.msra.mxu0 %v13954_v30  ;;  %11052 = vmatprep.subr.bf16.mxu1 %v13881_v32 }
0x1315   :  { %11093 = vmatprep.subr.bf16.mxu0 %v13883_v28  ;;  %v13383_v28 = vcombine.high %v3841_v23, %v3877_v24 }
0x1317   :  { %11053 = vmatpush2.bf16.msra.mxu1 %v13880_v40  ;;  %v3769_v40 = vld [vmem:[#allocation8 + $0x998] sm:$0xff] }
0x1318   :  { %11094 = vmatpush2.bf16.msra.mxu0 %v13882_v39  ;;  %11054 = vmatprep.subr.bf16.mxu1 %v13809_v41  ;;  %v3805_v39 = vld [vmem:[#allocation8 + $0xab8] sm:$0xff] }
0x1319   :  { %11095 = vmatprep.subr.bf16.mxu0 %v13811_v53  ;;  %v13380_v53 = vcombine.low %v3840_v18, %v3876_v19  ;;  %v13310_v49 = vcombine.low %v3769_v40, %v3805_v39  ;;  %v4561_v18 = vld [vmem:[#allocation8 + $0x2258] sm:$0xff] }
0x131a   :  { %v4597_v19 = vld [vmem:[#allocation8 + $0x2378] sm:$0xff] }
0x131b   :  { %11055 = vmatpush2.bf16.msra.mxu1 %v13808_v33  ;;  %v13311_v33 = vcombine.high %v3769_v40, %v3805_v39  ;;  %v14103_v24 = vcombine.high %v4561_v18, %v4597_v19 }
0x131c   :  { %11096 = vmatpush2.bf16.msra.mxu0 %v13810_v46  ;;  %11056 = vmatprep.subr.bf16.mxu1 %v13737_v34  ;;  %v3696_v46 = vld [vmem:[#allocation8 + $0x750] sm:$0xff] }
0x131d   :  { %11097 = vmatprep.subr.bf16.mxu0 %v13739_v47  ;;  %v3732_v34 = vld [vmem:[#allocation8 + $0x870] sm:$0xff]  ;;  %v3697_v47 = vld [vmem:[#allocation8 + $0x758] sm:$0xff] }
0x131e   :  { %v13237_v50 = vcombine.high %v3696_v46, %v3732_v34  ;;  %v13236_v56 = vcombine.low %v3696_v46, %v3732_v34  ;;  %v13238_v57 = vcombine.low %v3697_v47, %v3733_v21 }
0x131f   :  { %11057 = vmatpush2.bf16.msra.mxu1 %v13736_v51  ;;  %v13239_v51 = vcombine.high %v3697_v47, %v3733_v21  ;;  %v4272_v21 = vld [vmem:[#allocation8 + $0x1950] sm:$0xff] }
0x1320   :  { %11098 = vmatpush2.bf16.msra.mxu0 %v13738_v31  ;;  %11058 = vmatprep.subr.bf16.mxu1 %v13665_v52  ;;  %v3624_v31 = vld [vmem:[#allocation8 + $0x510] sm:$0xff] }
0x1321   :  { %11099 = vmatprep.subr.bf16.mxu0 %v13667_v54  ;;  %v3660_v52 = vld [vmem:[#allocation8 + $0x630] sm:$0xff]  ;;  %v3625_v54 = vld [vmem:[#allocation8 + $0x518] sm:$0xff] }
0x1322   :  { %v13165_v58 = vcombine.high %v3624_v31, %v3660_v52  ;;  %v13164_v14 = vcombine.low %v3624_v31, %v3660_v52  ;;  %v13166_v4 = vcombine.low %v3625_v54, %v3661_v55 }
0x1323   :  { %11059 = vmatpush2.bf16.msra.mxu1 %v13664_v59  ;;  %v13167_v59 = vcombine.high %v3625_v54, %v3661_v55  ;;  %v4200_v55 = vld [vmem:[#allocation8 + $0x1710] sm:$0xff] }
0x1324   :  { %11100 = vmatpush2.bf16.msra.mxu0 %v13666_v61  ;;  %11060 = vmatprep.subr.bf16.mxu1 %v13593_v62  ;;  %v3552_v61 = vld [vmem:[#allocation8 + $0x2d0] sm:$0xff] }
0x1325   :  { %11101 = vmatprep.subr.bf16.mxu0 %v13595_v0  ;;  %v3588_v62 = vld [vmem:[#allocation8 + $0x3f0] sm:$0xff]  ;;  %v3553_v0 = vld [vmem:[#allocation8 + $0x2d8] sm:$0xff] }
0x1326   :  { %v13093_v2 = vcombine.high %v3552_v61, %v3588_v62  ;;  %v13092_v5 = vcombine.low %v3552_v61, %v3588_v62 }
0x1327   :  { %11061 = vmatpush2.bf16.msra.mxu1 %v13592_v3  ;;  %v13095_v3 = vcombine.high %v3553_v0, %v3589_v13 }
0x1328   :  { %11102 = vmatpush2.bf16.msra.mxu0 %v13594_v7  ;;  %11112 = vmatprep.subr.bf16.mxu1 %v13525_v9  ;;  %v3480_v7 = vld [vmem:[#allocation8 + $0x90] sm:$0xff] }
0x1329   :  { %11153 = vmatprep.subr.bf16.mxu0 %v13527_v10  ;;  %v3516_v9 = vld [vmem:[#allocation8 + $0x1b0] sm:$0xff]  ;;  %v3481_v10 = vld [vmem:[#allocation8 + $0x98] sm:$0xff] }
0x132a   :  { %v10818_v20 = vpop.f32.mrf.mxu1  ;;  %11063 = vmatmul.mubr.bf16.vlgmr.msra.gmra.mxu1 %v15547_v6  ;;  %v13021_v12 = vcombine.high %v3480_v7, %v3516_v9  ;;  %v13023_v15 = vcombine.high %v3481_v10, %v3517_v1 }
0x132b   :  { %v10859_v25 = vpop.f32.mrf.mxu0  ;;  %11104 = vmatmul.mubr.bf16.vlgmr.msra.gmra.mxu0 %v15547_v6  ;;  %11113 = vmatpush1.bf16.msra.mxu1 %v13524_v11  ;;  %v13094_v11 = vcombine.low %v3553_v0, %v3589_v13  ;;  %v4128_v13 = vld [vmem:[#allocation8 + $0x14d0] sm:$0xff] }
0x132c   :  { %11144 = vmatprep.mubr.bf16.mxu1 %v15549_v8  ;;  %11154 = vmatpush1.bf16.msra.mxu0 %v13526_v17  ;;  %v10820_v27 = vpop.f32.mrf.mxu1  ;;  %v4560_v17 = vld [vmem:[#allocation8 + $0x2250] sm:$0xff] }
0x132d   :  { %11185 = vmatprep.mubr.bf16.mxu0 %v15549_v8  ;;  %v14289_v30 = vpack.c.bf16 %v10820_v27, %v10818_v20  ;;  %v10861_v32 = vpop.f32.mrf.mxu0  ;;  %11114 = vmatprep.subr.bf16.mxu1 %v13453_v63  ;;  %v4596_v63 = vld [vmem:[#allocation8 + $0x2370] sm:$0xff]  ;;  %v13020_v20 = vcombine.low %v3480_v7, %v3516_v9  ;;  %v4489_v27 = vld [vmem:[#allocation8 + $0x2018] sm:$0xff] }
0x132e   :  { %v14290_v37 = vpack.c.bf16 %v10861_v32, %v10859_v25  ;;  %v10822_v38 = vpop.f32.mrf.mxu1  ;;  %11155 = vmatprep.subr.bf16.mxu0 %v13455_v22  ;;  %v13022_v22 = vcombine.low %v3481_v10, %v3517_v1  ;;  %v14101_v23 = vcombine.high %v4560_v17, %v4596_v63  ;;  %v4488_v25 = vld [vmem:[#allocation8 + $0x2010] sm:$0xff] }
0x132f   :  { %12004 = vst [vmem:[#allocation2 + $0x50] sm:$0xff] %v14289_v30  ;;  %v10863_v41 = vpop.f32.mrf.mxu0  ;;  %11115 = vmatpush1.bf16.msra.mxu1 %v13452_v26  ;;  %v4524_v26 = vld [vmem:[#allocation8 + $0x2130] sm:$0xff]  ;;  %v14102_v30 = vcombine.low %v4561_v18, %v4597_v19  ;;  %v4453_v38 = vld [vmem:[#allocation8 + $0x1ef8] sm:$0xff]  ;;  %v3986_v19 = vld [vmem:[#allocation8 + $0x1060] sm:$0xff] }
0x1330   :  { %12005 = vst [vmem:[#allocation2 + $0x58] sm:$0xff] %v14290_v37  ;;  %11156 = vmatpush1.bf16.msra.mxu0 %v13454_v44  ;;  %v10823_v42 = vpop.f32.mrf.mxu1  ;;  %11116 = vmatprep.subr.bf16.mxu1 %v13381_v29  ;;  %v4525_v44 = vld [vmem:[#allocation8 + $0x2138] sm:$0xff]  ;;  %v14100_v29 = vcombine.low %v4560_v17, %v4596_v63  ;;  %v14029_v32 = vcombine.high %v4488_v25, %v4524_v26  ;;  %v4056_v1 = vld [vmem:[#allocation8 + $0x1290] sm:$0xff] }
0x1331   :  { %v10864_v45 = vpop.f32.mrf.mxu0  ;;  %11157 = vmatprep.subr.bf16.mxu0 %v13383_v28  ;;  %v14031_v28 = vcombine.high %v4489_v27, %v4525_v44  ;;  %v4417_v37 = vld [vmem:[#allocation8 + $0x1dd8] sm:$0xff]  ;;  %v14028_v40 = vcombine.low %v4488_v25, %v4524_v26  ;;  %v14030_v39 = vcombine.low %v4489_v27, %v4525_v44  ;;  %v13957_v41 = vcombine.high %v4416_v35, %v4452_v36  ;;  %v4344_v42 = vld [vmem:[#allocation8 + $0x1b90] sm:$0xff]  ;;  %v3914_v44 = vld [vmem:[#allocation8 + $0xe20] sm:$0xff] }
0x1332   :  { %v4381_v45 = vld [vmem:[#allocation8 + $0x1cb8] sm:$0xff]  ;;  %v13958_v46 = vcombine.low %v4417_v37, %v4453_v38 }
0x1333   :  { %11117 = vmatpush1.bf16.msra.mxu1 %v13380_v53  ;;  %v13959_v53 = vcombine.high %v4417_v37, %v4453_v38  ;;  %v3842_v37 = vld [vmem:[#allocation8 + $0xbe0] sm:$0xff] }
0x1334   :  { %11158 = vmatpush1.bf16.msra.mxu0 %v13382_v60  ;;  %11118 = vmatprep.subr.bf16.mxu1 %v13309_v43  ;;  %v4380_v60 = vld [vmem:[#allocation8 + $0x1cb0] sm:$0xff]  ;;  %v4345_v43 = vld [vmem:[#allocation8 + $0x1b98] sm:$0xff]  ;;  %v3878_v38 = vld [vmem:[#allocation8 + $0xd00] sm:$0xff] }
0x1335   :  { %11159 = vmatprep.subr.bf16.mxu0 %v13311_v33  ;;  %v13956_v33 = vcombine.low %v4416_v35, %v4452_v36  ;;  %v13885_v34 = vcombine.high %v4344_v42, %v4380_v60  ;;  %v13887_v47 = vcombine.high %v4345_v43, %v4381_v45  ;;  %v13886_v31 = vcombine.low %v4345_v43, %v4381_v45 }
0x1337   :  { %11119 = vmatpush1.bf16.msra.mxu1 %v13308_v48  ;;  %v4308_v48 = vld [vmem:[#allocation8 + $0x1a70] sm:$0xff] }
0x1338   :  { %11160 = vmatpush1.bf16.msra.mxu0 %v13310_v49  ;;  %11120 = vmatprep.subr.bf16.mxu1 %v13237_v50  ;;  %v4273_v49 = vld [vmem:[#allocation8 + $0x1958] sm:$0xff]  ;;  %v13813_v52 = vcombine.high %v4272_v21, %v4308_v48 }
0x1339   :  { %11161 = vmatprep.subr.bf16.mxu0 %v13239_v51  ;;  %v4309_v50 = vld [vmem:[#allocation8 + $0x1a78] sm:$0xff]  ;;  %v13884_v51 = vcombine.low %v4344_v42, %v4380_v60 }
0x133a   :  { %v13815_v54 = vcombine.high %v4273_v49, %v4309_v50  ;;  %v13814_v61 = vcombine.low %v4273_v49, %v4309_v50 }
0x133b   :  { %11121 = vmatpush1.bf16.msra.mxu1 %v13236_v56  ;;  %v4236_v56 = vld [vmem:[#allocation8 + $0x1830] sm:$0xff] }
0x133c   :  { %11162 = vmatpush1.bf16.msra.mxu0 %v13238_v57  ;;  %11122 = vmatprep.subr.bf16.mxu1 %v13165_v58  ;;  %v4201_v57 = vld [vmem:[#allocation8 + $0x1718] sm:$0xff]  ;;  %v13741_v62 = vcombine.high %v4200_v55, %v4236_v56 }
0x133d   :  { %11163 = vmatprep.subr.bf16.mxu0 %v13167_v59  ;;  %v4237_v58 = vld [vmem:[#allocation8 + $0x1838] sm:$0xff]  ;;  %v13812_v59 = vcombine.low %v4272_v21, %v4308_v48  ;;  %v3770_v21 = vld [vmem:[#allocation8 + $0x9a0] sm:$0xff] }
0x133e   :  { %v13743_v0 = vcombine.high %v4201_v57, %v4237_v58  ;;  %v13742_v7 = vcombine.low %v4201_v57, %v4237_v58  ;;  %v3806_v48 = vld [vmem:[#allocation8 + $0xac0] sm:$0xff] }
0x133f   :  { %11123 = vmatpush1.bf16.msra.mxu1 %v13164_v14  ;;  %v4164_v14 = vld [vmem:[#allocation8 + $0x15f0] sm:$0xff]  ;;  %v13313_v57 = vcombine.high %v3770_v21, %v3806_v48 }
0x1340   :  { %11164 = vmatpush1.bf16.msra.mxu0 %v13166_v4  ;;  %11124 = vmatprep.subr.bf16.mxu1 %v13093_v2  ;;  %v4129_v4 = vld [vmem:[#allocation8 + $0x14d8] sm:$0xff]  ;;  %v13669_v9 = vcombine.high %v4128_v13, %v4164_v14 }
0x1341   :  { %11165 = vmatprep.subr.bf16.mxu0 %v13095_v3  ;;  %v4165_v2 = vld [vmem:[#allocation8 + $0x15f8] sm:$0xff]  ;;  %v13740_v3 = vcombine.low %v4200_v55, %v4236_v56 }
0x1342   :  { %v13671_v10 = vcombine.high %v4129_v4, %v4165_v2  ;;  %v13670_v17 = vcombine.low %v4129_v4, %v4165_v2 }
0x1343   :  { %11125 = vmatpush1.bf16.msra.mxu1 %v13092_v5  ;;  %v4092_v5 = vld [vmem:[#allocation8 + $0x13b0] sm:$0xff] }
0x1344   :  { %11166 = vmatpush1.bf16.msra.mxu0 %v13094_v11  ;;  %11126 = vmatprep.subr.bf16.mxu1 %v13021_v12  ;;  %v4057_v11 = vld [vmem:[#allocation8 + $0x1298] sm:$0xff]  ;;  %v13597_v63 = vcombine.high %v4056_v1, %v4092_v5 }
0x1345   :  { %11167 = vmatprep.subr.bf16.mxu0 %v13023_v15  ;;  %v4093_v12 = vld [vmem:[#allocation8 + $0x13b8] sm:$0xff]  ;;  %v13668_v15 = vcombine.low %v4128_v13, %v4164_v14  ;;  %v3735_v13 = vld [vmem:[#allocation8 + $0x888] sm:$0xff]  ;;  %v13312_v14 = vcombine.low %v3770_v21, %v3806_v48  ;;  %v4418_v21 = vld [vmem:[#allocation8 + $0x1de0] sm:$0xff] }
0x1346   :  { %v13599_v18 = vcombine.high %v4057_v11, %v4093_v12  ;;  %v13598_v25 = vcombine.low %v4057_v11, %v4093_v12  ;;  %v4454_v48 = vld [vmem:[#allocation8 + $0x1f00] sm:$0xff] }
0x1347   :  { %11127 = vmatpush1.bf16.msra.mxu1 %v13020_v20  ;;  %v4022_v20 = vld [vmem:[#allocation8 + $0x1180] sm:$0xff] }
0x1348   :  { %11168 = vmatpush1.bf16.msra.mxu0 %v13022_v22  ;;  %11128 = vmatprep.subr.bf16.mxu1 %v14101_v23  ;;  %v3987_v22 = vld [vmem:[#allocation8 + $0x1068] sm:$0xff]  ;;  %v13529_v26 = vcombine.high %v3986_v19, %v4022_v20 }
0x1349   :  { %11169 = vmatprep.subr.bf16.mxu0 %v14103_v24  ;;  %v4023_v23 = vld [vmem:[#allocation8 + $0x1188] sm:$0xff]  ;;  %v13596_v24 = vcombine.low %v4056_v1, %v4092_v5 }
0x134a   :  { %v13531_v27 = vcombine.high %v3987_v22, %v4023_v23  ;;  %v13530_v35 = vcombine.low %v3987_v22, %v4023_v23  ;;  %v3663_v1 = vld [vmem:[#allocation8 + $0x648] sm:$0xff] }
0x134b   :  { %11129 = vmatpush2.bf16.msra.mxu1 %v14100_v29  ;;  %v3950_v29 = vld [vmem:[#allocation8 + $0xf40] sm:$0xff] }
0x134c   :  { %11170 = vmatpush2.bf16.msra.mxu0 %v14102_v30  ;;  %11130 = vmatprep.subr.bf16.mxu1 %v14029_v32  ;;  %v13528_v30 = vcombine.low %v3986_v19, %v4022_v20  ;;  %v3915_v32 = vld [vmem:[#allocation8 + $0xe28] sm:$0xff]  ;;  %v13457_v36 = vcombine.high %v3914_v44, %v3950_v29  ;;  %v13456_v60 = vcombine.low %v3914_v44, %v3950_v29 }
0x134d   :  { %11171 = vmatprep.subr.bf16.mxu0 %v14031_v28  ;;  %v3951_v28 = vld [vmem:[#allocation8 + $0xf48] sm:$0xff] }
0x134e   :  { %v13458_v45 = vcombine.low %v3915_v32, %v3951_v28  ;;  %v3591_v19 = vld [vmem:[#allocation8 + $0x408] sm:$0xff] }
0x134f   :  { %11131 = vmatpush2.bf16.msra.mxu1 %v14028_v40  ;;  %v3519_v44 = vld [vmem:[#allocation8 + $0x1c8] sm:$0xff] }
0x1350   :  { %11172 = vmatpush2.bf16.msra.mxu0 %v14030_v39  ;;  %11132 = vmatprep.subr.bf16.mxu1 %v13957_v41  ;;  %v13459_v39 = vcombine.high %v3915_v32, %v3951_v28  ;;  %v3843_v41 = vld [vmem:[#allocation8 + $0xbe8] sm:$0xff] }
0x1351   :  { %11173 = vmatprep.subr.bf16.mxu0 %v13959_v53  ;;  %v3879_v53 = vld [vmem:[#allocation8 + $0xd08] sm:$0xff] }
0x1352   :  { %v13386_v56 = vcombine.low %v3843_v41, %v3879_v53 }
0x1353   :  { %11133 = vmatpush2.bf16.msra.mxu1 %v13956_v33  ;;  %v13385_v33 = vcombine.high %v3842_v37, %v3878_v38 }
0x1354   :  { %11174 = vmatpush2.bf16.msra.mxu0 %v13958_v46  ;;  %11134 = vmatprep.subr.bf16.mxu1 %v13885_v34 }
0x1355   :  { %11175 = vmatprep.subr.bf16.mxu0 %v13887_v47  ;;  %v13387_v47 = vcombine.high %v3843_v41, %v3879_v53 }
0x1357   :  { %11135 = vmatpush2.bf16.msra.mxu1 %v13884_v51  ;;  %v3771_v51 = vld [vmem:[#allocation8 + $0x9a8] sm:$0xff] }
0x1358   :  { %11176 = vmatpush2.bf16.msra.mxu0 %v13886_v31  ;;  %11136 = vmatprep.subr.bf16.mxu1 %v13813_v52  ;;  %v3807_v31 = vld [vmem:[#allocation8 + $0xac8] sm:$0xff] }
0x1359   :  { %11177 = vmatprep.subr.bf16.mxu0 %v13815_v54  ;;  %v13384_v54 = vcombine.low %v3842_v37, %v3878_v38  ;;  %v13314_v4 = vcombine.low %v3771_v51, %v3807_v31  ;;  %v4563_v37 = vld [vmem:[#allocation8 + $0x2268] sm:$0xff] }
0x135a   :  { %v4599_v38 = vld [vmem:[#allocation8 + $0x2388] sm:$0xff] }
0x135b   :  { %11137 = vmatpush2.bf16.msra.mxu1 %v13812_v59  ;;  %v13315_v59 = vcombine.high %v3771_v51, %v3807_v31  ;;  %v14107_v53 = vcombine.high %v4563_v37, %v4599_v38 }
0x135c   :  { %11178 = vmatpush2.bf16.msra.mxu0 %v13814_v61  ;;  %11138 = vmatprep.subr.bf16.mxu1 %v13741_v62  ;;  %v3698_v61 = vld [vmem:[#allocation8 + $0x760] sm:$0xff] }
0x135d   :  { %11179 = vmatprep.subr.bf16.mxu0 %v13743_v0  ;;  %v3734_v62 = vld [vmem:[#allocation8 + $0x880] sm:$0xff]  ;;  %v3699_v0 = vld [vmem:[#allocation8 + $0x768] sm:$0xff] }
0x135e   :  { %v13241_v2 = vcombine.high %v3698_v61, %v3734_v62  ;;  %v13240_v5 = vcombine.low %v3698_v61, %v3734_v62  ;;  %v13242_v11 = vcombine.low %v3699_v0, %v3735_v13 }
0x135f   :  { %11139 = vmatpush2.bf16.msra.mxu1 %v13740_v3  ;;  %v13243_v3 = vcombine.high %v3699_v0, %v3735_v13  ;;  %v4274_v13 = vld [vmem:[#allocation8 + $0x1960] sm:$0xff] }
0x1360   :  { %11180 = vmatpush2.bf16.msra.mxu0 %v13742_v7  ;;  %11140 = vmatprep.subr.bf16.mxu1 %v13669_v9  ;;  %v3626_v7 = vld [vmem:[#allocation8 + $0x520] sm:$0xff] }
0x1361   :  { %11181 = vmatprep.subr.bf16.mxu0 %v13671_v10  ;;  %v3662_v9 = vld [vmem:[#allocation8 + $0x640] sm:$0xff]  ;;  %v3627_v10 = vld [vmem:[#allocation8 + $0x528] sm:$0xff] }
0x1362   :  { %v13169_v12 = vcombine.high %v3626_v7, %v3662_v9  ;;  %v13168_v20 = vcombine.low %v3626_v7, %v3662_v9  ;;  %v13170_v22 = vcombine.low %v3627_v10, %v3663_v1 }
0x1363   :  { %11141 = vmatpush2.bf16.msra.mxu1 %v13668_v15  ;;  %v13171_v15 = vcombine.high %v3627_v10, %v3663_v1  ;;  %v4202_v1 = vld [vmem:[#allocation8 + $0x1720] sm:$0xff] }
0x1364   :  { %11182 = vmatpush2.bf16.msra.mxu0 %v13670_v17  ;;  %11142 = vmatprep.subr.bf16.mxu1 %v13597_v63  ;;  %v3554_v17 = vld [vmem:[#allocation8 + $0x2e0] sm:$0xff] }
0x1365   :  { %11183 = vmatprep.subr.bf16.mxu0 %v13599_v18  ;;  %v3590_v63 = vld [vmem:[#allocation8 + $0x400] sm:$0xff]  ;;  %v3555_v18 = vld [vmem:[#allocation8 + $0x2e8] sm:$0xff] }
0x1366   :  { %v13097_v23 = vcombine.high %v3554_v17, %v3590_v63  ;;  %v13096_v29 = vcombine.low %v3554_v17, %v3590_v63 }
0x1367   :  { %11143 = vmatpush2.bf16.msra.mxu1 %v13596_v24  ;;  %v13099_v24 = vcombine.high %v3555_v18, %v3591_v19 }
0x1368   :  { %11184 = vmatpush2.bf16.msra.mxu0 %v13598_v25  ;;  %11194 = vmatprep.subr.bf16.mxu1 %v13529_v26  ;;  %v3482_v25 = vld [vmem:[#allocation8 + $0xa0] sm:$0xff] }
0x1369   :  { %11235 = vmatprep.subr.bf16.mxu0 %v13531_v27  ;;  %v3518_v26 = vld [vmem:[#allocation8 + $0x1c0] sm:$0xff]  ;;  %v3483_v27 = vld [vmem:[#allocation8 + $0xa8] sm:$0xff] }
0x136a   :  { %v10900_v40 = vpop.f32.mrf.mxu1  ;;  %11145 = vmatmul.mubr.bf16.vlgmr.msra.gmra.mxu1 %v15547_v6  ;;  %v13025_v32 = vcombine.high %v3482_v25, %v3518_v26  ;;  %v13027_v28 = vcombine.high %v3483_v27, %v3519_v44 }
0x136b   :  { %v10941_v42 = vpop.f32.mrf.mxu0  ;;  %11186 = vmatmul.mubr.bf16.vlgmr.msra.gmra.mxu0 %v15547_v6  ;;  %11195 = vmatpush1.bf16.msra.mxu1 %v13528_v30  ;;  %v13098_v30 = vcombine.low %v3555_v18, %v3591_v19  ;;  %v4130_v19 = vld [vmem:[#allocation8 + $0x14e0] sm:$0xff] }
0x136c   :  { %11226 = vmatprep.mubr.bf16.mxu1 %v15549_v8  ;;  %11236 = vmatpush1.bf16.msra.mxu0 %v13530_v35  ;;  %v10902_v43 = vpop.f32.mrf.mxu1  ;;  %v4562_v35 = vld [vmem:[#allocation8 + $0x2260] sm:$0xff] }
0x136d   :  { %11267 = vmatprep.mubr.bf16.mxu0 %v15549_v8  ;;  %v14291_v46 = vpack.c.bf16 %v10902_v43, %v10900_v40  ;;  %v10943_v34 = vpop.f32.mrf.mxu0  ;;  %11196 = vmatprep.subr.bf16.mxu1 %v13457_v36  ;;  %v4598_v36 = vld [vmem:[#allocation8 + $0x2380] sm:$0xff]  ;;  %v13024_v40 = vcombine.low %v3482_v25, %v3518_v26  ;;  %v4491_v43 = vld [vmem:[#allocation8 + $0x2028] sm:$0xff] }
0x136e   :  { %v14292_v49 = vpack.c.bf16 %v10943_v34, %v10941_v42  ;;  %v10904_v50 = vpop.f32.mrf.mxu1  ;;  %11237 = vmatprep.subr.bf16.mxu0 %v13459_v39  ;;  %v13026_v39 = vcombine.low %v3483_v27, %v3519_v44  ;;  %v14105_v41 = vcombine.high %v4562_v35, %v4598_v36  ;;  %v4490_v42 = vld [vmem:[#allocation8 + $0x2020] sm:$0xff] }
0x136f   :  { %12030 = vst [vmem:[#allocation2 + $0x60] sm:$0xff] %v14291_v46  ;;  %v10945_v52 = vpop.f32.mrf.mxu0  ;;  %11197 = vmatpush1.bf16.msra.mxu1 %v13456_v60  ;;  %v4526_v60 = vld [vmem:[#allocation8 + $0x2140] sm:$0xff]  ;;  %v14106_v46 = vcombine.low %v4563_v37, %v4599_v38  ;;  %v4455_v50 = vld [vmem:[#allocation8 + $0x1f08] sm:$0xff]  ;;  %v3988_v38 = vld [vmem:[#allocation8 + $0x1070] sm:$0xff] }
0x1370   :  { %12031 = vst [vmem:[#allocation2 + $0x68] sm:$0xff] %v14292_v49  ;;  %11238 = vmatpush1.bf16.msra.mxu0 %v13458_v45  ;;  %v10905_v55 = vpop.f32.mrf.mxu1  ;;  %11198 = vmatprep.subr.bf16.mxu1 %v13385_v33  ;;  %v4527_v45 = vld [vmem:[#allocation8 + $0x2148] sm:$0xff]  ;;  %v14104_v33 = vcombine.low %v4562_v35, %v4598_v36  ;;  %v14033_v34 = vcombine.high %v4490_v42, %v4526_v60  ;;  %v4058_v44 = vld [vmem:[#allocation8 + $0x12a0] sm:$0xff] }
0x1371   :  { %v10946_v58 = vpop.f32.mrf.mxu0  ;;  %11239 = vmatprep.subr.bf16.mxu0 %v13387_v47  ;;  %v14035_v47 = vcombine.high %v4491_v43, %v4527_v45  ;;  %v4419_v49 = vld [vmem:[#allocation8 + $0x1de8] sm:$0xff]  ;;  %v14032_v51 = vcombine.low %v4490_v42, %v4526_v60  ;;  %v14034_v31 = vcombine.low %v4491_v43, %v4527_v45  ;;  %v13961_v52 = vcombine.high %v4418_v21, %v4454_v48  ;;  %v4346_v55 = vld [vmem:[#allocation8 + $0x1ba0] sm:$0xff]  ;;  %v3916_v45 = vld [vmem:[#allocation8 + $0xe30] sm:$0xff] }
0x1372   :  { %v4383_v58 = vld [vmem:[#allocation8 + $0x1cc8] sm:$0xff]  ;;  %v13962_v61 = vcombine.low %v4419_v49, %v4455_v50 }
0x1373   :  { %11199 = vmatpush1.bf16.msra.mxu1 %v13384_v54  ;;  %v13963_v54 = vcombine.high %v4419_v49, %v4455_v50  ;;  %v3844_v49 = vld [vmem:[#allocation8 + $0xbf0] sm:$0xff] }
0x1374   :  { %11240 = vmatpush1.bf16.msra.mxu0 %v13386_v56  ;;  %11200 = vmatprep.subr.bf16.mxu1 %v13313_v57  ;;  %v4382_v56 = vld [vmem:[#allocation8 + $0x1cc0] sm:$0xff]  ;;  %v4347_v57 = vld [vmem:[#allocation8 + $0x1ba8] sm:$0xff]  ;;  %v3880_v50 = vld [vmem:[#allocation8 + $0xd10] sm:$0xff] }
0x1375   :  { %11241 = vmatprep.subr.bf16.mxu0 %v13315_v59  ;;  %v13960_v59 = vcombine.low %v4418_v21, %v4454_v48  ;;  %v13889_v62 = vcombine.high %v4346_v55, %v4382_v56  ;;  %v13891_v0 = vcombine.high %v4347_v57, %v4383_v58  ;;  %v13890_v7 = vcombine.low %v4347_v57, %v4383_v58 }
0x1377   :  { %11201 = vmatpush1.bf16.msra.mxu1 %v13312_v14  ;;  %v4310_v14 = vld [vmem:[#allocation8 + $0x1a80] sm:$0xff] }
0x1378   :  { %11242 = vmatpush1.bf16.msra.mxu0 %v13314_v4  ;;  %11202 = vmatprep.subr.bf16.mxu1 %v13241_v2  ;;  %v4275_v4 = vld [vmem:[#allocation8 + $0x1968] sm:$0xff]  ;;  %v13817_v9 = vcombine.high %v4274_v13, %v4310_v14 }
0x1379   :  { %11243 = vmatprep.subr.bf16.mxu0 %v13243_v3  ;;  %v4311_v2 = vld [vmem:[#allocation8 + $0x1a88] sm:$0xff]  ;;  %v13888_v3 = vcombine.low %v4346_v55, %v4382_v56 }
0x137a   :  { %v13819_v10 = vcombine.high %v4275_v4, %v4311_v2  ;;  %v13818_v17 = vcombine.low %v4275_v4, %v4311_v2 }
0x137b   :  { %11203 = vmatpush1.bf16.msra.mxu1 %v13240_v5  ;;  %v4238_v5 = vld [vmem:[#allocation8 + $0x1840] sm:$0xff] }
0x137c   :  { %11244 = vmatpush1.bf16.msra.mxu0 %v13242_v11  ;;  %11204 = vmatprep.subr.bf16.mxu1 %v13169_v12  ;;  %v4203_v11 = vld [vmem:[#allocation8 + $0x1728] sm:$0xff]  ;;  %v13745_v63 = vcombine.high %v4202_v1, %v4238_v5 }
0x137d   :  { %11245 = vmatprep.subr.bf16.mxu0 %v13171_v15  ;;  %v4239_v12 = vld [vmem:[#allocation8 + $0x1848] sm:$0xff]  ;;  %v13816_v15 = vcombine.low %v4274_v13, %v4310_v14  ;;  %v3772_v13 = vld [vmem:[#allocation8 + $0x9b0] sm:$0xff] }
0x137e   :  { %v13747_v18 = vcombine.high %v4203_v11, %v4239_v12  ;;  %v13746_v25 = vcombine.low %v4203_v11, %v4239_v12  ;;  %v3808_v14 = vld [vmem:[#allocation8 + $0xad0] sm:$0xff] }
0x137f   :  { %11205 = vmatpush1.bf16.msra.mxu1 %v13168_v20  ;;  %v4166_v20 = vld [vmem:[#allocation8 + $0x1600] sm:$0xff]  ;;  %v13317_v11 = vcombine.high %v3772_v13, %v3808_v14 }
0x1380   :  { %11246 = vmatpush1.bf16.msra.mxu0 %v13170_v22  ;;  %11206 = vmatprep.subr.bf16.mxu1 %v13097_v23  ;;  %v4131_v22 = vld [vmem:[#allocation8 + $0x14e8] sm:$0xff]  ;;  %v13673_v26 = vcombine.high %v4130_v19, %v4166_v20 }
0x1381   :  { %11247 = vmatprep.subr.bf16.mxu0 %v13099_v24  ;;  %v4167_v23 = vld [vmem:[#allocation8 + $0x1608] sm:$0xff]  ;;  %v13744_v24 = vcombine.low %v4202_v1, %v4238_v5 }
0x1382   :  { %v13675_v27 = vcombine.high %v4131_v22, %v4167_v23  ;;  %v13674_v35 = vcombine.low %v4131_v22, %v4167_v23 }
0x1383   :  { %11207 = vmatpush1.bf16.msra.mxu1 %v13096_v29  ;;  %v4094_v29 = vld [vmem:[#allocation8 + $0x13c0] sm:$0xff] }
0x1384   :  { %11248 = vmatpush1.bf16.msra.mxu0 %v13098_v30  ;;  %11208 = vmatprep.subr.bf16.mxu1 %v13025_v32  ;;  %v4059_v30 = vld [vmem:[#allocation8 + $0x12a8] sm:$0xff]  ;;  %v13601_v36 = vcombine.high %v4058_v44, %v4094_v29 }
0x1385   :  { %11249 = vmatprep.subr.bf16.mxu0 %v13027_v28  ;;  %v4095_v32 = vld [vmem:[#allocation8 + $0x13c8] sm:$0xff]  ;;  %v13672_v28 = vcombine.low %v4130_v19, %v4166_v20  ;;  %v3737_v19 = vld [vmem:[#allocation8 + $0x898] sm:$0xff]  ;;  %v13316_v20 = vcombine.low %v3772_v13, %v3808_v14  ;;  %v4420_v13 = vld [vmem:[#allocation8 + $0x1df0] sm:$0xff] }
0x1386   :  { %v13603_v37 = vcombine.high %v4059_v30, %v4095_v32  ;;  %v13602_v42 = vcombine.low %v4059_v30, %v4095_v32  ;;  %v4456_v14 = vld [vmem:[#allocation8 + $0x1f10] sm:$0xff] }
0x1387   :  { %11209 = vmatpush1.bf16.msra.mxu1 %v13024_v40  ;;  %v4024_v40 = vld [vmem:[#allocation8 + $0x1190] sm:$0xff] }
0x1388   :  { %11250 = vmatpush1.bf16.msra.mxu0 %v13026_v39  ;;  %11210 = vmatprep.subr.bf16.mxu1 %v14105_v41  ;;  %v3989_v39 = vld [vmem:[#allocation8 + $0x1078] sm:$0xff]  ;;  %v13533_v60 = vcombine.high %v3988_v38, %v4024_v40 }
0x1389   :  { %11251 = vmatprep.subr.bf16.mxu0 %v14107_v53  ;;  %v4025_v41 = vld [vmem:[#allocation8 + $0x1198] sm:$0xff]  ;;  %v13600_v53 = vcombine.low %v4058_v44, %v4094_v29 }
0x138a   :  { %v13535_v43 = vcombine.high %v3989_v39, %v4025_v41  ;;  %v13534_v21 = vcombine.low %v3989_v39, %v4025_v41  ;;  %v3665_v44 = vld [vmem:[#allocation8 + $0x658] sm:$0xff] }
0x138b   :  { %11211 = vmatpush2.bf16.msra.mxu1 %v14104_v33  ;;  %v3952_v33 = vld [vmem:[#allocation8 + $0xf50] sm:$0xff] }
0x138c   :  { %11252 = vmatpush2.bf16.msra.mxu0 %v14106_v46  ;;  %11212 = vmatprep.subr.bf16.mxu1 %v14033_v34  ;;  %v13532_v46 = vcombine.low %v3988_v38, %v4024_v40  ;;  %v3917_v34 = vld [vmem:[#allocation8 + $0xe38] sm:$0xff]  ;;  %v13461_v48 = vcombine.high %v3916_v45, %v3952_v33  ;;  %v13460_v56 = vcombine.low %v3916_v45, %v3952_v33 }
0x138d   :  { %11253 = vmatprep.subr.bf16.mxu0 %v14035_v47  ;;  %v3953_v47 = vld [vmem:[#allocation8 + $0xf58] sm:$0xff] }
0x138e   :  { %v13462_v58 = vcombine.low %v3917_v34, %v3953_v47  ;;  %v3593_v38 = vld [vmem:[#allocation8 + $0x418] sm:$0xff] }
0x138f   :  { %11213 = vmatpush2.bf16.msra.mxu1 %v14032_v51  ;;  %v3521_v45 = vld [vmem:[#allocation8 + $0x1d8] sm:$0xff] }
0x1390   :  { %11254 = vmatpush2.bf16.msra.mxu0 %v14034_v31  ;;  %11214 = vmatprep.subr.bf16.mxu1 %v13961_v52  ;;  %v13463_v31 = vcombine.high %v3917_v34, %v3953_v47  ;;  %v3845_v52 = vld [vmem:[#allocation8 + $0xbf8] sm:$0xff] }
0x1391   :  { %11255 = vmatprep.subr.bf16.mxu0 %v13963_v54  ;;  %v3881_v54 = vld [vmem:[#allocation8 + $0xd18] sm:$0xff] }
0x1392   :  { %v13390_v5 = vcombine.low %v3845_v52, %v3881_v54 }
0x1393   :  { %11215 = vmatpush2.bf16.msra.mxu1 %v13960_v59  ;;  %v13389_v59 = vcombine.high %v3844_v49, %v3880_v50 }
0x1394   :  { %11256 = vmatpush2.bf16.msra.mxu0 %v13962_v61  ;;  %11216 = vmatprep.subr.bf16.mxu1 %v13889_v62 }
0x1395   :  { %11257 = vmatprep.subr.bf16.mxu0 %v13891_v0  ;;  %v13391_v0 = vcombine.high %v3845_v52, %v3881_v54 }
0x1397   :  { %11217 = vmatpush2.bf16.msra.mxu1 %v13888_v3  ;;  %v3773_v3 = vld [vmem:[#allocation8 + $0x9b8] sm:$0xff] }
0x1398   :  { %11258 = vmatpush2.bf16.msra.mxu0 %v13890_v7  ;;  %11218 = vmatprep.subr.bf16.mxu1 %v13817_v9  ;;  %v3809_v7 = vld [vmem:[#allocation8 + $0xad8] sm:$0xff] }
0x1399   :  { %11259 = vmatprep.subr.bf16.mxu0 %v13819_v10  ;;  %v13388_v10 = vcombine.low %v3844_v49, %v3880_v50  ;;  %v13318_v22 = vcombine.low %v3773_v3, %v3809_v7  ;;  %v4565_v49 = vld [vmem:[#allocation8 + $0x2278] sm:$0xff] }
0x139a   :  { %v4601_v50 = vld [vmem:[#allocation8 + $0x2398] sm:$0xff] }
0x139b   :  { %11219 = vmatpush2.bf16.msra.mxu1 %v13816_v15  ;;  %v13319_v15 = vcombine.high %v3773_v3, %v3809_v7  ;;  %v14111_v54 = vcombine.high %v4565_v49, %v4601_v50 }
0x139c   :  { %11260 = vmatpush2.bf16.msra.mxu0 %v13818_v17  ;;  %11220 = vmatprep.subr.bf16.mxu1 %v13745_v63  ;;  %v3700_v17 = vld [vmem:[#allocation8 + $0x770] sm:$0xff] }
0x139d   :  { %11261 = vmatprep.subr.bf16.mxu0 %v13747_v18  ;;  %v3736_v63 = vld [vmem:[#allocation8 + $0x890] sm:$0xff]  ;;  %v3701_v18 = vld [vmem:[#allocation8 + $0x778] sm:$0xff] }
0x139e   :  { %v13245_v23 = vcombine.high %v3700_v17, %v3736_v63  ;;  %v13244_v29 = vcombine.low %v3700_v17, %v3736_v63  ;;  %v13246_v30 = vcombine.low %v3701_v18, %v3737_v19 }
0x139f   :  { %11221 = vmatpush2.bf16.msra.mxu1 %v13744_v24  ;;  %v13247_v24 = vcombine.high %v3701_v18, %v3737_v19  ;;  %v4276_v19 = vld [vmem:[#allocation8 + $0x1970] sm:$0xff] }
0x13a0   :  { %11262 = vmatpush2.bf16.msra.mxu0 %v13746_v25  ;;  %11222 = vmatprep.subr.bf16.mxu1 %v13673_v26  ;;  %v3628_v25 = vld [vmem:[#allocation8 + $0x530] sm:$0xff] }
0x13a1   :  { %11263 = vmatprep.subr.bf16.mxu0 %v13675_v27  ;;  %v3664_v26 = vld [vmem:[#allocation8 + $0x650] sm:$0xff]  ;;  %v3629_v27 = vld [vmem:[#allocation8 + $0x538] sm:$0xff] }
0x13a2   :  { %v13173_v32 = vcombine.high %v3628_v25, %v3664_v26  ;;  %v13172_v40 = vcombine.low %v3628_v25, %v3664_v26  ;;  %v13174_v39 = vcombine.low %v3629_v27, %v3665_v44 }
0x13a3   :  { %11223 = vmatpush2.bf16.msra.mxu1 %v13672_v28  ;;  %v13175_v28 = vcombine.high %v3629_v27, %v3665_v44  ;;  %v4204_v44 = vld [vmem:[#allocation8 + $0x1730] sm:$0xff] }
0x13a4   :  { %11264 = vmatpush2.bf16.msra.mxu0 %v13674_v35  ;;  %11224 = vmatprep.subr.bf16.mxu1 %v13601_v36  ;;  %v3556_v35 = vld [vmem:[#allocation8 + $0x2f0] sm:$0xff] }
0x13a5   :  { %11265 = vmatprep.subr.bf16.mxu0 %v13603_v37  ;;  %v3592_v36 = vld [vmem:[#allocation8 + $0x410] sm:$0xff]  ;;  %v3557_v37 = vld [vmem:[#allocation8 + $0x2f8] sm:$0xff] }
0x13a6   :  { %v13101_v41 = vcombine.high %v3556_v35, %v3592_v36  ;;  %v13100_v33 = vcombine.low %v3556_v35, %v3592_v36 }
0x13a7   :  { %11225 = vmatpush2.bf16.msra.mxu1 %v13600_v53  ;;  %v13103_v53 = vcombine.high %v3557_v37, %v3593_v38 }
0x13a8   :  { %11266 = vmatpush2.bf16.msra.mxu0 %v13602_v42  ;;  %11276 = vmatprep.subr.bf16.mxu1 %v13533_v60  ;;  %v3484_v42 = vld [vmem:[#allocation8 + $0xb0] sm:$0xff] }
0x13a9   :  { %11317 = vmatprep.subr.bf16.mxu0 %v13535_v43  ;;  %v3520_v60 = vld [vmem:[#allocation8 + $0x1d0] sm:$0xff]  ;;  %v3485_v43 = vld [vmem:[#allocation8 + $0xb8] sm:$0xff] }
0x13aa   :  { %v10982_v51 = vpop.f32.mrf.mxu1  ;;  %11227 = vmatmul.mubr.bf16.vlgmr.msra.gmra.mxu1 %v15547_v6  ;;  %v13029_v34 = vcombine.high %v3484_v42, %v3520_v60  ;;  %v13031_v47 = vcombine.high %v3485_v43, %v3521_v45 }
0x13ab   :  { %v11023_v55 = vpop.f32.mrf.mxu0  ;;  %11268 = vmatmul.mubr.bf16.vlgmr.msra.gmra.mxu0 %v15547_v6  ;;  %11277 = vmatpush1.bf16.msra.mxu1 %v13532_v46  ;;  %v13102_v46 = vcombine.low %v3557_v37, %v3593_v38  ;;  %v4132_v38 = vld [vmem:[#allocation8 + $0x14f0] sm:$0xff] }
0x13ac   :  { %11308 = vmatprep.mubr.bf16.mxu1 %v15549_v8  ;;  %11318 = vmatpush1.bf16.msra.mxu0 %v13534_v21  ;;  %v10984_v57 = vpop.f32.mrf.mxu1  ;;  %v4564_v21 = vld [vmem:[#allocation8 + $0x2270] sm:$0xff] }
0x13ad   :  { %11349 = vmatprep.mubr.bf16.mxu0 %v15549_v8  ;;  %v14293_v61 = vpack.c.bf16 %v10984_v57, %v10982_v51  ;;  %v11025_v62 = vpop.f32.mrf.mxu0  ;;  %11278 = vmatprep.subr.bf16.mxu1 %v13461_v48  ;;  %v4600_v48 = vld [vmem:[#allocation8 + $0x2390] sm:$0xff]  ;;  %v13028_v51 = vcombine.low %v3484_v42, %v3520_v60  ;;  %v4493_v57 = vld [vmem:[#allocation8 + $0x2038] sm:$0xff] }
0x13ae   :  { %v14294_v4 = vpack.c.bf16 %v11025_v62, %v11023_v55  ;;  %v10986_v2 = vpop.f32.mrf.mxu1  ;;  %11319 = vmatprep.subr.bf16.mxu0 %v13463_v31  ;;  %v13030_v31 = vcombine.low %v3485_v43, %v3521_v45  ;;  %v14109_v52 = vcombine.high %v4564_v21, %v4600_v48  ;;  %v4492_v55 = vld [vmem:[#allocation8 + $0x2030] sm:$0xff] }
0x13af   :  { %12032 = vst [vmem:[#allocation2 + $0x70] sm:$0xff] %v14293_v61  ;;  %v11027_v9 = vpop.f32.mrf.mxu0  ;;  %11279 = vmatpush1.bf16.msra.mxu1 %v13460_v56  ;;  %v4528_v56 = vld [vmem:[#allocation8 + $0x2150] sm:$0xff]  ;;  %v14110_v61 = vcombine.low %v4565_v49, %v4601_v50  ;;  %v4457_v2 = vld [vmem:[#allocation8 + $0x1f18] sm:$0xff]  ;;  %v3990_v50 = vld [vmem:[#allocation8 + $0x1080] sm:$0xff] }
0x13b0   :  { %12033 = vst [vmem:[#allocation2 + $0x78] sm:$0xff] %v14294_v4  ;;  %11320 = vmatpush1.bf16.msra.mxu0 %v13462_v58  ;;  %v10987_v1 = vpop.f32.mrf.mxu1  ;;  %11280 = vmatprep.subr.bf16.mxu1 %v13389_v59  ;;  %v4529_v58 = vld [vmem:[#allocation8 + $0x2158] sm:$0xff]  ;;  %v14108_v59 = vcombine.low %v4564_v21, %v4600_v48  ;;  %v14037_v62 = vcombine.high %v4492_v55, %v4528_v56  ;;  %v4060_v45 = vld [vmem:[#allocation8 + $0x12b0] sm:$0xff] }
0x13b1   :  { %v11028_v12 = vpop.f32.mrf.mxu0  ;;  %11321 = vmatprep.subr.bf16.mxu0 %v13391_v0  ;;  %v14039_v0 = vcombine.high %v4493_v57, %v4529_v58  ;;  %v4421_v4 = vld [vmem:[#allocation8 + $0x1df8] sm:$0xff]  ;;  %v14036_v3 = vcombine.low %v4492_v55, %v4528_v56  ;;  %v14038_v7 = vcombine.low %v4493_v57, %v4529_v58  ;;  %v13965_v9 = vcombine.high %v4420_v13, %v4456_v14  ;;  %v4348_v1 = vld [vmem:[#allocation8 + $0x1bb0] sm:$0xff]  ;;  %v3918_v58 = vld [vmem:[#allocation8 + $0xe40] sm:$0xff] }
0x13b2   :  { %v4385_v12 = vld [vmem:[#allocation8 + $0x1cd8] sm:$0xff]  ;;  %v13966_v17 = vcombine.low %v4421_v4, %v4457_v2 }
0x13b3   :  { %11281 = vmatpush1.bf16.msra.mxu1 %v13388_v10  ;;  %v13967_v10 = vcombine.high %v4421_v4, %v4457_v2  ;;  %v3846_v4 = vld [vmem:[#allocation8 + $0xc00] sm:$0xff] }
0x13b4   :  { %11322 = vmatpush1.bf16.msra.mxu0 %v13390_v5  ;;  %11282 = vmatprep.subr.bf16.mxu1 %v13317_v11  ;;  %v4384_v5 = vld [vmem:[#allocation8 + $0x1cd0] sm:$0xff]  ;;  %v4349_v11 = vld [vmem:[#allocation8 + $0x1bb8] sm:$0xff]  ;;  %v3882_v2 = vld [vmem:[#allocation8 + $0xd20] sm:$0xff] }
0x13b5   :  { %11323 = vmatprep.subr.bf16.mxu0 %v13319_v15  ;;  %v13964_v15 = vcombine.low %v4420_v13, %v4456_v14  ;;  %v13893_v63 = vcombine.high %v4348_v1, %v4384_v5  ;;  %v13895_v18 = vcombine.high %v4349_v11, %v4385_v12  ;;  %v13894_v25 = vcombine.low %v4349_v11, %v4385_v12 }
0x13b7   :  { %11283 = vmatpush1.bf16.msra.mxu1 %v13316_v20  ;;  %v4312_v20 = vld [vmem:[#allocation8 + $0x1a90] sm:$0xff] }
0x13b8   :  { %11324 = vmatpush1.bf16.msra.mxu0 %v13318_v22  ;;  %11284 = vmatprep.subr.bf16.mxu1 %v13245_v23  ;;  %v4277_v22 = vld [vmem:[#allocation8 + $0x1978] sm:$0xff]  ;;  %v13821_v26 = vcombine.high %v4276_v19, %v4312_v20 }
0x13b9   :  { %11325 = vmatprep.subr.bf16.mxu0 %v13247_v24  ;;  %v4313_v23 = vld [vmem:[#allocation8 + $0x1a98] sm:$0xff]  ;;  %v13892_v24 = vcombine.low %v4348_v1, %v4384_v5 }
0x13ba   :  { %v13823_v27 = vcombine.high %v4277_v22, %v4313_v23  ;;  %v13822_v35 = vcombine.low %v4277_v22, %v4313_v23 }
0x13bb   :  { %11285 = vmatpush1.bf16.msra.mxu1 %v13244_v29  ;;  %v4240_v29 = vld [vmem:[#allocation8 + $0x1850] sm:$0xff] }
0x13bc   :  { %11326 = vmatpush1.bf16.msra.mxu0 %v13246_v30  ;;  %11286 = vmatprep.subr.bf16.mxu1 %v13173_v32  ;;  %v4205_v30 = vld [vmem:[#allocation8 + $0x1738] sm:$0xff]  ;;  %v13749_v36 = vcombine.high %v4204_v44, %v4240_v29 }
0x13bd   :  { %11327 = vmatprep.subr.bf16.mxu0 %v13175_v28  ;;  %v4241_v32 = vld [vmem:[#allocation8 + $0x1858] sm:$0xff]  ;;  %v13820_v28 = vcombine.low %v4276_v19, %v4312_v20  ;;  %v3774_v19 = vld [vmem:[#allocation8 + $0x9c0] sm:$0xff] }
0x13be   :  { %v13751_v37 = vcombine.high %v4205_v30, %v4241_v32  ;;  %v13750_v42 = vcombine.low %v4205_v30, %v4241_v32  ;;  %v3810_v20 = vld [vmem:[#allocation8 + $0xae0] sm:$0xff] }
0x13bf   :  { %11287 = vmatpush1.bf16.msra.mxu1 %v13172_v40  ;;  %v4168_v40 = vld [vmem:[#allocation8 + $0x1610] sm:$0xff]  ;;  %v13321_v30 = vcombine.high %v3774_v19, %v3810_v20 }
0x13c0   :  { %11328 = vmatpush1.bf16.msra.mxu0 %v13174_v39  ;;  %11288 = vmatprep.subr.bf16.mxu1 %v13101_v41  ;;  %v4133_v39 = vld [vmem:[#allocation8 + $0x14f8] sm:$0xff]  ;;  %v13677_v60 = vcombine.high %v4132_v38, %v4168_v40 }
0x13c1   :  { %11329 = vmatprep.subr.bf16.mxu0 %v13103_v53  ;;  %v4169_v41 = vld [vmem:[#allocation8 + $0x1618] sm:$0xff]  ;;  %v13748_v53 = vcombine.low %v4204_v44, %v4240_v29 }
0x13c2   :  { %v13679_v43 = vcombine.high %v4133_v39, %v4169_v41  ;;  %v13678_v21 = vcombine.low %v4133_v39, %v4169_v41 }
0x13c3   :  { %11289 = vmatpush1.bf16.msra.mxu1 %v13100_v33  ;;  %v4096_v33 = vld [vmem:[#allocation8 + $0x13d0] sm:$0xff] }
0x13c4   :  { %11330 = vmatpush1.bf16.msra.mxu0 %v13102_v46  ;;  %11290 = vmatprep.subr.bf16.mxu1 %v13029_v34  ;;  %v4061_v46 = vld [vmem:[#allocation8 + $0x12b8] sm:$0xff]  ;;  %v13605_v48 = vcombine.high %v4060_v45, %v4096_v33 }
0x13c5   :  { %11331 = vmatprep.subr.bf16.mxu0 %v13031_v47  ;;  %v4097_v34 = vld [vmem:[#allocation8 + $0x13d8] sm:$0xff]  ;;  %v13676_v47 = vcombine.low %v4132_v38, %v4168_v40  ;;  %v3739_v38 = vld [vmem:[#allocation8 + $0x8a8] sm:$0xff]  ;;  %v13320_v40 = vcombine.low %v3774_v19, %v3810_v20  ;;  %v4422_v19 = vld [vmem:[#allocation8 + $0x1e00] sm:$0xff] }
0x13c6   :  { %v13607_v49 = vcombine.high %v4061_v46, %v4097_v34  ;;  %v13606_v55 = vcombine.low %v4061_v46, %v4097_v34  ;;  %v4458_v20 = vld [vmem:[#allocation8 + $0x1f20] sm:$0xff] }
0x13c7   :  { %11291 = vmatpush1.bf16.msra.mxu1 %v13028_v51  ;;  %v4026_v51 = vld [vmem:[#allocation8 + $0x11a0] sm:$0xff] }
0x13c8   :  { %11332 = vmatpush1.bf16.msra.mxu0 %v13030_v31  ;;  %11292 = vmatprep.subr.bf16.mxu1 %v14109_v52  ;;  %v3991_v31 = vld [vmem:[#allocation8 + $0x1088] sm:$0xff]  ;;  %v13537_v56 = vcombine.high %v3990_v50, %v4026_v51 }
0x13c9   :  { %11333 = vmatprep.subr.bf16.mxu0 %v14111_v54  ;;  %v4027_v52 = vld [vmem:[#allocation8 + $0x11a8] sm:$0xff]  ;;  %v13604_v54 = vcombine.low %v4060_v45, %v4096_v33 }
0x13ca   :  { %v13539_v57 = vcombine.high %v3991_v31, %v4027_v52  ;;  %v13538_v13 = vcombine.low %v3991_v31, %v4027_v52  ;;  %v3667_v45 = vld [vmem:[#allocation8 + $0x668] sm:$0xff] }
0x13cb   :  { %11293 = vmatpush2.bf16.msra.mxu1 %v14108_v59  ;;  %v3954_v59 = vld [vmem:[#allocation8 + $0xf60] sm:$0xff] }
0x13cc   :  { %11334 = vmatpush2.bf16.msra.mxu0 %v14110_v61  ;;  %11294 = vmatprep.subr.bf16.mxu1 %v14037_v62  ;;  %v13536_v61 = vcombine.low %v3990_v50, %v4026_v51  ;;  %v3919_v62 = vld [vmem:[#allocation8 + $0xe48] sm:$0xff]  ;;  %v13465_v14 = vcombine.high %v3918_v58, %v3954_v59  ;;  %v13464_v5 = vcombine.low %v3918_v58, %v3954_v59 }
0x13cd   :  { %11335 = vmatprep.subr.bf16.mxu0 %v14039_v0  ;;  %v3955_v0 = vld [vmem:[#allocation8 + $0xf68] sm:$0xff] }
0x13ce   :  { %v13466_v12 = vcombine.low %v3919_v62, %v3955_v0  ;;  %v3595_v50 = vld [vmem:[#allocation8 + $0x428] sm:$0xff] }
0x13cf   :  { %11295 = vmatpush2.bf16.msra.mxu1 %v14036_v3  ;;  %v3523_v58 = vld [vmem:[#allocation8 + $0x1e8] sm:$0xff] }
0x13d0   :  { %11336 = vmatpush2.bf16.msra.mxu0 %v14038_v7  ;;  %11296 = vmatprep.subr.bf16.mxu1 %v13965_v9  ;;  %v13467_v7 = vcombine.high %v3919_v62, %v3955_v0  ;;  %v3847_v9 = vld [vmem:[#allocation8 + $0xc08] sm:$0xff] }
0x13d1   :  { %11337 = vmatprep.subr.bf16.mxu0 %v13967_v10  ;;  %v3883_v10 = vld [vmem:[#allocation8 + $0xd28] sm:$0xff] }
0x13d2   :  { %v13394_v29 = vcombine.low %v3847_v9, %v3883_v10 }
0x13d3   :  { %11297 = vmatpush2.bf16.msra.mxu1 %v13964_v15  ;;  %v13393_v15 = vcombine.high %v3846_v4, %v3882_v2 }
0x13d4   :  { %11338 = vmatpush2.bf16.msra.mxu0 %v13966_v17  ;;  %11298 = vmatprep.subr.bf16.mxu1 %v13893_v63 }
0x13d5   :  { %11339 = vmatprep.subr.bf16.mxu0 %v13895_v18  ;;  %v13395_v18 = vcombine.high %v3847_v9, %v3883_v10 }
0x13d7   :  { %11299 = vmatpush2.bf16.msra.mxu1 %v13892_v24  ;;  %v3775_v24 = vld [vmem:[#allocation8 + $0x9c8] sm:$0xff] }
0x13d8   :  { %11340 = vmatpush2.bf16.msra.mxu0 %v13894_v25  ;;  %11300 = vmatprep.subr.bf16.mxu1 %v13821_v26  ;;  %v3811_v25 = vld [vmem:[#allocation8 + $0xae8] sm:$0xff] }
0x13d9   :  { %11341 = vmatprep.subr.bf16.mxu0 %v13823_v27  ;;  %v13392_v27 = vcombine.low %v3846_v4, %v3882_v2  ;;  %v13322_v39 = vcombine.low %v3775_v24, %v3811_v25  ;;  %v4567_v4 = vld [vmem:[#allocation8 + $0x2288] sm:$0xff] }
0x13da   :  { %v4603_v2 = vld [vmem:[#allocation8 + $0x23a8] sm:$0xff] }
0x13db   :  { %11301 = vmatpush2.bf16.msra.mxu1 %v13820_v28  ;;  %v13323_v28 = vcombine.high %v3775_v24, %v3811_v25  ;;  %v14115_v10 = vcombine.high %v4567_v4, %v4603_v2 }
0x13dc   :  { %11342 = vmatpush2.bf16.msra.mxu0 %v13822_v35  ;;  %11302 = vmatprep.subr.bf16.mxu1 %v13749_v36  ;;  %v3702_v35 = vld [vmem:[#allocation8 + $0x780] sm:$0xff] }
0x13dd   :  { %11343 = vmatprep.subr.bf16.mxu0 %v13751_v37  ;;  %v3738_v36 = vld [vmem:[#allocation8 + $0x8a0] sm:$0xff]  ;;  %v3703_v37 = vld [vmem:[#allocation8 + $0x788] sm:$0xff] }
0x13de   :  { %v13249_v41 = vcombine.high %v3702_v35, %v3738_v36  ;;  %v13248_v33 = vcombine.low %v3702_v35, %v3738_v36  ;;  %v13250_v46 = vcombine.low %v3703_v37, %v3739_v38 }
0x13df   :  { %11303 = vmatpush2.bf16.msra.mxu1 %v13748_v53  ;;  %v13251_v53 = vcombine.high %v3703_v37, %v3739_v38  ;;  %v4278_v38 = vld [vmem:[#allocation8 + $0x1980] sm:$0xff] }
0x13e0   :  { %11344 = vmatpush2.bf16.msra.mxu0 %v13750_v42  ;;  %11304 = vmatprep.subr.bf16.mxu1 %v13677_v60  ;;  %v3630_v42 = vld [vmem:[#allocation8 + $0x540] sm:$0xff] }
0x13e1   :  { %11345 = vmatprep.subr.bf16.mxu0 %v13679_v43  ;;  %v3666_v60 = vld [vmem:[#allocation8 + $0x660] sm:$0xff]  ;;  %v3631_v43 = vld [vmem:[#allocation8 + $0x548] sm:$0xff] }
0x13e2   :  { %v13177_v34 = vcombine.high %v3630_v42, %v3666_v60  ;;  %v13176_v51 = vcombine.low %v3630_v42, %v3666_v60  ;;  %v13178_v31 = vcombine.low %v3631_v43, %v3667_v45 }
0x13e3   :  { %11305 = vmatpush2.bf16.msra.mxu1 %v13676_v47  ;;  %v13179_v47 = vcombine.high %v3631_v43, %v3667_v45  ;;  %v4206_v45 = vld [vmem:[#allocation8 + $0x1740] sm:$0xff] }
0x13e4   :  { %11346 = vmatpush2.bf16.msra.mxu0 %v13678_v21  ;;  %11306 = vmatprep.subr.bf16.mxu1 %v13605_v48  ;;  %v3558_v21 = vld [vmem:[#allocation8 + $0x300] sm:$0xff] }
0x13e5   :  { %11347 = vmatprep.subr.bf16.mxu0 %v13607_v49  ;;  %v3594_v48 = vld [vmem:[#allocation8 + $0x420] sm:$0xff]  ;;  %v3559_v49 = vld [vmem:[#allocation8 + $0x308] sm:$0xff] }
0x13e6   :  { %v13105_v52 = vcombine.high %v3558_v21, %v3594_v48  ;;  %v13104_v59 = vcombine.low %v3558_v21, %v3594_v48 }
0x13e7   :  { %11307 = vmatpush2.bf16.msra.mxu1 %v13604_v54  ;;  %v13107_v54 = vcombine.high %v3559_v49, %v3595_v50 }
0x13e8   :  { %11348 = vmatpush2.bf16.msra.mxu0 %v13606_v55  ;;  %11358 = vmatprep.subr.bf16.mxu1 %v13537_v56  ;;  %v3486_v55 = vld [vmem:[#allocation8 + $0xc0] sm:$0xff] }
0x13e9   :  { %11399 = vmatprep.subr.bf16.mxu0 %v13539_v57  ;;  %v3522_v56 = vld [vmem:[#allocation8 + $0x1e0] sm:$0xff]  ;;  %v3487_v57 = vld [vmem:[#allocation8 + $0xc8] sm:$0xff] }
0x13ea   :  { %v11064_v3 = vpop.f32.mrf.mxu1  ;;  %11309 = vmatmul.mubr.bf16.vlgmr.msra.gmra.mxu1 %v15547_v6  ;;  %v13033_v62 = vcombine.high %v3486_v55, %v3522_v56  ;;  %v13035_v0 = vcombine.high %v3487_v57, %v3523_v58 }
0x13eb   :  { %v11105_v1 = vpop.f32.mrf.mxu0  ;;  %11350 = vmatmul.mubr.bf16.vlgmr.msra.gmra.mxu0 %v15547_v6  ;;  %11359 = vmatpush1.bf16.msra.mxu1 %v13536_v61  ;;  %v13106_v61 = vcombine.low %v3559_v49, %v3595_v50  ;;  %v4134_v50 = vld [vmem:[#allocation8 + $0x1500] sm:$0xff] }
0x13ec   :  { %11390 = vmatprep.mubr.bf16.mxu1 %v15549_v8  ;;  %11400 = vmatpush1.bf16.msra.mxu0 %v13538_v13  ;;  %v11066_v11 = vpop.f32.mrf.mxu1  ;;  %v4566_v13 = vld [vmem:[#allocation8 + $0x2280] sm:$0xff] }
0x13ed   :  { %11431 = vmatprep.mubr.bf16.mxu0 %v15549_v8  ;;  %v14295_v17 = vpack.c.bf16 %v11066_v11, %v11064_v3  ;;  %v11107_v63 = vpop.f32.mrf.mxu0  ;;  %11360 = vmatprep.subr.bf16.mxu1 %v13465_v14  ;;  %v4602_v14 = vld [vmem:[#allocation8 + $0x23a0] sm:$0xff]  ;;  %v13032_v3 = vcombine.low %v3486_v55, %v3522_v56  ;;  %v4495_v11 = vld [vmem:[#allocation8 + $0x2048] sm:$0xff] }
0x13ee   :  { %v14296_v22 = vpack.c.bf16 %v11107_v63, %v11105_v1  ;;  %v11068_v23 = vpop.f32.mrf.mxu1  ;;  %11401 = vmatprep.subr.bf16.mxu0 %v13467_v7  ;;  %v13034_v7 = vcombine.low %v3487_v57, %v3523_v58  ;;  %v14113_v9 = vcombine.high %v4566_v13, %v4602_v14  ;;  %v4494_v1 = vld [vmem:[#allocation8 + $0x2040] sm:$0xff] }
0x13ef   :  { %12058 = vst [vmem:[#allocation2 + $0x80] sm:$0xff] %v14295_v17  ;;  %v11109_v26 = vpop.f32.mrf.mxu0  ;;  %11361 = vmatpush1.bf16.msra.mxu1 %v13464_v5  ;;  %v4530_v5 = vld [vmem:[#allocation8 + $0x2160] sm:$0xff]  ;;  %v14114_v17 = vcombine.low %v4567_v4, %v4603_v2  ;;  %v4459_v23 = vld [vmem:[#allocation8 + $0x1f28] sm:$0xff]  ;;  %v3992_v2 = vld [vmem:[#allocation8 + $0x1090] sm:$0xff] }
0x13f0   :  { %12059 = vst [vmem:[#allocation2 + $0x88] sm:$0xff] %v14296_v22  ;;  %11402 = vmatpush1.bf16.msra.mxu0 %v13466_v12  ;;  %v11069_v44 = vpop.f32.mrf.mxu1  ;;  %11362 = vmatprep.subr.bf16.mxu1 %v13393_v15  ;;  %v4531_v12 = vld [vmem:[#allocation8 + $0x2168] sm:$0xff]  ;;  %v14112_v15 = vcombine.low %v4566_v13, %v4602_v14  ;;  %v14041_v63 = vcombine.high %v4494_v1, %v4530_v5  ;;  %v4062_v58 = vld [vmem:[#allocation8 + $0x12c0] sm:$0xff] }
0x13f1   :  { %v11110_v32 = vpop.f32.mrf.mxu0  ;;  %11403 = vmatprep.subr.bf16.mxu0 %v13395_v18  ;;  %v14043_v18 = vcombine.high %v4495_v11, %v4531_v12  ;;  %v4423_v22 = vld [vmem:[#allocation8 + $0x1e08] sm:$0xff]  ;;  %v14040_v24 = vcombine.low %v4494_v1, %v4530_v5  ;;  %v14042_v25 = vcombine.low %v4495_v11, %v4531_v12  ;;  %v13969_v26 = vcombine.high %v4422_v19, %v4458_v20  ;;  %v4350_v44 = vld [vmem:[#allocation8 + $0x1bc0] sm:$0xff]  ;;  %v3920_v12 = vld [vmem:[#allocation8 + $0xe50] sm:$0xff] }
0x13f2   :  { %v4387_v32 = vld [vmem:[#allocation8 + $0x1ce8] sm:$0xff]  ;;  %v13970_v35 = vcombine.low %v4423_v22, %v4459_v23 }
0x13f3   :  { %11363 = vmatpush1.bf16.msra.mxu1 %v13392_v27  ;;  %v13971_v27 = vcombine.high %v4423_v22, %v4459_v23  ;;  %v3848_v22 = vld [vmem:[#allocation8 + $0xc10] sm:$0xff] }
0x13f4   :  { %11404 = vmatpush1.bf16.msra.mxu0 %v13394_v29  ;;  %11364 = vmatprep.subr.bf16.mxu1 %v13321_v30  ;;  %v4386_v29 = vld [vmem:[#allocation8 + $0x1ce0] sm:$0xff]  ;;  %v4351_v30 = vld [vmem:[#allocation8 + $0x1bc8] sm:$0xff]  ;;  %v3884_v23 = vld [vmem:[#allocation8 + $0xd30] sm:$0xff] }
0x13f5   :  { %11405 = vmatprep.subr.bf16.mxu0 %v13323_v28  ;;  %v13968_v28 = vcombine.low %v4422_v19, %v4458_v20  ;;  %v13897_v36 = vcombine.high %v4350_v44, %v4386_v29  ;;  %v13899_v37 = vcombine.high %v4351_v30, %v4387_v32  ;;  %v13898_v42 = vcombine.low %v4351_v30, %v4387_v32 }
0x13f7   :  { %11365 = vmatpush1.bf16.msra.mxu1 %v13320_v40  ;;  %v4314_v40 = vld [vmem:[#allocation8 + $0x1aa0] sm:$0xff] }
0x13f8   :  { %11406 = vmatpush1.bf16.msra.mxu0 %v13322_v39  ;;  %11366 = vmatprep.subr.bf16.mxu1 %v13249_v41  ;;  %v4279_v39 = vld [vmem:[#allocation8 + $0x1988] sm:$0xff]  ;;  %v13825_v60 = vcombine.high %v4278_v38, %v4314_v40 }
0x13f9   :  { %11407 = vmatprep.subr.bf16.mxu0 %v13251_v53  ;;  %v4315_v41 = vld [vmem:[#allocation8 + $0x1aa8] sm:$0xff]  ;;  %v13896_v53 = vcombine.low %v4350_v44, %v4386_v29 }
0x13fa   :  { %v13827_v43 = vcombine.high %v4279_v39, %v4315_v41  ;;  %v13826_v21 = vcombine.low %v4279_v39, %v4315_v41 }
0x13fb   :  { %11367 = vmatpush1.bf16.msra.mxu1 %v13248_v33  ;;  %v4242_v33 = vld [vmem:[#allocation8 + $0x1860] sm:$0xff] }
0x13fc   :  { %11408 = vmatpush1.bf16.msra.mxu0 %v13250_v46  ;;  %11368 = vmatprep.subr.bf16.mxu1 %v13177_v34  ;;  %v4207_v46 = vld [vmem:[#allocation8 + $0x1748] sm:$0xff]  ;;  %v13753_v48 = vcombine.high %v4206_v45, %v4242_v33 }
0x13fd   :  { %11409 = vmatprep.subr.bf16.mxu0 %v13179_v47  ;;  %v4243_v34 = vld [vmem:[#allocation8 + $0x1868] sm:$0xff]  ;;  %v13824_v47 = vcombine.low %v4278_v38, %v4314_v40  ;;  %v3776_v38 = vld [vmem:[#allocation8 + $0x9d0] sm:$0xff] }
0x13fe   :  { %v13755_v49 = vcombine.high %v4207_v46, %v4243_v34  ;;  %v13754_v55 = vcombine.low %v4207_v46, %v4243_v34  ;;  %v3812_v40 = vld [vmem:[#allocation8 + $0xaf0] sm:$0xff] }
0x13ff   :  { %11369 = vmatpush1.bf16.msra.mxu1 %v13176_v51  ;;  %v4170_v51 = vld [vmem:[#allocation8 + $0x1620] sm:$0xff]  ;;  %v13325_v46 = vcombine.high %v3776_v38, %v3812_v40 }
0x1400   :  { %11410 = vmatpush1.bf16.msra.mxu0 %v13178_v31  ;;  %11370 = vmatprep.subr.bf16.mxu1 %v13105_v52  ;;  %v4135_v31 = vld [vmem:[#allocation8 + $0x1508] sm:$0xff]  ;;  %v13681_v56 = vcombine.high %v4134_v50, %v4170_v51 }
0x1401   :  { %11411 = vmatprep.subr.bf16.mxu0 %v13107_v54  ;;  %v4171_v52 = vld [vmem:[#allocation8 + $0x1628] sm:$0xff]  ;;  %v13752_v54 = vcombine.low %v4206_v45, %v4242_v33 }
0x1402   :  { %v13683_v57 = vcombine.high %v4135_v31, %v4171_v52  ;;  %v13682_v13 = vcombine.low %v4135_v31, %v4171_v52 }
0x1403   :  { %11371 = vmatpush1.bf16.msra.mxu1 %v13104_v59  ;;  %v4098_v59 = vld [vmem:[#allocation8 + $0x13e0] sm:$0xff] }
0x1404   :  { %11412 = vmatpush1.bf16.msra.mxu0 %v13106_v61  ;;  %11372 = vmatprep.subr.bf16.mxu1 %v13033_v62  ;;  %v4063_v61 = vld [vmem:[#allocation8 + $0x12c8] sm:$0xff]  ;;  %v13609_v14 = vcombine.high %v4062_v58, %v4098_v59 }
0x1405   :  { %11413 = vmatprep.subr.bf16.mxu0 %v13035_v0  ;;  %v4099_v62 = vld [vmem:[#allocation8 + $0x13e8] sm:$0xff]  ;;  %v13680_v0 = vcombine.low %v4134_v50, %v4170_v51  ;;  %v3741_v50 = vld [vmem:[#allocation8 + $0x8b8] sm:$0xff]  ;;  %v13324_v51 = vcombine.low %v3776_v38, %v3812_v40  ;;  %v4424_v38 = vld [vmem:[#allocation8 + $0x1e10] sm:$0xff] }
0x1406   :  { %v13611_v4 = vcombine.high %v4063_v61, %v4099_v62  ;;  %v13610_v1 = vcombine.low %v4063_v61, %v4099_v62  ;;  %v4460_v40 = vld [vmem:[#allocation8 + $0x1f30] sm:$0xff] }
0x1407   :  { %11373 = vmatpush1.bf16.msra.mxu1 %v13032_v3  ;;  %v4028_v3 = vld [vmem:[#allocation8 + $0x11b0] sm:$0xff] }
0x1408   :  { %11414 = vmatpush1.bf16.msra.mxu0 %v13034_v7  ;;  %11374 = vmatprep.subr.bf16.mxu1 %v14113_v9  ;;  %v3993_v7 = vld [vmem:[#allocation8 + $0x1098] sm:$0xff]  ;;  %v13541_v5 = vcombine.high %v3992_v2, %v4028_v3 }
0x1409   :  { %11415 = vmatprep.subr.bf16.mxu0 %v14115_v10  ;;  %v4029_v9 = vld [vmem:[#allocation8 + $0x11b8] sm:$0xff]  ;;  %v13608_v10 = vcombine.low %v4062_v58, %v4098_v59 }
0x140a   :  { %v13543_v11 = vcombine.high %v3993_v7, %v4029_v9  ;;  %v13542_v19 = vcombine.low %v3993_v7, %v4029_v9  ;;  %v3669_v58 = vld [vmem:[#allocation8 + $0x678] sm:$0xff] }
0x140b   :  { %11375 = vmatpush2.bf16.msra.mxu1 %v14112_v15  ;;  %v3956_v15 = vld [vmem:[#allocation8 + $0xf70] sm:$0xff] }
0x140c   :  { %11416 = vmatpush2.bf16.msra.mxu0 %v14114_v17  ;;  %11376 = vmatprep.subr.bf16.mxu1 %v14041_v63  ;;  %v13540_v17 = vcombine.low %v3992_v2, %v4028_v3  ;;  %v3921_v63 = vld [vmem:[#allocation8 + $0xe58] sm:$0xff]  ;;  %v13469_v20 = vcombine.high %v3920_v12, %v3956_v15  ;;  %v13468_v29 = vcombine.low %v3920_v12, %v3956_v15 }
0x140d   :  { %11417 = vmatprep.subr.bf16.mxu0 %v14043_v18  ;;  %v3957_v18 = vld [vmem:[#allocation8 + $0xf78] sm:$0xff] }
0x140e   :  { %v13470_v32 = vcombine.low %v3921_v63, %v3957_v18  ;;  %v3597_v2 = vld [vmem:[#allocation8 + $0x438] sm:$0xff] }
0x140f   :  { %11377 = vmatpush2.bf16.msra.mxu1 %v14040_v24  ;;  %v3525_v12 = vld [vmem:[#allocation8 + $0x1f8] sm:$0xff] }
0x1410   :  { %11418 = vmatpush2.bf16.msra.mxu0 %v14042_v25  ;;  %11378 = vmatprep.subr.bf16.mxu1 %v13969_v26  ;;  %v13471_v25 = vcombine.high %v3921_v63, %v3957_v18  ;;  %v3849_v26 = vld [vmem:[#allocation8 + $0xc18] sm:$0xff] }
0x1411   :  { %11419 = vmatprep.subr.bf16.mxu0 %v13971_v27  ;;  %v3885_v27 = vld [vmem:[#allocation8 + $0xd38] sm:$0xff] }
0x1412   :  { %v13398_v33 = vcombine.low %v3849_v26, %v3885_v27 }
0x1413   :  { %11379 = vmatpush2.bf16.msra.mxu1 %v13968_v28  ;;  %v13397_v28 = vcombine.high %v3848_v22, %v3884_v23 }
0x1414   :  { %11420 = vmatpush2.bf16.msra.mxu0 %v13970_v35  ;;  %11380 = vmatprep.subr.bf16.mxu1 %v13897_v36 }
0x1415   :  { %11421 = vmatprep.subr.bf16.mxu0 %v13899_v37  ;;  %v13399_v37 = vcombine.high %v3849_v26, %v3885_v27 }
0x1417   :  { %11381 = vmatpush2.bf16.msra.mxu1 %v13896_v53  ;;  %v3777_v53 = vld [vmem:[#allocation8 + $0x9d8] sm:$0xff] }
0x1418   :  { %11422 = vmatpush2.bf16.msra.mxu0 %v13898_v42  ;;  %11382 = vmatprep.subr.bf16.mxu1 %v13825_v60  ;;  %v3813_v42 = vld [vmem:[#allocation8 + $0xaf8] sm:$0xff] }
0x1419   :  { %11423 = vmatprep.subr.bf16.mxu0 %v13827_v43  ;;  %v13396_v43 = vcombine.low %v3848_v22, %v3884_v23  ;;  %v13326_v31 = vcombine.low %v3777_v53, %v3813_v42  ;;  %v4569_v22 = vld [vmem:[#allocation8 + $0x2298] sm:$0xff] }
0x141a   :  { %v4605_v23 = vld [vmem:[#allocation8 + $0x23b8] sm:$0xff] }
0x141b   :  { %11383 = vmatpush2.bf16.msra.mxu1 %v13824_v47  ;;  %v13327_v47 = vcombine.high %v3777_v53, %v3813_v42  ;;  %v14119_v27 = vcombine.high %v4569_v22, %v4605_v23 }
0x141c   :  { %11424 = vmatpush2.bf16.msra.mxu0 %v13826_v21  ;;  %11384 = vmatprep.subr.bf16.mxu1 %v13753_v48  ;;  %v3704_v21 = vld [vmem:[#allocation8 + $0x790] sm:$0xff] }
0x141d   :  { %11425 = vmatprep.subr.bf16.mxu0 %v13755_v49  ;;  %v3740_v48 = vld [vmem:[#allocation8 + $0x8b0] sm:$0xff]  ;;  %v3705_v49 = vld [vmem:[#allocation8 + $0x798] sm:$0xff] }
0x141e   :  { %v13253_v52 = vcombine.high %v3704_v21, %v3740_v48  ;;  %v13252_v59 = vcombine.low %v3704_v21, %v3740_v48  ;;  %v13254_v61 = vcombine.low %v3705_v49, %v3741_v50 }
0x141f   :  { %11385 = vmatpush2.bf16.msra.mxu1 %v13752_v54  ;;  %v13255_v54 = vcombine.high %v3705_v49, %v3741_v50  ;;  %v4280_v50 = vld [vmem:[#allocation8 + $0x1990] sm:$0xff] }
0x1420   :  { %11426 = vmatpush2.bf16.msra.mxu0 %v13754_v55  ;;  %11386 = vmatprep.subr.bf16.mxu1 %v13681_v56  ;;  %v3632_v55 = vld [vmem:[#allocation8 + $0x550] sm:$0xff] }
0x1421   :  { %11427 = vmatprep.subr.bf16.mxu0 %v13683_v57  ;;  %v3668_v56 = vld [vmem:[#allocation8 + $0x670] sm:$0xff]  ;;  %v3633_v57 = vld [vmem:[#allocation8 + $0x558] sm:$0xff] }
0x1422   :  { %v13181_v62 = vcombine.high %v3632_v55, %v3668_v56  ;;  %v13180_v3 = vcombine.low %v3632_v55, %v3668_v56  ;;  %v13182_v7 = vcombine.low %v3633_v57, %v3669_v58 }
0x1423   :  { %11387 = vmatpush2.bf16.msra.mxu1 %v13680_v0  ;;  %v13183_v0 = vcombine.high %v3633_v57, %v3669_v58  ;;  %v4208_v58 = vld [vmem:[#allocation8 + $0x1750] sm:$0xff] }
0x1424   :  { %11428 = vmatpush2.bf16.msra.mxu0 %v13682_v13  ;;  %11388 = vmatprep.subr.bf16.mxu1 %v13609_v14  ;;  %v3560_v13 = vld [vmem:[#allocation8 + $0x310] sm:$0xff] }
0x1425   :  { %11429 = vmatprep.subr.bf16.mxu0 %v13611_v4  ;;  %v3596_v14 = vld [vmem:[#allocation8 + $0x430] sm:$0xff]  ;;  %v3561_v4 = vld [vmem:[#allocation8 + $0x318] sm:$0xff] }
0x1426   :  { %v13109_v9 = vcombine.high %v3560_v13, %v3596_v14  ;;  %v13108_v15 = vcombine.low %v3560_v13, %v3596_v14 }
0x1427   :  { %11389 = vmatpush2.bf16.msra.mxu1 %v13608_v10  ;;  %v13111_v10 = vcombine.high %v3561_v4, %v3597_v2 }
0x1428   :  { %11430 = vmatpush2.bf16.msra.mxu0 %v13610_v1  ;;  %11440 = vmatprep.subr.bf16.mxu1 %v13541_v5  ;;  %v3488_v1 = vld [vmem:[#allocation8 + $0xd0] sm:$0xff] }
0x1429   :  { %11481 = vmatprep.subr.bf16.mxu0 %v13543_v11  ;;  %v3524_v5 = vld [vmem:[#allocation8 + $0x1f0] sm:$0xff]  ;;  %v3489_v11 = vld [vmem:[#allocation8 + $0xd8] sm:$0xff] }
0x142a   :  { %v11146_v24 = vpop.f32.mrf.mxu1  ;;  %11391 = vmatmul.mubr.bf16.vlgmr.msra.gmra.mxu1 %v15547_v6  ;;  %v13037_v63 = vcombine.high %v3488_v1, %v3524_v5  ;;  %v13039_v18 = vcombine.high %v3489_v11, %v3525_v12 }
0x142b   :  { %v11187_v44 = vpop.f32.mrf.mxu0  ;;  %11432 = vmatmul.mubr.bf16.vlgmr.msra.gmra.mxu0 %v15547_v6  ;;  %11441 = vmatpush1.bf16.msra.mxu1 %v13540_v17  ;;  %v13110_v17 = vcombine.low %v3561_v4, %v3597_v2  ;;  %v4136_v2 = vld [vmem:[#allocation8 + $0x1510] sm:$0xff] }
0x142c   :  { %11472 = vmatprep.mubr.bf16.mxu1 %v15549_v8  ;;  %11482 = vmatpush1.bf16.msra.mxu0 %v13542_v19  ;;  %v11148_v30 = vpop.f32.mrf.mxu1  ;;  %v4568_v19 = vld [vmem:[#allocation8 + $0x2290] sm:$0xff] }
0x142d   :  { %11513 = vmatprep.mubr.bf16.mxu0 %v15549_v8  ;;  %v14297_v35 = vpack.c.bf16 %v11148_v30, %v11146_v24  ;;  %v11189_v36 = vpop.f32.mrf.mxu0  ;;  %11442 = vmatprep.subr.bf16.mxu1 %v13469_v20  ;;  %v4604_v20 = vld [vmem:[#allocation8 + $0x23b0] sm:$0xff]  ;;  %v13036_v24 = vcombine.low %v3488_v1, %v3524_v5  ;;  %v4497_v30 = vld [vmem:[#allocation8 + $0x2058] sm:$0xff] }
0x142e   :  { %v14298_v39 = vpack.c.bf16 %v11189_v36, %v11187_v44  ;;  %v11150_v41 = vpop.f32.mrf.mxu1  ;;  %11483 = vmatprep.subr.bf16.mxu0 %v13471_v25  ;;  %v13038_v25 = vcombine.low %v3489_v11, %v3525_v12  ;;  %v14117_v26 = vcombine.high %v4568_v19, %v4604_v20  ;;  %v4496_v44 = vld [vmem:[#allocation8 + $0x2050] sm:$0xff] }
0x142f   :  { %12060 = vst [vmem:[#allocation2 + $0x90] sm:$0xff] %v14297_v35  ;;  %v11191_v60 = vpop.f32.mrf.mxu0  ;;  %11443 = vmatpush1.bf16.msra.mxu1 %v13468_v29  ;;  %v4532_v29 = vld [vmem:[#allocation8 + $0x2170] sm:$0xff]  ;;  %v14118_v35 = vcombine.low %v4569_v22, %v4605_v23  ;;  %v4461_v41 = vld [vmem:[#allocation8 + $0x1f38] sm:$0xff]  ;;  %v3994_v23 = vld [vmem:[#allocation8 + $0x10a0] sm:$0xff] }
0x1430   :  { %12061 = vst [vmem:[#allocation2 + $0x98] sm:$0xff] %v14298_v39  ;;  %11484 = vmatpush1.bf16.msra.mxu0 %v13470_v32  ;;  %v11151_v45 = vpop.f32.mrf.mxu1  ;;  %11444 = vmatprep.subr.bf16.mxu1 %v13397_v28  ;;  %v4533_v32 = vld [vmem:[#allocation8 + $0x2178] sm:$0xff]  ;;  %v14116_v28 = vcombine.low %v4568_v19, %v4604_v20  ;;  %v14045_v36 = vcombine.high %v4496_v44, %v4532_v29  ;;  %v4064_v12 = vld [vmem:[#allocation8 + $0x12d0] sm:$0xff] }
0x1431   :  { %v11192_v34 = vpop.f32.mrf.mxu0  ;;  %11485 = vmatprep.subr.bf16.mxu0 %v13399_v37  ;;  %v14047_v37 = vcombine.high %v4497_v30, %v4533_v32  ;;  %v4425_v39 = vld [vmem:[#allocation8 + $0x1e18] sm:$0xff]  ;;  %v14044_v53 = vcombine.low %v4496_v44, %v4532_v29  ;;  %v14046_v42 = vcombine.low %v4497_v30, %v4533_v32  ;;  %v13973_v60 = vcombine.high %v4424_v38, %v4460_v40  ;;  %v4352_v45 = vld [vmem:[#allocation8 + $0x1bd0] sm:$0xff]  ;;  %v3922_v32 = vld [vmem:[#allocation8 + $0xe60] sm:$0xff] }
0x1432   :  { %v4389_v34 = vld [vmem:[#allocation8 + $0x1cf8] sm:$0xff]  ;;  %v13974_v21 = vcombine.low %v4425_v39, %v4461_v41 }
0x1433   :  { %11445 = vmatpush1.bf16.msra.mxu1 %v13396_v43  ;;  %v13975_v43 = vcombine.high %v4425_v39, %v4461_v41  ;;  %v3850_v39 = vld [vmem:[#allocation8 + $0xc20] sm:$0xff] }
0x1434   :  { %11486 = vmatpush1.bf16.msra.mxu0 %v13398_v33  ;;  %11446 = vmatprep.subr.bf16.mxu1 %v13325_v46  ;;  %v4388_v33 = vld [vmem:[#allocation8 + $0x1cf0] sm:$0xff]  ;;  %v4353_v46 = vld [vmem:[#allocation8 + $0x1bd8] sm:$0xff]  ;;  %v3886_v41 = vld [vmem:[#allocation8 + $0xd40] sm:$0xff] }
0x1435   :  { %11487 = vmatprep.subr.bf16.mxu0 %v13327_v47  ;;  %v13972_v47 = vcombine.low %v4424_v38, %v4460_v40  ;;  %v13901_v48 = vcombine.high %v4352_v45, %v4388_v33  ;;  %v13903_v49 = vcombine.high %v4353_v46, %v4389_v34  ;;  %v13902_v55 = vcombine.low %v4353_v46, %v4389_v34 }
0x1437   :  { %11447 = vmatpush1.bf16.msra.mxu1 %v13324_v51  ;;  %v4316_v51 = vld [vmem:[#allocation8 + $0x1ab0] sm:$0xff] }
0x1438   :  { %11488 = vmatpush1.bf16.msra.mxu0 %v13326_v31  ;;  %11448 = vmatprep.subr.bf16.mxu1 %v13253_v52  ;;  %v4281_v31 = vld [vmem:[#allocation8 + $0x1998] sm:$0xff]  ;;  %v13829_v56 = vcombine.high %v4280_v50, %v4316_v51 }
0x1439   :  { %11489 = vmatprep.subr.bf16.mxu0 %v13255_v54  ;;  %v4317_v52 = vld [vmem:[#allocation8 + $0x1ab8] sm:$0xff]  ;;  %v13900_v54 = vcombine.low %v4352_v45, %v4388_v33 }
0x143a   :  { %v13831_v57 = vcombine.high %v4281_v31, %v4317_v52  ;;  %v13830_v13 = vcombine.low %v4281_v31, %v4317_v52 }
0x143b   :  { %11449 = vmatpush1.bf16.msra.mxu1 %v13252_v59  ;;  %v4244_v59 = vld [vmem:[#allocation8 + $0x1870] sm:$0xff] }
0x143c   :  { %11490 = vmatpush1.bf16.msra.mxu0 %v13254_v61  ;;  %11450 = vmatprep.subr.bf16.mxu1 %v13181_v62  ;;  %v4209_v61 = vld [vmem:[#allocation8 + $0x1758] sm:$0xff]  ;;  %v13757_v14 = vcombine.high %v4208_v58, %v4244_v59 }
0x143d   :  { %11491 = vmatprep.subr.bf16.mxu0 %v13183_v0  ;;  %v4245_v62 = vld [vmem:[#allocation8 + $0x1878] sm:$0xff]  ;;  %v13828_v0 = vcombine.low %v4280_v50, %v4316_v51  ;;  %v3778_v50 = vld [vmem:[#allocation8 + $0x9e0] sm:$0xff] }
0x143e   :  { %v13759_v4 = vcombine.high %v4209_v61, %v4245_v62  ;;  %v13758_v1 = vcombine.low %v4209_v61, %v4245_v62  ;;  %v3814_v51 = vld [vmem:[#allocation8 + $0xb00] sm:$0xff] }
0x143f   :  { %11451 = vmatpush1.bf16.msra.mxu1 %v13180_v3  ;;  %v4172_v3 = vld [vmem:[#allocation8 + $0x1630] sm:$0xff]  ;;  %v13329_v61 = vcombine.high %v3778_v50, %v3814_v51 }
0x1440   :  { %11492 = vmatpush1.bf16.msra.mxu0 %v13182_v7  ;;  %11452 = vmatprep.subr.bf16.mxu1 %v13109_v9  ;;  %v4137_v7 = vld [vmem:[#allocation8 + $0x1518] sm:$0xff]  ;;  %v13685_v5 = vcombine.high %v4136_v2, %v4172_v3 }
0x1441   :  { %11493 = vmatprep.subr.bf16.mxu0 %v13111_v10  ;;  %v4173_v9 = vld [vmem:[#allocation8 + $0x1638] sm:$0xff]  ;;  %v13756_v10 = vcombine.low %v4208_v58, %v4244_v59 }
0x1442   :  { %v13687_v11 = vcombine.high %v4137_v7, %v4173_v9  ;;  %v13686_v19 = vcombine.low %v4137_v7, %v4173_v9 }
0x1443   :  { %11453 = vmatpush1.bf16.msra.mxu1 %v13108_v15  ;;  %v4100_v15 = vld [vmem:[#allocation8 + $0x13f0] sm:$0xff] }
0x1444   :  { %11494 = vmatpush1.bf16.msra.mxu0 %v13110_v17  ;;  %11454 = vmatprep.subr.bf16.mxu1 %v13037_v63  ;;  %v4065_v17 = vld [vmem:[#allocation8 + $0x12d8] sm:$0xff]  ;;  %v13613_v20 = vcombine.high %v4064_v12, %v4100_v15 }
0x1445   :  { %11495 = vmatprep.subr.bf16.mxu0 %v13039_v18  ;;  %v4101_v63 = vld [vmem:[#allocation8 + $0x13f8] sm:$0xff]  ;;  %v13684_v18 = vcombine.low %v4136_v2, %v4172_v3  ;;  %v3743_v2 = vld [vmem:[#allocation8 + $0x8c8] sm:$0xff]  ;;  %v13328_v3 = vcombine.low %v3778_v50, %v3814_v51  ;;  %v4426_v50 = vld [vmem:[#allocation8 + $0x1e20] sm:$0xff] }
0x1446   :  { %v13615_v22 = vcombine.high %v4065_v17, %v4101_v63  ;;  %v13614_v44 = vcombine.low %v4065_v17, %v4101_v63  ;;  %v4462_v51 = vld [vmem:[#allocation8 + $0x1f40] sm:$0xff] }
0x1447   :  { %11455 = vmatpush1.bf16.msra.mxu1 %v13036_v24  ;;  %v4030_v24 = vld [vmem:[#allocation8 + $0x11c0] sm:$0xff] }
0x1448   :  { %11496 = vmatpush1.bf16.msra.mxu0 %v13038_v25  ;;  %11456 = vmatprep.subr.bf16.mxu1 %v14117_v26  ;;  %v3995_v25 = vld [vmem:[#allocation8 + $0x10a8] sm:$0xff]  ;;  %v13545_v29 = vcombine.high %v3994_v23, %v4030_v24 }
0x1449   :  { %11497 = vmatprep.subr.bf16.mxu0 %v14119_v27  ;;  %v4031_v26 = vld [vmem:[#allocation8 + $0x11c8] sm:$0xff]  ;;  %v13612_v27 = vcombine.low %v4064_v12, %v4100_v15 }
0x144a   :  { %v13547_v30 = vcombine.high %v3995_v25, %v4031_v26  ;;  %v13546_v38 = vcombine.low %v3995_v25, %v4031_v26  ;;  %v3671_v12 = vld [vmem:[#allocation8 + $0x688] sm:$0xff] }
0x144b   :  { %11457 = vmatpush2.bf16.msra.mxu1 %v14116_v28  ;;  %v3958_v28 = vld [vmem:[#allocation8 + $0xf80] sm:$0xff] }
0x144c   :  { %11498 = vmatpush2.bf16.msra.mxu0 %v14118_v35  ;;  %11458 = vmatprep.subr.bf16.mxu1 %v14045_v36  ;;  %v13544_v35 = vcombine.low %v3994_v23, %v4030_v24  ;;  %v3923_v36 = vld [vmem:[#allocation8 + $0xe68] sm:$0xff]  ;;  %v13473_v40 = vcombine.high %v3922_v32, %v3958_v28  ;;  %v13472_v33 = vcombine.low %v3922_v32, %v3958_v28 }
0x144d   :  { %11499 = vmatprep.subr.bf16.mxu0 %v14047_v37  ;;  %v3959_v37 = vld [vmem:[#allocation8 + $0xf88] sm:$0xff] }
0x144e   :  { %v13474_v34 = vcombine.low %v3923_v36, %v3959_v37  ;;  %v3599_v23 = vld [vmem:[#allocation8 + $0x448] sm:$0xff] }
0x144f   :  { %11459 = vmatpush2.bf16.msra.mxu1 %v14044_v53  ;;  %v3527_v32 = vld [vmem:[#allocation8 + $0x208] sm:$0xff] }
0x1450   :  { %11500 = vmatpush2.bf16.msra.mxu0 %v14046_v42  ;;  %11460 = vmatprep.subr.bf16.mxu1 %v13973_v60  ;;  %v13475_v42 = vcombine.high %v3923_v36, %v3959_v37  ;;  %v3851_v60 = vld [vmem:[#allocation8 + $0xc28] sm:$0xff] }
0x1451   :  { %11501 = vmatprep.subr.bf16.mxu0 %v13975_v43  ;;  %v3887_v43 = vld [vmem:[#allocation8 + $0xd48] sm:$0xff] }
0x1452   :  { %v13402_v59 = vcombine.low %v3851_v60, %v3887_v43 }
0x1453   :  { %11461 = vmatpush2.bf16.msra.mxu1 %v13972_v47  ;;  %v13401_v47 = vcombine.high %v3850_v39, %v3886_v41 }
0x1454   :  { %11502 = vmatpush2.bf16.msra.mxu0 %v13974_v21  ;;  %11462 = vmatprep.subr.bf16.mxu1 %v13901_v48 }
0x1455   :  { %11503 = vmatprep.subr.bf16.mxu0 %v13903_v49  ;;  %v13403_v49 = vcombine.high %v3851_v60, %v3887_v43 }
0x1457   :  { %11463 = vmatpush2.bf16.msra.mxu1 %v13900_v54  ;;  %v3779_v54 = vld [vmem:[#allocation8 + $0x9e8] sm:$0xff] }
0x1458   :  { %11504 = vmatpush2.bf16.msra.mxu0 %v13902_v55  ;;  %11464 = vmatprep.subr.bf16.mxu1 %v13829_v56  ;;  %v3815_v55 = vld [vmem:[#allocation8 + $0xb08] sm:$0xff] }
0x1459   :  { %11505 = vmatprep.subr.bf16.mxu0 %v13831_v57  ;;  %v13400_v57 = vcombine.low %v3850_v39, %v3886_v41  ;;  %v13330_v7 = vcombine.low %v3779_v54, %v3815_v55  ;;  %v4571_v39 = vld [vmem:[#allocation8 + $0x22a8] sm:$0xff] }
0x145a   :  { %v4607_v41 = vld [vmem:[#allocation8 + $0x23c8] sm:$0xff] }
0x145b   :  { %11465 = vmatpush2.bf16.msra.mxu1 %v13828_v0  ;;  %v13331_v0 = vcombine.high %v3779_v54, %v3815_v55  ;;  %v14123_v43 = vcombine.high %v4571_v39, %v4607_v41 }
0x145c   :  { %11506 = vmatpush2.bf16.msra.mxu0 %v13830_v13  ;;  %11466 = vmatprep.subr.bf16.mxu1 %v13757_v14  ;;  %v3706_v13 = vld [vmem:[#allocation8 + $0x7a0] sm:$0xff] }
0x145d   :  { %11507 = vmatprep.subr.bf16.mxu0 %v13759_v4  ;;  %v3742_v14 = vld [vmem:[#allocation8 + $0x8c0] sm:$0xff]  ;;  %v3707_v4 = vld [vmem:[#allocation8 + $0x7a8] sm:$0xff] }
0x145e   :  { %v13257_v9 = vcombine.high %v3706_v13, %v3742_v14  ;;  %v13256_v15 = vcombine.low %v3706_v13, %v3742_v14  ;;  %v13258_v17 = vcombine.low %v3707_v4, %v3743_v2 }
0x145f   :  { %11467 = vmatpush2.bf16.msra.mxu1 %v13756_v10  ;;  %v13259_v10 = vcombine.high %v3707_v4, %v3743_v2  ;;  %v4282_v2 = vld [vmem:[#allocation8 + $0x19a0] sm:$0xff] }
0x1460   :  { %11508 = vmatpush2.bf16.msra.mxu0 %v13758_v1  ;;  %11468 = vmatprep.subr.bf16.mxu1 %v13685_v5  ;;  %v3634_v1 = vld [vmem:[#allocation8 + $0x560] sm:$0xff] }
0x1461   :  { %11509 = vmatprep.subr.bf16.mxu0 %v13687_v11  ;;  %v3670_v5 = vld [vmem:[#allocation8 + $0x680] sm:$0xff]  ;;  %v3635_v11 = vld [vmem:[#allocation8 + $0x568] sm:$0xff] }
0x1462   :  { %v13185_v63 = vcombine.high %v3634_v1, %v3670_v5  ;;  %v13184_v24 = vcombine.low %v3634_v1, %v3670_v5  ;;  %v13186_v25 = vcombine.low %v3635_v11, %v3671_v12 }
0x1463   :  { %11469 = vmatpush2.bf16.msra.mxu1 %v13684_v18  ;;  %v13187_v18 = vcombine.high %v3635_v11, %v3671_v12  ;;  %v4210_v12 = vld [vmem:[#allocation8 + $0x1760] sm:$0xff] }
0x1464   :  { %11510 = vmatpush2.bf16.msra.mxu0 %v13686_v19  ;;  %11470 = vmatprep.subr.bf16.mxu1 %v13613_v20  ;;  %v3562_v19 = vld [vmem:[#allocation8 + $0x320] sm:$0xff] }
0x1465   :  { %11511 = vmatprep.subr.bf16.mxu0 %v13615_v22  ;;  %v3598_v20 = vld [vmem:[#allocation8 + $0x440] sm:$0xff]  ;;  %v3563_v22 = vld [vmem:[#allocation8 + $0x328] sm:$0xff] }
0x1466   :  { %v13113_v26 = vcombine.high %v3562_v19, %v3598_v20  ;;  %v13112_v28 = vcombine.low %v3562_v19, %v3598_v20 }
0x1467   :  { %11471 = vmatpush2.bf16.msra.mxu1 %v13612_v27  ;;  %v13115_v27 = vcombine.high %v3563_v22, %v3599_v23 }
0x1468   :  { %11512 = vmatpush2.bf16.msra.mxu0 %v13614_v44  ;;  %11522 = vmatprep.subr.bf16.mxu1 %v13545_v29  ;;  %v3490_v44 = vld [vmem:[#allocation8 + $0xe0] sm:$0xff] }
0x1469   :  { %11563 = vmatprep.subr.bf16.mxu0 %v13547_v30  ;;  %v3526_v29 = vld [vmem:[#allocation8 + $0x200] sm:$0xff]  ;;  %v3491_v30 = vld [vmem:[#allocation8 + $0xe8] sm:$0xff] }
0x146a   :  { %v11228_v53 = vpop.f32.mrf.mxu1  ;;  %11473 = vmatmul.mubr.bf16.vlgmr.msra.gmra.mxu1 %v15547_v6  ;;  %v13041_v36 = vcombine.high %v3490_v44, %v3526_v29  ;;  %v13043_v37 = vcombine.high %v3491_v30, %v3527_v32 }
0x146b   :  { %v11269_v45 = vpop.f32.mrf.mxu0  ;;  %11514 = vmatmul.mubr.bf16.vlgmr.msra.gmra.mxu0 %v15547_v6  ;;  %11523 = vmatpush1.bf16.msra.mxu1 %v13544_v35  ;;  %v13114_v35 = vcombine.low %v3563_v22, %v3599_v23  ;;  %v4138_v23 = vld [vmem:[#allocation8 + $0x1520] sm:$0xff] }
0x146c   :  { %11554 = vmatprep.mubr.bf16.mxu1 %v15549_v8  ;;  %11564 = vmatpush1.bf16.msra.mxu0 %v13546_v38  ;;  %v11230_v46 = vpop.f32.mrf.mxu1  ;;  %v4570_v38 = vld [vmem:[#allocation8 + $0x22a0] sm:$0xff] }
0x146d   :  { %11595 = vmatprep.mubr.bf16.mxu0 %v15549_v8  ;;  %v14299_v21 = vpack.c.bf16 %v11230_v46, %v11228_v53  ;;  %v11271_v48 = vpop.f32.mrf.mxu0  ;;  %11524 = vmatprep.subr.bf16.mxu1 %v13473_v40  ;;  %v4606_v40 = vld [vmem:[#allocation8 + $0x23c0] sm:$0xff]  ;;  %v13040_v53 = vcombine.low %v3490_v44, %v3526_v29  ;;  %v4499_v46 = vld [vmem:[#allocation8 + $0x2068] sm:$0xff] }
0x146e   :  { %v14300_v31 = vpack.c.bf16 %v11271_v48, %v11269_v45  ;;  %v11232_v52 = vpop.f32.mrf.mxu1  ;;  %11565 = vmatprep.subr.bf16.mxu0 %v13475_v42  ;;  %v13042_v42 = vcombine.low %v3491_v30, %v3527_v32  ;;  %v14121_v60 = vcombine.high %v4570_v38, %v4606_v40  ;;  %v4498_v45 = vld [vmem:[#allocation8 + $0x2060] sm:$0xff] }
0x146f   :  { %12086 = vst [vmem:[#allocation2 + $0xa0] sm:$0xff] %v14299_v21  ;;  %v11273_v56 = vpop.f32.mrf.mxu0  ;;  %11525 = vmatpush1.bf16.msra.mxu1 %v13472_v33  ;;  %v4534_v33 = vld [vmem:[#allocation8 + $0x2180] sm:$0xff]  ;;  %v14122_v21 = vcombine.low %v4571_v39, %v4607_v41  ;;  %v4463_v52 = vld [vmem:[#allocation8 + $0x1f48] sm:$0xff]  ;;  %v3996_v41 = vld [vmem:[#allocation8 + $0x10b0] sm:$0xff] }
0x1470   :  { %12087 = vst [vmem:[#allocation2 + $0xa8] sm:$0xff] %v14300_v31  ;;  %11566 = vmatpush1.bf16.msra.mxu0 %v13474_v34  ;;  %v11233_v58 = vpop.f32.mrf.mxu1  ;;  %11526 = vmatprep.subr.bf16.mxu1 %v13401_v47  ;;  %v4535_v34 = vld [vmem:[#allocation8 + $0x2188] sm:$0xff]  ;;  %v14120_v47 = vcombine.low %v4570_v38, %v4606_v40  ;;  %v14049_v48 = vcombine.high %v4498_v45, %v4534_v33  ;;  %v4066_v32 = vld [vmem:[#allocation8 + $0x12e0] sm:$0xff] }
0x1471   :  { %v11274_v62 = vpop.f32.mrf.mxu0  ;;  %11567 = vmatprep.subr.bf16.mxu0 %v13403_v49  ;;  %v14051_v49 = vcombine.high %v4499_v46, %v4535_v34  ;;  %v4427_v31 = vld [vmem:[#allocation8 + $0x1e28] sm:$0xff]  ;;  %v14048_v54 = vcombine.low %v4498_v45, %v4534_v33  ;;  %v14050_v55 = vcombine.low %v4499_v46, %v4535_v34  ;;  %v13977_v56 = vcombine.high %v4426_v50, %v4462_v51  ;;  %v4354_v58 = vld [vmem:[#allocation8 + $0x1be0] sm:$0xff]  ;;  %v3924_v34 = vld [vmem:[#allocation8 + $0xe70] sm:$0xff] }
0x1472   :  { %v4391_v62 = vld [vmem:[#allocation8 + $0x1d08] sm:$0xff]  ;;  %v13978_v13 = vcombine.low %v4427_v31, %v4463_v52 }
0x1473   :  { %11527 = vmatpush1.bf16.msra.mxu1 %v13400_v57  ;;  %v13979_v57 = vcombine.high %v4427_v31, %v4463_v52  ;;  %v3852_v31 = vld [vmem:[#allocation8 + $0xc30] sm:$0xff] }
0x1474   :  { %11568 = vmatpush1.bf16.msra.mxu0 %v13402_v59  ;;  %11528 = vmatprep.subr.bf16.mxu1 %v13329_v61  ;;  %v4390_v59 = vld [vmem:[#allocation8 + $0x1d00] sm:$0xff]  ;;  %v4355_v61 = vld [vmem:[#allocation8 + $0x1be8] sm:$0xff]  ;;  %v3888_v52 = vld [vmem:[#allocation8 + $0xd50] sm:$0xff] }
0x1475   :  { %11569 = vmatprep.subr.bf16.mxu0 %v13331_v0  ;;  %v13976_v0 = vcombine.low %v4426_v50, %v4462_v51  ;;  %v13905_v14 = vcombine.high %v4354_v58, %v4390_v59  ;;  %v13907_v4 = vcombine.high %v4355_v61, %v4391_v62  ;;  %v13906_v1 = vcombine.low %v4355_v61, %v4391_v62 }
0x1477   :  { %11529 = vmatpush1.bf16.msra.mxu1 %v13328_v3  ;;  %v4318_v3 = vld [vmem:[#allocation8 + $0x1ac0] sm:$0xff] }
0x1478   :  { %11570 = vmatpush1.bf16.msra.mxu0 %v13330_v7  ;;  %11530 = vmatprep.subr.bf16.mxu1 %v13257_v9  ;;  %v4283_v7 = vld [vmem:[#allocation8 + $0x19a8] sm:$0xff]  ;;  %v13833_v5 = vcombine.high %v4282_v2, %v4318_v3 }
0x1479   :  { %11571 = vmatprep.subr.bf16.mxu0 %v13259_v10  ;;  %v4319_v9 = vld [vmem:[#allocation8 + $0x1ac8] sm:$0xff]  ;;  %v13904_v10 = vcombine.low %v4354_v58, %v4390_v59 }
0x147a   :  { %v13835_v11 = vcombine.high %v4283_v7, %v4319_v9  ;;  %v13834_v19 = vcombine.low %v4283_v7, %v4319_v9 }
0x147b   :  { %11531 = vmatpush1.bf16.msra.mxu1 %v13256_v15  ;;  %v4246_v15 = vld [vmem:[#allocation8 + $0x1880] sm:$0xff] }
0x147c   :  { %11572 = vmatpush1.bf16.msra.mxu0 %v13258_v17  ;;  %11532 = vmatprep.subr.bf16.mxu1 %v13185_v63  ;;  %v4211_v17 = vld [vmem:[#allocation8 + $0x1768] sm:$0xff]  ;;  %v13761_v20 = vcombine.high %v4210_v12, %v4246_v15 }
0x147d   :  { %11573 = vmatprep.subr.bf16.mxu0 %v13187_v18  ;;  %v4247_v63 = vld [vmem:[#allocation8 + $0x1888] sm:$0xff]  ;;  %v13832_v18 = vcombine.low %v4282_v2, %v4318_v3  ;;  %v3780_v2 = vld [vmem:[#allocation8 + $0x9f0] sm:$0xff] }
0x147e   :  { %v13763_v22 = vcombine.high %v4211_v17, %v4247_v63  ;;  %v13762_v44 = vcombine.low %v4211_v17, %v4247_v63  ;;  %v3816_v3 = vld [vmem:[#allocation8 + $0xb10] sm:$0xff] }
0x147f   :  { %11533 = vmatpush1.bf16.msra.mxu1 %v13184_v24  ;;  %v4174_v24 = vld [vmem:[#allocation8 + $0x1640] sm:$0xff]  ;;  %v13333_v17 = vcombine.high %v3780_v2, %v3816_v3 }
0x1480   :  { %11574 = vmatpush1.bf16.msra.mxu0 %v13186_v25  ;;  %11534 = vmatprep.subr.bf16.mxu1 %v13113_v26  ;;  %v4139_v25 = vld [vmem:[#allocation8 + $0x1528] sm:$0xff]  ;;  %v13689_v29 = vcombine.high %v4138_v23, %v4174_v24 }
0x1481   :  { %11575 = vmatprep.subr.bf16.mxu0 %v13115_v27  ;;  %v4175_v26 = vld [vmem:[#allocation8 + $0x1648] sm:$0xff]  ;;  %v13760_v27 = vcombine.low %v4210_v12, %v4246_v15 }
0x1482   :  { %v13691_v30 = vcombine.high %v4139_v25, %v4175_v26  ;;  %v13690_v38 = vcombine.low %v4139_v25, %v4175_v26 }
0x1483   :  { %11535 = vmatpush1.bf16.msra.mxu1 %v13112_v28  ;;  %v4102_v28 = vld [vmem:[#allocation8 + $0x1400] sm:$0xff] }
0x1484   :  { %11576 = vmatpush1.bf16.msra.mxu0 %v13114_v35  ;;  %11536 = vmatprep.subr.bf16.mxu1 %v13041_v36  ;;  %v4067_v35 = vld [vmem:[#allocation8 + $0x12e8] sm:$0xff]  ;;  %v13617_v40 = vcombine.high %v4066_v32, %v4102_v28 }
0x1485   :  { %11577 = vmatprep.subr.bf16.mxu0 %v13043_v37  ;;  %v4103_v36 = vld [vmem:[#allocation8 + $0x1408] sm:$0xff]  ;;  %v13688_v37 = vcombine.low %v4138_v23, %v4174_v24  ;;  %v3745_v23 = vld [vmem:[#allocation8 + $0x8d8] sm:$0xff]  ;;  %v13332_v24 = vcombine.low %v3780_v2, %v3816_v3  ;;  %v4428_v2 = vld [vmem:[#allocation8 + $0x1e30] sm:$0xff] }
0x1486   :  { %v13619_v39 = vcombine.high %v4067_v35, %v4103_v36  ;;  %v13618_v45 = vcombine.low %v4067_v35, %v4103_v36  ;;  %v4464_v3 = vld [vmem:[#allocation8 + $0x1f50] sm:$0xff] }
0x1487   :  { %11537 = vmatpush1.bf16.msra.mxu1 %v13040_v53  ;;  %v4032_v53 = vld [vmem:[#allocation8 + $0x11d0] sm:$0xff] }
0x1488   :  { %11578 = vmatpush1.bf16.msra.mxu0 %v13042_v42  ;;  %11538 = vmatprep.subr.bf16.mxu1 %v14121_v60  ;;  %v3997_v42 = vld [vmem:[#allocation8 + $0x10b8] sm:$0xff]  ;;  %v13549_v33 = vcombine.high %v3996_v41, %v4032_v53 }
0x1489   :  { %11579 = vmatprep.subr.bf16.mxu0 %v14123_v43  ;;  %v4033_v60 = vld [vmem:[#allocation8 + $0x11d8] sm:$0xff]  ;;  %v13616_v43 = vcombine.low %v4066_v32, %v4102_v28 }
0x148a   :  { %v13551_v46 = vcombine.high %v3997_v42, %v4033_v60  ;;  %v13550_v50 = vcombine.low %v3997_v42, %v4033_v60  ;;  %v3673_v32 = vld [vmem:[#allocation8 + $0x698] sm:$0xff] }
0x148b   :  { %11539 = vmatpush2.bf16.msra.mxu1 %v14120_v47  ;;  %v3960_v47 = vld [vmem:[#allocation8 + $0xf90] sm:$0xff] }
0x148c   :  { %11580 = vmatpush2.bf16.msra.mxu0 %v14122_v21  ;;  %11540 = vmatprep.subr.bf16.mxu1 %v14049_v48  ;;  %v13548_v21 = vcombine.low %v3996_v41, %v4032_v53  ;;  %v3925_v48 = vld [vmem:[#allocation8 + $0xe78] sm:$0xff]  ;;  %v13477_v51 = vcombine.high %v3924_v34, %v3960_v47  ;;  %v13476_v59 = vcombine.low %v3924_v34, %v3960_v47 }
0x148d   :  { %11581 = vmatprep.subr.bf16.mxu0 %v14051_v49  ;;  %v3961_v49 = vld [vmem:[#allocation8 + $0xf98] sm:$0xff] }
0x148e   :  { %v13478_v62 = vcombine.low %v3925_v48, %v3961_v49  ;;  %v3601_v41 = vld [vmem:[#allocation8 + $0x458] sm:$0xff] }
0x148f   :  { %11541 = vmatpush2.bf16.msra.mxu1 %v14048_v54  ;;  %v3529_v34 = vld [vmem:[#allocation8 + $0x218] sm:$0xff] }
0x1490   :  { %11582 = vmatpush2.bf16.msra.mxu0 %v14050_v55  ;;  %11542 = vmatprep.subr.bf16.mxu1 %v13977_v56  ;;  %v13479_v55 = vcombine.high %v3925_v48, %v3961_v49  ;;  %v3853_v56 = vld [vmem:[#allocation8 + $0xc38] sm:$0xff] }
0x1491   :  { %11583 = vmatprep.subr.bf16.mxu0 %v13979_v57  ;;  %v3889_v57 = vld [vmem:[#allocation8 + $0xd58] sm:$0xff] }
0x1492   :  { %v13406_v15 = vcombine.low %v3853_v56, %v3889_v57 }
0x1493   :  { %11543 = vmatpush2.bf16.msra.mxu1 %v13976_v0  ;;  %v13405_v0 = vcombine.high %v3852_v31, %v3888_v52 }
0x1494   :  { %11584 = vmatpush2.bf16.msra.mxu0 %v13978_v13  ;;  %11544 = vmatprep.subr.bf16.mxu1 %v13905_v14 }
0x1495   :  { %11585 = vmatprep.subr.bf16.mxu0 %v13907_v4  ;;  %v13407_v4 = vcombine.high %v3853_v56, %v3889_v57 }
0x1497   :  { %11545 = vmatpush2.bf16.msra.mxu1 %v13904_v10  ;;  %v3781_v10 = vld [vmem:[#allocation8 + $0x9f8] sm:$0xff] }
0x1498   :  { %11586 = vmatpush2.bf16.msra.mxu0 %v13906_v1  ;;  %11546 = vmatprep.subr.bf16.mxu1 %v13833_v5  ;;  %v3817_v1 = vld [vmem:[#allocation8 + $0xb18] sm:$0xff] }
0x1499   :  { %11587 = vmatprep.subr.bf16.mxu0 %v13835_v11  ;;  %v13404_v11 = vcombine.low %v3852_v31, %v3888_v52  ;;  %v13334_v25 = vcombine.low %v3781_v10, %v3817_v1  ;;  %v4573_v31 = vld [vmem:[#allocation8 + $0x22b8] sm:$0xff] }
0x149a   :  { %v4609_v52 = vld [vmem:[#allocation8 + $0x23d8] sm:$0xff] }
0x149b   :  { %11547 = vmatpush2.bf16.msra.mxu1 %v13832_v18  ;;  %v13335_v18 = vcombine.high %v3781_v10, %v3817_v1  ;;  %v14127_v57 = vcombine.high %v4573_v31, %v4609_v52 }
0x149c   :  { %11588 = vmatpush2.bf16.msra.mxu0 %v13834_v19  ;;  %11548 = vmatprep.subr.bf16.mxu1 %v13761_v20  ;;  %v3708_v19 = vld [vmem:[#allocation8 + $0x7b0] sm:$0xff] }
0x149d   :  { %11589 = vmatprep.subr.bf16.mxu0 %v13763_v22  ;;  %v3744_v20 = vld [vmem:[#allocation8 + $0x8d0] sm:$0xff]  ;;  %v3709_v22 = vld [vmem:[#allocation8 + $0x7b8] sm:$0xff] }
0x149e   :  { %v13261_v26 = vcombine.high %v3708_v19, %v3744_v20  ;;  %v13260_v28 = vcombine.low %v3708_v19, %v3744_v20  ;;  %v13262_v35 = vcombine.low %v3709_v22, %v3745_v23 }
0x149f   :  { %11549 = vmatpush2.bf16.msra.mxu1 %v13760_v27  ;;  %v13263_v27 = vcombine.high %v3709_v22, %v3745_v23  ;;  %v4284_v23 = vld [vmem:[#allocation8 + $0x19b0] sm:$0xff] }
0x14a0   :  { %11590 = vmatpush2.bf16.msra.mxu0 %v13762_v44  ;;  %11550 = vmatprep.subr.bf16.mxu1 %v13689_v29  ;;  %v3636_v44 = vld [vmem:[#allocation8 + $0x570] sm:$0xff] }
0x14a1   :  { %11591 = vmatprep.subr.bf16.mxu0 %v13691_v30  ;;  %v3672_v29 = vld [vmem:[#allocation8 + $0x690] sm:$0xff]  ;;  %v3637_v30 = vld [vmem:[#allocation8 + $0x578] sm:$0xff] }
0x14a2   :  { %v13189_v36 = vcombine.high %v3636_v44, %v3672_v29  ;;  %v13188_v53 = vcombine.low %v3636_v44, %v3672_v29  ;;  %v13190_v42 = vcombine.low %v3637_v30, %v3673_v32 }
0x14a3   :  { %11551 = vmatpush2.bf16.msra.mxu1 %v13688_v37  ;;  %v13191_v37 = vcombine.high %v3637_v30, %v3673_v32  ;;  %v4212_v32 = vld [vmem:[#allocation8 + $0x1770] sm:$0xff] }
0x14a4   :  { %11592 = vmatpush2.bf16.msra.mxu0 %v13690_v38  ;;  %11552 = vmatprep.subr.bf16.mxu1 %v13617_v40  ;;  %v3564_v38 = vld [vmem:[#allocation8 + $0x330] sm:$0xff] }
0x14a5   :  { %11593 = vmatprep.subr.bf16.mxu0 %v13619_v39  ;;  %v3600_v40 = vld [vmem:[#allocation8 + $0x450] sm:$0xff]  ;;  %v3565_v39 = vld [vmem:[#allocation8 + $0x338] sm:$0xff] }
0x14a6   :  { %v13117_v60 = vcombine.high %v3564_v38, %v3600_v40  ;;  %v13116_v47 = vcombine.low %v3564_v38, %v3600_v40 }
0x14a7   :  { %11553 = vmatpush2.bf16.msra.mxu1 %v13616_v43  ;;  %v13119_v43 = vcombine.high %v3565_v39, %v3601_v41 }
0x14a8   :  { %11594 = vmatpush2.bf16.msra.mxu0 %v13618_v45  ;;  %11604 = vmatprep.subr.bf16.mxu1 %v13549_v33  ;;  %v3492_v45 = vld [vmem:[#allocation8 + $0xf0] sm:$0xff] }
0x14a9   :  { %11645 = vmatprep.subr.bf16.mxu0 %v13551_v46  ;;  %v3528_v33 = vld [vmem:[#allocation8 + $0x210] sm:$0xff]  ;;  %v3493_v46 = vld [vmem:[#allocation8 + $0xf8] sm:$0xff] }
0x14aa   :  { %v11310_v54 = vpop.f32.mrf.mxu1  ;;  %11555 = vmatmul.mubr.bf16.vlgmr.msra.gmra.mxu1 %v15547_v6  ;;  %v13045_v48 = vcombine.high %v3492_v45, %v3528_v33  ;;  %v13047_v49 = vcombine.high %v3493_v46, %v3529_v34 }
0x14ab   :  { %v11351_v58 = vpop.f32.mrf.mxu0  ;;  %11596 = vmatmul.mubr.bf16.vlgmr.msra.gmra.mxu0 %v15547_v6  ;;  %11605 = vmatpush1.bf16.msra.mxu1 %v13548_v21  ;;  %v13118_v21 = vcombine.low %v3565_v39, %v3601_v41  ;;  %v4140_v41 = vld [vmem:[#allocation8 + $0x1530] sm:$0xff] }
0x14ac   :  { %11636 = vmatprep.mubr.bf16.mxu1 %v15549_v8  ;;  %11646 = vmatpush1.bf16.msra.mxu0 %v13550_v50  ;;  %v11312_v61 = vpop.f32.mrf.mxu1  ;;  %v4572_v50 = vld [vmem:[#allocation8 + $0x22b0] sm:$0xff] }
0x14ad   :  { %11677 = vmatprep.mubr.bf16.mxu0 %v15549_v8  ;;  %v14301_v13 = vpack.c.bf16 %v11312_v61, %v11310_v54  ;;  %v11353_v14 = vpop.f32.mrf.mxu0  ;;  %11606 = vmatprep.subr.bf16.mxu1 %v13477_v51  ;;  %v4608_v51 = vld [vmem:[#allocation8 + $0x23d0] sm:$0xff]  ;;  %v13044_v54 = vcombine.low %v3492_v45, %v3528_v33  ;;  %v4501_v61 = vld [vmem:[#allocation8 + $0x2078] sm:$0xff] }
0x14ae   :  { %v14302_v7 = vpack.c.bf16 %v11353_v14, %v11351_v58  ;;  %v11314_v9 = vpop.f32.mrf.mxu1  ;;  %11647 = vmatprep.subr.bf16.mxu0 %v13479_v55  ;;  %v13046_v55 = vcombine.low %v3493_v46, %v3529_v34  ;;  %v14125_v56 = vcombine.high %v4572_v50, %v4608_v51  ;;  %v4500_v58 = vld [vmem:[#allocation8 + $0x2070] sm:$0xff] }
0x14af   :  { %12088 = vst [vmem:[#allocation2 + $0xb0] sm:$0xff] %v14301_v13  ;;  %v11355_v5 = vpop.f32.mrf.mxu0  ;;  %11607 = vmatpush1.bf16.msra.mxu1 %v13476_v59  ;;  %v4536_v59 = vld [vmem:[#allocation8 + $0x2190] sm:$0xff]  ;;  %v14126_v13 = vcombine.low %v4573_v31, %v4609_v52  ;;  %v4465_v9 = vld [vmem:[#allocation8 + $0x1f58] sm:$0xff]  ;;  %v3998_v52 = vld [vmem:[#allocation8 + $0x10c0] sm:$0xff] }
0x14b0   :  { %12089 = vst [vmem:[#allocation2 + $0xb8] sm:$0xff] %v14302_v7  ;;  %11648 = vmatpush1.bf16.msra.mxu0 %v13478_v62  ;;  %v11315_v12 = vpop.f32.mrf.mxu1  ;;  %11608 = vmatprep.subr.bf16.mxu1 %v13405_v0  ;;  %v4537_v62 = vld [vmem:[#allocation8 + $0x2198] sm:$0xff]  ;;  %v14124_v0 = vcombine.low %v4572_v50, %v4608_v51  ;;  %v14053_v14 = vcombine.high %v4500_v58, %v4536_v59  ;;  %v4068_v34 = vld [vmem:[#allocation8 + $0x12f0] sm:$0xff] }
0x14b1   :  { %v11356_v63 = vpop.f32.mrf.mxu0  ;;  %11649 = vmatprep.subr.bf16.mxu0 %v13407_v4  ;;  %v14055_v4 = vcombine.high %v4501_v61, %v4537_v62  ;;  %v4429_v7 = vld [vmem:[#allocation8 + $0x1e38] sm:$0xff]  ;;  %v14052_v10 = vcombine.low %v4500_v58, %v4536_v59  ;;  %v14054_v1 = vcombine.low %v4501_v61, %v4537_v62  ;;  %v13981_v5 = vcombine.high %v4428_v2, %v4464_v3  ;;  %v4356_v12 = vld [vmem:[#allocation8 + $0x1bf0] sm:$0xff]  ;;  %v3926_v62 = vld [vmem:[#allocation8 + $0xe80] sm:$0xff] }
0x14b2   :  { %v4393_v63 = vld [vmem:[#allocation8 + $0x1d18] sm:$0xff]  ;;  %v13982_v19 = vcombine.low %v4429_v7, %v4465_v9 }
0x14b3   :  { %11609 = vmatpush1.bf16.msra.mxu1 %v13404_v11  ;;  %v13983_v11 = vcombine.high %v4429_v7, %v4465_v9  ;;  %v3854_v7 = vld [vmem:[#allocation8 + $0xc40] sm:$0xff] }
0x14b4   :  { %11650 = vmatpush1.bf16.msra.mxu0 %v13406_v15  ;;  %11610 = vmatprep.subr.bf16.mxu1 %v13333_v17  ;;  %v4392_v15 = vld [vmem:[#allocation8 + $0x1d10] sm:$0xff]  ;;  %v4357_v17 = vld [vmem:[#allocation8 + $0x1bf8] sm:$0xff]  ;;  %v3890_v9 = vld [vmem:[#allocation8 + $0xd60] sm:$0xff] }
0x14b5   :  { %11651 = vmatprep.subr.bf16.mxu0 %v13335_v18  ;;  %v13980_v18 = vcombine.low %v4428_v2, %v4464_v3  ;;  %v13909_v20 = vcombine.high %v4356_v12, %v4392_v15  ;;  %v13911_v22 = vcombine.high %v4357_v17, %v4393_v63  ;;  %v13910_v44 = vcombine.low %v4357_v17, %v4393_v63 }
0x14b7   :  { %11611 = vmatpush1.bf16.msra.mxu1 %v13332_v24  ;;  %v4320_v24 = vld [vmem:[#allocation8 + $0x1ad0] sm:$0xff] }
0x14b8   :  { %11652 = vmatpush1.bf16.msra.mxu0 %v13334_v25  ;;  %11612 = vmatprep.subr.bf16.mxu1 %v13261_v26  ;;  %v4285_v25 = vld [vmem:[#allocation8 + $0x19b8] sm:$0xff]  ;;  %v13837_v29 = vcombine.high %v4284_v23, %v4320_v24 }
0x14b9   :  { %11653 = vmatprep.subr.bf16.mxu0 %v13263_v27  ;;  %v4321_v26 = vld [vmem:[#allocation8 + $0x1ad8] sm:$0xff]  ;;  %v13908_v27 = vcombine.low %v4356_v12, %v4392_v15 }
0x14ba   :  { %v13839_v30 = vcombine.high %v4285_v25, %v4321_v26  ;;  %v13838_v38 = vcombine.low %v4285_v25, %v4321_v26  ;;  %v3783_v26 = vld [vmem:[#allocation8 + $0xa08] sm:$0xff] }
0x14bb   :  { %11613 = vmatpush1.bf16.msra.mxu1 %v13260_v28  ;;  %v4248_v28 = vld [vmem:[#allocation8 + $0x1890] sm:$0xff] }
0x14bc   :  { %11654 = vmatpush1.bf16.msra.mxu0 %v13262_v35  ;;  %11614 = vmatprep.subr.bf16.mxu1 %v13189_v36  ;;  %v4213_v35 = vld [vmem:[#allocation8 + $0x1778] sm:$0xff]  ;;  %v13765_v40 = vcombine.high %v4212_v32, %v4248_v28 }
0x14bd   :  { %11655 = vmatprep.subr.bf16.mxu0 %v13191_v37  ;;  %v4249_v36 = vld [vmem:[#allocation8 + $0x1898] sm:$0xff]  ;;  %v13836_v37 = vcombine.low %v4284_v23, %v4320_v24  ;;  %v3782_v23 = vld [vmem:[#allocation8 + $0xa00] sm:$0xff] }
0x14be   :  { %v13767_v39 = vcombine.high %v4213_v35, %v4249_v36  ;;  %v13766_v45 = vcombine.low %v4213_v35, %v4249_v36  ;;  %v3818_v24 = vld [vmem:[#allocation8 + $0xb20] sm:$0xff] }
0x14bf   :  { %11615 = vmatpush1.bf16.msra.mxu1 %v13188_v53  ;;  %v4176_v53 = vld [vmem:[#allocation8 + $0x1650] sm:$0xff] }
0x14c0   :  { %11656 = vmatpush1.bf16.msra.mxu0 %v13190_v42  ;;  %11616 = vmatprep.subr.bf16.mxu1 %v13117_v60  ;;  %v4141_v42 = vld [vmem:[#allocation8 + $0x1538] sm:$0xff]  ;;  %v13693_v33 = vcombine.high %v4140_v41, %v4176_v53 }
0x14c1   :  { %11657 = vmatprep.subr.bf16.mxu0 %v13119_v43  ;;  %v4177_v60 = vld [vmem:[#allocation8 + $0x1658] sm:$0xff]  ;;  %v13764_v43 = vcombine.low %v4212_v32, %v4248_v28  ;;  %v13337_v28 = vcombine.high %v3782_v23, %v3818_v24 }
0x14c2   :  { %v13695_v46 = vcombine.high %v4141_v42, %v4177_v60  ;;  %v13694_v50 = vcombine.low %v4141_v42, %v4177_v60 }
0x14c3   :  { %11617 = vmatpush1.bf16.msra.mxu1 %v13116_v47  ;;  %v4104_v47 = vld [vmem:[#allocation8 + $0x1410] sm:$0xff] }
0x14c4   :  { %11658 = vmatpush1.bf16.msra.mxu0 %v13118_v21  ;;  %11618 = vmatprep.subr.bf16.mxu1 %v13045_v48  ;;  %v4069_v21 = vld [vmem:[#allocation8 + $0x12f8] sm:$0xff]  ;;  %v13621_v51 = vcombine.high %v4068_v34, %v4104_v47 }
0x14c5   :  { %11659 = vmatprep.subr.bf16.mxu0 %v13047_v49  ;;  %v4105_v48 = vld [vmem:[#allocation8 + $0x1418] sm:$0xff]  ;;  %v13692_v49 = vcombine.low %v4140_v41, %v4176_v53  ;;  %v13336_v41 = vcombine.low %v3782_v23, %v3818_v24 }
0x14c6   :  { %v13623_v31 = vcombine.high %v4069_v21, %v4105_v48  ;;  %v13622_v58 = vcombine.low %v4069_v21, %v4105_v48 }
0x14c7   :  { %11619 = vmatpush1.bf16.msra.mxu1 %v13044_v54  ;;  %v4034_v54 = vld [vmem:[#allocation8 + $0x11e0] sm:$0xff] }
0x14c8   :  { %11660 = vmatpush1.bf16.msra.mxu0 %v13046_v55  ;;  %11620 = vmatprep.subr.bf16.mxu1 %v14125_v56  ;;  %v3999_v55 = vld [vmem:[#allocation8 + $0x10c8] sm:$0xff]  ;;  %v13553_v59 = vcombine.high %v3998_v52, %v4034_v54 }
0x14c9   :  { %11661 = vmatprep.subr.bf16.mxu0 %v14127_v57  ;;  %v4035_v56 = vld [vmem:[#allocation8 + $0x11e8] sm:$0xff]  ;;  %v13620_v57 = vcombine.low %v4068_v34, %v4104_v47 }
0x14ca   :  { %v13555_v61 = vcombine.high %v3999_v55, %v4035_v56  ;;  %v13554_v2 = vcombine.low %v3999_v55, %v4035_v56 }
0x14cb   :  { %11621 = vmatpush2.bf16.msra.mxu1 %v14124_v0  ;;  %v3962_v0 = vld [vmem:[#allocation8 + $0xfa0] sm:$0xff] }
0x14cc   :  { %11662 = vmatpush2.bf16.msra.mxu0 %v14126_v13  ;;  %11622 = vmatprep.subr.bf16.mxu1 %v14053_v14  ;;  %v13552_v13 = vcombine.low %v3998_v52, %v4034_v54  ;;  %v3927_v14 = vld [vmem:[#allocation8 + $0xe88] sm:$0xff]  ;;  %v13481_v3 = vcombine.high %v3926_v62, %v3962_v0  ;;  %v13480_v15 = vcombine.low %v3926_v62, %v3962_v0 }
0x14cd   :  { %11663 = vmatprep.subr.bf16.mxu0 %v14055_v4  ;;  %v3963_v4 = vld [vmem:[#allocation8 + $0xfa8] sm:$0xff] }
0x14ce   :  { %v13482_v63 = vcombine.low %v3927_v14, %v3963_v4 }
0x14cf   :  { %11623 = vmatpush2.bf16.msra.mxu1 %v14052_v10 }
0x14d0   :  { %11664 = vmatpush2.bf16.msra.mxu0 %v14054_v1  ;;  %11624 = vmatprep.subr.bf16.mxu1 %v13981_v5  ;;  %v13483_v1 = vcombine.high %v3927_v14, %v3963_v4  ;;  %v3855_v5 = vld [vmem:[#allocation8 + $0xc48] sm:$0xff]  ;;  %v4574_v4 = vld [vmem:[#allocation8 + $0x22c0] sm:$0xff] }
0x14d1   :  { %11665 = vmatprep.subr.bf16.mxu0 %v13983_v11  ;;  %v3891_v11 = vld [vmem:[#allocation8 + $0xd68] sm:$0xff] }
0x14d2   :  { %v13410_v32 = vcombine.low %v3855_v5, %v3891_v11 }
0x14d3   :  { %11625 = vmatpush2.bf16.msra.mxu1 %v13980_v18  ;;  %v13409_v18 = vcombine.high %v3854_v7, %v3890_v9 }
0x14d4   :  { %11666 = vmatpush2.bf16.msra.mxu0 %v13982_v19  ;;  %11626 = vmatprep.subr.bf16.mxu1 %v13909_v20 }
0x14d5   :  { %11667 = vmatprep.subr.bf16.mxu0 %v13911_v22  ;;  %v13411_v22 = vcombine.high %v3855_v5, %v3891_v11 }
0x14d7   :  { %11627 = vmatpush2.bf16.msra.mxu1 %v13908_v27  ;;  %v3819_v27 = vld [vmem:[#allocation8 + $0xb28] sm:$0xff] }
0x14d8   :  { %11668 = vmatpush2.bf16.msra.mxu0 %v13910_v44  ;;  %11628 = vmatprep.subr.bf16.mxu1 %v13837_v29  ;;  %v13408_v29 = vcombine.low %v3854_v7, %v3890_v9  ;;  %v13339_v36 = vcombine.high %v3783_v26, %v3819_v27  ;;  %v13338_v53 = vcombine.low %v3783_v26, %v3819_v27  ;;  %v4611_v7 = vld [vmem:[#allocation8 + $0x23e8] sm:$0xff]  ;;  %v4430_v26 = vld [vmem:[#allocation8 + $0x1e40] sm:$0xff] }
0x14d9   :  { %11669 = vmatprep.subr.bf16.mxu0 %v13839_v30  ;;  %v4466_v27 = vld [vmem:[#allocation8 + $0x1f60] sm:$0xff] }
0x14db   :  { %11629 = vmatpush2.bf16.msra.mxu1 %v13836_v37  ;;  %v3710_v37 = vld [vmem:[#allocation8 + $0x7c0] sm:$0xff] }
0x14dc   :  { %11670 = vmatpush2.bf16.msra.mxu0 %v13838_v38  ;;  %11630 = vmatprep.subr.bf16.mxu1 %v13765_v40  ;;  %v3746_v38 = vld [vmem:[#allocation8 + $0x8e0] sm:$0xff]  ;;  %v3711_v40 = vld [vmem:[#allocation8 + $0x7c8] sm:$0xff] }
0x14dd   :  { %11671 = vmatprep.subr.bf16.mxu0 %v13767_v39  ;;  %v3747_v39 = vld [vmem:[#allocation8 + $0x8e8] sm:$0xff]  ;;  %v13265_v42 = vcombine.high %v3710_v37, %v3746_v38  ;;  %v13264_v34 = vcombine.low %v3710_v37, %v3746_v38  ;;  %v4394_v37 = vld [vmem:[#allocation8 + $0x1d20] sm:$0xff] }
0x14de   :  { %v13267_v60 = vcombine.high %v3711_v40, %v3747_v39  ;;  %v13266_v47 = vcombine.low %v3711_v40, %v3747_v39  ;;  %v4359_v38 = vld [vmem:[#allocation8 + $0x1c08] sm:$0xff]  ;;  %v13984_v39 = vcombine.low %v4430_v26, %v4466_v27 }
0x14df   :  { %11631 = vmatpush2.bf16.msra.mxu1 %v13764_v43  ;;  %v3638_v43 = vld [vmem:[#allocation8 + $0x580] sm:$0xff]  ;;  %v4395_v40 = vld [vmem:[#allocation8 + $0x1d28] sm:$0xff] }
0x14e0   :  { %11672 = vmatpush2.bf16.msra.mxu0 %v13766_v45  ;;  %11632 = vmatprep.subr.bf16.mxu1 %v13693_v33  ;;  %v3674_v45 = vld [vmem:[#allocation8 + $0x6a0] sm:$0xff]  ;;  %v3639_v33 = vld [vmem:[#allocation8 + $0x588] sm:$0xff] }
0x14e1   :  { %11673 = vmatprep.subr.bf16.mxu0 %v13695_v46  ;;  %v3675_v46 = vld [vmem:[#allocation8 + $0x6a8] sm:$0xff]  ;;  %v13193_v21 = vcombine.high %v3638_v43, %v3674_v45  ;;  %v13192_v52 = vcombine.low %v3638_v43, %v3674_v45  ;;  %v4322_v43 = vld [vmem:[#allocation8 + $0x1ae0] sm:$0xff] }
0x14e2   :  { %v13195_v48 = vcombine.high %v3639_v33, %v3675_v46  ;;  %v13194_v54 = vcombine.low %v3639_v33, %v3675_v46  ;;  %v4287_v45 = vld [vmem:[#allocation8 + $0x19c8] sm:$0xff] }
0x14e3   :  { %11633 = vmatpush2.bf16.msra.mxu1 %v13692_v49  ;;  %v3566_v49 = vld [vmem:[#allocation8 + $0x340] sm:$0xff]  ;;  %v4323_v33 = vld [vmem:[#allocation8 + $0x1ae8] sm:$0xff] }
0x14e4   :  { %11674 = vmatpush2.bf16.msra.mxu0 %v13694_v50  ;;  %11634 = vmatprep.subr.bf16.mxu1 %v13621_v51  ;;  %v3602_v50 = vld [vmem:[#allocation8 + $0x460] sm:$0xff]  ;;  %v3567_v51 = vld [vmem:[#allocation8 + $0x348] sm:$0xff] }
0x14e5   :  { %11675 = vmatprep.subr.bf16.mxu0 %v13623_v31  ;;  %v3603_v31 = vld [vmem:[#allocation8 + $0x468] sm:$0xff]  ;;  %v13121_v55 = vcombine.high %v3566_v49, %v3602_v50  ;;  %v13120_v62 = vcombine.low %v3566_v49, %v3602_v50  ;;  %v4250_v49 = vld [vmem:[#allocation8 + $0x18a0] sm:$0xff] }
0x14e6   :  { %v13123_v56 = vcombine.high %v3567_v51, %v3603_v31  ;;  %v13122_v0 = vcombine.low %v3567_v51, %v3603_v31  ;;  %v4215_v50 = vld [vmem:[#allocation8 + $0x1788] sm:$0xff] }
0x14e7   :  { %11635 = vmatpush2.bf16.msra.mxu1 %v13620_v57  ;;  %v3494_v57 = vld [vmem:[#allocation8 + $0x100] sm:$0xff]  ;;  %v4251_v51 = vld [vmem:[#allocation8 + $0x18a8] sm:$0xff] }
0x14e8   :  { %11676 = vmatpush2.bf16.msra.mxu0 %v13622_v58  ;;  %11686 = vmatprep.subr.bf16.mxu1 %v13553_v59  ;;  %v3530_v58 = vld [vmem:[#allocation8 + $0x220] sm:$0xff]  ;;  %v3495_v59 = vld [vmem:[#allocation8 + $0x108] sm:$0xff] }
0x14e9   :  { %11727 = vmatprep.subr.bf16.mxu0 %v13555_v61  ;;  %v3531_v61 = vld [vmem:[#allocation8 + $0x228] sm:$0xff]  ;;  %v13048_v9 = vcombine.low %v3494_v57, %v3530_v58 }
0x14ea   :  { %v15613_v10 = vpop.f32.mrf.mxu1  ;;  %11637 = vmatmul.mubr.bf16.vlgmr.msra.gmra.mxu1 %v15547_v6  ;;  %v13051_v14 = vcombine.high %v3495_v59, %v3531_v61 }
0x14eb   :  { %v15616_v12 = vpop.f32.mrf.mxu0  ;;  %11678 = vmatmul.mubr.bf16.vlgmr.msra.gmra.mxu0 %v15547_v6  ;;  %11687 = vmatpush1.bf16.msra.mxu1 %v13552_v13  ;;  %v13049_v13 = vcombine.high %v3494_v57, %v3530_v58  ;;  %v4178_v57 = vld [vmem:[#allocation8 + $0x1660] sm:$0xff]  ;;  %v4143_v58 = vld [vmem:[#allocation8 + $0x1548] sm:$0xff] }
0x14ec   :  { %11718 = vmatprep.mubr.bf16.mxu1 %v15549_v8  ;;  %11728 = vmatpush1.bf16.msra.mxu0 %v13554_v2  ;;  %v15620_v17 = vpop.f32.mrf.mxu1  ;;  %v4610_v2 = vld [vmem:[#allocation8 + $0x23e0] sm:$0xff] }
0x14ed   :  { %11759 = vmatprep.mubr.bf16.mxu0 %v15549_v8  ;;  %v14303_v19 = vpack.c.bf16 %v15620_v17, %v15613_v10  ;;  %v15625_v20 = vpop.f32.mrf.mxu0  ;;  %11688 = vmatprep.subr.bf16.mxu1 %v13481_v3  ;;  %v4575_v3 = vld [vmem:[#allocation8 + $0x22c8] sm:$0xff]  ;;  %v14129_v5 = vcombine.high %v4574_v4, %v4610_v2 }
0x14ee   :  { %v11396_v25 = vpop.f32.mrf.mxu1  ;;  %11729 = vmatprep.subr.bf16.mxu0 %v13483_v1  ;;  %v13050_v1 = vcombine.low %v3495_v59, %v3531_v61  ;;  %v14131_v11 = vcombine.high %v4575_v3, %v4611_v7  ;;  %v14130_v23 = vcombine.low %v4575_v3, %v4611_v7  ;;  %v4179_v59 = vld [vmem:[#allocation8 + $0x1668] sm:$0xff] }
0x14ef   :  { %12114 = vst [vmem:[#allocation2 + $0xc0] sm:$0xff] %v14303_v19  ;;  %v11437_v44 = vpop.f32.mrf.mxu0  ;;  %11689 = vmatpush1.bf16.msra.mxu1 %v13480_v15  ;;  %v4502_v15 = vld [vmem:[#allocation8 + $0x2080] sm:$0xff]  ;;  %v4539_v19 = vld [vmem:[#allocation8 + $0x21a8] sm:$0xff] }
0x14f0   :  { %11730 = vmatpush1.bf16.msra.mxu0 %v13482_v63  ;;  %v11397_v30 = vpop.f32.mrf.mxu1  ;;  %11690 = vmatprep.subr.bf16.mxu1 %v13409_v18  ;;  %v4538_v63 = vld [vmem:[#allocation8 + $0x21a0] sm:$0xff]  ;;  %v4503_v18 = vld [vmem:[#allocation8 + $0x2088] sm:$0xff] }
0x14f1   :  { %v11438_v35 = vpop.f32.mrf.mxu0  ;;  %11731 = vmatprep.subr.bf16.mxu0 %v13411_v22  ;;  %v14128_v22 = vcombine.low %v4574_v4, %v4610_v2  ;;  %v14057_v24 = vcombine.high %v4502_v15, %v4538_v63  ;;  %v14059_v25 = vcombine.high %v4503_v18, %v4539_v19  ;;  %v4431_v44 = vld [vmem:[#allocation8 + $0x1e48] sm:$0xff]  ;;  %v14056_v30 = vcombine.low %v4502_v15, %v4538_v63  ;;  %v4106_v4 = vld [vmem:[#allocation8 + $0x1420] sm:$0xff]  ;;  %v4036_v15 = vld [vmem:[#allocation8 + $0x11f0] sm:$0xff] }
0x14f2   :  { %v4071_v2 = vld [vmem:[#allocation8 + $0x1308] sm:$0xff]  ;;  %v4001_v63 = vld [vmem:[#allocation8 + $0x10d8] sm:$0xff] }
0x14f3   :  { %11691 = vmatpush1.bf16.msra.mxu1 %v13408_v29  ;;  %v4467_v29 = vld [vmem:[#allocation8 + $0x1f68] sm:$0xff] }
0x14f4   :  { %11732 = vmatpush1.bf16.msra.mxu0 %v13410_v32  ;;  %11692 = vmatprep.subr.bf16.mxu1 %v13337_v28  ;;  %v14058_v32 = vcombine.low %v4503_v18, %v4539_v19  ;;  %v13985_v28 = vcombine.high %v4430_v26, %v4466_v27  ;;  %v13987_v35 = vcombine.high %v4431_v44, %v4467_v29  ;;  %v4107_v3 = vld [vmem:[#allocation8 + $0x1428] sm:$0xff]  ;;  %v4037_v18 = vld [vmem:[#allocation8 + $0x11f8] sm:$0xff]  ;;  %v3964_v26 = vld [vmem:[#allocation8 + $0xfb0] sm:$0xff] }
0x14f5   :  { %11733 = vmatprep.subr.bf16.mxu0 %v13339_v36  ;;  %v4358_v36 = vld [vmem:[#allocation8 + $0x1c00] sm:$0xff] }
0x14f6   :  { %v13912_v46 = vcombine.low %v4358_v36, %v4394_v37 }
0x14f7   :  { %11693 = vmatpush1.bf16.msra.mxu1 %v13336_v41  ;;  %v13986_v41 = vcombine.low %v4431_v44, %v4467_v29  ;;  %v3929_v44 = vld [vmem:[#allocation8 + $0xe98] sm:$0xff] }
0x14f8   :  { %11734 = vmatpush1.bf16.msra.mxu0 %v13338_v53  ;;  %11694 = vmatprep.subr.bf16.mxu1 %v13265_v42  ;;  %v13913_v53 = vcombine.high %v4358_v36, %v4394_v37  ;;  %v13915_v42 = vcombine.high %v4359_v38, %v4395_v40  ;;  %v3965_v29 = vld [vmem:[#allocation8 + $0xfb8] sm:$0xff] }
0x14f9   :  { %11735 = vmatprep.subr.bf16.mxu0 %v13267_v60  ;;  %v4286_v60 = vld [vmem:[#allocation8 + $0x19c0] sm:$0xff]  ;;  %v13487_v37 = vcombine.high %v3929_v44, %v3965_v29 }
0x14fa   :  { %v13840_v31 = vcombine.low %v4286_v60, %v4322_v43 }
0x14fb   :  { %11695 = vmatpush1.bf16.msra.mxu1 %v13264_v34  ;;  %v13914_v34 = vcombine.low %v4359_v38, %v4395_v40  ;;  %v3857_v38 = vld [vmem:[#allocation8 + $0xc58] sm:$0xff] }
0x14fc   :  { %11736 = vmatpush1.bf16.msra.mxu0 %v13266_v47  ;;  %11696 = vmatprep.subr.bf16.mxu1 %v13193_v21  ;;  %v13841_v47 = vcombine.high %v4286_v60, %v4322_v43  ;;  %v13843_v21 = vcombine.high %v4287_v45, %v4323_v33  ;;  %v3893_v40 = vld [vmem:[#allocation8 + $0xd78] sm:$0xff] }
0x14fd   :  { %11737 = vmatprep.subr.bf16.mxu0 %v13195_v48  ;;  %v4214_v48 = vld [vmem:[#allocation8 + $0x1780] sm:$0xff] }
0x14fe   :  { %v13768_v61 = vcombine.low %v4214_v48, %v4250_v49 }
0x14ff   :  { %11697 = vmatpush1.bf16.msra.mxu1 %v13192_v52  ;;  %v13842_v52 = vcombine.low %v4287_v45, %v4323_v33  ;;  %v13415_v45 = vcombine.high %v3857_v38, %v3893_v40  ;;  %v3784_v33 = vld [vmem:[#allocation8 + $0xa10] sm:$0xff] }
0x1500   :  { %11738 = vmatpush1.bf16.msra.mxu0 %v13194_v54  ;;  %11698 = vmatprep.subr.bf16.mxu1 %v13121_v55  ;;  %v13769_v54 = vcombine.high %v4214_v48, %v4250_v49  ;;  %v13771_v55 = vcombine.high %v4215_v50, %v4251_v51 }
0x1501   :  { %11739 = vmatprep.subr.bf16.mxu0 %v13123_v56  ;;  %v4142_v56 = vld [vmem:[#allocation8 + $0x1540] sm:$0xff] }
0x1502   :  { %v13696_v7 = vcombine.low %v4142_v56, %v4178_v57 }
0x1503   :  { %11699 = vmatpush1.bf16.msra.mxu1 %v13120_v62  ;;  %v13770_v62 = vcombine.low %v4215_v50, %v4251_v51  ;;  %v13414_v51 = vcombine.low %v3857_v38, %v3893_v40 }
0x1504   :  { %11740 = vmatpush1.bf16.msra.mxu0 %v13122_v0  ;;  %11700 = vmatprep.subr.bf16.mxu1 %v13049_v13  ;;  %v13697_v0 = vcombine.high %v4142_v56, %v4178_v57  ;;  %v13699_v13 = vcombine.high %v4143_v58, %v4179_v59  ;;  %v3713_v56 = vld [vmem:[#allocation8 + $0x7d8] sm:$0xff] }
0x1505   :  { %11741 = vmatprep.subr.bf16.mxu0 %v13051_v14  ;;  %v4070_v14 = vld [vmem:[#allocation8 + $0x1300] sm:$0xff]  ;;  %v3749_v57 = vld [vmem:[#allocation8 + $0x8f8] sm:$0xff] }
0x1506   :  { %v13624_v19 = vcombine.low %v4070_v14, %v4106_v4 }
0x1507   :  { %11701 = vmatpush1.bf16.msra.mxu1 %v13048_v9  ;;  %v13698_v9 = vcombine.low %v4143_v58, %v4179_v59 }
0x1508   :  { %11742 = vmatpush1.bf16.msra.mxu0 %v13050_v1  ;;  %11702 = vmatprep.subr.bf16.mxu1 %v14129_v5  ;;  %v13625_v1 = vcombine.high %v4070_v14, %v4106_v4  ;;  %v13627_v5 = vcombine.high %v4071_v2, %v4107_v3  ;;  %v3641_v14 = vld [vmem:[#allocation8 + $0x598] sm:$0xff] }
0x1509   :  { %11743 = vmatprep.subr.bf16.mxu0 %v14131_v11  ;;  %v4000_v11 = vld [vmem:[#allocation8 + $0x10d0] sm:$0xff]  ;;  %v3677_v4 = vld [vmem:[#allocation8 + $0x6b8] sm:$0xff] }
0x150a   :  { %v13556_v27 = vcombine.low %v4000_v11, %v4036_v15 }
0x150b   :  { %11703 = vmatpush2.bf16.msra.mxu1 %v14128_v22  ;;  %v13626_v22 = vcombine.low %v4071_v2, %v4107_v3  ;;  %v13270_v3 = vcombine.low %v3713_v56, %v3749_v57 }
0x150c   :  { %11744 = vmatpush2.bf16.msra.mxu0 %v14130_v23  ;;  %11704 = vmatprep.subr.bf16.mxu1 %v14057_v24  ;;  %v13557_v23 = vcombine.high %v4000_v11, %v4036_v15  ;;  %v13559_v24 = vcombine.high %v4001_v63, %v4037_v18  ;;  %v3569_v11 = vld [vmem:[#allocation8 + $0x358] sm:$0xff] }
0x150d   :  { %11745 = vmatprep.subr.bf16.mxu0 %v14059_v25  ;;  %v3928_v25 = vld [vmem:[#allocation8 + $0xe90] sm:$0xff]  ;;  %v3605_v15 = vld [vmem:[#allocation8 + $0x478] sm:$0xff] }
0x150f   :  { %11705 = vmatpush2.bf16.msra.mxu1 %v14056_v30  ;;  %v13558_v30 = vcombine.low %v4001_v63, %v4037_v18  ;;  %v13198_v18 = vcombine.low %v3641_v14, %v3677_v4 }
0x1510   :  { %11746 = vmatpush2.bf16.msra.mxu0 %v14058_v32  ;;  %11706 = vmatprep.subr.bf16.mxu1 %v13985_v28  ;;  %v13485_v32 = vcombine.high %v3928_v25, %v3964_v26  ;;  %v3856_v28 = vld [vmem:[#allocation8 + $0xc50] sm:$0xff] }
0x1511   :  { %11747 = vmatprep.subr.bf16.mxu0 %v13987_v35  ;;  %v3892_v35 = vld [vmem:[#allocation8 + $0xd70] sm:$0xff] }
0x1512   :  { %v13413_v60 = vcombine.high %v3856_v28, %v3892_v35  ;;  %v13412_v49 = vcombine.low %v3856_v28, %v3892_v35  ;;  %v4612_v28 = vld [vmem:[#allocation8 + $0x23f0] sm:$0xff]  ;;  %v4577_v35 = vld [vmem:[#allocation8 + $0x22d8] sm:$0xff] }
0x1513   :  { %11707 = vmatpush2.bf16.msra.mxu1 %v13984_v39 }
0x1514   :  { %11748 = vmatpush2.bf16.msra.mxu0 %v13986_v41  ;;  %11708 = vmatprep.subr.bf16.mxu1 %v13913_v53  ;;  %v13484_v41 = vcombine.low %v3928_v25, %v3964_v26  ;;  %v3497_v25 = vld [vmem:[#allocation8 + $0x118] sm:$0xff] }
0x1515   :  { %11749 = vmatprep.subr.bf16.mxu0 %v13915_v42  ;;  %v13486_v42 = vcombine.low %v3929_v44, %v3965_v29  ;;  %v3533_v26 = vld [vmem:[#allocation8 + $0x238] sm:$0xff]  ;;  %v13126_v44 = vcombine.low %v3569_v11, %v3605_v15 }
0x1516   :  { %v13054_v40 = vcombine.low %v3497_v25, %v3533_v26 }
0x1517   :  { %11709 = vmatpush2.bf16.msra.mxu1 %v13912_v46  ;;  %v3820_v46 = vld [vmem:[#allocation8 + $0xb30] sm:$0xff] }
0x1518   :  { %11750 = vmatpush2.bf16.msra.mxu0 %v13914_v34  ;;  %11710 = vmatprep.subr.bf16.mxu1 %v13841_v47  ;;  %v3785_v47 = vld [vmem:[#allocation8 + $0xa18] sm:$0xff]  ;;  %v13340_v58 = vcombine.low %v3784_v33, %v3820_v46 }
0x1519   :  { %11751 = vmatprep.subr.bf16.mxu0 %v13843_v21  ;;  %v3821_v21 = vld [vmem:[#allocation8 + $0xb38] sm:$0xff] }
0x151a   :  { %v13342_v59 = vcombine.low %v3785_v47, %v3821_v21 }
0x151b   :  { %11711 = vmatpush2.bf16.msra.mxu1 %v13840_v31  ;;  %v13341_v31 = vcombine.high %v3784_v33, %v3820_v46  ;;  %v4505_v33 = vld [vmem:[#allocation8 + $0x2098] sm:$0xff] }
0x151c   :  { %11752 = vmatpush2.bf16.msra.mxu0 %v13842_v52  ;;  %11712 = vmatprep.subr.bf16.mxu1 %v13769_v54  ;;  %v3712_v54 = vld [vmem:[#allocation8 + $0x7d0] sm:$0xff]  ;;  %v4541_v46 = vld [vmem:[#allocation8 + $0x21b8] sm:$0xff] }
0x151d   :  { %11753 = vmatprep.subr.bf16.mxu0 %v13771_v55  ;;  %v3748_v55 = vld [vmem:[#allocation8 + $0x8f0] sm:$0xff] }
0x151e   :  { %v13268_v2 = vcombine.low %v3712_v54, %v3748_v55 }
0x151f   :  { %11713 = vmatpush2.bf16.msra.mxu1 %v13768_v61  ;;  %v13269_v61 = vcombine.high %v3712_v54, %v3748_v55 }
0x1520   :  { %11754 = vmatpush2.bf16.msra.mxu0 %v13770_v62  ;;  %11714 = vmatprep.subr.bf16.mxu1 %v13697_v0  ;;  %v13271_v62 = vcombine.high %v3713_v56, %v3749_v57  ;;  %v3640_v0 = vld [vmem:[#allocation8 + $0x590] sm:$0xff] }
0x1521   :  { %11755 = vmatprep.subr.bf16.mxu0 %v13699_v13  ;;  %v3676_v13 = vld [vmem:[#allocation8 + $0x6b0] sm:$0xff] }
0x1522   :  { %v13196_v63 = vcombine.low %v3640_v0, %v3676_v13  ;;  %v4360_v56 = vld [vmem:[#allocation8 + $0x1c10] sm:$0xff] }
0x1523   :  { %11715 = vmatpush2.bf16.msra.mxu1 %v13696_v7  ;;  %v13197_v7 = vcombine.high %v3640_v0, %v3676_v13  ;;  %v4396_v57 = vld [vmem:[#allocation8 + $0x1d30] sm:$0xff] }
0x1524   :  { %11756 = vmatpush2.bf16.msra.mxu0 %v13698_v9  ;;  %11716 = vmatprep.subr.bf16.mxu1 %v13625_v1  ;;  %v13199_v9 = vcombine.high %v3641_v14, %v3677_v4  ;;  %v3568_v1 = vld [vmem:[#allocation8 + $0x350] sm:$0xff]  ;;  %v13917_v0 = vcombine.high %v4360_v56, %v4396_v57 }
0x1525   :  { %11757 = vmatprep.subr.bf16.mxu0 %v13627_v5  ;;  %v3604_v5 = vld [vmem:[#allocation8 + $0x470] sm:$0xff] }
0x1526   :  { %v4288_v14 = vld [vmem:[#allocation8 + $0x19d0] sm:$0xff] }
0x1527   :  { %11717 = vmatpush2.bf16.msra.mxu1 %v13624_v19  ;;  %v13125_v19 = vcombine.high %v3568_v1, %v3604_v5  ;;  %v4324_v4 = vld [vmem:[#allocation8 + $0x1af0] sm:$0xff] }
0x1528   :  { %11758 = vmatpush2.bf16.msra.mxu0 %v13626_v22  ;;  %11768 = vmatprep.subr.bf16.mxu1 %v13557_v23  ;;  %v13127_v22 = vcombine.high %v3569_v11, %v3605_v15  ;;  %v3496_v23 = vld [vmem:[#allocation8 + $0x110] sm:$0xff] }
0x1529   :  { %11809 = vmatprep.subr.bf16.mxu0 %v13559_v24  ;;  %v3532_v24 = vld [vmem:[#allocation8 + $0x230] sm:$0xff] }
0x152a   :  { %v15627_v36 = vpop.f32.mrf.mxu1  ;;  %11719 = vmatmul.mubr.bf16.vlgmr.msra.gmra.mxu1 %v15547_v6  ;;  %v13053_v29 = vcombine.high %v3496_v23, %v3532_v24  ;;  %v13052_v38 = vcombine.low %v3496_v23, %v3532_v24  ;;  %v4216_v11 = vld [vmem:[#allocation8 + $0x1790] sm:$0xff] }
0x152b   :  { %v15630_v39 = vpop.f32.mrf.mxu0  ;;  %11760 = vmatmul.mubr.bf16.vlgmr.msra.gmra.mxu0 %v15547_v6  ;;  %11769 = vmatpush1.bf16.msra.mxu1 %v13556_v27  ;;  %v13124_v27 = vcombine.low %v3568_v1, %v3604_v5  ;;  %v13845_v1 = vcombine.high %v4288_v14, %v4324_v4  ;;  %v4252_v15 = vld [vmem:[#allocation8 + $0x18b0] sm:$0xff] }
0x152c   :  { %11800 = vmatprep.mubr.bf16.mxu1 %v15549_v8  ;;  %11810 = vmatpush1.bf16.msra.mxu0 %v13558_v30  ;;  %v15634_v53 = vpop.f32.mrf.mxu1  ;;  %v13055_v30 = vcombine.high %v3497_v25, %v3533_v26  ;;  %v13773_v23 = vcombine.high %v4216_v11, %v4252_v15  ;;  %v4144_v25 = vld [vmem:[#allocation8 + $0x1550] sm:$0xff] }
0x152d   :  { %11841 = vmatprep.mubr.bf16.mxu0 %v15549_v8  ;;  %v15637_v43 = vpop.f32.mrf.mxu0  ;;  %11770 = vmatprep.subr.bf16.mxu1 %v13485_v32  ;;  %v13343_v8 = vcombine.high %v3785_v47, %v3821_v21  ;;  %v4576_v32 = vld [vmem:[#allocation8 + $0x22d0] sm:$0xff] }
0x152e   :  { %v11478_v34 = vpop.f32.mrf.mxu1  ;;  %11811 = vmatprep.subr.bf16.mxu0 %v13487_v37  ;;  %v4613_v37 = vld [vmem:[#allocation8 + $0x23f8] sm:$0xff]  ;;  %v4180_v26 = vld [vmem:[#allocation8 + $0x1670] sm:$0xff] }
0x152f   :  { %v11519_v48 = vpop.f32.mrf.mxu0  ;;  %11771 = vmatpush1.bf16.msra.mxu1 %v13484_v41  ;;  %v14133_v41 = vcombine.high %v4576_v32, %v4612_v28  ;;  %v14132_v34 = vcombine.low %v4576_v32, %v4612_v28  ;;  %v14134_v47 = vcombine.low %v4577_v35, %v4613_v37  ;;  %v13701_v32 = vcombine.high %v4144_v25, %v4180_v26 }
0x1530   :  { %11812 = vmatpush1.bf16.msra.mxu0 %v13486_v42  ;;  %v11479_v50 = vpop.f32.mrf.mxu1  ;;  %11772 = vmatprep.subr.bf16.mxu1 %v13413_v60  ;;  %v14135_v42 = vcombine.high %v4577_v35, %v4613_v37  ;;  %v4504_v60 = vld [vmem:[#allocation8 + $0x2090] sm:$0xff]  ;;  %v14063_v48 = vcombine.high %v4505_v33, %v4541_v46 }
0x1531   :  { %v11520_v52 = vpop.f32.mrf.mxu0  ;;  %11813 = vmatprep.subr.bf16.mxu0 %v13415_v45  ;;  %v4540_v45 = vld [vmem:[#allocation8 + $0x21b0] sm:$0xff] }
0x1532   :  { %v14061_v21 = vcombine.high %v4504_v60, %v4540_v45  ;;  %v4468_v50 = vld [vmem:[#allocation8 + $0x1f70] sm:$0xff]  ;;  %v14060_v52 = vcombine.low %v4504_v60, %v4540_v45 }
0x1533   :  { %11773 = vmatpush1.bf16.msra.mxu1 %v13412_v49  ;;  %v4432_v49 = vld [vmem:[#allocation8 + $0x1e50] sm:$0xff] }
0x1534   :  { %11814 = vmatpush1.bf16.msra.mxu0 %v13414_v51  ;;  %11774 = vmatprep.subr.bf16.mxu1 %v13341_v31  ;;  %v4433_v51 = vld [vmem:[#allocation8 + $0x1e58] sm:$0xff]  ;;  %v13989_v54 = vcombine.high %v4432_v49, %v4468_v50  ;;  %v4072_v35 = vld [vmem:[#allocation8 + $0x1310] sm:$0xff] }
0x1535   :  { %11815 = vmatprep.subr.bf16.mxu0 %v13343_v8  ;;  %v4469_v31 = vld [vmem:[#allocation8 + $0x1f78] sm:$0xff]  ;;  %v14062_v8 = vcombine.low %v4505_v33, %v4541_v46  ;;  %v4108_v37 = vld [vmem:[#allocation8 + $0x1430] sm:$0xff] }
0x1536   :  { %v13991_v55 = vcombine.high %v4433_v51, %v4469_v31  ;;  %v13629_v60 = vcombine.high %v4072_v35, %v4108_v37  ;;  %v13628_v33 = vcombine.low %v4072_v35, %v4108_v37  ;;  %v12231_v35 = vld [vmem:[#allocation2 + $0x128] sm:$0x11] }
0x1537   :  { %11775 = vmatpush1.bf16.msra.mxu1 %v13340_v58  ;;  %v4361_v58 = vld [vmem:[#allocation8 + $0x1c18] sm:$0xff] }
0x1538   :  { %11816 = vmatpush1.bf16.msra.mxu0 %v13342_v59  ;;  %11776 = vmatprep.subr.bf16.mxu1 %v13269_v61  ;;  %v4397_v59 = vld [vmem:[#allocation8 + $0x1d38] sm:$0xff]  ;;  %v13988_v61 = vcombine.low %v4432_v49, %v4468_v50 }
0x1539   :  { %11817 = vmatprep.subr.bf16.mxu0 %v13271_v62  ;;  %v13990_v62 = vcombine.low %v4433_v51, %v4469_v31  ;;  %v13919_v13 = vcombine.high %v4361_v58, %v4397_v59 }
0x153b   :  { %11777 = vmatpush1.bf16.msra.mxu1 %v13268_v2  ;;  %v4289_v2 = vld [vmem:[#allocation8 + $0x19d8] sm:$0xff] }
0x153c   :  { %11818 = vmatpush1.bf16.msra.mxu0 %v13270_v3  ;;  %11778 = vmatprep.subr.bf16.mxu1 %v13197_v7  ;;  %v4325_v3 = vld [vmem:[#allocation8 + $0x1af8] sm:$0xff]  ;;  %v13916_v7 = vcombine.low %v4360_v56, %v4396_v57 }
0x153d   :  { %11819 = vmatprep.subr.bf16.mxu0 %v13199_v9  ;;  %v13918_v9 = vcombine.low %v4361_v58, %v4397_v59  ;;  %v13847_v5 = vcombine.high %v4289_v2, %v4325_v3 }
0x153f   :  { %11779 = vmatpush1.bf16.msra.mxu1 %v13196_v63  ;;  %v4217_v63 = vld [vmem:[#allocation8 + $0x1798] sm:$0xff] }
0x1540   :  { %11820 = vmatpush1.bf16.msra.mxu0 %v13198_v18  ;;  %11780 = vmatprep.subr.bf16.mxu1 %v13125_v19  ;;  %v4253_v18 = vld [vmem:[#allocation8 + $0x18b8] sm:$0xff]  ;;  %v13844_v19 = vcombine.low %v4288_v14, %v4324_v4 }
0x1541   :  { %11821 = vmatprep.subr.bf16.mxu0 %v13127_v22  ;;  %v13846_v22 = vcombine.low %v4289_v2, %v4325_v3  ;;  %v13775_v24 = vcombine.high %v4217_v63, %v4253_v18 }
0x1543   :  { %11781 = vmatpush1.bf16.msra.mxu1 %v13124_v27  ;;  %v4145_v27 = vld [vmem:[#allocation8 + $0x1558] sm:$0xff] }
0x1544   :  { %11822 = vmatpush1.bf16.msra.mxu0 %v13126_v44  ;;  %11782 = vmatprep.subr.bf16.mxu1 %v13053_v29  ;;  %v4181_v44 = vld [vmem:[#allocation8 + $0x1678] sm:$0xff]  ;;  %v13772_v29 = vcombine.low %v4216_v11, %v4252_v15 }
0x1545   :  { %11823 = vmatprep.subr.bf16.mxu0 %v13055_v30  ;;  %v13774_v30 = vcombine.low %v4217_v63, %v4253_v18  ;;  %v13703_v28 = vcombine.high %v4145_v27, %v4181_v44 }
0x1547   :  { %11783 = vmatpush1.bf16.msra.mxu1 %v13052_v38  ;;  %v4073_v38 = vld [vmem:[#allocation8 + $0x1318] sm:$0xff] }
0x1548   :  { %11824 = vmatpush1.bf16.msra.mxu0 %v13054_v40  ;;  %11784 = vmatprep.subr.bf16.mxu1 %v14133_v41  ;;  %v4109_v40 = vld [vmem:[#allocation8 + $0x1438] sm:$0xff]  ;;  %v13700_v41 = vcombine.low %v4144_v25, %v4180_v26  ;;  %v12210_v26 = vld [vmem:[#allocation2 + $0x80] sm:$0xff] }
0x1549   :  { %11825 = vmatprep.subr.bf16.mxu0 %v14135_v42  ;;  %v13702_v42 = vcombine.low %v4145_v27, %v4181_v44  ;;  %v13631_v45 = vcombine.high %v4073_v38, %v4109_v40  ;;  %v13630_v46 = vcombine.low %v4073_v38, %v4109_v40  ;;  %v12206_v44 = vld [vmem:[#allocation2 + $0x60] sm:$0xff] }
0x154a   :  { %v12194_v38 = vld [vmem:[#allocation2] sm:$0xff] }
0x154b   :  { %11785 = vmatpush2.bf16.msra.mxu1 %v14132_v34 }
0x154c   :  { %11826 = vmatpush2.bf16.msra.mxu0 %v14134_v47  ;;  %11786 = vmatprep.subr.bf16.mxu1 %v14061_v21 }
0x154d   :  { %11827 = vmatprep.subr.bf16.mxu0 %v14063_v48 }
0x154f   :  { %11787 = vmatpush2.bf16.msra.mxu1 %v14060_v52 }
0x1550   :  { %11828 = vmatpush2.bf16.msra.mxu0 %v14062_v8  ;;  %11788 = vmatprep.subr.bf16.mxu1 %v13989_v54 }
0x1551   :  { %11829 = vmatprep.subr.bf16.mxu0 %v13991_v55 }
0x1553   :  { %11789 = vmatpush2.bf16.msra.mxu1 %v13988_v61 }
0x1554   :  { %11830 = vmatpush2.bf16.msra.mxu0 %v13990_v62  ;;  %11790 = vmatprep.subr.bf16.mxu1 %v13917_v0  ;;  %v14850_v62 = vmov 65535  }
0x1555   :  { %11831 = vmatprep.subr.bf16.mxu0 %v13919_v13  ;;  %v12431_v0 = vsel %vm1059_vm11, 4294967295, %v14850_v62 }
0x1556   :  { %v15656_v3 = vsel %vm12430_vm7, %v12431_v0, 0 }
0x1557   :  { %11791 = vmatpush2.bf16.msra.mxu1 %v13916_v7 }
0x1558   :  { %11832 = vmatpush2.bf16.msra.mxu0 %v13918_v9  ;;  %11792 = vmatprep.subr.bf16.mxu1 %v13845_v1  ;;  %v12230_v1 = vld [vmem:[#allocation2 + $0x120] sm:$0x11] }
0x1559   :  { %11833 = vmatprep.subr.bf16.mxu0 %v13847_v5 }
0x155b   :  { %11793 = vmatpush2.bf16.msra.mxu1 %v13844_v19 }
0x155c   :  { %11834 = vmatpush2.bf16.msra.mxu0 %v13846_v22  ;;  %11794 = vmatprep.subr.bf16.mxu1 %v13773_v23 }
0x155d   :  { %11835 = vmatprep.subr.bf16.mxu0 %v13775_v24  ;;  %v12214_v24 = vld [vmem:[#allocation2 + $0xa0] sm:$0xff] }
0x155e   :  { %v14189_v27 = vcombine.high %v12210_v26, %v12214_v24 }
0x155f   :  { %11795 = vmatpush2.bf16.msra.mxu1 %v13772_v29  ;;  %v14188_v29 = vcombine.low %v12210_v26, %v12214_v24  ;;  %v12216_v24 = vld [vmem:[#allocation2 + $0xb0] sm:$0xff] }
0x1560   :  { %11836 = vmatpush2.bf16.msra.mxu0 %v13774_v30  ;;  %11796 = vmatprep.subr.bf16.mxu1 %v13701_v32  ;;  %v12202_v30 = vld [vmem:[#allocation2 + $0x40] sm:$0xff] }
0x1561   :  { %11837 = vmatprep.subr.bf16.mxu0 %v13703_v28  ;;  %v14181_v32 = vcombine.high %v12202_v30, %v12206_v44  ;;  %v12198_v28 = vld [vmem:[#allocation2 + $0x20] sm:$0xff]  ;;  %v14180_v37 = vcombine.low %v12202_v30, %v12206_v44  ;;  %v12204_v30 = vld [vmem:[#allocation2 + $0x50] sm:$0xff] }
0x1563   :  { %11797 = vmatpush2.bf16.msra.mxu1 %v13700_v41  ;;  %v14172_v41 = vcombine.low %v12194_v38, %v12198_v28 }
0x1564   :  { %11838 = vmatpush2.bf16.msra.mxu0 %v13702_v42  ;;  %11798 = vmatprep.subr.bf16.mxu1 %v13629_v60  ;;  %v15663_v60 = vld [vmem:[#allocation9 + $0x28] sm:$0x3] }
0x1565   :  { %11839 = vmatprep.subr.bf16.mxu0 %v13631_v45 }
0x1567   :  { %11799 = vmatpush2.bf16.msra.mxu1 %v13628_v33 }
0x1568   :  { %11840 = vmatpush2.bf16.msra.mxu0 %v13630_v46  ;;  %v12215_v46 = vld [vmem:[#allocation2 + $0xa8] sm:$0xff] }
0x156a   :  { %v11556_v34 = vpop.f32.mrf.mxu1  ;;  %11801 = vmatmul.mubr.bf16.vlgmr.msra.gmra.mxu1 %v15547_v6 }
0x156b   :  { %v15640_v47 = vpop.f32.mrf.mxu0  ;;  %11842 = vmatmul.mubr.bf16.vlgmr.msra.gmra.mxu0 %v15547_v6  ;;  %12489 = vmatprep.mubr.bf16.mxu1 %v14844_v16  ;;  %v14736_v25 = vpack.c.bf16 %v11556_v34, %v15613_v10 }
0x156c   :  { %v11558_v21 = vpop.f32.mrf.mxu1  ;;  %12571 = vmatprep.mubr.bf16.mxu0 %v14844_v16 }
0x156d   :  { %v14307_v48 = vpack.c.bf16 %v11558_v21, %v11556_v34  ;;  %v15645_v49 = vpop.f32.mrf.mxu0  ;;  %v14735_v23 = vpack.c.bf16 %v11558_v21, %v15620_v17  ;;  %v14173_v17 = vcombine.high %v12194_v38, %v12198_v28  ;;  %v14738_v34 = vpack.c.bf16 %v15640_v47, %v15616_v12  ;;  %v12211_v21 = vld [vmem:[#allocation2 + $0x88] sm:$0xff] }
0x156e   :  { %v11560_v50 = vpop.f32.mrf.mxu1  ;;  %v14737_v33 = vpack.c.bf16 %v15645_v49, %v15625_v20  ;;  %v12195_v49 = vld [vmem:[#allocation2 + $0x8] sm:$0xff] }
0x156f   :  { %12142 = vst [vmem:[#allocation2 + $0xe0] sm:$0xff] %v14307_v48  ;;  %v11601_v51 = vpop.f32.mrf.mxu0  ;;  %v14191_v48 = vcombine.high %v12211_v21, %v12215_v46  ;;  %v12207_v50 = vld [vmem:[#allocation2 + $0x68] sm:$0xff] }
0x1570   :  { %v11561_v31 = vpop.f32.mrf.mxu1  ;;  %v14190_v51 = vcombine.low %v12211_v21, %v12215_v46 }
0x1571   :  { %v11602_v52 = vpop.f32.mrf.mxu0  ;;  %v12203_v31 = vld [vmem:[#allocation2 + $0x48] sm:$0xff] }
0x1572   :  { %v14183_v52 = vcombine.high %v12203_v31, %v12207_v50  ;;  %v14182_v20 = vcombine.low %v12203_v31, %v12207_v50 }
0x15aa   :  { %v15647_v8 = vpop.f32.mrf.mxu1 }
0x15ab   :  { %v15649_v54 = vpop.f32.mrf.mxu0  ;;  %v14741_v26 = vpack.c.bf16 %v15647_v8, %v15627_v36  ;;  %v12200_v8 = vld [vmem:[#allocation2 + $0x30] sm:$0xff] }
0x15ac   :  { %v15651_v55 = vpop.f32.mrf.mxu1 }
0x15ad   :  { %v15653_v6 = vpop.f32.mrf.mxu0 }
0x15ae   :  { %v11642_v56 = vpop.f32.mrf.mxu1 }
0x15af   :  { %v11683_v57 = vpop.f32.mrf.mxu0  ;;  %v12199_v56 = vld [vmem:[#allocation2 + $0x28] sm:$0xff] }
0x15b0   :  { %v11643_v58 = vpop.f32.mrf.mxu1  ;;  %v14175_v57 = vcombine.high %v12195_v49, %v12199_v56 }
0x15b1   :  { %v11684_v59 = vpop.f32.mrf.mxu0  ;;  %v14174_v58 = vcombine.low %v12195_v49, %v12199_v56 }
0x15ea   :  { %v11720_v61 = vpop.f32.mrf.mxu1 }
0x15eb   :  { %v11761_v13 = vpop.f32.mrf.mxu0 }
0x15ec   :  { %v11722_v14 = vpop.f32.mrf.mxu1 }
0x15ed   :  { %v14311_v4 = vpack.c.bf16 %v11722_v14, %v11720_v61  ;;  %v11763_v2 = vpop.f32.mrf.mxu0  ;;  %v12232_v61 = vld [vmem:[#allocation2 + $0x130] sm:$0x11] }
0x15ee   :  { %v14312_v7 = vpack.c.bf16 %v11763_v2, %v11761_v13  ;;  %v11724_v9 = vpop.f32.mrf.mxu1  ;;  %v12233_v13 = vld [vmem:[#allocation2 + $0x138] sm:$0x11] }
0x15ef   :  { %12170 = vst [vmem:[#allocation2 + $0x100] sm:$0xff] %v14311_v4  ;;  %v11765_v5 = vpop.f32.mrf.mxu0  ;;  %v14204_v11 = vcombine.low %v14311_v4, %v12230_v1  ;;  %v14205_v15 = vcombine.high %v14311_v4, %v12230_v1 }
0x15f0   :  { %v11725_v63 = vpop.f32.mrf.mxu1  ;;  %v14207_v40 = vcombine.high %v14312_v7, %v12231_v35  ;;  %v14206_v10 = vcombine.low %v14312_v7, %v12231_v35  ;;  %v12205_v35 = vld [vmem:[#allocation2 + $0x58] sm:$0xff] }
0x15f1   :  { %v11766_v18 = vpop.f32.mrf.mxu0  ;;  %v12437_v19 = vand.u32 %v14205_v15, %v15656_v3  ;;  %v12434_v22 = vand.u32 %v14204_v11, %v15656_v3 }
0x15f2   :  { %v12443_v42 = vand.u32 %v14207_v40, %v15656_v3  ;;  %v12440_v45 = vand.u32 %v14206_v10, %v15656_v3  ;;  %v12197_v40 = vld [vmem:[#allocation2 + $0x18] sm:$0xff] }
0x15f3   :  { %12463 = vmatprep.subr.bf16.mxu1 %v12437_v19 }
0x15f4   :  { %12464 = vmatpush1.bf16.msra.mxu1 %v12434_v22  ;;  %v14739_v22 = vpack.c.bf16 %v15651_v55, %v15634_v53  ;;  %v12208_v55 = vld [vmem:[#allocation2 + $0x70] sm:$0xff] }
0x15f5   :  { %12465 = vmatprep.subr.bf16.mxu1 %v14735_v23  ;;  %v14740_v23 = vpack.c.bf16 %v15653_v6, %v15637_v43  ;;  %v12209_v43 = vld [vmem:[#allocation2 + $0x78] sm:$0xff]  ;;  %v14185_v28 = vcombine.high %v12204_v30, %v12208_v55 }
0x15f6   :  { %v14187_v36 = vcombine.high %v12205_v35, %v12209_v43  ;;  %v14186_v38 = vcombine.low %v12205_v35, %v12209_v43 }
0x15f8   :  { %12466 = vmatpush1.bf16.msra.mxu1 %v14736_v25  ;;  %v12217_v25 = vld [vmem:[#allocation2 + $0xb8] sm:$0xff] }
0x15f9   :  { %12467 = vmatprep.subr.bf16.mxu1 %v14189_v27  ;;  %v12212_v27 = vld [vmem:[#allocation2 + $0x90] sm:$0xff] }
0x15fa   :  { %v14193_v44 = vcombine.high %v12212_v27, %v12216_v24  ;;  %v14192_v6 = vcombine.low %v12212_v27, %v12216_v24 }
0x15fc   :  { %12468 = vmatpush1.bf16.msra.mxu1 %v14188_v29  ;;  %v12213_v29 = vld [vmem:[#allocation2 + $0x98] sm:$0xff] }
0x15fd   :  { %12469 = vmatprep.subr.bf16.mxu1 %v14181_v32  ;;  %v14195_v53 = vcombine.high %v12213_v29, %v12217_v25  ;;  %v14194_v32 = vcombine.low %v12213_v29, %v12217_v25 }
0x1600   :  { %12470 = vmatpush1.bf16.msra.mxu1 %v14180_v37  ;;  %v12196_v37 = vld [vmem:[#allocation2 + $0x10] sm:$0xff] }
0x1601   :  { %12471 = vmatprep.subr.bf16.mxu1 %v14173_v17  ;;  %v14177_v17 = vcombine.high %v12196_v37, %v12200_v8  ;;  %v14176_v10 = vcombine.low %v12196_v37, %v12200_v8 }
0x1604   :  { %12472 = vmatpush1.bf16.msra.mxu1 %v14172_v41 }
0x1605   :  { %12504 = vmatprep.subr.bf16.mxu1 %v12443_v42 }
0x1607   :  { %14212 = vmatmul.mubr.msk.bf16.vlgmr.msra.gmra.mxu1 %vm12426_vm8, %v15663_v60 }
0x1608   :  { %12505 = vmatpush1.bf16.msra.mxu1 %v12440_v45  ;;  %12530 = vmatprep.mubr.bf16.mxu1 %v14844_v16 }
0x1609   :  { %12506 = vmatprep.subr.bf16.mxu1 %v14737_v33 }
0x160c   :  { %12507 = vmatpush1.bf16.msra.mxu1 %v14738_v34 }
0x160d   :  { %12508 = vmatprep.subr.bf16.mxu1 %v14191_v48 }
0x1610   :  { %12509 = vmatpush1.bf16.msra.mxu1 %v14190_v51 }
0x1611   :  { %12510 = vmatprep.subr.bf16.mxu1 %v14183_v52 }
0x1614   :  { %12511 = vmatpush1.bf16.msra.mxu1 %v14182_v20 }
0x1615   :  { %12512 = vmatprep.subr.bf16.mxu1 %v14175_v57 }
0x1618   :  { %12513 = vmatpush1.bf16.msra.mxu1 %v14174_v58 }
0x161b   :  { %14213 = vmatmul.mubr.msk.bf16.vlgmr.msra.gmra.mxu1 %vm12426_vm8, %v15663_v60 }
0x161c   :  { %12612 = vmatprep.mubr.bf16.mxu1 %v14844_v16 }
0x162a   :  { %v11802_v12 = vpop.f32.mrf.mxu1 }
0x162b   :  { %v11843_v47 = vpop.f32.mrf.mxu0 }
0x162c   :  { %v11804_v59 = vpop.f32.mrf.mxu1 }
0x162d   :  { %v14313_v62 = vpack.c.bf16 %v11804_v59, %v11802_v12  ;;  %v11845_v0 = vpop.f32.mrf.mxu0 }
0x162e   :  { %v14314_v14 = vpack.c.bf16 %v11845_v0, %v11843_v47  ;;  %v11806_v4 = vpop.f32.mrf.mxu1 }
0x162f   :  { %v11847_v2 = vpop.f32.mrf.mxu0  ;;  %v14208_v7 = vcombine.low %v14313_v62, %v12232_v61  ;;  %v14209_v9 = vcombine.high %v14313_v62, %v12232_v61 }
0x1630   :  { %v11807_v1 = vpop.f32.mrf.mxu1  ;;  %v14210_v5 = vcombine.low %v14314_v14, %v12233_v13  ;;  %v14211_v11 = vcombine.high %v14314_v14, %v12233_v13 }
0x1631   :  { %v11848_v15 = vpop.f32.mrf.mxu0  ;;  %v12449_v63 = vand.u32 %v14209_v9, %v15656_v3  ;;  %v12446_v16 = vand.u32 %v14208_v7, %v15656_v3 }
0x1632   :  { %v12455_v18 = vand.u32 %v14211_v11, %v15656_v3  ;;  %v12452_v19 = vand.u32 %v14210_v5, %v15656_v3  ;;  %v14742_v3 = vpack.c.bf16 %v15649_v54, %v15630_v39  ;;  %v12201_v39 = vld [vmem:[#allocation2 + $0x38] sm:$0xff]  ;;  %v14184_v54 = vcombine.low %v12204_v30, %v12208_v55 }
0x1633   :  { %12545 = vmatprep.subr.bf16.mxu0 %v12449_v63  ;;  %v14179_v41 = vcombine.high %v12197_v40, %v12201_v39  ;;  %v14178_v42 = vcombine.low %v12197_v40, %v12201_v39 }
0x1634   :  { %12586 = vmatprep.subr.bf16.mxu1 %v12455_v18  ;;  %12546 = vmatpush1.bf16.msra.mxu0 %v12446_v16 }
0x1635   :  { %12587 = vmatpush1.bf16.msra.mxu1 %v12452_v19  ;;  %12547 = vmatprep.subr.bf16.mxu0 %v14739_v22 }
0x1636   :  { %12588 = vmatprep.subr.bf16.mxu1 %v14740_v23 }
0x1638   :  { %12548 = vmatpush1.bf16.msra.mxu0 %v14741_v26 }
0x1639   :  { %12589 = vmatpush1.bf16.msra.mxu1 %v14742_v3  ;;  %12549 = vmatprep.subr.bf16.mxu0 %v14193_v44 }
0x163a   :  { %12590 = vmatprep.subr.bf16.mxu1 %v14195_v53 }
0x163c   :  { %12550 = vmatpush1.bf16.msra.mxu0 %v14192_v6 }
0x163d   :  { %12591 = vmatpush1.bf16.msra.mxu1 %v14194_v32  ;;  %12551 = vmatprep.subr.bf16.mxu0 %v14185_v28 }
0x163e   :  { %12592 = vmatprep.subr.bf16.mxu1 %v14187_v36 }
0x1640   :  { %12552 = vmatpush1.bf16.msra.mxu0 %v14184_v54 }
0x1641   :  { %12593 = vmatpush1.bf16.msra.mxu1 %v14186_v38  ;;  %12553 = vmatprep.subr.bf16.mxu0 %v14177_v17 }
0x1642   :  { %12594 = vmatprep.subr.bf16.mxu1 %v14179_v41 }
0x1644   :  { %12554 = vmatpush1.bf16.msra.mxu0 %v14176_v10 }
0x1645   :  { %12595 = vmatpush1.bf16.msra.mxu1 %v14178_v42 }
0x1647   :  { %14214 = vmatmul.mubr.msk.bf16.vlgmr.msra.gmra.mxu0 %vm12426_vm8, %v15663_v60 }
0x1648   :  { %14215 = vmatmul.mubr.msk.bf16.vlgmr.msra.gmra.mxu1 %vm12426_vm8, %v15663_v60 }
0x16c7   :  { %v12491_v45 = vpop.f32.mrf.mxu1 }
0x16c9   :  { %v12493_v33 = vpop.f32.mrf.mxu1 }
0x16ca   :  { %v12629_v46 = vcombine.low %v12491_v45, %v12493_v33 }
0x16cb   :  { %v12495_v34 = vpop.f32.mrf.mxu1 }
0x16cc   :  { %12637 = vst [vmem:[%s15710_s6] sm:$0xff] %v12629_v46 }
0x16cd   :  { %v12496_v21 = vpop.f32.mrf.mxu1 }
0x16db   :  { %v12532_v48 = vpop.f32.mrf.mxu1 }
0x16dd   :  { %v12534_v50 = vpop.f32.mrf.mxu1 }
0x16de   :  { %v12630_v51 = vcombine.low %v12532_v48, %v12534_v50 }
0x16df   :  { %v12536_v31 = vpop.f32.mrf.mxu1 }
0x16e0   :  { %12638 = vst [vmem:[%s15710_s6 + $0x8] sm:$0xff] %v12630_v51 }
0x16e1   :  { %v12537_v52 = vpop.f32.mrf.mxu1 }
0x1707   :  { %v12573_v56 = vpop.f32.mrf.mxu0 }
0x1708   :  { %v12614_v60 = vpop.f32.mrf.mxu1 }
0x1709   :  { %v12575_v20 = vpop.f32.mrf.mxu0 }
0x170a   :  { %v12631_v49 = vcombine.low %v12573_v56, %v12575_v20  ;;  %v12616_v57 = vpop.f32.mrf.mxu1 }
0x170b   :  { %v12632_v58 = vcombine.low %v12614_v60, %v12616_v57  ;;  %v12577_v12 = vpop.f32.mrf.mxu0 }
0x170c   :  { %12639 = vst [vmem:[%s15710_s6 + $0x10] sm:$0xff] %v12631_v49  ;;  %v12618_v47 = vpop.f32.mrf.mxu1 }
0x170d   :  { %12640 = vst [vmem:[%s15710_s6 + $0x18] sm:$0xff] %v12632_v58  ;;  %v12578_v59 = vpop.f32.mrf.mxu0 }
0x170e   :  { %v12619_v61 = vpop.f32.mrf.mxu1 }
0x170f   :  { %12645 = vsyncpa [#allocation5], 1 }
0x1710   :  { %12646 = vsyncpa [#allocation7], 1 }
0x1711   :  { %12647 = vsyncpa [#allocation10], 1 }

</bundles_post_ra>
